<compile_context>
chip_gen: v6e
topology: v6e:2x2x1
jax: 0.10.0
libtpu: 0.0.40
codegen_flags: <defaults>
</compile_context>

<pallas_src>
import functools

import numpy as np
import jax
import jax.numpy as jnp
from jax.experimental import pallas as pl
from jax.experimental.pallas import tpu as pltpu

_TAPS = tuple((dy, dx) for dy in (-1, 0, 1) for dx in (-1, 0, 1))
_PAD = 128                      # lane halo on each side of the flattened image
_COMPILER_PARAMS = pltpu.CompilerParams(
    dimension_semantics=("parallel",),
    vmem_limit_bytes=32 * 1024 * 1024,
)


# ----------------------------------------------------------------------------
# compile-time constants (masks / selection matrices) and weight re-layout
# ----------------------------------------------------------------------------
def _conv_masks(H, W):
    """(9, H*W) f32: mask[t, y*W+x] = 1 iff (y+dy, x+dx) is inside the image."""
    y = np.arange(H).reshape(H, 1)
    x = np.arange(W).reshape(1, W)
    rows = []
    for dy, dx in _TAPS:
        ok = (y + dy >= 0) & (y + dy < H) & (x + dx >= 0) & (x + dx < W)
        rows.append(ok.reshape(-1))
    return jnp.asarray(np.stack(rows).astype(np.float32))


def _pool_select(H, W):
    """(L, (H//2)*(W//2)) exact 0/1 compaction matrix for 2x2 max-pool."""
    L = H * W - W - 1
    Ho, Wo = H // 2, W // 2
    S = np.zeros((L, Ho * Wo), np.float32)
    for yo in range(Ho):
        for xo in range(Wo):
            S[2 * yo * W + 2 * xo, yo * Wo + xo] = 1.0
    return jnp.asarray(S)


def _upsample_select(H, W):
    """(H*W, 4*H*W) exact 0/1 nearest-2x replication matrix."""
    Hh, Wh = 2 * H, 2 * W
    U = np.zeros((H * W, Hh * Wh), np.float32)
    for yh in range(Hh):
        for xh in range(Wh):
            U[(yh // 2) * W + (xh // 2), yh * Wh + xh] = 1.0
    return jnp.asarray(U)


def _prep_conv3(w):   # (Co, Ci, 3, 3) -> (9, Co, Ci) bf16, tap t = (dy+1)*3+(dx+1)
    Co, Ci = w.shape[0], w.shape[1]
    return jnp.transpose(w, (2, 3, 0, 1)).reshape(9, Co, Ci).astype(jnp.bfloat16)


def _prep_conv1(w):   # (Co, Ci, 1, 1) -> (Co, Ci) bf16
    return w.reshape(w.shape[0], w.shape[1]).astype(jnp.bfloat16)


def _prep_bias(b):    # (Co,) -> (Co, 1) f32
    return b.reshape(-1, 1).astype(jnp.float32)


# ----------------------------------------------------------------------------
# Pallas kernels
# ----------------------------------------------------------------------------
def _conv3x3_acc(pad_ref, m_ref, w_ref, W):
    """3x3 conv via 9 shifted bf16 MXU matmuls accumulated in f32.

    pad_ref: (Ci, HW + 2*_PAD) zero-haloed flattened image (VMEM scratch)
    m_ref:   (9, HW) per-tap validity masks
    w_ref:   (9, Co, Ci) bf16 weights
    """
    HW = m_ref.shape[1]
    Co = w_ref.shape[1]
    acc = jnp.zeros((Co, HW), jnp.float32)
    for t, (dy, dx) in enumerate(_TAPS):
        s = dy * W + dx
        xt = pad_ref[:, _PAD + s:_PAD + s + HW] * m_ref[t:t + 1, :]
        acc = acc + jnp.dot(w_ref[t], xt.astype(jnp.bfloat16),
                            preferred_element_type=jnp.float32)
    return acc


def _down_block_kernel(x_ref, m_ref, s_ref, w_ref, b_ref, *rest, W, fuse_1x1):
    """conv3x3 + bias + ReLU + 2x2 maxpool (+ optional fused 1x1 conv)."""
    if fuse_1x1:
        w1_ref, b1_ref, o_ref, pad_ref, y_ref = rest
    else:
        o_ref, pad_ref, y_ref = rest

    HW = m_ref.shape[1]
    L = s_ref.shape[0]

    # stage the image into a zero-haloed VMEM scratch (aligned store at _PAD)
    pad_ref[...] = jnp.zeros_like(pad_ref)
    pad_ref[:, _PAD:_PAD + HW] = x_ref[0]

    # 3x3 conv + bias + ReLU
    y = jnp.maximum(_conv3x3_acc(pad_ref, m_ref, w_ref, W) + b_ref[...], 0.0)

    # 2x2 max pool: shift+max over the flat layout, then exact compaction matmul
    y_ref[...] = y
    pm = jnp.maximum(jnp.maximum(y_ref[:, 0:L], y_ref[:, 1:1 + L]),
                     jnp.maximum(y_ref[:, W:W + L], y_ref[:, W + 1:W + 1 + L]))
    out = jnp.dot(pm, s_ref[...], preferred_element_type=jnp.float32)

    if fuse_1x1:  # fused self.conv1d (1x1, no activation)
        out = jnp.dot(w1_ref[...], out.astype(jnp.bfloat16),
                      preferred_element_type=jnp.float32) + b1_ref[...]
    o_ref[0] = out


def _up_block_kernel(src_ref, skip_ref, u_ref, m_ref, wu_ref, bu_ref,
                     wcu_ref, wcs_ref, bc_ref, *rest, W, fuse_1x1):
    """nearest-2x upsample + conv3x3 + ReLU + skip conv3x3 (K-split concat)."""
    if fuse_1x1:
        w1_ref, b1_ref, o_ref, pad_a, pad_b, pad_c = rest
    else:
        o_ref, pad_a, pad_b, pad_c = rest

    HW = m_ref.shape[1]

    # nearest-2x upsample as an exact 0/1 replication matmul (stays in VMEM)
    up = jnp.dot(src_ref[0], u_ref[...], preferred_element_type=jnp.float32)

    pad_a[...] = jnp.zeros_like(pad_a)
    pad_a[:, _PAD:_PAD + HW] = up

    # UpsampleBlock conv: 3x3 + bias + ReLU
    u = jnp.maximum(_conv3x3_acc(pad_a, m_ref, wu_ref, W) + bu_ref[...], 0.0)

    # conv_blocks[i]: conv([u ; skip]) == conv_u(u) + conv_s(skip)  (no concat)
    pad_b[...] = jnp.zeros_like(pad_b)
    pad_b[:, _PAD:_PAD + HW] = u
    pad_c[...] = jnp.zeros_like(pad_c)
    pad_c[:, _PAD:_PAD + HW] = skip_ref[0]

    out = (_conv3x3_acc(pad_b, m_ref, wcu_ref, W)
           + _conv3x3_acc(pad_c, m_ref, wcs_ref, W)
           + bc_ref[...])

    if fuse_1x1:  # fused self.last_conv (1x1, no activation)
        out = jnp.dot(w1_ref[...], out.astype(jnp.bfloat16),
                      preferred_element_type=jnp.float32) + b1_ref[...]
    o_ref[0] = out


# ----------------------------------------------------------------------------
# block wrappers (pallas_call with batch grid, parallel semantics)
# ----------------------------------------------------------------------------
def down_block(x, H, W, w3, b3, extra_1x1=None):
    """DownsampleBlock (+ optionally the fused self.conv1d). x: (N, Cin, H*W)."""
    N, Ci, HW = x.shape
    Co = w3.shape[0]
    HWo = (H // 2) * (W // 2)
    L = HW - W - 1

    masks = _conv_masks(H, W)
    S = _pool_select(H, W)
    w9 = _prep_conv3(w3)
    b2 = _prep_bias(b3)

    fuse = extra_1x1 is not None
    inputs = [x, masks, S, w9, b2]
    in_specs = [
        pl.BlockSpec((1, Ci, HW), lambda n: (n, 0, 0)),
        pl.BlockSpec((9, HW), lambda n: (0, 0)),
        pl.BlockSpec((L, HWo), lambda n: (0, 0)),
        pl.BlockSpec((9, Co, Ci), lambda n: (0, 0, 0)),
        pl.BlockSpec((Co, 1), lambda n: (0, 0)),
    ]
    Cout = Co
    if fuse:
        w1 = _prep_conv1(extra_1x1[0])
        b1 = _prep_bias(extra_1x1[1])
        Cout = w1.shape[0]
        inputs += [w1, b1]
        in_specs += [pl.BlockSpec((Cout, Co), lambda n: (0, 0)),
                     pl.BlockSpec((Cout, 1), lambda n: (0, 0))]

    flops = N * (18 * Co * Ci * HW + 2 * Co * L * HWo
                 + (2 * Cout * Co * HWo if fuse else 0))
    bytes_accessed = (4 * (x.size + N * Cout * HWo + masks.size + S.size)
                      + 2 * w9.size)

    return pl.pallas_call(
        functools.partial(_down_block_kernel, W=W, fuse_1x1=fuse),
        grid=(N,),
        in_specs=in_specs,
        out_specs=pl.BlockSpec((1, Cout, HWo), lambda n: (n, 0, 0)),
        out_shape=jax.ShapeDtypeStruct((N, Cout, HWo), jnp.float32),
        scratch_shapes=[pltpu.VMEM((Ci, HW + 2 * _PAD), jnp.float32),
                        pltpu.VMEM((Co, HW), jnp.float32)],
        compiler_params=_COMPILER_PARAMS,
        cost_estimate=pl.CostEstimate(flops=int(flops), transcendentals=0,
                                      bytes_accessed=int(bytes_accessed)),
    )(*inputs)


def up_block(src, skip, Hh, Wh, wup, bup, wcb, bcb, extra_1x1=None):
    """UpsampleBlock + skip conv (+ optionally the fused self.last_conv).

    src : (N, Cl, (Hh//2)*(Wh//2))   features to upsample
    skip: (N, Cs, Hh*Wh)             cached features at the target resolution
    """
    N, Cl, HWl = src.shape
    _, Cs, HWh = skip.shape
    Cout = wcb.shape[0]

    U = _upsample_select(Hh // 2, Wh // 2)
    masks = _conv_masks(Hh, Wh)
    wu9 = _prep_conv3(wup)
    wcu9 = _prep_conv3(wcb[:, :Cl])          # K-split: upsampled branch
    wcs9 = _prep_conv3(wcb[:, Cl:])          # K-split: skip branch
    bu2 = _prep_bias(bup)
    bc2 = _prep_bias(bcb)

    fuse = extra_1x1 is not None
    inputs = [src, skip, U, masks, wu9, bu2, wcu9, wcs9, bc2]
    in_specs = [
        pl.BlockSpec((1, Cl, HWl), lambda n: (n, 0, 0)),
        pl.BlockSpec((1, Cs, HWh), lambda n: (n, 0, 0)),
        pl.BlockSpec((HWl, HWh), lambda n: (0, 0)),
        pl.BlockSpec((9, HWh), lambda n: (0, 0)),
        pl.BlockSpec((9, Cl, Cl), lambda n: (0, 0, 0)),
        pl.BlockSpec((Cl, 1), lambda n: (0, 0)),
        pl.BlockSpec((9, Cout, Cl), lambda n: (0, 0, 0)),
        pl.BlockSpec((9, Cout, Cs), lambda n: (0, 0, 0)),
        pl.BlockSpec((Cout, 1), lambda n: (0, 0)),
    ]
    Cfin = Cout
    if fuse:
        w1 = _prep_conv1(extra_1x1[0])
        b1 = _prep_bias(extra_1x1[1])
        Cfin = w1.shape[0]
        inputs += [w1, b1]
        in_specs += [pl.BlockSpec((Cfin, Cout), lambda n: (0, 0)),
                     pl.BlockSpec((Cfin, 1), lambda n: (0, 0))]

    flops = N * (2 * Cl * HWl * HWh + 18 * Cl * Cl * HWh
                 + 18 * Cout * (Cl + Cs) * HWh
                 + (2 * Cfin * Cout * HWh if fuse else 0))
    bytes_accessed = (4 * (src.size + skip.size + U.size + masks.size
                           + N * Cfin * HWh)
                      + 2 * (wu9.size + wcu9.size + wcs9.size))

    return pl.pallas_call(
        functools.partial(_up_block_kernel, W=Wh, fuse_1x1=fuse),
        grid=(N,),
        in_specs=in_specs,
        out_specs=pl.BlockSpec((1, Cfin, HWh), lambda n: (n, 0, 0)),
        out_shape=jax.ShapeDtypeStruct((N, Cfin, HWh), jnp.float32),
        scratch_shapes=[pltpu.VMEM((Cl, HWh + 2 * _PAD), jnp.float32),
                        pltpu.VMEM((Cl, HWh + 2 * _PAD), jnp.float32),
                        pltpu.VMEM((Cs, HWh + 2 * _PAD), jnp.float32)],
        compiler_params=_COMPILER_PARAMS,
        cost_estimate=pl.CostEstimate(flops=int(flops), transcendentals=0,
                                      bytes_accessed=int(bytes_accessed)),
    )(*inputs)


# ----------------------------------------------------------------------------
# UNet parameters / forward (mirrors the PyTorch module)
# ----------------------------------------------------------------------------
def init_unet_params(key, insize, outsize, n_blocks=3,
                     hidden_channels=(8, 16, 32), pool=2):
    keys = list(jax.random.split(key, 4 * n_blocks + 4))
    kit = iter(keys)

    def conv_param(cin, cout, k):
        kw, kb = jax.random.split(next(kit))
        bound = 1.0 / float(np.sqrt(cin * k * k))
        w = jax.random.uniform(kw, (cout, cin, k, k), jnp.float32, -bound, bound)
        b = jax.random.uniform(kb, (cout,), jnp.float32, -bound, bound)
        return w, b

    layer_sizes = [insize]
    down, up, cblocks = [], [], []
    for i in range(n_blocks):
        last = layer_sizes[-1]
        layer = (hidden_channels[i], last[1] // pool, last[2] // pool)
        layer_sizes.append(layer)
        down.append(conv_param(last[0], layer[0], 3))
        up.append(conv_param(layer[0], layer[0], 3))
        cblocks.append(conv_param(last[0] + layer[0], last[0], 3))

    params = {
        "down": down,
        "up": up,
        "cblocks": cblocks,
        "conv1d": conv_param(hidden_channels[-1], hidden_channels[-1], 1),
        "last": conv_param(insize[0], outsize[0], 1),
    }
    # NOTE: the PyTorch module also constructs `channel_wise_conv` (nn.Linear)
    # and a ScaledSigmoid activation in __init__, but neither is used in
    # forward(); they are intentionally omitted here.
    return params


def unet_forward(params, x_nchw, n_blocks=3):
    N, C0, H0, W0 = x_nchw.shape
    # channels-first, flattened spatial (metadata-only reshape, no transpose)
    x = x_nchw.astype(jnp.float32).reshape(N, C0, H0 * W0)

    feats = [(x, H0, W0)]
    _x, H, W = x, H0, W0
    for i in range(n_blocks):
        w3, b3 = params["down"][i]
        # self.conv1d (1x1) runs right after the last down block -> fused in.
        extra = params["conv1d"] if i == n_blocks - 1 else None
        _x = down_block(_x, H, W, w3, b3, extra)
        H, W = H // 2, W // 2
        feats.append((_x, H, W))        # feats[n_blocks] is never consumed

    for i in range(n_blocks - 1, -1, -1):
        skip, Hs, Ws = feats[i]
        wup, bup = params["up"][i]
        wcb, bcb = params["cblocks"][i]
        # self.last_conv (1x1) runs right after the last up block -> fused in.
        extra = params["last"] if i == 0 else None
        _x = up_block(_x, skip, Hs, Ws, wup, bup, wcb, bcb, extra)

    return _x.reshape(N, -1, H0, W0)    # back to NCHW


if __name__ == "__main__":
    key = jax.random.PRNGKey(0)
    pkey, xkey = jax.random.split(key)

    insize = (4, 16, 16)
    outsize = (1, 16, 16)
    batch = 2

    params = init_unet_params(pkey, insize, outsize)
    x = jax.random.normal(xkey, (batch,) + insize, dtype=jnp.float32)

    fwd = jax.jit(unet_forward)
    out = jax.block_until_ready(fwd(params, x))

    assert out.shape == (batch,) + outsize, out.shape
    assert out.dtype == jnp.float32
    assert bool(jnp.all(jnp.isfinite(out)))
    print("KERNEL_OK")
</pallas_src>

<mosaic_0001>
module attributes {stable_mosaic.version = 11 : i64} {
  func.func @_down_block_kernel(%arg0: i32, %arg1: memref<1x4x256xf32, #tpu.memory_space<vmem>>, %arg2: memref<9x256xf32, #tpu.memory_space<vmem>>, %arg3: memref<239x64xf32, #tpu.memory_space<vmem>>, %arg4: memref<9x8x4xbf16, #tpu.memory_space<vmem>>, %arg5: memref<8x1xf32, #tpu.memory_space<vmem>>, %arg6: memref<1x8x64xf32, #tpu.memory_space<vmem>>, %arg7: memref<4x512xf32, #tpu.memory_space<vmem>>, %arg8: memref<8x256xf32, #tpu.memory_space<vmem>>) attributes {dimension_semantics = [#tpu.dimension_semantics<parallel>], iteration_bounds = array<i64: 2>, scalar_prefetch = 0 : i64, scratch_operands = 2 : i64, tpu.core_type = #tpu.core_type<tc>, window_params = [{transform_indices = @transform_0, window_bounds = array<i64: 1, 4, 256>}, {pipeline_mode = #tpu.pipeline_mode<synchronous>, transform_indices = @transform_1, window_bounds = array<i64: 9, 256>}, {pipeline_mode = #tpu.pipeline_mode<synchronous>, transform_indices = @transform_2, window_bounds = array<i64: 239, 64>}, {pipeline_mode = #tpu.pipeline_mode<synchronous>, transform_indices = @transform_3, window_bounds = array<i64: 9, 8, 4>}, {pipeline_mode = #tpu.pipeline_mode<synchronous>, transform_indices = @transform_4, window_bounds = array<i64: 8, 1>}, {transform_indices = @transform_5, window_bounds = array<i64: 1, 8, 64>}]} {
    %cst = arith.constant 0.000000e+00 : f32
    %0 = vector.broadcast %cst : f32 to vector<4x512xf32>
    %c0 = arith.constant 0 : index
    %c0_0 = arith.constant 0 : index
    %1 = vector.load %arg7[%c0, %c0_0] : memref<4x512xf32, #tpu.memory_space<vmem>>, vector<4x512xf32>
    tpu.vector_store %arg7[%c0, %c0_0], %0 {strides = array<i32>} : memref<4x512xf32, #tpu.memory_space<vmem>>, vector<4x512xf32>,
    %c0_1 = arith.constant 0 : index
    %c0_2 = arith.constant 0 : index
    %c0_3 = arith.constant 0 : index
    %2 = vector.load %arg1[%c0_1, %c0_2, %c0_3] : memref<1x4x256xf32, #tpu.memory_space<vmem>>, vector<1x4x256xf32>
    %3 = vector.shape_cast %2 : vector<1x4x256xf32> to vector<4x256xf32>
    %c0_4 = arith.constant 0 : index
    %c128 = arith.constant 128 : index
    %4 = vector.load %arg7[%c0_4, %c128] : memref<4x512xf32, #tpu.memory_space<vmem>>, vector<4x256xf32>
    tpu.vector_store %arg7[%c0_4, %c128], %3 {strides = array<i32>} : memref<4x512xf32, #tpu.memory_space<vmem>>, vector<4x256xf32>,
    %cst_5 = arith.constant 0.000000e+00 : f32
    %5 = vector.broadcast %cst_5 : f32 to vector<8x256xf32>
    %c0_6 = arith.constant 0 : index
    %c111 = arith.constant 111 : index
    %6 = vector.load %arg7[%c0_6, %c111] : memref<4x512xf32, #tpu.memory_space<vmem>>, vector<4x256xf32>
    %c0_7 = arith.constant 0 : index
    %c0_8 = arith.constant 0 : index
    %7 = vector.load %arg2[%c0_7, %c0_8] : memref<9x256xf32, #tpu.memory_space<vmem>>, vector<1x256xf32>
    %8 = vector.broadcast %7 : vector<1x256xf32> to vector<4x256xf32>
    %9 = arith.mulf %6, %8 : vector<4x256xf32>
    %c0_9 = arith.constant 0 : index
    %c0_10 = arith.constant 0 : index
    %c0_11 = arith.constant 0 : index
    %10 = vector.load %arg4[%c0_9, %c0_10, %c0_11] : memref<9x8x4xbf16, #tpu.memory_space<vmem>>, vector<1x8x4xbf16>
    %11 = vector.shape_cast %10 : vector<1x8x4xbf16> to vector<8x4xbf16>
    %12 = arith.truncf %9 : vector<4x256xf32> to vector<4x256xbf16>
    %cst_12 = arith.constant dense<0.000000e+00> : vector<8x256xf32>
    %13 = tpu.matmul %11, %12, %cst_12 {dimension_numbers = #tpu.dot_dimension_numbers<[1], [0], [0], [1], [0, 0, 1, 1], [], []>} : vector<8x4xbf16>, vector<4x256xbf16>, vector<8x256xf32> -> vector<8x256xf32>
    %14 = arith.addf %5, %13 : vector<8x256xf32>
    %c0_13 = arith.constant 0 : index
    %c112 = arith.constant 112 : index
    %15 = vector.load %arg7[%c0_13, %c112] : memref<4x512xf32, #tpu.memory_space<vmem>>, vector<4x256xf32>
    %c1 = arith.constant 1 : index
    %c0_14 = arith.constant 0 : index
    %16 = vector.load %arg2[%c1, %c0_14] : memref<9x256xf32, #tpu.memory_space<vmem>>, vector<1x256xf32>
    %17 = vector.broadcast %16 : vector<1x256xf32> to vector<4x256xf32>
    %18 = arith.mulf %15, %17 : vector<4x256xf32>
    %c1_15 = arith.constant 1 : index
    %c0_16 = arith.constant 0 : index
    %c0_17 = arith.constant 0 : index
    %19 = vector.load %arg4[%c1_15, %c0_16, %c0_17] : memref<9x8x4xbf16, #tpu.memory_space<vmem>>, vector<1x8x4xbf16>
    %20 = vector.shape_cast %19 : vector<1x8x4xbf16> to vector<8x4xbf16>
    %21 = arith.truncf %18 : vector<4x256xf32> to vector<4x256xbf16>
    %cst_18 = arith.constant dense<0.000000e+00> : vector<8x256xf32>
    %22 = tpu.matmul %20, %21, %cst_18 {dimension_numbers = #tpu.dot_dimension_numbers<[1], [0], [0], [1], [0, 0, 1, 1], [], []>} : vector<8x4xbf16>, vector<4x256xbf16>, vector<8x256xf32> -> vector<8x256xf32>
    %23 = arith.addf %14, %22 : vector<8x256xf32>
    %c0_19 = arith.constant 0 : index
    %c113 = arith.constant 113 : index
    %24 = vector.load %arg7[%c0_19, %c113] : memref<4x512xf32, #tpu.memory_space<vmem>>, vector<4x256xf32>
    %c2 = arith.constant 2 : index
    %c0_20 = arith.constant 0 : index
    %25 = vector.load %arg2[%c2, %c0_20] : memref<9x256xf32, #tpu.memory_space<vmem>>, vector<1x256xf32>
    %26 = vector.broadcast %25 : vector<1x256xf32> to vector<4x256xf32>
    %27 = arith.mulf %24, %26 : vector<4x256xf32>
    %c2_21 = arith.constant 2 : index
    %c0_22 = arith.constant 0 : index
    %c0_23 = arith.constant 0 : index
    %28 = vector.load %arg4[%c2_21, %c0_22, %c0_23] : memref<9x8x4xbf16, #tpu.memory_space<vmem>>, vector<1x8x4xbf16>
    %29 = vector.shape_cast %28 : vector<1x8x4xbf16> to vector<8x4xbf16>
    %30 = arith.truncf %27 : vector<4x256xf32> to vector<4x256xbf16>
    %cst_24 = arith.constant dense<0.000000e+00> : vector<8x256xf32>
    %31 = tpu.matmul %29, %30, %cst_24 {dimension_numbers = #tpu.dot_dimension_numbers<[1], [0], [0], [1], [0, 0, 1, 1], [], []>} : vector<8x4xbf16>, vector<4x256xbf16>, vector<8x256xf32> -> vector<8x256xf32>
    %32 = arith.addf %23, %31 : vector<8x256xf32>
    %c0_25 = arith.constant 0 : index
    %c127 = arith.constant 127 : index
    %33 = vector.load %arg7[%c0_25, %c127] : memref<4x512xf32, #tpu.memory_space<vmem>>, vector<4x256xf32>
    %c3 = arith.constant 3 : index
    %c0_26 = arith.constant 0 : index
    %34 = vector.load %arg2[%c3, %c0_26] : memref<9x256xf32, #tpu.memory_space<vmem>>, vector<1x256xf32>
    %35 = vector.broadcast %34 : vector<1x256xf32> to vector<4x256xf32>
    %36 = arith.mulf %33, %35 : vector<4x256xf32>
    %c3_27 = arith.constant 3 : index
    %c0_28 = arith.constant 0 : index
    %c0_29 = arith.constant 0 : index
    %37 = vector.load %arg4[%c3_27, %c0_28, %c0_29] : memref<9x8x4xbf16, #tpu.memory_space<vmem>>, vector<1x8x4xbf16>
    %38 = vector.shape_cast %37 : vector<1x8x4xbf16> to vector<8x4xbf16>
    %39 = arith.truncf %36 : vector<4x256xf32> to vector<4x256xbf16>
    %cst_30 = arith.constant dense<0.000000e+00> : vector<8x256xf32>
    %40 = tpu.matmul %38, %39, %cst_30 {dimension_numbers = #tpu.dot_dimension_numbers<[1], [0], [0], [1], [0, 0, 1, 1], [], []>} : vector<8x4xbf16>, vector<4x256xbf16>, vector<8x256xf32> -> vector<8x256xf32>
    %41 = arith.addf %32, %40 : vector<8x256xf32>
    %c0_31 = arith.constant 0 : index
    %c128_32 = arith.constant 128 : index
    %42 = vector.load %arg7[%c0_31, %c128_32] : memref<4x512xf32, #tpu.memory_space<vmem>>, vector<4x256xf32>
    %c4 = arith.constant 4 : index
    %c0_33 = arith.constant 0 : index
    %43 = vector.load %arg2[%c4, %c0_33] : memref<9x256xf32, #tpu.memory_space<vmem>>, vector<1x256xf32>
    %44 = vector.broadcast %43 : vector<1x256xf32> to vector<4x256xf32>
    %45 = arith.mulf %42, %44 : vector<4x256xf32>
    %c4_34 = arith.constant 4 : index
    %c0_35 = arith.constant 0 : index
    %c0_36 = arith.constant 0 : index
    %46 = vector.load %arg4[%c4_34, %c0_35, %c0_36] : memref<9x8x4xbf16, #tpu.memory_space<vmem>>, vector<1x8x4xbf16>
    %47 = vector.shape_cast %46 : vector<1x8x4xbf16> to vector<8x4xbf16>
    %48 = arith.truncf %45 : vector<4x256xf32> to vector<4x256xbf16>
    %cst_37 = arith.constant dense<0.000000e+00> : vector<8x256xf32>
    %49 = tpu.matmul %47, %48, %cst_37 {dimension_numbers = #tpu.dot_dimension_numbers<[1], [0], [0], [1], [0, 0, 1, 1], [], []>} : vector<8x4xbf16>, vector<4x256xbf16>, vector<8x256xf32> -> vector<8x256xf32>
    %50 = arith.addf %41, %49 : vector<8x256xf32>
    %c0_38 = arith.constant 0 : index
    %c129 = arith.constant 129 : index
    %51 = vector.load %arg7[%c0_38, %c129] : memref<4x512xf32, #tpu.memory_space<vmem>>, vector<4x256xf32>
    %c5 = arith.constant 5 : index
    %c0_39 = arith.constant 0 : index
    %52 = vector.load %arg2[%c5, %c0_39] : memref<9x256xf32, #tpu.memory_space<vmem>>, vector<1x256xf32>
    %53 = vector.broadcast %52 : vector<1x256xf32> to vector<4x256xf32>
    %54 = arith.mulf %51, %53 : vector<4x256xf32>
    %c5_40 = arith.constant 5 : index
    %c0_41 = arith.constant 0 : index
    %c0_42 = arith.constant 0 : index
    %55 = vector.load %arg4[%c5_40, %c0_41, %c0_42] : memref<9x8x4xbf16, #tpu.memory_space<vmem>>, vector<1x8x4xbf16>
    %56 = vector.shape_cast %55 : vector<1x8x4xbf16> to vector<8x4xbf16>
    %57 = arith.truncf %54 : vector<4x256xf32> to vector<4x256xbf16>
    %cst_43 = arith.constant dense<0.000000e+00> : vector<8x256xf32>
    %58 = tpu.matmul %56, %57, %cst_43 {dimension_numbers = #tpu.dot_dimension_numbers<[1], [0], [0], [1], [0, 0, 1, 1], [], []>} : vector<8x4xbf16>, vector<4x256xbf16>, vector<8x256xf32> -> vector<8x256xf32>
    %59 = arith.addf %50, %58 : vector<8x256xf32>
    %c0_44 = arith.constant 0 : index
    %c143 = arith.constant 143 : index
    %60 = vector.load %arg7[%c0_44, %c143] : memref<4x512xf32, #tpu.memory_space<vmem>>, vector<4x256xf32>
    %c6 = arith.constant 6 : index
    %c0_45 = arith.constant 0 : index
    %61 = vector.load %arg2[%c6, %c0_45] : memref<9x256xf32, #tpu.memory_space<vmem>>, vector<1x256xf32>
    %62 = vector.broadcast %61 : vector<1x256xf32> to vector<4x256xf32>
    %63 = arith.mulf %60, %62 : vector<4x256xf32>
    %c6_46 = arith.constant 6 : index
    %c0_47 = arith.constant 0 : index
    %c0_48 = arith.constant 0 : index
    %64 = vector.load %arg4[%c6_46, %c0_47, %c0_48] : memref<9x8x4xbf16, #tpu.memory_space<vmem>>, vector<1x8x4xbf16>
    %65 = vector.shape_cast %64 : vector<1x8x4xbf16> to vector<8x4xbf16>
    %66 = arith.truncf %63 : vector<4x256xf32> to vector<4x256xbf16>
    %cst_49 = arith.constant dense<0.000000e+00> : vector<8x256xf32>
    %67 = tpu.matmul %65, %66, %cst_49 {dimension_numbers = #tpu.dot_dimension_numbers<[1], [0], [0], [1], [0, 0, 1, 1], [], []>} : vector<8x4xbf16>, vector<4x256xbf16>, vector<8x256xf32> -> vector<8x256xf32>
    %68 = arith.addf %59, %67 : vector<8x256xf32>
    %c0_50 = arith.constant 0 : index
    %c144 = arith.constant 144 : index
    %69 = vector.load %arg7[%c0_50, %c144] : memref<4x512xf32, #tpu.memory_space<vmem>>, vector<4x256xf32>
    %c7 = arith.constant 7 : index
    %c0_51 = arith.constant 0 : index
    %70 = vector.load %arg2[%c7, %c0_51] : memref<9x256xf32, #tpu.memory_space<vmem>>, vector<1x256xf32>
    %71 = vector.broadcast %70 : vector<1x256xf32> to vector<4x256xf32>
    %72 = arith.mulf %69, %71 : vector<4x256xf32>
    %c7_52 = arith.constant 7 : index
    %c0_53 = arith.constant 0 : index
    %c0_54 = arith.constant 0 : index
    %73 = vector.load %arg4[%c7_52, %c0_53, %c0_54] : memref<9x8x4xbf16, #tpu.memory_space<vmem>>, vector<1x8x4xbf16>
    %74 = vector.shape_cast %73 : vector<1x8x4xbf16> to vector<8x4xbf16>
    %75 = arith.truncf %72 : vector<4x256xf32> to vector<4x256xbf16>
    %cst_55 = arith.constant dense<0.000000e+00> : vector<8x256xf32>
    %76 = tpu.matmul %74, %75, %cst_55 {dimension_numbers = #tpu.dot_dimension_numbers<[1], [0], [0], [1], [0, 0, 1, 1], [], []>} : vector<8x4xbf16>, vector<4x256xbf16>, vector<8x256xf32> -> vector<8x256xf32>
    %77 = arith.addf %68, %76 : vector<8x256xf32>
    %c0_56 = arith.constant 0 : index
    %c145 = arith.constant 145 : index
    %78 = vector.load %arg7[%c0_56, %c145] : memref<4x512xf32, #tpu.memory_space<vmem>>, vector<4x256xf32>
    %c8 = arith.constant 8 : index
    %c0_57 = arith.constant 0 : index
    %79 = vector.load %arg2[%c8, %c0_57] : memref<9x256xf32, #tpu.memory_space<vmem>>, vector<1x256xf32>
    %80 = vector.broadcast %79 : vector<1x256xf32> to vector<4x256xf32>
    %81 = arith.mulf %78, %80 : vector<4x256xf32>
    %c8_58 = arith.constant 8 : index
    %c0_59 = arith.constant 0 : index
    %c0_60 = arith.constant 0 : index
    %82 = vector.load %arg4[%c8_58, %c0_59, %c0_60] : memref<9x8x4xbf16, #tpu.memory_space<vmem>>, vector<1x8x4xbf16>
    %83 = vector.shape_cast %82 : vector<1x8x4xbf16> to vector<8x4xbf16>
    %84 = arith.truncf %81 : vector<4x256xf32> to vector<4x256xbf16>
    %cst_61 = arith.constant dense<0.000000e+00> : vector<8x256xf32>
    %85 = tpu.matmul %83, %84, %cst_61 {dimension_numbers = #tpu.dot_dimension_numbers<[1], [0], [0], [1], [0, 0, 1, 1], [], []>} : vector<8x4xbf16>, vector<4x256xbf16>, vector<8x256xf32> -> vector<8x256xf32>
    %86 = arith.addf %77, %85 : vector<8x256xf32>
    %c0_62 = arith.constant 0 : index
    %c0_63 = arith.constant 0 : index
    %87 = vector.load %arg5[%c0_62, %c0_63] : memref<8x1xf32, #tpu.memory_space<vmem>>, vector<8x1xf32>
    %88 = vector.broadcast %87 : vector<8x1xf32> to vector<8x256xf32>
    %89 = arith.addf %86, %88 : vector<8x256xf32>
    %cst_64 = arith.constant 0.000000e+00 : f32
    %90 = vector.broadcast %cst_64 : f32 to vector<8x256xf32>
    %91 = arith.maximumf %89, %90 : vector<8x256xf32>
    %c0_65 = arith.constant 0 : index
    %c0_66 = arith.constant 0 : index
    %92 = vector.load %arg8[%c0_65, %c0_66] : memref<8x256xf32, #tpu.memory_space<vmem>>, vector<8x256xf32>
    tpu.vector_store %arg8[%c0_65, %c0_66], %91 {strides = array<i32>} : memref<8x256xf32, #tpu.memory_space<vmem>>, vector<8x256xf32>,
    %c0_67 = arith.constant 0 : index
    %c0_68 = arith.constant 0 : index
    %93 = vector.load %arg8[%c0_67, %c0_68] : memref<8x256xf32, #tpu.memory_space<vmem>>, vector<8x239xf32>
    %c0_69 = arith.constant 0 : index
    %c1_70 = arith.constant 1 : index
    %94 = vector.load %arg8[%c0_69, %c1_70] : memref<8x256xf32, #tpu.memory_space<vmem>>, vector<8x239xf32>
    %95 = arith.maximumf %93, %94 : vector<8x239xf32>
    %c0_71 = arith.constant 0 : index
    %c16 = arith.constant 16 : index
    %96 = vector.load %arg8[%c0_71, %c16] : memref<8x256xf32, #tpu.memory_space<vmem>>, vector<8x239xf32>
    %c0_72 = arith.constant 0 : index
    %c17 = arith.constant 17 : index
    %97 = vector.load %arg8[%c0_72, %c17] : memref<8x256xf32, #tpu.memory_space<vmem>>, vector<8x239xf32>
    %98 = arith.maximumf %96, %97 : vector<8x239xf32>
    %99 = arith.maximumf %95, %98 : vector<8x239xf32>
    %c0_73 = arith.constant 0 : index
    %c0_74 = arith.constant 0 : index
    %100 = vector.load %arg3[%c0_73, %c0_74] : memref<239x64xf32, #tpu.memory_space<vmem>>, vector<239x64xf32>
    %cst_75 = arith.constant dense<0.000000e+00> : vector<8x64xf32>
    %101 = tpu.matmul %99, %100, %cst_75 {dimension_numbers = #tpu.dot_dimension_numbers<[1], [0], [0], [1], [0, 0, 1, 1], [], []>} : vector<8x239xf32>, vector<239x64xf32>, vector<8x64xf32> -> vector<8x64xf32>
    %c0_76 = arith.constant 0 : index
    %c0_77 = arith.constant 0 : index
    %c0_78 = arith.constant 0 : index
    %102 = vector.load %arg6[%c0_76, %c0_77, %c0_78] : memref<1x8x64xf32, #tpu.memory_space<vmem>>, vector<1x8x64xf32>
    %103 = vector.shape_cast %102 : vector<1x8x64xf32> to vector<8x64xf32>
    %104 = vector.shape_cast %101 : vector<8x64xf32> to vector<1x8x64xf32>
    tpu.vector_store %arg6[%c0_76, %c0_77, %c0_78], %104 {strides = array<i32>} : memref<1x8x64xf32, #tpu.memory_space<vmem>>, vector<1x8x64xf32>,
    return
  }
  func.func @transform_0(%arg0: i32) -> (i32, i32, i32) {
    %c0_i32 = arith.constant 0 : i32
    %c0_i32_0 = arith.constant 0 : i32
    %c0_i32_1 = arith.constant 0 : i32
    return %arg0, %c0_i32, %c0_i32_0 : i32, i32, i32
  }
  func.func @transform_1(%arg0: i32) -> (i32, i32) {
    %c0_i32 = arith.constant 0 : i32
    %c0_i32_0 = arith.constant 0 : i32
    %c0_i32_1 = arith.constant 0 : i32
    return %c0_i32, %c0_i32_0 : i32, i32
  }
  func.func @transform_2(%arg0: i32) -> (i32, i32) {
    %c0_i32 = arith.constant 0 : i32
    %c0_i32_0 = arith.constant 0 : i32
    %c0_i32_1 = arith.constant 0 : i32
    return %c0_i32, %c0_i32_0 : i32, i32
  }
  func.func @transform_3(%arg0: i32) -> (i32, i32, i32) {
    %c0_i32 = arith.constant 0 : i32
    %c0_i32_0 = arith.constant 0 : i32
    %c0_i32_1 = arith.constant 0 : i32
    %c0_i32_2 = arith.constant 0 : i32
    return %c0_i32, %c0_i32_0, %c0_i32_1 : i32, i32, i32
  }
  func.func @transform_4(%arg0: i32) -> (i32, i32) {
    %c0_i32 = arith.constant 0 : i32
    %c0_i32_0 = arith.constant 0 : i32
    %c0_i32_1 = arith.constant 0 : i32
    return %c0_i32, %c0_i32_0 : i32, i32
  }
  func.func @transform_5(%arg0: i32) -> (i32, i32, i32) {
    %c0_i32 = arith.constant 0 : i32
    %c0_i32_0 = arith.constant 0 : i32
    %c0_i32_1 = arith.constant 0 : i32
    return %arg0, %c0_i32, %c0_i32_0 : i32, i32, i32
  }
}

module attributes {stable_mosaic.version = 11 : i64} {
  func.func @_down_block_kernel(%arg0: i32, %arg1: memref<1x16x16xf32, #tpu.memory_space<vmem>>, %arg2: memref<9x16xf32, #tpu.memory_space<vmem>>, %arg3: memref<11x4xf32, #tpu.memory_space<vmem>>, %arg4: memref<9x32x16xbf16, #tpu.memory_space<vmem>>, %arg5: memref<32x1xf32, #tpu.memory_space<vmem>>, %arg6: memref<32x32xbf16, #tpu.memory_space<vmem>>, %arg7: memref<32x1xf32, #tpu.memory_space<vmem>>, %arg8: memref<1x32x4xf32, #tpu.memory_space<vmem>>, %arg9: memref<16x272xf32, #tpu.memory_space<vmem>>, %arg10: memref<32x16xf32, #tpu.memory_space<vmem>>) attributes {dimension_semantics = [#tpu.dimension_semantics<parallel>], iteration_bounds = array<i64: 2>, scalar_prefetch = 0 : i64, scratch_operands = 2 : i64, tpu.core_type = #tpu.core_type<tc>, window_params = [{transform_indices = @transform_0, window_bounds = array<i64: 1, 16, 16>}, {pipeline_mode = #tpu.pipeline_mode<synchronous>, transform_indices = @transform_1, window_bounds = array<i64: 9, 16>}, {pipeline_mode = #tpu.pipeline_mode<synchronous>, transform_indices = @transform_2, window_bounds = array<i64: 11, 4>}, {pipeline_mode = #tpu.pipeline_mode<synchronous>, transform_indices = @transform_3, window_bounds = array<i64: 9, 32, 16>}, {pipeline_mode = #tpu.pipeline_mode<synchronous>, transform_indices = @transform_4, window_bounds = array<i64: 32, 1>}, {pipeline_mode = #tpu.pipeline_mode<synchronous>, transform_indices = @transform_5, window_bounds = array<i64: 32, 32>}, {pipeline_mode = #tpu.pipeline_mode<synchronous>, transform_indices = @transform_6, window_bounds = array<i64: 32, 1>}, {transform_indices = @transform_7, window_bounds = array<i64: 1, 32, 4>}]} {
    %cst = arith.constant 0.000000e+00 : f32
    %0 = vector.broadcast %cst : f32 to vector<16x272xf32>
    %c0 = arith.constant 0 : index
    %c0_0 = arith.constant 0 : index
    %1 = vector.load %arg9[%c0, %c0_0] : memref<16x272xf32, #tpu.memory_space<vmem>>, vector<16x272xf32>
    tpu.vector_store %arg9[%c0, %c0_0], %0 {strides = array<i32>} : memref<16x272xf32, #tpu.memory_space<vmem>>, vector<16x272xf32>,
    %c0_1 = arith.constant 0 : index
    %c0_2 = arith.constant 0 : index
    %c0_3 = arith.constant 0 : index
    %2 = vector.load %arg1[%c0_1, %c0_2, %c0_3] : memref<1x16x16xf32, #tpu.memory_space<vmem>>, vector<1x16x16xf32>
    %3 = vector.shape_cast %2 : vector<1x16x16xf32> to vector<16x16xf32>
    %c0_4 = arith.constant 0 : index
    %c128 = arith.constant 128 : index
    %4 = vector.load %arg9[%c0_4, %c128] : memref<16x272xf32, #tpu.memory_space<vmem>>, vector<16x16xf32>
    tpu.vector_store %arg9[%c0_4, %c128], %3 {strides = array<i32>} : memref<16x272xf32, #tpu.memory_space<vmem>>, vector<16x16xf32>,
    %cst_5 = arith.constant 0.000000e+00 : f32
    %5 = vector.broadcast %cst_5 : f32 to vector<32x16xf32>
    %c0_6 = arith.constant 0 : index
    %c123 = arith.constant 123 : index
    %6 = vector.load %arg9[%c0_6, %c123] : memref<16x272xf32, #tpu.memory_space<vmem>>, vector<16x16xf32>
    %c0_7 = arith.constant 0 : index
    %c0_8 = arith.constant 0 : index
    %7 = vector.load %arg2[%c0_7, %c0_8] : memref<9x16xf32, #tpu.memory_space<vmem>>, vector<1x16xf32>
    %8 = vector.broadcast %7 : vector<1x16xf32> to vector<16x16xf32>
    %9 = arith.mulf %6, %8 : vector<16x16xf32>
    %c0_9 = arith.constant 0 : index
    %c0_10 = arith.constant 0 : index
    %c0_11 = arith.constant 0 : index
    %10 = vector.load %arg4[%c0_9, %c0_10, %c0_11] : memref<9x32x16xbf16, #tpu.memory_space<vmem>>, vector<1x32x16xbf16>
    %11 = vector.shape_cast %10 : vector<1x32x16xbf16> to vector<32x16xbf16>
    %12 = arith.truncf %9 : vector<16x16xf32> to vector<16x16xbf16>
    %cst_12 = arith.constant dense<0.000000e+00> : vector<32x16xf32>
    %13 = tpu.matmul %11, %12, %cst_12 {dimension_numbers = #tpu.dot_dimension_numbers<[1], [0], [0], [1], [0, 0, 1, 1], [], []>} : vector<32x16xbf16>, vector<16x16xbf16>, vector<32x16xf32> -> vector<32x16xf32>
    %14 = arith.addf %5, %13 : vector<32x16xf32>
    %c0_13 = arith.constant 0 : index
    %c124 = arith.constant 124 : index
    %15 = vector.load %arg9[%c0_13, %c124] : memref<16x272xf32, #tpu.memory_space<vmem>>, vector<16x16xf32>
    %c1 = arith.constant 1 : index
    %c0_14 = arith.constant 0 : index
    %16 = vector.load %arg2[%c1, %c0_14] : memref<9x16xf32, #tpu.memory_space<vmem>>, vector<1x16xf32>
    %17 = vector.broadcast %16 : vector<1x16xf32> to vector<16x16xf32>
    %18 = arith.mulf %15, %17 : vector<16x16xf32>
    %c1_15 = arith.constant 1 : index
    %c0_16 = arith.constant 0 : index
    %c0_17 = arith.constant 0 : index
    %19 = vector.load %arg4[%c1_15, %c0_16, %c0_17] : memref<9x32x16xbf16, #tpu.memory_space<vmem>>, vector<1x32x16xbf16>
    %20 = vector.shape_cast %19 : vector<1x32x16xbf16> to vector<32x16xbf16>
    %21 = arith.truncf %18 : vector<16x16xf32> to vector<16x16xbf16>
    %cst_18 = arith.constant dense<0.000000e+00> : vector<32x16xf32>
    %22 = tpu.matmul %20, %21, %cst_18 {dimension_numbers = #tpu.dot_dimension_numbers<[1], [0], [0], [1], [0, 0, 1, 1], [], []>} : vector<32x16xbf16>, vector<16x16xbf16>, vector<32x16xf32> -> vector<32x16xf32>
    %23 = arith.addf %14, %22 : vector<32x16xf32>
    %c0_19 = arith.constant 0 : index
    %c125 = arith.constant 125 : index
    %24 = vector.load %arg9[%c0_19, %c125] : memref<16x272xf32, #tpu.memory_space<vmem>>, vector<16x16xf32>
    %c2 = arith.constant 2 : index
    %c0_20 = arith.constant 0 : index
    %25 = vector.load %arg2[%c2, %c0_20] : memref<9x16xf32, #tpu.memory_space<vmem>>, vector<1x16xf32>
    %26 = vector.broadcast %25 : vector<1x16xf32> to vector<16x16xf32>
    %27 = arith.mulf %24, %26 : vector<16x16xf32>
    %c2_21 = arith.constant 2 : index
    %c0_22 = arith.constant 0 : index
    %c0_23 = arith.constant 0 : index
    %28 = vector.load %arg4[%c2_21, %c0_22, %c0_23] : memref<9x32x16xbf16, #tpu.memory_space<vmem>>, vector<1x32x16xbf16>
    %29 = vector.shape_cast %28 : vector<1x32x16xbf16> to vector<32x16xbf16>
    %30 = arith.truncf %27 : vector<16x16xf32> to vector<16x16xbf16>
    %cst_24 = arith.constant dense<0.000000e+00> : vector<32x16xf32>
    %31 = tpu.matmul %29, %30, %cst_24 {dimension_numbers = #tpu.dot_dimension_numbers<[1], [0], [0], [1], [0, 0, 1, 1], [], []>} : vector<32x16xbf16>, vector<16x16xbf16>, vector<32x16xf32> -> vector<32x16xf32>
    %32 = arith.addf %23, %31 : vector<32x16xf32>
    %c0_25 = arith.constant 0 : index
    %c127 = arith.constant 127 : index
    %33 = vector.load %arg9[%c0_25, %c127] : memref<16x272xf32, #tpu.memory_space<vmem>>, vector<16x16xf32>
    %c3 = arith.constant 3 : index
    %c0_26 = arith.constant 0 : index
    %34 = vector.load %arg2[%c3, %c0_26] : memref<9x16xf32, #tpu.memory_space<vmem>>, vector<1x16xf32>
    %35 = vector.broadcast %34 : vector<1x16xf32> to vector<16x16xf32>
    %36 = arith.mulf %33, %35 : vector<16x16xf32>
    %c3_27 = arith.constant 3 : index
    %c0_28 = arith.constant 0 : index
    %c0_29 = arith.constant 0 : index
    %37 = vector.load %arg4[%c3_27, %c0_28, %c0_29] : memref<9x32x16xbf16, #tpu.memory_space<vmem>>, vector<1x32x16xbf16>
    %38 = vector.shape_cast %37 : vector<1x32x16xbf16> to vector<32x16xbf16>
    %39 = arith.truncf %36 : vector<16x16xf32> to vector<16x16xbf16>
    %cst_30 = arith.constant dense<0.000000e+00> : vector<32x16xf32>
    %40 = tpu.matmul %38, %39, %cst_30 {dimension_numbers = #tpu.dot_dimension_numbers<[1], [0], [0], [1], [0, 0, 1, 1], [], []>} : vector<32x16xbf16>, vector<16x16xbf16>, vector<32x16xf32> -> vector<32x16xf32>
    %41 = arith.addf %32, %40 : vector<32x16xf32>
    %c0_31 = arith.constant 0 : index
    %c128_32 = arith.constant 128 : index
    %42 = vector.load %arg9[%c0_31, %c128_32] : memref<16x272xf32, #tpu.memory_space<vmem>>, vector<16x16xf32>
    %c4 = arith.constant 4 : index
    %c0_33 = arith.constant 0 : index
    %43 = vector.load %arg2[%c4, %c0_33] : memref<9x16xf32, #tpu.memory_space<vmem>>, vector<1x16xf32>
    %44 = vector.broadcast %43 : vector<1x16xf32> to vector<16x16xf32>
    %45 = arith.mulf %42, %44 : vector<16x16xf32>
    %c4_34 = arith.constant 4 : index
    %c0_35 = arith.constant 0 : index
    %c0_36 = arith.constant 0 : index
    %46 = vector.load %arg4[%c4_34, %c0_35, %c0_36] : memref<9x32x16xbf16, #tpu.memory_space<vmem>>, vector<1x32x16xbf16>
    %47 = vector.shape_cast %46 : vector<1x32x16xbf16> to vector<32x16xbf16>
    %48 = arith.truncf %45 : vector<16x16xf32> to vector<16x16xbf16>
    %cst_37 = arith.constant dense<0.000000e+00> : vector<32x16xf32>
    %49 = tpu.matmul %47, %48, %cst_37 {dimension_numbers = #tpu.dot_dimension_numbers<[1], [0], [0], [1], [0, 0, 1, 1], [], []>} : vector<32x16xbf16>, vector<16x16xbf16>, vector<32x16xf32> -> vector<32x16xf32>
    %50 = arith.addf %41, %49 : vector<32x16xf32>
    %c0_38 = arith.constant 0 : index
    %c129 = arith.constant 129 : index
    %51 = vector.load %arg9[%c0_38, %c129] : memref<16x272xf32, #tpu.memory_space<vmem>>, vector<16x16xf32>
    %c5 = arith.constant 5 : index
    %c0_39 = arith.constant 0 : index
    %52 = vector.load %arg2[%c5, %c0_39] : memref<9x16xf32, #tpu.memory_space<vmem>>, vector<1x16xf32>
    %53 = vector.broadcast %52 : vector<1x16xf32> to vector<16x16xf32>
    %54 = arith.mulf %51, %53 : vector<16x16xf32>
    %c5_40 = arith.constant 5 : index
    %c0_41 = arith.constant 0 : index
    %c0_42 = arith.constant 0 : index
    %55 = vector.load %arg4[%c5_40, %c0_41, %c0_42] : memref<9x32x16xbf16, #tpu.memory_space<vmem>>, vector<1x32x16xbf16>
    %56 = vector.shape_cast %55 : vector<1x32x16xbf16> to vector<32x16xbf16>
    %57 = arith.truncf %54 : vector<16x16xf32> to vector<16x16xbf16>
    %cst_43 = arith.constant dense<0.000000e+00> : vector<32x16xf32>
    %58 = tpu.matmul %56, %57, %cst_43 {dimension_numbers = #tpu.dot_dimension_numbers<[1], [0], [0], [1], [0, 0, 1, 1], [], []>} : vector<32x16xbf16>, vector<16x16xbf16>, vector<32x16xf32> -> vector<32x16xf32>
    %59 = arith.addf %50, %58 : vector<32x16xf32>
    %c0_44 = arith.constant 0 : index
    %c131 = arith.constant 131 : index
    %60 = vector.load %arg9[%c0_44, %c131] : memref<16x272xf32, #tpu.memory_space<vmem>>, vector<16x16xf32>
    %c6 = arith.constant 6 : index
    %c0_45 = arith.constant 0 : index
    %61 = vector.load %arg2[%c6, %c0_45] : memref<9x16xf32, #tpu.memory_space<vmem>>, vector<1x16xf32>
    %62 = vector.broadcast %61 : vector<1x16xf32> to vector<16x16xf32>
    %63 = arith.mulf %60, %62 : vector<16x16xf32>
    %c6_46 = arith.constant 6 : index
    %c0_47 = arith.constant 0 : index
    %c0_48 = arith.constant 0 : index
    %64 = vector.load %arg4[%c6_46, %c0_47, %c0_48] : memref<9x32x16xbf16, #tpu.memory_space<vmem>>, vector<1x32x16xbf16>
    %65 = vector.shape_cast %64 : vector<1x32x16xbf16> to vector<32x16xbf16>
    %66 = arith.truncf %63 : vector<16x16xf32> to vector<16x16xbf16>
    %cst_49 = arith.constant dense<0.000000e+00> : vector<32x16xf32>
    %67 = tpu.matmul %65, %66, %cst_49 {dimension_numbers = #tpu.dot_dimension_numbers<[1], [0], [0], [1], [0, 0, 1, 1], [], []>} : vector<32x16xbf16>, vector<16x16xbf16>, vector<32x16xf32> -> vector<32x16xf32>
    %68 = arith.addf %59, %67 : vector<32x16xf32>
    %c0_50 = arith.constant 0 : index
    %c132 = arith.constant 132 : index
    %69 = vector.load %arg9[%c0_50, %c132] : memref<16x272xf32, #tpu.memory_space<vmem>>, vector<16x16xf32>
    %c7 = arith.constant 7 : index
    %c0_51 = arith.constant 0 : index
    %70 = vector.load %arg2[%c7, %c0_51] : memref<9x16xf32, #tpu.memory_space<vmem>>, vector<1x16xf32>
    %71 = vector.broadcast %70 : vector<1x16xf32> to vector<16x16xf32>
    %72 = arith.mulf %69, %71 : vector<16x16xf32>
    %c7_52 = arith.constant 7 : index
    %c0_53 = arith.constant 0 : index
    %c0_54 = arith.constant 0 : index
    %73 = vector.load %arg4[%c7_52, %c0_53, %c0_54] : memref<9x32x16xbf16, #tpu.memory_space<vmem>>, vector<1x32x16xbf16>
    %74 = vector.shape_cast %73 : vector<1x32x16xbf16> to vector<32x16xbf16>
    %75 = arith.truncf %72 : vector<16x16xf32> to vector<16x16xbf16>
    %cst_55 = arith.constant dense<0.000000e+00> : vector<32x16xf32>
    %76 = tpu.matmul %74, %75, %cst_55 {dimension_numbers = #tpu.dot_dimension_numbers<[1], [0], [0], [1], [0, 0, 1, 1], [], []>} : vector<32x16xbf16>, vector<16x16xbf16>, vector<32x16xf32> -> vector<32x16xf32>
    %77 = arith.addf %68, %76 : vector<32x16xf32>
    %c0_56 = arith.constant 0 : index
    %c133 = arith.constant 133 : index
    %78 = vector.load %arg9[%c0_56, %c133] : memref<16x272xf32, #tpu.memory_space<vmem>>, vector<16x16xf32>
    %c8 = arith.constant 8 : index
    %c0_57 = arith.constant 0 : index
    %79 = vector.load %arg2[%c8, %c0_57] : memref<9x16xf32, #tpu.memory_space<vmem>>, vector<1x16xf32>
    %80 = vector.broadcast %79 : vector<1x16xf32> to vector<16x16xf32>
    %81 = arith.mulf %78, %80 : vector<16x16xf32>
    %c8_58 = arith.constant 8 : index
    %c0_59 = arith.constant 0 : index
    %c0_60 = arith.constant 0 : index
    %82 = vector.load %arg4[%c8_58, %c0_59, %c0_60] : memref<9x32x16xbf16, #tpu.memory_space<vmem>>, vector<1x32x16xbf16>
    %83 = vector.shape_cast %82 : vector<1x32x16xbf16> to vector<32x16xbf16>
    %84 = arith.truncf %81 : vector<16x16xf32> to vector<16x16xbf16>
    %cst_61 = arith.constant dense<0.000000e+00> : vector<32x16xf32>
    %85 = tpu.matmul %83, %84, %cst_61 {dimension_numbers = #tpu.dot_dimension_numbers<[1], [0], [0], [1], [0, 0, 1, 1], [], []>} : vector<32x16xbf16>, vector<16x16xbf16>, vector<32x16xf32> -> vector<32x16xf32>
    %86 = arith.addf %77, %85 : vector<32x16xf32>
    %c0_62 = arith.constant 0 : index
    %c0_63 = arith.constant 0 : index
    %87 = vector.load %arg5[%c0_62, %c0_63] : memref<32x1xf32, #tpu.memory_space<vmem>>, vector<32x1xf32>
    %88 = vector.broadcast %87 : vector<32x1xf32> to vector<32x16xf32>
    %89 = arith.addf %86, %88 : vector<32x16xf32>
    %cst_64 = arith.constant 0.000000e+00 : f32
    %90 = vector.broadcast %cst_64 : f32 to vector<32x16xf32>
    %91 = arith.maximumf %89, %90 : vector<32x16xf32>
    %c0_65 = arith.constant 0 : index
    %c0_66 = arith.constant 0 : index
    %92 = vector.load %arg10[%c0_65, %c0_66] : memref<32x16xf32, #tpu.memory_space<vmem>>, vector<32x16xf32>
    tpu.vector_store %arg10[%c0_65, %c0_66], %91 {strides = array<i32>} : memref<32x16xf32, #tpu.memory_space<vmem>>, vector<32x16xf32>,
    %c0_67 = arith.constant 0 : index
    %c0_68 = arith.constant 0 : index
    %93 = vector.load %arg10[%c0_67, %c0_68] : memref<32x16xf32, #tpu.memory_space<vmem>>, vector<32x11xf32>
    %c0_69 = arith.constant 0 : index
    %c1_70 = arith.constant 1 : index
    %94 = vector.load %arg10[%c0_69, %c1_70] : memref<32x16xf32, #tpu.memory_space<vmem>>, vector<32x11xf32>
    %95 = arith.maximumf %93, %94 : vector<32x11xf32>
    %c0_71 = arith.constant 0 : index
    %c4_72 = arith.constant 4 : index
    %96 = vector.load %arg10[%c0_71, %c4_72] : memref<32x16xf32, #tpu.memory_space<vmem>>, vector<32x11xf32>
    %c0_73 = arith.constant 0 : index
    %c5_74 = arith.constant 5 : index
    %97 = vector.load %arg10[%c0_73, %c5_74] : memref<32x16xf32, #tpu.memory_space<vmem>>, vector<32x11xf32>
    %98 = arith.maximumf %96, %97 : vector<32x11xf32>
    %99 = arith.maximumf %95, %98 : vector<32x11xf32>
    %c0_75 = arith.constant 0 : index
    %c0_76 = arith.constant 0 : index
    %100 = vector.load %arg3[%c0_75, %c0_76] : memref<11x4xf32, #tpu.memory_space<vmem>>, vector<11x4xf32>
    %cst_77 = arith.constant dense<0.000000e+00> : vector<32x4xf32>
    %101 = tpu.matmul %99, %100, %cst_77 {dimension_numbers = #tpu.dot_dimension_numbers<[1], [0], [0], [1], [0, 0, 1, 1], [], []>} : vector<32x11xf32>, vector<11x4xf32>, vector<32x4xf32> -> vector<32x4xf32>
    %c0_78 = arith.constant 0 : index
    %c0_79 = arith.constant 0 : index
    %102 = vector.load %arg6[%c0_78, %c0_79] : memref<32x32xbf16, #tpu.memory_space<vmem>>, vector<32x32xbf16>
    %103 = arith.truncf %101 : vector<32x4xf32> to vector<32x4xbf16>
    %cst_80 = arith.constant dense<0.000000e+00> : vector<32x4xf32>
    %104 = tpu.matmul %102, %103, %cst_80 {dimension_numbers = #tpu.dot_dimension_numbers<[1], [0], [0], [1], [0, 0, 1, 1], [], []>} : vector<32x32xbf16>, vector<32x4xbf16>, vector<32x4xf32> -> vector<32x4xf32>
    %c0_81 = arith.constant 0 : index
    %c0_82 = arith.constant 0 : index
    %105 = vector.load %arg7[%c0_81, %c0_82] : memref<32x1xf32, #tpu.memory_space<vmem>>, vector<32x1xf32>
    %106 = vector.broadcast %105 : vector<32x1xf32> to vector<32x4xf32>
    %107 = arith.addf %104, %106 : vector<32x4xf32>
    %c0_83 = arith.constant 0 : index
    %c0_84 = arith.constant 0 : index
    %c0_85 = arith.constant 0 : index
    %108 = vector.load %arg8[%c0_83, %c0_84, %c0_85] : memref<1x32x4xf32, #tpu.memory_space<vmem>>, vector<1x32x4xf32>
    %109 = vector.shape_cast %108 : vector<1x32x4xf32> to vector<32x4xf32>
    %110 = vector.shape_cast %107 : vector<32x4xf32> to vector<1x32x4xf32>
    tpu.vector_store %arg8[%c0_83, %c0_84, %c0_85], %110 {strides = array<i32>} : memref<1x32x4xf32, #tpu.memory_space<vmem>>, vector<1x32x4xf32>,
    return
  }
  func.func @transform_0(%arg0: i32) -> (i32, i32, i32) {
    %c0_i32 = arith.constant 0 : i32
    %c0_i32_0 = arith.constant 0 : i32
    %c0_i32_1 = arith.constant 0 : i32
    return %arg0, %c0_i32, %c0_i32_0 : i32, i32, i32
  }
  func.func @transform_1(%arg0: i32) -> (i32, i32) {
    %c0_i32 = arith.constant 0 : i32
    %c0_i32_0 = arith.constant 0 : i32
    %c0_i32_1 = arith.constant 0 : i32
    return %c0_i32, %c0_i32_0 : i32, i32
  }
  func.func @transform_2(%arg0: i32) -> (i32, i32) {
    %c0_i32 = arith.constant 0 : i32
    %c0_i32_0 = arith.constant 0 : i32
    %c0_i32_1 = arith.constant 0 : i32
    return %c0_i32, %c0_i32_0 : i32, i32
  }
  func.func @transform_3(%arg0: i32) -> (i32, i32, i32) {
    %c0_i32 = arith.constant 0 : i32
    %c0_i32_0 = arith.constant 0 : i32
    %c0_i32_1 = arith.constant 0 : i32
    %c0_i32_2 = arith.constant 0 : i32
    return %c0_i32, %c0_i32_0, %c0_i32_1 : i32, i32, i32
  }
  func.func @transform_4(%arg0: i32) -> (i32, i32) {
    %c0_i32 = arith.constant 0 : i32
    %c0_i32_0 = arith.constant 0 : i32
    %c0_i32_1 = arith.constant 0 : i32
    return %c0_i32, %c0_i32_0 : i32, i32
  }
  func.func @transform_5(%arg0: i32) -> (i32, i32) {
    %c0_i32 = arith.constant 0 : i32
    %c0_i32_0 = arith.constant 0 : i32
    %c0_i32_1 = arith.constant 0 : i32
    return %c0_i32, %c0_i32_0 : i32, i32
  }
  func.func @transform_6(%arg0: i32) -> (i32, i32) {
    %c0_i32 = arith.constant 0 : i32
    %c0_i32_0 = arith.constant 0 : i32
    %c0_i32_1 = arith.constant 0 : i32
    return %c0_i32, %c0_i32_0 : i32, i32
  }
  func.func @transform_7(%arg0: i32) -> (i32, i32, i32) {
    %c0_i32 = arith.constant 0 : i32
    %c0_i32_0 = arith.constant 0 : i32
    %c0_i32_1 = arith.constant 0 : i32
    return %arg0, %c0_i32, %c0_i32_0 : i32, i32, i32
  }
}

module attributes {stable_mosaic.version = 11 : i64} {
  func.func @_down_block_kernel(%arg0: i32, %arg1: memref<1x8x64xf32, #tpu.memory_space<vmem>>, %arg2: memref<9x64xf32, #tpu.memory_space<vmem>>, %arg3: memref<55x16xf32, #tpu.memory_space<vmem>>, %arg4: memref<9x16x8xbf16, #tpu.memory_space<vmem>>, %arg5: memref<16x1xf32, #tpu.memory_space<vmem>>, %arg6: memref<1x16x16xf32, #tpu.memory_space<vmem>>, %arg7: memref<8x320xf32, #tpu.memory_space<vmem>>, %arg8: memref<16x64xf32, #tpu.memory_space<vmem>>) attributes {dimension_semantics = [#tpu.dimension_semantics<parallel>], iteration_bounds = array<i64: 2>, scalar_prefetch = 0 : i64, scratch_operands = 2 : i64, tpu.core_type = #tpu.core_type<tc>, window_params = [{transform_indices = @transform_0, window_bounds = array<i64: 1, 8, 64>}, {pipeline_mode = #tpu.pipeline_mode<synchronous>, transform_indices = @transform_1, window_bounds = array<i64: 9, 64>}, {pipeline_mode = #tpu.pipeline_mode<synchronous>, transform_indices = @transform_2, window_bounds = array<i64: 55, 16>}, {pipeline_mode = #tpu.pipeline_mode<synchronous>, transform_indices = @transform_3, window_bounds = array<i64: 9, 16, 8>}, {pipeline_mode = #tpu.pipeline_mode<synchronous>, transform_indices = @transform_4, window_bounds = array<i64: 16, 1>}, {transform_indices = @transform_5, window_bounds = array<i64: 1, 16, 16>}]} {
    %cst = arith.constant 0.000000e+00 : f32
    %0 = vector.broadcast %cst : f32 to vector<8x320xf32>
    %c0 = arith.constant 0 : index
    %c0_0 = arith.constant 0 : index
    %1 = vector.load %arg7[%c0, %c0_0] : memref<8x320xf32, #tpu.memory_space<vmem>>, vector<8x320xf32>
    tpu.vector_store %arg7[%c0, %c0_0], %0 {strides = array<i32>} : memref<8x320xf32, #tpu.memory_space<vmem>>, vector<8x320xf32>,
    %c0_1 = arith.constant 0 : index
    %c0_2 = arith.constant 0 : index
    %c0_3 = arith.constant 0 : index
    %2 = vector.load %arg1[%c0_1, %c0_2, %c0_3] : memref<1x8x64xf32, #tpu.memory_space<vmem>>, vector<1x8x64xf32>
    %3 = vector.shape_cast %2 : vector<1x8x64xf32> to vector<8x64xf32>
    %c0_4 = arith.constant 0 : index
    %c128 = arith.constant 128 : index
    %4 = vector.load %arg7[%c0_4, %c128] : memref<8x320xf32, #tpu.memory_space<vmem>>, vector<8x64xf32>
    tpu.vector_store %arg7[%c0_4, %c128], %3 {strides = array<i32>} : memref<8x320xf32, #tpu.memory_space<vmem>>, vector<8x64xf32>,
    %cst_5 = arith.constant 0.000000e+00 : f32
    %5 = vector.broadcast %cst_5 : f32 to vector<16x64xf32>
    %c0_6 = arith.constant 0 : index
    %c119 = arith.constant 119 : index
    %6 = vector.load %arg7[%c0_6, %c119] : memref<8x320xf32, #tpu.memory_space<vmem>>, vector<8x64xf32>
    %c0_7 = arith.constant 0 : index
    %c0_8 = arith.constant 0 : index
    %7 = vector.load %arg2[%c0_7, %c0_8] : memref<9x64xf32, #tpu.memory_space<vmem>>, vector<1x64xf32>
    %8 = vector.broadcast %7 : vector<1x64xf32> to vector<8x64xf32>
    %9 = arith.mulf %6, %8 : vector<8x64xf32>
    %c0_9 = arith.constant 0 : index
    %c0_10 = arith.constant 0 : index
    %c0_11 = arith.constant 0 : index
    %10 = vector.load %arg4[%c0_9, %c0_10, %c0_11] : memref<9x16x8xbf16, #tpu.memory_space<vmem>>, vector<1x16x8xbf16>
    %11 = vector.shape_cast %10 : vector<1x16x8xbf16> to vector<16x8xbf16>
    %12 = arith.truncf %9 : vector<8x64xf32> to vector<8x64xbf16>
    %cst_12 = arith.constant dense<0.000000e+00> : vector<16x64xf32>
    %13 = tpu.matmul %11, %12, %cst_12 {dimension_numbers = #tpu.dot_dimension_numbers<[1], [0], [0], [1], [0, 0, 1, 1], [], []>} : vector<16x8xbf16>, vector<8x64xbf16>, vector<16x64xf32> -> vector<16x64xf32>
    %14 = arith.addf %5, %13 : vector<16x64xf32>
    %c0_13 = arith.constant 0 : index
    %c120 = arith.constant 120 : index
    %15 = vector.load %arg7[%c0_13, %c120] : memref<8x320xf32, #tpu.memory_space<vmem>>, vector<8x64xf32>
    %c1 = arith.constant 1 : index
    %c0_14 = arith.constant 0 : index
    %16 = vector.load %arg2[%c1, %c0_14] : memref<9x64xf32, #tpu.memory_space<vmem>>, vector<1x64xf32>
    %17 = vector.broadcast %16 : vector<1x64xf32> to vector<8x64xf32>
    %18 = arith.mulf %15, %17 : vector<8x64xf32>
    %c1_15 = arith.constant 1 : index
    %c0_16 = arith.constant 0 : index
    %c0_17 = arith.constant 0 : index
    %19 = vector.load %arg4[%c1_15, %c0_16, %c0_17] : memref<9x16x8xbf16, #tpu.memory_space<vmem>>, vector<1x16x8xbf16>
    %20 = vector.shape_cast %19 : vector<1x16x8xbf16> to vector<16x8xbf16>
    %21 = arith.truncf %18 : vector<8x64xf32> to vector<8x64xbf16>
    %cst_18 = arith.constant dense<0.000000e+00> : vector<16x64xf32>
    %22 = tpu.matmul %20, %21, %cst_18 {dimension_numbers = #tpu.dot_dimension_numbers<[1], [0], [0], [1], [0, 0, 1, 1], [], []>} : vector<16x8xbf16>, vector<8x64xbf16>, vector<16x64xf32> -> vector<16x64xf32>
    %23 = arith.addf %14, %22 : vector<16x64xf32>
    %c0_19 = arith.constant 0 : index
    %c121 = arith.constant 121 : index
    %24 = vector.load %arg7[%c0_19, %c121] : memref<8x320xf32, #tpu.memory_space<vmem>>, vector<8x64xf32>
    %c2 = arith.constant 2 : index
    %c0_20 = arith.constant 0 : index
    %25 = vector.load %arg2[%c2, %c0_20] : memref<9x64xf32, #tpu.memory_space<vmem>>, vector<1x64xf32>
    %26 = vector.broadcast %25 : vector<1x64xf32> to vector<8x64xf32>
    %27 = arith.mulf %24, %26 : vector<8x64xf32>
    %c2_21 = arith.constant 2 : index
    %c0_22 = arith.constant 0 : index
    %c0_23 = arith.constant 0 : index
    %28 = vector.load %arg4[%c2_21, %c0_22, %c0_23] : memref<9x16x8xbf16, #tpu.memory_space<vmem>>, vector<1x16x8xbf16>
    %29 = vector.shape_cast %28 : vector<1x16x8xbf16> to vector<16x8xbf16>
    %30 = arith.truncf %27 : vector<8x64xf32> to vector<8x64xbf16>
    %cst_24 = arith.constant dense<0.000000e+00> : vector<16x64xf32>
    %31 = tpu.matmul %29, %30, %cst_24 {dimension_numbers = #tpu.dot_dimension_numbers<[1], [0], [0], [1], [0, 0, 1, 1], [], []>} : vector<16x8xbf16>, vector<8x64xbf16>, vector<16x64xf32> -> vector<16x64xf32>
    %32 = arith.addf %23, %31 : vector<16x64xf32>
    %c0_25 = arith.constant 0 : index
    %c127 = arith.constant 127 : index
    %33 = vector.load %arg7[%c0_25, %c127] : memref<8x320xf32, #tpu.memory_space<vmem>>, vector<8x64xf32>
    %c3 = arith.constant 3 : index
    %c0_26 = arith.constant 0 : index
    %34 = vector.load %arg2[%c3, %c0_26] : memref<9x64xf32, #tpu.memory_space<vmem>>, vector<1x64xf32>
    %35 = vector.broadcast %34 : vector<1x64xf32> to vector<8x64xf32>
    %36 = arith.mulf %33, %35 : vector<8x64xf32>
    %c3_27 = arith.constant 3 : index
    %c0_28 = arith.constant 0 : index
    %c0_29 = arith.constant 0 : index
    %37 = vector.load %arg4[%c3_27, %c0_28, %c0_29] : memref<9x16x8xbf16, #tpu.memory_space<vmem>>, vector<1x16x8xbf16>
    %38 = vector.shape_cast %37 : vector<1x16x8xbf16> to vector<16x8xbf16>
    %39 = arith.truncf %36 : vector<8x64xf32> to vector<8x64xbf16>
    %cst_30 = arith.constant dense<0.000000e+00> : vector<16x64xf32>
    %40 = tpu.matmul %38, %39, %cst_30 {dimension_numbers = #tpu.dot_dimension_numbers<[1], [0], [0], [1], [0, 0, 1, 1], [], []>} : vector<16x8xbf16>, vector<8x64xbf16>, vector<16x64xf32> -> vector<16x64xf32>
    %41 = arith.addf %32, %40 : vector<16x64xf32>
    %c0_31 = arith.constant 0 : index
    %c128_32 = arith.constant 128 : index
    %42 = vector.load %arg7[%c0_31, %c128_32] : memref<8x320xf32, #tpu.memory_space<vmem>>, vector<8x64xf32>
    %c4 = arith.constant 4 : index
    %c0_33 = arith.constant 0 : index
    %43 = vector.load %arg2[%c4, %c0_33] : memref<9x64xf32, #tpu.memory_space<vmem>>, vector<1x64xf32>
    %44 = vector.broadcast %43 : vector<1x64xf32> to vector<8x64xf32>
    %45 = arith.mulf %42, %44 : vector<8x64xf32>
    %c4_34 = arith.constant 4 : index
    %c0_35 = arith.constant 0 : index
    %c0_36 = arith.constant 0 : index
    %46 = vector.load %arg4[%c4_34, %c0_35, %c0_36] : memref<9x16x8xbf16, #tpu.memory_space<vmem>>, vector<1x16x8xbf16>
    %47 = vector.shape_cast %46 : vector<1x16x8xbf16> to vector<16x8xbf16>
    %48 = arith.truncf %45 : vector<8x64xf32> to vector<8x64xbf16>
    %cst_37 = arith.constant dense<0.000000e+00> : vector<16x64xf32>
    %49 = tpu.matmul %47, %48, %cst_37 {dimension_numbers = #tpu.dot_dimension_numbers<[1], [0], [0], [1], [0, 0, 1, 1], [], []>} : vector<16x8xbf16>, vector<8x64xbf16>, vector<16x64xf32> -> vector<16x64xf32>
    %50 = arith.addf %41, %49 : vector<16x64xf32>
    %c0_38 = arith.constant 0 : index
    %c129 = arith.constant 129 : index
    %51 = vector.load %arg7[%c0_38, %c129] : memref<8x320xf32, #tpu.memory_space<vmem>>, vector<8x64xf32>
    %c5 = arith.constant 5 : index
    %c0_39 = arith.constant 0 : index
    %52 = vector.load %arg2[%c5, %c0_39] : memref<9x64xf32, #tpu.memory_space<vmem>>, vector<1x64xf32>
    %53 = vector.broadcast %52 : vector<1x64xf32> to vector<8x64xf32>
    %54 = arith.mulf %51, %53 : vector<8x64xf32>
    %c5_40 = arith.constant 5 : index
    %c0_41 = arith.constant 0 : index
    %c0_42 = arith.constant 0 : index
    %55 = vector.load %arg4[%c5_40, %c0_41, %c0_42] : memref<9x16x8xbf16, #tpu.memory_space<vmem>>, vector<1x16x8xbf16>
    %56 = vector.shape_cast %55 : vector<1x16x8xbf16> to vector<16x8xbf16>
    %57 = arith.truncf %54 : vector<8x64xf32> to vector<8x64xbf16>
    %cst_43 = arith.constant dense<0.000000e+00> : vector<16x64xf32>
    %58 = tpu.matmul %56, %57, %cst_43 {dimension_numbers = #tpu.dot_dimension_numbers<[1], [0], [0], [1], [0, 0, 1, 1], [], []>} : vector<16x8xbf16>, vector<8x64xbf16>, vector<16x64xf32> -> vector<16x64xf32>
    %59 = arith.addf %50, %58 : vector<16x64xf32>
    %c0_44 = arith.constant 0 : index
    %c135 = arith.constant 135 : index
    %60 = vector.load %arg7[%c0_44, %c135] : memref<8x320xf32, #tpu.memory_space<vmem>>, vector<8x64xf32>
    %c6 = arith.constant 6 : index
    %c0_45 = arith.constant 0 : index
    %61 = vector.load %arg2[%c6, %c0_45] : memref<9x64xf32, #tpu.memory_space<vmem>>, vector<1x64xf32>
    %62 = vector.broadcast %61 : vector<1x64xf32> to vector<8x64xf32>
    %63 = arith.mulf %60, %62 : vector<8x64xf32>
    %c6_46 = arith.constant 6 : index
    %c0_47 = arith.constant 0 : index
    %c0_48 = arith.constant 0 : index
    %64 = vector.load %arg4[%c6_46, %c0_47, %c0_48] : memref<9x16x8xbf16, #tpu.memory_space<vmem>>, vector<1x16x8xbf16>
    %65 = vector.shape_cast %64 : vector<1x16x8xbf16> to vector<16x8xbf16>
    %66 = arith.truncf %63 : vector<8x64xf32> to vector<8x64xbf16>
    %cst_49 = arith.constant dense<0.000000e+00> : vector<16x64xf32>
    %67 = tpu.matmul %65, %66, %cst_49 {dimension_numbers = #tpu.dot_dimension_numbers<[1], [0], [0], [1], [0, 0, 1, 1], [], []>} : vector<16x8xbf16>, vector<8x64xbf16>, vector<16x64xf32> -> vector<16x64xf32>
    %68 = arith.addf %59, %67 : vector<16x64xf32>
    %c0_50 = arith.constant 0 : index
    %c136 = arith.constant 136 : index
    %69 = vector.load %arg7[%c0_50, %c136] : memref<8x320xf32, #tpu.memory_space<vmem>>, vector<8x64xf32>
    %c7 = arith.constant 7 : index
    %c0_51 = arith.constant 0 : index
    %70 = vector.load %arg2[%c7, %c0_51] : memref<9x64xf32, #tpu.memory_space<vmem>>, vector<1x64xf32>
    %71 = vector.broadcast %70 : vector<1x64xf32> to vector<8x64xf32>
    %72 = arith.mulf %69, %71 : vector<8x64xf32>
    %c7_52 = arith.constant 7 : index
    %c0_53 = arith.constant 0 : index
    %c0_54 = arith.constant 0 : index
    %73 = vector.load %arg4[%c7_52, %c0_53, %c0_54] : memref<9x16x8xbf16, #tpu.memory_space<vmem>>, vector<1x16x8xbf16>
    %74 = vector.shape_cast %73 : vector<1x16x8xbf16> to vector<16x8xbf16>
    %75 = arith.truncf %72 : vector<8x64xf32> to vector<8x64xbf16>
    %cst_55 = arith.constant dense<0.000000e+00> : vector<16x64xf32>
    %76 = tpu.matmul %74, %75, %cst_55 {dimension_numbers = #tpu.dot_dimension_numbers<[1], [0], [0], [1], [0, 0, 1, 1], [], []>} : vector<16x8xbf16>, vector<8x64xbf16>, vector<16x64xf32> -> vector<16x64xf32>
    %77 = arith.addf %68, %76 : vector<16x64xf32>
    %c0_56 = arith.constant 0 : index
    %c137 = arith.constant 137 : index
    %78 = vector.load %arg7[%c0_56, %c137] : memref<8x320xf32, #tpu.memory_space<vmem>>, vector<8x64xf32>
    %c8 = arith.constant 8 : index
    %c0_57 = arith.constant 0 : index
    %79 = vector.load %arg2[%c8, %c0_57] : memref<9x64xf32, #tpu.memory_space<vmem>>, vector<1x64xf32>
    %80 = vector.broadcast %79 : vector<1x64xf32> to vector<8x64xf32>
    %81 = arith.mulf %78, %80 : vector<8x64xf32>
    %c8_58 = arith.constant 8 : index
    %c0_59 = arith.constant 0 : index
    %c0_60 = arith.constant 0 : index
    %82 = vector.load %arg4[%c8_58, %c0_59, %c0_60] : memref<9x16x8xbf16, #tpu.memory_space<vmem>>, vector<1x16x8xbf16>
    %83 = vector.shape_cast %82 : vector<1x16x8xbf16> to vector<16x8xbf16>
    %84 = arith.truncf %81 : vector<8x64xf32> to vector<8x64xbf16>
    %cst_61 = arith.constant dense<0.000000e+00> : vector<16x64xf32>
    %85 = tpu.matmul %83, %84, %cst_61 {dimension_numbers = #tpu.dot_dimension_numbers<[1], [0], [0], [1], [0, 0, 1, 1], [], []>} : vector<16x8xbf16>, vector<8x64xbf16>, vector<16x64xf32> -> vector<16x64xf32>
    %86 = arith.addf %77, %85 : vector<16x64xf32>
    %c0_62 = arith.constant 0 : index
    %c0_63 = arith.constant 0 : index
    %87 = vector.load %arg5[%c0_62, %c0_63] : memref<16x1xf32, #tpu.memory_space<vmem>>, vector<16x1xf32>
    %88 = vector.broadcast %87 : vector<16x1xf32> to vector<16x64xf32>
    %89 = arith.addf %86, %88 : vector<16x64xf32>
    %cst_64 = arith.constant 0.000000e+00 : f32
    %90 = vector.broadcast %cst_64 : f32 to vector<16x64xf32>
    %91 = arith.maximumf %89, %90 : vector<16x64xf32>
    %c0_65 = arith.constant 0 : index
    %c0_66 = arith.constant 0 : index
    %92 = vector.load %arg8[%c0_65, %c0_66] : memref<16x64xf32, #tpu.memory_space<vmem>>, vector<16x64xf32>
    tpu.vector_store %arg8[%c0_65, %c0_66], %91 {strides = array<i32>} : memref<16x64xf32, #tpu.memory_space<vmem>>, vector<16x64xf32>,
    %c0_67 = arith.constant 0 : index
    %c0_68 = arith.constant 0 : index
    %93 = vector.load %arg8[%c0_67, %c0_68] : memref<16x64xf32, #tpu.memory_space<vmem>>, vector<16x55xf32>
    %c0_69 = arith.constant 0 : index
    %c1_70 = arith.constant 1 : index
    %94 = vector.load %arg8[%c0_69, %c1_70] : memref<16x64xf32, #tpu.memory_space<vmem>>, vector<16x55xf32>
    %95 = arith.maximumf %93, %94 : vector<16x55xf32>
    %c0_71 = arith.constant 0 : index
    %c8_72 = arith.constant 8 : index
    %96 = vector.load %arg8[%c0_71, %c8_72] : memref<16x64xf32, #tpu.memory_space<vmem>>, vector<16x55xf32>
    %c0_73 = arith.constant 0 : index
    %c9 = arith.constant 9 : index
    %97 = vector.load %arg8[%c0_73, %c9] : memref<16x64xf32, #tpu.memory_space<vmem>>, vector<16x55xf32>
    %98 = arith.maximumf %96, %97 : vector<16x55xf32>
    %99 = arith.maximumf %95, %98 : vector<16x55xf32>
    %c0_74 = arith.constant 0 : index
    %c0_75 = arith.constant 0 : index
    %100 = vector.load %arg3[%c0_74, %c0_75] : memref<55x16xf32, #tpu.memory_space<vmem>>, vector<55x16xf32>
    %cst_76 = arith.constant dense<0.000000e+00> : vector<16x16xf32>
    %101 = tpu.matmul %99, %100, %cst_76 {dimension_numbers = #tpu.dot_dimension_numbers<[1], [0], [0], [1], [0, 0, 1, 1], [], []>} : vector<16x55xf32>, vector<55x16xf32>, vector<16x16xf32> -> vector<16x16xf32>
    %c0_77 = arith.constant 0 : index
    %c0_78 = arith.constant 0 : index
    %c0_79 = arith.constant 0 : index
    %102 = vector.load %arg6[%c0_77, %c0_78, %c0_79] : memref<1x16x16xf32, #tpu.memory_space<vmem>>, vector<1x16x16xf32>
    %103 = vector.shape_cast %102 : vector<1x16x16xf32> to vector<16x16xf32>
    %104 = vector.shape_cast %101 : vector<16x16xf32> to vector<1x16x16xf32>
    tpu.vector_store %arg6[%c0_77, %c0_78, %c0_79], %104 {strides = array<i32>} : memref<1x16x16xf32, #tpu.memory_space<vmem>>, vector<1x16x16xf32>,
    return
  }
  func.func @transform_0(%arg0: i32) -> (i32, i32, i32) {
    %c0_i32 = arith.constant 0 : i32
    %c0_i32_0 = arith.constant 0 : i32
    %c0_i32_1 = arith.constant 0 : i32
    return %arg0, %c0_i32, %c0_i32_0 : i32, i32, i32
  }
  func.func @transform_1(%arg0: i32) -> (i32, i32) {
    %c0_i32 = arith.constant 0 : i32
    %c0_i32_0 = arith.constant 0 : i32
    %c0_i32_1 = arith.constant 0 : i32
    return %c0_i32, %c0_i32_0 : i32, i32
  }
  func.func @transform_2(%arg0: i32) -> (i32, i32) {
    %c0_i32 = arith.constant 0 : i32
    %c0_i32_0 = arith.constant 0 : i32
    %c0_i32_1 = arith.constant 0 : i32
    return %c0_i32, %c0_i32_0 : i32, i32
  }
  func.func @transform_3(%arg0: i32) -> (i32, i32, i32) {
    %c0_i32 = arith.constant 0 : i32
    %c0_i32_0 = arith.constant 0 : i32
    %c0_i32_1 = arith.constant 0 : i32
    %c0_i32_2 = arith.constant 0 : i32
    return %c0_i32, %c0_i32_0, %c0_i32_1 : i32, i32, i32
  }
  func.func @transform_4(%arg0: i32) -> (i32, i32) {
    %c0_i32 = arith.constant 0 : i32
    %c0_i32_0 = arith.constant 0 : i32
    %c0_i32_1 = arith.constant 0 : i32
    return %c0_i32, %c0_i32_0 : i32, i32
  }
  func.func @transform_5(%arg0: i32) -> (i32, i32, i32) {
    %c0_i32 = arith.constant 0 : i32
    %c0_i32_0 = arith.constant 0 : i32
    %c0_i32_1 = arith.constant 0 : i32
    return %arg0, %c0_i32, %c0_i32_0 : i32, i32, i32
  }
}

module attributes {stable_mosaic.version = 11 : i64} {
  func.func @_up_block_kernel(%arg0: i32, %arg1: memref<1x32x4xf32, #tpu.memory_space<vmem>>, %arg2: memref<1x16x16xf32, #tpu.memory_space<vmem>>, %arg3: memref<4x16xf32, #tpu.memory_space<vmem>>, %arg4: memref<9x16xf32, #tpu.memory_space<vmem>>, %arg5: memref<9x32x32xbf16, #tpu.memory_space<vmem>>, %arg6: memref<32x1xf32, #tpu.memory_space<vmem>>, %arg7: memref<9x16x32xbf16, #tpu.memory_space<vmem>>, %arg8: memref<9x16x16xbf16, #tpu.memory_space<vmem>>, %arg9: memref<16x1xf32, #tpu.memory_space<vmem>>, %arg10: memref<1x16x16xf32, #tpu.memory_space<vmem>>, %arg11: memref<32x272xf32, #tpu.memory_space<vmem>>, %arg12: memref<32x272xf32, #tpu.memory_space<vmem>>, %arg13: memref<16x272xf32, #tpu.memory_space<vmem>>) attributes {dimension_semantics = [#tpu.dimension_semantics<parallel>], iteration_bounds = array<i64: 2>, scalar_prefetch = 0 : i64, scratch_operands = 3 : i64, tpu.core_type = #tpu.core_type<tc>, window_params = [{transform_indices = @transform_0, window_bounds = array<i64: 1, 32, 4>}, {transform_indices = @transform_1, window_bounds = array<i64: 1, 16, 16>}, {pipeline_mode = #tpu.pipeline_mode<synchronous>, transform_indices = @transform_2, window_bounds = array<i64: 4, 16>}, {pipeline_mode = #tpu.pipeline_mode<synchronous>, transform_indices = @transform_3, window_bounds = array<i64: 9, 16>}, {pipeline_mode = #tpu.pipeline_mode<synchronous>, transform_indices = @transform_4, window_bounds = array<i64: 9, 32, 32>}, {pipeline_mode = #tpu.pipeline_mode<synchronous>, transform_indices = @transform_5, window_bounds = array<i64: 32, 1>}, {pipeline_mode = #tpu.pipeline_mode<synchronous>, transform_indices = @transform_6, window_bounds = array<i64: 9, 16, 32>}, {pipeline_mode = #tpu.pipeline_mode<synchronous>, transform_indices = @transform_7, window_bounds = array<i64: 9, 16, 16>}, {pipeline_mode = #tpu.pipeline_mode<synchronous>, transform_indices = @transform_8, window_bounds = array<i64: 16, 1>}, {transform_indices = @transform_9, window_bounds = array<i64: 1, 16, 16>}]} {
    %c0 = arith.constant 0 : index
    %c0_0 = arith.constant 0 : index
    %c0_1 = arith.constant 0 : index
    %0 = vector.load %arg1[%c0, %c0_0, %c0_1] : memref<1x32x4xf32, #tpu.memory_space<vmem>>, vector<1x32x4xf32>
    %1 = vector.shape_cast %0 : vector<1x32x4xf32> to vector<32x4xf32>
    %c0_2 = arith.constant 0 : index
    %c0_3 = arith.constant 0 : index
    %2 = vector.load %arg3[%c0_2, %c0_3] : memref<4x16xf32, #tpu.memory_space<vmem>>, vector<4x16xf32>
    %cst = arith.constant dense<0.000000e+00> : vector<32x16xf32>
    %3 = tpu.matmul %1, %2, %cst {dimension_numbers = #tpu.dot_dimension_numbers<[1], [0], [0], [1], [0, 0, 1, 1], [], []>} : vector<32x4xf32>, vector<4x16xf32>, vector<32x16xf32> -> vector<32x16xf32>
    %cst_4 = arith.constant 0.000000e+00 : f32
    %4 = vector.broadcast %cst_4 : f32 to vector<32x272xf32>
    %c0_5 = arith.constant 0 : index
    %c0_6 = arith.constant 0 : index
    %5 = vector.load %arg11[%c0_5, %c0_6] : memref<32x272xf32, #tpu.memory_space<vmem>>, vector<32x272xf32>
    tpu.vector_store %arg11[%c0_5, %c0_6], %4 {strides = array<i32>} : memref<32x272xf32, #tpu.memory_space<vmem>>, vector<32x272xf32>,
    %c0_7 = arith.constant 0 : index
    %c128 = arith.constant 128 : index
    %6 = vector.load %arg11[%c0_7, %c128] : memref<32x272xf32, #tpu.memory_space<vmem>>, vector<32x16xf32>
    tpu.vector_store %arg11[%c0_7, %c128], %3 {strides = array<i32>} : memref<32x272xf32, #tpu.memory_space<vmem>>, vector<32x16xf32>,
    %cst_8 = arith.constant 0.000000e+00 : f32
    %7 = vector.broadcast %cst_8 : f32 to vector<32x16xf32>
    %c0_9 = arith.constant 0 : index
    %c123 = arith.constant 123 : index
    %8 = vector.load %arg11[%c0_9, %c123] : memref<32x272xf32, #tpu.memory_space<vmem>>, vector<32x16xf32>
    %c0_10 = arith.constant 0 : index
    %c0_11 = arith.constant 0 : index
    %9 = vector.load %arg4[%c0_10, %c0_11] : memref<9x16xf32, #tpu.memory_space<vmem>>, vector<1x16xf32>
    %10 = vector.broadcast %9 : vector<1x16xf32> to vector<32x16xf32>
    %11 = arith.mulf %8, %10 : vector<32x16xf32>
    %c0_12 = arith.constant 0 : index
    %c0_13 = arith.constant 0 : index
    %c0_14 = arith.constant 0 : index
    %12 = vector.load %arg5[%c0_12, %c0_13, %c0_14] : memref<9x32x32xbf16, #tpu.memory_space<vmem>>, vector<1x32x32xbf16>
    %13 = vector.shape_cast %12 : vector<1x32x32xbf16> to vector<32x32xbf16>
    %14 = arith.truncf %11 : vector<32x16xf32> to vector<32x16xbf16>
    %cst_15 = arith.constant dense<0.000000e+00> : vector<32x16xf32>
    %15 = tpu.matmul %13, %14, %cst_15 {dimension_numbers = #tpu.dot_dimension_numbers<[1], [0], [0], [1], [0, 0, 1, 1], [], []>} : vector<32x32xbf16>, vector<32x16xbf16>, vector<32x16xf32> -> vector<32x16xf32>
    %16 = arith.addf %7, %15 : vector<32x16xf32>
    %c0_16 = arith.constant 0 : index
    %c124 = arith.constant 124 : index
    %17 = vector.load %arg11[%c0_16, %c124] : memref<32x272xf32, #tpu.memory_space<vmem>>, vector<32x16xf32>
    %c1 = arith.constant 1 : index
    %c0_17 = arith.constant 0 : index
    %18 = vector.load %arg4[%c1, %c0_17] : memref<9x16xf32, #tpu.memory_space<vmem>>, vector<1x16xf32>
    %19 = vector.broadcast %18 : vector<1x16xf32> to vector<32x16xf32>
    %20 = arith.mulf %17, %19 : vector<32x16xf32>
    %c1_18 = arith.constant 1 : index
    %c0_19 = arith.constant 0 : index
    %c0_20 = arith.constant 0 : index
    %21 = vector.load %arg5[%c1_18, %c0_19, %c0_20] : memref<9x32x32xbf16, #tpu.memory_space<vmem>>, vector<1x32x32xbf16>
    %22 = vector.shape_cast %21 : vector<1x32x32xbf16> to vector<32x32xbf16>
    %23 = arith.truncf %20 : vector<32x16xf32> to vector<32x16xbf16>
    %cst_21 = arith.constant dense<0.000000e+00> : vector<32x16xf32>
    %24 = tpu.matmul %22, %23, %cst_21 {dimension_numbers = #tpu.dot_dimension_numbers<[1], [0], [0], [1], [0, 0, 1, 1], [], []>} : vector<32x32xbf16>, vector<32x16xbf16>, vector<32x16xf32> -> vector<32x16xf32>
    %25 = arith.addf %16, %24 : vector<32x16xf32>
    %c0_22 = arith.constant 0 : index
    %c125 = arith.constant 125 : index
    %26 = vector.load %arg11[%c0_22, %c125] : memref<32x272xf32, #tpu.memory_space<vmem>>, vector<32x16xf32>
    %c2 = arith.constant 2 : index
    %c0_23 = arith.constant 0 : index
    %27 = vector.load %arg4[%c2, %c0_23] : memref<9x16xf32, #tpu.memory_space<vmem>>, vector<1x16xf32>
    %28 = vector.broadcast %27 : vector<1x16xf32> to vector<32x16xf32>
    %29 = arith.mulf %26, %28 : vector<32x16xf32>
    %c2_24 = arith.constant 2 : index
    %c0_25 = arith.constant 0 : index
    %c0_26 = arith.constant 0 : index
    %30 = vector.load %arg5[%c2_24, %c0_25, %c0_26] : memref<9x32x32xbf16, #tpu.memory_space<vmem>>, vector<1x32x32xbf16>
    %31 = vector.shape_cast %30 : vector<1x32x32xbf16> to vector<32x32xbf16>
    %32 = arith.truncf %29 : vector<32x16xf32> to vector<32x16xbf16>
    %cst_27 = arith.constant dense<0.000000e+00> : vector<32x16xf32>
    %33 = tpu.matmul %31, %32, %cst_27 {dimension_numbers = #tpu.dot_dimension_numbers<[1], [0], [0], [1], [0, 0, 1, 1], [], []>} : vector<32x32xbf16>, vector<32x16xbf16>, vector<32x16xf32> -> vector<32x16xf32>
    %34 = arith.addf %25, %33 : vector<32x16xf32>
    %c0_28 = arith.constant 0 : index
    %c127 = arith.constant 127 : index
    %35 = vector.load %arg11[%c0_28, %c127] : memref<32x272xf32, #tpu.memory_space<vmem>>, vector<32x16xf32>
    %c3 = arith.constant 3 : index
    %c0_29 = arith.constant 0 : index
    %36 = vector.load %arg4[%c3, %c0_29] : memref<9x16xf32, #tpu.memory_space<vmem>>, vector<1x16xf32>
    %37 = vector.broadcast %36 : vector<1x16xf32> to vector<32x16xf32>
    %38 = arith.mulf %35, %37 : vector<32x16xf32>
    %c3_30 = arith.constant 3 : index
    %c0_31 = arith.constant 0 : index
    %c0_32 = arith.constant 0 : index
    %39 = vector.load %arg5[%c3_30, %c0_31, %c0_32] : memref<9x32x32xbf16, #tpu.memory_space<vmem>>, vector<1x32x32xbf16>
    %40 = vector.shape_cast %39 : vector<1x32x32xbf16> to vector<32x32xbf16>
    %41 = arith.truncf %38 : vector<32x16xf32> to vector<32x16xbf16>
    %cst_33 = arith.constant dense<0.000000e+00> : vector<32x16xf32>
    %42 = tpu.matmul %40, %41, %cst_33 {dimension_numbers = #tpu.dot_dimension_numbers<[1], [0], [0], [1], [0, 0, 1, 1], [], []>} : vector<32x32xbf16>, vector<32x16xbf16>, vector<32x16xf32> -> vector<32x16xf32>
    %43 = arith.addf %34, %42 : vector<32x16xf32>
    %c0_34 = arith.constant 0 : index
    %c128_35 = arith.constant 128 : index
    %44 = vector.load %arg11[%c0_34, %c128_35] : memref<32x272xf32, #tpu.memory_space<vmem>>, vector<32x16xf32>
    %c4 = arith.constant 4 : index
    %c0_36 = arith.constant 0 : index
    %45 = vector.load %arg4[%c4, %c0_36] : memref<9x16xf32, #tpu.memory_space<vmem>>, vector<1x16xf32>
    %46 = vector.broadcast %45 : vector<1x16xf32> to vector<32x16xf32>
    %47 = arith.mulf %44, %46 : vector<32x16xf32>
    %c4_37 = arith.constant 4 : index
    %c0_38 = arith.constant 0 : index
    %c0_39 = arith.constant 0 : index
    %48 = vector.load %arg5[%c4_37, %c0_38, %c0_39] : memref<9x32x32xbf16, #tpu.memory_space<vmem>>, vector<1x32x32xbf16>
    %49 = vector.shape_cast %48 : vector<1x32x32xbf16> to vector<32x32xbf16>
    %50 = arith.truncf %47 : vector<32x16xf32> to vector<32x16xbf16>
    %cst_40 = arith.constant dense<0.000000e+00> : vector<32x16xf32>
    %51 = tpu.matmul %49, %50, %cst_40 {dimension_numbers = #tpu.dot_dimension_numbers<[1], [0], [0], [1], [0, 0, 1, 1], [], []>} : vector<32x32xbf16>, vector<32x16xbf16>, vector<32x16xf32> -> vector<32x16xf32>
    %52 = arith.addf %43, %51 : vector<32x16xf32>
    %c0_41 = arith.constant 0 : index
    %c129 = arith.constant 129 : index
    %53 = vector.load %arg11[%c0_41, %c129] : memref<32x272xf32, #tpu.memory_space<vmem>>, vector<32x16xf32>
    %c5 = arith.constant 5 : index
    %c0_42 = arith.constant 0 : index
    %54 = vector.load %arg4[%c5, %c0_42] : memref<9x16xf32, #tpu.memory_space<vmem>>, vector<1x16xf32>
    %55 = vector.broadcast %54 : vector<1x16xf32> to vector<32x16xf32>
    %56 = arith.mulf %53, %55 : vector<32x16xf32>
    %c5_43 = arith.constant 5 : index
    %c0_44 = arith.constant 0 : index
    %c0_45 = arith.constant 0 : index
    %57 = vector.load %arg5[%c5_43, %c0_44, %c0_45] : memref<9x32x32xbf16, #tpu.memory_space<vmem>>, vector<1x32x32xbf16>
    %58 = vector.shape_cast %57 : vector<1x32x32xbf16> to vector<32x32xbf16>
    %59 = arith.truncf %56 : vector<32x16xf32> to vector<32x16xbf16>
    %cst_46 = arith.constant dense<0.000000e+00> : vector<32x16xf32>
    %60 = tpu.matmul %58, %59, %cst_46 {dimension_numbers = #tpu.dot_dimension_numbers<[1], [0], [0], [1], [0, 0, 1, 1], [], []>} : vector<32x32xbf16>, vector<32x16xbf16>, vector<32x16xf32> -> vector<32x16xf32>
    %61 = arith.addf %52, %60 : vector<32x16xf32>
    %c0_47 = arith.constant 0 : index
    %c131 = arith.constant 131 : index
    %62 = vector.load %arg11[%c0_47, %c131] : memref<32x272xf32, #tpu.memory_space<vmem>>, vector<32x16xf32>
    %c6 = arith.constant 6 : index
    %c0_48 = arith.constant 0 : index
    %63 = vector.load %arg4[%c6, %c0_48] : memref<9x16xf32, #tpu.memory_space<vmem>>, vector<1x16xf32>
    %64 = vector.broadcast %63 : vector<1x16xf32> to vector<32x16xf32>
    %65 = arith.mulf %62, %64 : vector<32x16xf32>
    %c6_49 = arith.constant 6 : index
    %c0_50 = arith.constant 0 : index
    %c0_51 = arith.constant 0 : index
    %66 = vector.load %arg5[%c6_49, %c0_50, %c0_51] : memref<9x32x32xbf16, #tpu.memory_space<vmem>>, vector<1x32x32xbf16>
    %67 = vector.shape_cast %66 : vector<1x32x32xbf16> to vector<32x32xbf16>
    %68 = arith.truncf %65 : vector<32x16xf32> to vector<32x16xbf16>
    %cst_52 = arith.constant dense<0.000000e+00> : vector<32x16xf32>
    %69 = tpu.matmul %67, %68, %cst_52 {dimension_numbers = #tpu.dot_dimension_numbers<[1], [0], [0], [1], [0, 0, 1, 1], [], []>} : vector<32x32xbf16>, vector<32x16xbf16>, vector<32x16xf32> -> vector<32x16xf32>
    %70 = arith.addf %61, %69 : vector<32x16xf32>
    %c0_53 = arith.constant 0 : index
    %c132 = arith.constant 132 : index
    %71 = vector.load %arg11[%c0_53, %c132] : memref<32x272xf32, #tpu.memory_space<vmem>>, vector<32x16xf32>
    %c7 = arith.constant 7 : index
    %c0_54 = arith.constant 0 : index
    %72 = vector.load %arg4[%c7, %c0_54] : memref<9x16xf32, #tpu.memory_space<vmem>>, vector<1x16xf32>
    %73 = vector.broadcast %72 : vector<1x16xf32> to vector<32x16xf32>
    %74 = arith.mulf %71, %73 : vector<32x16xf32>
    %c7_55 = arith.constant 7 : index
    %c0_56 = arith.constant 0 : index
    %c0_57 = arith.constant 0 : index
    %75 = vector.load %arg5[%c7_55, %c0_56, %c0_57] : memref<9x32x32xbf16, #tpu.memory_space<vmem>>, vector<1x32x32xbf16>
    %76 = vector.shape_cast %75 : vector<1x32x32xbf16> to vector<32x32xbf16>
    %77 = arith.truncf %74 : vector<32x16xf32> to vector<32x16xbf16>
    %cst_58 = arith.constant dense<0.000000e+00> : vector<32x16xf32>
    %78 = tpu.matmul %76, %77, %cst_58 {dimension_numbers = #tpu.dot_dimension_numbers<[1], [0], [0], [1], [0, 0, 1, 1], [], []>} : vector<32x32xbf16>, vector<32x16xbf16>, vector<32x16xf32> -> vector<32x16xf32>
    %79 = arith.addf %70, %78 : vector<32x16xf32>
    %c0_59 = arith.constant 0 : index
    %c133 = arith.constant 133 : index
    %80 = vector.load %arg11[%c0_59, %c133] : memref<32x272xf32, #tpu.memory_space<vmem>>, vector<32x16xf32>
    %c8 = arith.constant 8 : index
    %c0_60 = arith.constant 0 : index
    %81 = vector.load %arg4[%c8, %c0_60] : memref<9x16xf32, #tpu.memory_space<vmem>>, vector<1x16xf32>
    %82 = vector.broadcast %81 : vector<1x16xf32> to vector<32x16xf32>
    %83 = arith.mulf %80, %82 : vector<32x16xf32>
    %c8_61 = arith.constant 8 : index
    %c0_62 = arith.constant 0 : index
    %c0_63 = arith.constant 0 : index
    %84 = vector.load %arg5[%c8_61, %c0_62, %c0_63] : memref<9x32x32xbf16, #tpu.memory_space<vmem>>, vector<1x32x32xbf16>
    %85 = vector.shape_cast %84 : vector<1x32x32xbf16> to vector<32x32xbf16>
    %86 = arith.truncf %83 : vector<32x16xf32> to vector<32x16xbf16>
    %cst_64 = arith.constant dense<0.000000e+00> : vector<32x16xf32>
    %87 = tpu.matmul %85, %86, %cst_64 {dimension_numbers = #tpu.dot_dimension_numbers<[1], [0], [0], [1], [0, 0, 1, 1], [], []>} : vector<32x32xbf16>, vector<32x16xbf16>, vector<32x16xf32> -> vector<32x16xf32>
    %88 = arith.addf %79, %87 : vector<32x16xf32>
    %c0_65 = arith.constant 0 : index
    %c0_66 = arith.constant 0 : index
    %89 = vector.load %arg6[%c0_65, %c0_66] : memref<32x1xf32, #tpu.memory_space<vmem>>, vector<32x1xf32>
    %90 = vector.broadcast %89 : vector<32x1xf32> to vector<32x16xf32>
    %91 = arith.addf %88, %90 : vector<32x16xf32>
    %cst_67 = arith.constant 0.000000e+00 : f32
    %92 = vector.broadcast %cst_67 : f32 to vector<32x16xf32>
    %93 = arith.maximumf %91, %92 : vector<32x16xf32>
    %cst_68 = arith.constant 0.000000e+00 : f32
    %94 = vector.broadcast %cst_68 : f32 to vector<32x272xf32>
    %c0_69 = arith.constant 0 : index
    %c0_70 = arith.constant 0 : index
    %95 = vector.load %arg12[%c0_69, %c0_70] : memref<32x272xf32, #tpu.memory_space<vmem>>, vector<32x272xf32>
    tpu.vector_store %arg12[%c0_69, %c0_70], %94 {strides = array<i32>} : memref<32x272xf32, #tpu.memory_space<vmem>>, vector<32x272xf32>,
    %c0_71 = arith.constant 0 : index
    %c128_72 = arith.constant 128 : index
    %96 = vector.load %arg12[%c0_71, %c128_72] : memref<32x272xf32, #tpu.memory_space<vmem>>, vector<32x16xf32>
    tpu.vector_store %arg12[%c0_71, %c128_72], %93 {strides = array<i32>} : memref<32x272xf32, #tpu.memory_space<vmem>>, vector<32x16xf32>,
    %cst_73 = arith.constant 0.000000e+00 : f32
    %97 = vector.broadcast %cst_73 : f32 to vector<16x272xf32>
    %c0_74 = arith.constant 0 : index
    %c0_75 = arith.constant 0 : index
    %98 = vector.load %arg13[%c0_74, %c0_75] : memref<16x272xf32, #tpu.memory_space<vmem>>, vector<16x272xf32>
    tpu.vector_store %arg13[%c0_74, %c0_75], %97 {strides = array<i32>} : memref<16x272xf32, #tpu.memory_space<vmem>>, vector<16x272xf32>,
    %c0_76 = arith.constant 0 : index
    %c0_77 = arith.constant 0 : index
    %c0_78 = arith.constant 0 : index
    %99 = vector.load %arg2[%c0_76, %c0_77, %c0_78] : memref<1x16x16xf32, #tpu.memory_space<vmem>>, vector<1x16x16xf32>
    %100 = vector.shape_cast %99 : vector<1x16x16xf32> to vector<16x16xf32>
    %c0_79 = arith.constant 0 : index
    %c128_80 = arith.constant 128 : index
    %101 = vector.load %arg13[%c0_79, %c128_80] : memref<16x272xf32, #tpu.memory_space<vmem>>, vector<16x16xf32>
    tpu.vector_store %arg13[%c0_79, %c128_80], %100 {strides = array<i32>} : memref<16x272xf32, #tpu.memory_space<vmem>>, vector<16x16xf32>,
    %cst_81 = arith.constant 0.000000e+00 : f32
    %102 = vector.broadcast %cst_81 : f32 to vector<16x16xf32>
    %c0_82 = arith.constant 0 : index
    %c123_83 = arith.constant 123 : index
    %103 = vector.load %arg12[%c0_82, %c123_83] : memref<32x272xf32, #tpu.memory_space<vmem>>, vector<32x16xf32>
    %c0_84 = arith.constant 0 : index
    %c0_85 = arith.constant 0 : index
    %104 = vector.load %arg4[%c0_84, %c0_85] : memref<9x16xf32, #tpu.memory_space<vmem>>, vector<1x16xf32>
    %105 = vector.broadcast %104 : vector<1x16xf32> to vector<32x16xf32>
    %106 = arith.mulf %103, %105 : vector<32x16xf32>
    %c0_86 = arith.constant 0 : index
    %c0_87 = arith.constant 0 : index
    %c0_88 = arith.constant 0 : index
    %107 = vector.load %arg7[%c0_86, %c0_87, %c0_88] : memref<9x16x32xbf16, #tpu.memory_space<vmem>>, vector<1x16x32xbf16>
    %108 = vector.shape_cast %107 : vector<1x16x32xbf16> to vector<16x32xbf16>
    %109 = arith.truncf %106 : vector<32x16xf32> to vector<32x16xbf16>
    %cst_89 = arith.constant dense<0.000000e+00> : vector<16x16xf32>
    %110 = tpu.matmul %108, %109, %cst_89 {dimension_numbers = #tpu.dot_dimension_numbers<[1], [0], [0], [1], [0, 0, 1, 1], [], []>} : vector<16x32xbf16>, vector<32x16xbf16>, vector<16x16xf32> -> vector<16x16xf32>
    %111 = arith.addf %102, %110 : vector<16x16xf32>
    %c0_90 = arith.constant 0 : index
    %c124_91 = arith.constant 124 : index
    %112 = vector.load %arg12[%c0_90, %c124_91] : memref<32x272xf32, #tpu.memory_space<vmem>>, vector<32x16xf32>
    %c1_92 = arith.constant 1 : index
    %c0_93 = arith.constant 0 : index
    %113 = vector.load %arg4[%c1_92, %c0_93] : memref<9x16xf32, #tpu.memory_space<vmem>>, vector<1x16xf32>
    %114 = vector.broadcast %113 : vector<1x16xf32> to vector<32x16xf32>
    %115 = arith.mulf %112, %114 : vector<32x16xf32>
    %c1_94 = arith.constant 1 : index
    %c0_95 = arith.constant 0 : index
    %c0_96 = arith.constant 0 : index
    %116 = vector.load %arg7[%c1_94, %c0_95, %c0_96] : memref<9x16x32xbf16, #tpu.memory_space<vmem>>, vector<1x16x32xbf16>
    %117 = vector.shape_cast %116 : vector<1x16x32xbf16> to vector<16x32xbf16>
    %118 = arith.truncf %115 : vector<32x16xf32> to vector<32x16xbf16>
    %cst_97 = arith.constant dense<0.000000e+00> : vector<16x16xf32>
    %119 = tpu.matmul %117, %118, %cst_97 {dimension_numbers = #tpu.dot_dimension_numbers<[1], [0], [0], [1], [0, 0, 1, 1], [], []>} : vector<16x32xbf16>, vector<32x16xbf16>, vector<16x16xf32> -> vector<16x16xf32>
    %120 = arith.addf %111, %119 : vector<16x16xf32>
    %c0_98 = arith.constant 0 : index
    %c125_99 = arith.constant 125 : index
    %121 = vector.load %arg12[%c0_98, %c125_99] : memref<32x272xf32, #tpu.memory_space<vmem>>, vector<32x16xf32>
    %c2_100 = arith.constant 2 : index
    %c0_101 = arith.constant 0 : index
    %122 = vector.load %arg4[%c2_100, %c0_101] : memref<9x16xf32, #tpu.memory_space<vmem>>, vector<1x16xf32>
    %123 = vector.broadcast %122 : vector<1x16xf32> to vector<32x16xf32>
    %124 = arith.mulf %121, %123 : vector<32x16xf32>
    %c2_102 = arith.constant 2 : index
    %c0_103 = arith.constant 0 : index
    %c0_104 = arith.constant 0 : index
    %125 = vector.load %arg7[%c2_102, %c0_103, %c0_104] : memref<9x16x32xbf16, #tpu.memory_space<vmem>>, vector<1x16x32xbf16>
    %126 = vector.shape_cast %125 : vector<1x16x32xbf16> to vector<16x32xbf16>
    %127 = arith.truncf %124 : vector<32x16xf32> to vector<32x16xbf16>
    %cst_105 = arith.constant dense<0.000000e+00> : vector<16x16xf32>
    %128 = tpu.matmul %126, %127, %cst_105 {dimension_numbers = #tpu.dot_dimension_numbers<[1], [0], [0], [1], [0, 0, 1, 1], [], []>} : vector<16x32xbf16>, vector<32x16xbf16>, vector<16x16xf32> -> vector<16x16xf32>
    %129 = arith.addf %120, %128 : vector<16x16xf32>
    %c0_106 = arith.constant 0 : index
    %c127_107 = arith.constant 127 : index
    %130 = vector.load %arg12[%c0_106, %c127_107] : memref<32x272xf32, #tpu.memory_space<vmem>>, vector<32x16xf32>
    %c3_108 = arith.constant 3 : index
    %c0_109 = arith.constant 0 : index
    %131 = vector.load %arg4[%c3_108, %c0_109] : memref<9x16xf32, #tpu.memory_space<vmem>>, vector<1x16xf32>
    %132 = vector.broadcast %131 : vector<1x16xf32> to vector<32x16xf32>
    %133 = arith.mulf %130, %132 : vector<32x16xf32>
    %c3_110 = arith.constant 3 : index
    %c0_111 = arith.constant 0 : index
    %c0_112 = arith.constant 0 : index
    %134 = vector.load %arg7[%c3_110, %c0_111, %c0_112] : memref<9x16x32xbf16, #tpu.memory_space<vmem>>, vector<1x16x32xbf16>
    %135 = vector.shape_cast %134 : vector<1x16x32xbf16> to vector<16x32xbf16>
    %136 = arith.truncf %133 : vector<32x16xf32> to vector<32x16xbf16>
    %cst_113 = arith.constant dense<0.000000e+00> : vector<16x16xf32>
    %137 = tpu.matmul %135, %136, %cst_113 {dimension_numbers = #tpu.dot_dimension_numbers<[1], [0], [0], [1], [0, 0, 1, 1], [], []>} : vector<16x32xbf16>, vector<32x16xbf16>, vector<16x16xf32> -> vector<16x16xf32>
    %138 = arith.addf %129, %137 : vector<16x16xf32>
    %c0_114 = arith.constant 0 : index
    %c128_115 = arith.constant 128 : index
    %139 = vector.load %arg12[%c0_114, %c128_115] : memref<32x272xf32, #tpu.memory_space<vmem>>, vector<32x16xf32>
    %c4_116 = arith.constant 4 : index
    %c0_117 = arith.constant 0 : index
    %140 = vector.load %arg4[%c4_116, %c0_117] : memref<9x16xf32, #tpu.memory_space<vmem>>, vector<1x16xf32>
    %141 = vector.broadcast %140 : vector<1x16xf32> to vector<32x16xf32>
    %142 = arith.mulf %139, %141 : vector<32x16xf32>
    %c4_118 = arith.constant 4 : index
    %c0_119 = arith.constant 0 : index
    %c0_120 = arith.constant 0 : index
    %143 = vector.load %arg7[%c4_118, %c0_119, %c0_120] : memref<9x16x32xbf16, #tpu.memory_space<vmem>>, vector<1x16x32xbf16>
    %144 = vector.shape_cast %143 : vector<1x16x32xbf16> to vector<16x32xbf16>
    %145 = arith.truncf %142 : vector<32x16xf32> to vector<32x16xbf16>
    %cst_121 = arith.constant dense<0.000000e+00> : vector<16x16xf32>
    %146 = tpu.matmul %144, %145, %cst_121 {dimension_numbers = #tpu.dot_dimension_numbers<[1], [0], [0], [1], [0, 0, 1, 1], [], []>} : vector<16x32xbf16>, vector<32x16xbf16>, vector<16x16xf32> -> vector<16x16xf32>
    %147 = arith.addf %138, %146 : vector<16x16xf32>
    %c0_122 = arith.constant 0 : index
    %c129_123 = arith.constant 129 : index
    %148 = vector.load %arg12[%c0_122, %c129_123] : memref<32x272xf32, #tpu.memory_space<vmem>>, vector<32x16xf32>
    %c5_124 = arith.constant 5 : index
    %c0_125 = arith.constant 0 : index
    %149 = vector.load %arg4[%c5_124, %c0_125] : memref<9x16xf32, #tpu.memory_space<vmem>>, vector<1x16xf32>
    %150 = vector.broadcast %149 : vector<1x16xf32> to vector<32x16xf32>
    %151 = arith.mulf %148, %150 : vector<32x16xf32>
    %c5_126 = arith.constant 5 : index
    %c0_127 = arith.constant 0 : index
    %c0_128 = arith.constant 0 : index
    %152 = vector.load %arg7[%c5_126, %c0_127, %c0_128] : memref<9x16x32xbf16, #tpu.memory_space<vmem>>, vector<1x16x32xbf16>
    %153 = vector.shape_cast %152 : vector<1x16x32xbf16> to vector<16x32xbf16>
    %154 = arith.truncf %151 : vector<32x16xf32> to vector<32x16xbf16>
    %cst_129 = arith.constant dense<0.000000e+00> : vector<16x16xf32>
    %155 = tpu.matmul %153, %154, %cst_129 {dimension_numbers = #tpu.dot_dimension_numbers<[1], [0], [0], [1], [0, 0, 1, 1], [], []>} : vector<16x32xbf16>, vector<32x16xbf16>, vector<16x16xf32> -> vector<16x16xf32>
    %156 = arith.addf %147, %155 : vector<16x16xf32>
    %c0_130 = arith.constant 0 : index
    %c131_131 = arith.constant 131 : index
    %157 = vector.load %arg12[%c0_130, %c131_131] : memref<32x272xf32, #tpu.memory_space<vmem>>, vector<32x16xf32>
    %c6_132 = arith.constant 6 : index
    %c0_133 = arith.constant 0 : index
    %158 = vector.load %arg4[%c6_132, %c0_133] : memref<9x16xf32, #tpu.memory_space<vmem>>, vector<1x16xf32>
    %159 = vector.broadcast %158 : vector<1x16xf32> to vector<32x16xf32>
    %160 = arith.mulf %157, %159 : vector<32x16xf32>
    %c6_134 = arith.constant 6 : index
    %c0_135 = arith.constant 0 : index
    %c0_136 = arith.constant 0 : index
    %161 = vector.load %arg7[%c6_134, %c0_135, %c0_136] : memref<9x16x32xbf16, #tpu.memory_space<vmem>>, vector<1x16x32xbf16>
    %162 = vector.shape_cast %161 : vector<1x16x32xbf16> to vector<16x32xbf16>
    %163 = arith.truncf %160 : vector<32x16xf32> to vector<32x16xbf16>
    %cst_137 = arith.constant dense<0.000000e+00> : vector<16x16xf32>
    %164 = tpu.matmul %162, %163, %cst_137 {dimension_numbers = #tpu.dot_dimension_numbers<[1], [0], [0], [1], [0, 0, 1, 1], [], []>} : vector<16x32xbf16>, vector<32x16xbf16>, vector<16x16xf32> -> vector<16x16xf32>
    %165 = arith.addf %156, %164 : vector<16x16xf32>
    %c0_138 = arith.constant 0 : index
    %c132_139 = arith.constant 132 : index
    %166 = vector.load %arg12[%c0_138, %c132_139] : memref<32x272xf32, #tpu.memory_space<vmem>>, vector<32x16xf32>
    %c7_140 = arith.constant 7 : index
    %c0_141 = arith.constant 0 : index
    %167 = vector.load %arg4[%c7_140, %c0_141] : memref<9x16xf32, #tpu.memory_space<vmem>>, vector<1x16xf32>
    %168 = vector.broadcast %167 : vector<1x16xf32> to vector<32x16xf32>
    %169 = arith.mulf %166, %168 : vector<32x16xf32>
    %c7_142 = arith.constant 7 : index
    %c0_143 = arith.constant 0 : index
    %c0_144 = arith.constant 0 : index
    %170 = vector.load %arg7[%c7_142, %c0_143, %c0_144] : memref<9x16x32xbf16, #tpu.memory_space<vmem>>, vector<1x16x32xbf16>
    %171 = vector.shape_cast %170 : vector<1x16x32xbf16> to vector<16x32xbf16>
    %172 = arith.truncf %169 : vector<32x16xf32> to vector<32x16xbf16>
    %cst_145 = arith.constant dense<0.000000e+00> : vector<16x16xf32>
    %173 = tpu.matmul %171, %172, %cst_145 {dimension_numbers = #tpu.dot_dimension_numbers<[1], [0], [0], [1], [0, 0, 1, 1], [], []>} : vector<16x32xbf16>, vector<32x16xbf16>, vector<16x16xf32> -> vector<16x16xf32>
    %174 = arith.addf %165, %173 : vector<16x16xf32>
    %c0_146 = arith.constant 0 : index
    %c133_147 = arith.constant 133 : index
    %175 = vector.load %arg12[%c0_146, %c133_147] : memref<32x272xf32, #tpu.memory_space<vmem>>, vector<32x16xf32>
    %c8_148 = arith.constant 8 : index
    %c0_149 = arith.constant 0 : index
    %176 = vector.load %arg4[%c8_148, %c0_149] : memref<9x16xf32, #tpu.memory_space<vmem>>, vector<1x16xf32>
    %177 = vector.broadcast %176 : vector<1x16xf32> to vector<32x16xf32>
    %178 = arith.mulf %175, %177 : vector<32x16xf32>
    %c8_150 = arith.constant 8 : index
    %c0_151 = arith.constant 0 : index
    %c0_152 = arith.constant 0 : index
    %179 = vector.load %arg7[%c8_150, %c0_151, %c0_152] : memref<9x16x32xbf16, #tpu.memory_space<vmem>>, vector<1x16x32xbf16>
    %180 = vector.shape_cast %179 : vector<1x16x32xbf16> to vector<16x32xbf16>
    %181 = arith.truncf %178 : vector<32x16xf32> to vector<32x16xbf16>
    %cst_153 = arith.constant dense<0.000000e+00> : vector<16x16xf32>
    %182 = tpu.matmul %180, %181, %cst_153 {dimension_numbers = #tpu.dot_dimension_numbers<[1], [0], [0], [1], [0, 0, 1, 1], [], []>} : vector<16x32xbf16>, vector<32x16xbf16>, vector<16x16xf32> -> vector<16x16xf32>
    %183 = arith.addf %174, %182 : vector<16x16xf32>
    %cst_154 = arith.constant 0.000000e+00 : f32
    %184 = vector.broadcast %cst_154 : f32 to vector<16x16xf32>
    %c0_155 = arith.constant 0 : index
    %c123_156 = arith.constant 123 : index
    %185 = vector.load %arg13[%c0_155, %c123_156] : memref<16x272xf32, #tpu.memory_space<vmem>>, vector<16x16xf32>
    %c0_157 = arith.constant 0 : index
    %c0_158 = arith.constant 0 : index
    %186 = vector.load %arg4[%c0_157, %c0_158] : memref<9x16xf32, #tpu.memory_space<vmem>>, vector<1x16xf32>
    %187 = vector.broadcast %186 : vector<1x16xf32> to vector<16x16xf32>
    %188 = arith.mulf %185, %187 : vector<16x16xf32>
    %c0_159 = arith.constant 0 : index
    %c0_160 = arith.constant 0 : index
    %c0_161 = arith.constant 0 : index
    %189 = vector.load %arg8[%c0_159, %c0_160, %c0_161] : memref<9x16x16xbf16, #tpu.memory_space<vmem>>, vector<1x16x16xbf16>
    %190 = vector.shape_cast %189 : vector<1x16x16xbf16> to vector<16x16xbf16>
    %191 = arith.truncf %188 : vector<16x16xf32> to vector<16x16xbf16>
    %cst_162 = arith.constant dense<0.000000e+00> : vector<16x16xf32>
    %192 = tpu.matmul %190, %191, %cst_162 {dimension_numbers = #tpu.dot_dimension_numbers<[1], [0], [0], [1], [0, 0, 1, 1], [], []>} : vector<16x16xbf16>, vector<16x16xbf16>, vector<16x16xf32> -> vector<16x16xf32>
    %193 = arith.addf %184, %192 : vector<16x16xf32>
    %c0_163 = arith.constant 0 : index
    %c124_164 = arith.constant 124 : index
    %194 = vector.load %arg13[%c0_163, %c124_164] : memref<16x272xf32, #tpu.memory_space<vmem>>, vector<16x16xf32>
    %c1_165 = arith.constant 1 : index
    %c0_166 = arith.constant 0 : index
    %195 = vector.load %arg4[%c1_165, %c0_166] : memref<9x16xf32, #tpu.memory_space<vmem>>, vector<1x16xf32>
    %196 = vector.broadcast %195 : vector<1x16xf32> to vector<16x16xf32>
    %197 = arith.mulf %194, %196 : vector<16x16xf32>
    %c1_167 = arith.constant 1 : index
    %c0_168 = arith.constant 0 : index
    %c0_169 = arith.constant 0 : index
    %198 = vector.load %arg8[%c1_167, %c0_168, %c0_169] : memref<9x16x16xbf16, #tpu.memory_space<vmem>>, vector<1x16x16xbf16>
    %199 = vector.shape_cast %198 : vector<1x16x16xbf16> to vector<16x16xbf16>
    %200 = arith.truncf %197 : vector<16x16xf32> to vector<16x16xbf16>
    %cst_170 = arith.constant dense<0.000000e+00> : vector<16x16xf32>
    %201 = tpu.matmul %199, %200, %cst_170 {dimension_numbers = #tpu.dot_dimension_numbers<[1], [0], [0], [1], [0, 0, 1, 1], [], []>} : vector<16x16xbf16>, vector<16x16xbf16>, vector<16x16xf32> -> vector<16x16xf32>
    %202 = arith.addf %193, %201 : vector<16x16xf32>
    %c0_171 = arith.constant 0 : index
    %c125_172 = arith.constant 125 : index
    %203 = vector.load %arg13[%c0_171, %c125_172] : memref<16x272xf32, #tpu.memory_space<vmem>>, vector<16x16xf32>
    %c2_173 = arith.constant 2 : index
    %c0_174 = arith.constant 0 : index
    %204 = vector.load %arg4[%c2_173, %c0_174] : memref<9x16xf32, #tpu.memory_space<vmem>>, vector<1x16xf32>
    %205 = vector.broadcast %204 : vector<1x16xf32> to vector<16x16xf32>
    %206 = arith.mulf %203, %205 : vector<16x16xf32>
    %c2_175 = arith.constant 2 : index
    %c0_176 = arith.constant 0 : index
    %c0_177 = arith.constant 0 : index
    %207 = vector.load %arg8[%c2_175, %c0_176, %c0_177] : memref<9x16x16xbf16, #tpu.memory_space<vmem>>, vector<1x16x16xbf16>
    %208 = vector.shape_cast %207 : vector<1x16x16xbf16> to vector<16x16xbf16>
    %209 = arith.truncf %206 : vector<16x16xf32> to vector<16x16xbf16>
    %cst_178 = arith.constant dense<0.000000e+00> : vector<16x16xf32>
    %210 = tpu.matmul %208, %209, %cst_178 {dimension_numbers = #tpu.dot_dimension_numbers<[1], [0], [0], [1], [0, 0, 1, 1], [], []>} : vector<16x16xbf16>, vector<16x16xbf16>, vector<16x16xf32> -> vector<16x16xf32>
    %211 = arith.addf %202, %210 : vector<16x16xf32>
    %c0_179 = arith.constant 0 : index
    %c127_180 = arith.constant 127 : index
    %212 = vector.load %arg13[%c0_179, %c127_180] : memref<16x272xf32, #tpu.memory_space<vmem>>, vector<16x16xf32>
    %c3_181 = arith.constant 3 : index
    %c0_182 = arith.constant 0 : index
    %213 = vector.load %arg4[%c3_181, %c0_182] : memref<9x16xf32, #tpu.memory_space<vmem>>, vector<1x16xf32>
    %214 = vector.broadcast %213 : vector<1x16xf32> to vector<16x16xf32>
    %215 = arith.mulf %212, %214 : vector<16x16xf32>
    %c3_183 = arith.constant 3 : index
    %c0_184 = arith.constant 0 : index
    %c0_185 = arith.constant 0 : index
    %216 = vector.load %arg8[%c3_183, %c0_184, %c0_185] : memref<9x16x16xbf16, #tpu.memory_space<vmem>>, vector<1x16x16xbf16>
    %217 = vector.shape_cast %216 : vector<1x16x16xbf16> to vector<16x16xbf16>
    %218 = arith.truncf %215 : vector<16x16xf32> to vector<16x16xbf16>
    %cst_186 = arith.constant dense<0.000000e+00> : vector<16x16xf32>
    %219 = tpu.matmul %217, %218, %cst_186 {dimension_numbers = #tpu.dot_dimension_numbers<[1], [0], [0], [1], [0, 0, 1, 1], [], []>} : vector<16x16xbf16>, vector<16x16xbf16>, vector<16x16xf32> -> vector<16x16xf32>
    %220 = arith.addf %211, %219 : vector<16x16xf32>
    %c0_187 = arith.constant 0 : index
    %c128_188 = arith.constant 128 : index
    %221 = vector.load %arg13[%c0_187, %c128_188] : memref<16x272xf32, #tpu.memory_space<vmem>>, vector<16x16xf32>
    %c4_189 = arith.constant 4 : index
    %c0_190 = arith.constant 0 : index
    %222 = vector.load %arg4[%c4_189, %c0_190] : memref<9x16xf32, #tpu.memory_space<vmem>>, vector<1x16xf32>
    %223 = vector.broadcast %222 : vector<1x16xf32> to vector<16x16xf32>
    %224 = arith.mulf %221, %223 : vector<16x16xf32>
    %c4_191 = arith.constant 4 : index
    %c0_192 = arith.constant 0 : index
    %c0_193 = arith.constant 0 : index
    %225 = vector.load %arg8[%c4_191, %c0_192, %c0_193] : memref<9x16x16xbf16, #tpu.memory_space<vmem>>, vector<1x16x16xbf16>
    %226 = vector.shape_cast %225 : vector<1x16x16xbf16> to vector<16x16xbf16>
    %227 = arith.truncf %224 : vector<16x16xf32> to vector<16x16xbf16>
    %cst_194 = arith.constant dense<0.000000e+00> : vector<16x16xf32>
    %228 = tpu.matmul %226, %227, %cst_194 {dimension_numbers = #tpu.dot_dimension_numbers<[1], [0], [0], [1], [0, 0, 1, 1], [], []>} : vector<16x16xbf16>, vector<16x16xbf16>, vector<16x16xf32> -> vector<16x16xf32>
    %229 = arith.addf %220, %228 : vector<16x16xf32>
    %c0_195 = arith.constant 0 : index
    %c129_196 = arith.constant 129 : index
    %230 = vector.load %arg13[%c0_195, %c129_196] : memref<16x272xf32, #tpu.memory_space<vmem>>, vector<16x16xf32>
    %c5_197 = arith.constant 5 : index
    %c0_198 = arith.constant 0 : index
    %231 = vector.load %arg4[%c5_197, %c0_198] : memref<9x16xf32, #tpu.memory_space<vmem>>, vector<1x16xf32>
    %232 = vector.broadcast %231 : vector<1x16xf32> to vector<16x16xf32>
    %233 = arith.mulf %230, %232 : vector<16x16xf32>
    %c5_199 = arith.constant 5 : index
    %c0_200 = arith.constant 0 : index
    %c0_201 = arith.constant 0 : index
    %234 = vector.load %arg8[%c5_199, %c0_200, %c0_201] : memref<9x16x16xbf16, #tpu.memory_space<vmem>>, vector<1x16x16xbf16>
    %235 = vector.shape_cast %234 : vector<1x16x16xbf16> to vector<16x16xbf16>
    %236 = arith.truncf %233 : vector<16x16xf32> to vector<16x16xbf16>
    %cst_202 = arith.constant dense<0.000000e+00> : vector<16x16xf32>
    %237 = tpu.matmul %235, %236, %cst_202 {dimension_numbers = #tpu.dot_dimension_numbers<[1], [0], [0], [1], [0, 0, 1, 1], [], []>} : vector<16x16xbf16>, vector<16x16xbf16>, vector<16x16xf32> -> vector<16x16xf32>
    %238 = arith.addf %229, %237 : vector<16x16xf32>
    %c0_203 = arith.constant 0 : index
    %c131_204 = arith.constant 131 : index
    %239 = vector.load %arg13[%c0_203, %c131_204] : memref<16x272xf32, #tpu.memory_space<vmem>>, vector<16x16xf32>
    %c6_205 = arith.constant 6 : index
    %c0_206 = arith.constant 0 : index
    %240 = vector.load %arg4[%c6_205, %c0_206] : memref<9x16xf32, #tpu.memory_space<vmem>>, vector<1x16xf32>
    %241 = vector.broadcast %240 : vector<1x16xf32> to vector<16x16xf32>
    %242 = arith.mulf %239, %241 : vector<16x16xf32>
    %c6_207 = arith.constant 6 : index
    %c0_208 = arith.constant 0 : index
    %c0_209 = arith.constant 0 : index
    %243 = vector.load %arg8[%c6_207, %c0_208, %c0_209] : memref<9x16x16xbf16, #tpu.memory_space<vmem>>, vector<1x16x16xbf16>
    %244 = vector.shape_cast %243 : vector<1x16x16xbf16> to vector<16x16xbf16>
    %245 = arith.truncf %242 : vector<16x16xf32> to vector<16x16xbf16>
    %cst_210 = arith.constant dense<0.000000e+00> : vector<16x16xf32>
    %246 = tpu.matmul %244, %245, %cst_210 {dimension_numbers = #tpu.dot_dimension_numbers<[1], [0], [0], [1], [0, 0, 1, 1], [], []>} : vector<16x16xbf16>, vector<16x16xbf16>, vector<16x16xf32> -> vector<16x16xf32>
    %247 = arith.addf %238, %246 : vector<16x16xf32>
    %c0_211 = arith.constant 0 : index
    %c132_212 = arith.constant 132 : index
    %248 = vector.load %arg13[%c0_211, %c132_212] : memref<16x272xf32, #tpu.memory_space<vmem>>, vector<16x16xf32>
    %c7_213 = arith.constant 7 : index
    %c0_214 = arith.constant 0 : index
    %249 = vector.load %arg4[%c7_213, %c0_214] : memref<9x16xf32, #tpu.memory_space<vmem>>, vector<1x16xf32>
    %250 = vector.broadcast %249 : vector<1x16xf32> to vector<16x16xf32>
    %251 = arith.mulf %248, %250 : vector<16x16xf32>
    %c7_215 = arith.constant 7 : index
    %c0_216 = arith.constant 0 : index
    %c0_217 = arith.constant 0 : index
    %252 = vector.load %arg8[%c7_215, %c0_216, %c0_217] : memref<9x16x16xbf16, #tpu.memory_space<vmem>>, vector<1x16x16xbf16>
    %253 = vector.shape_cast %252 : vector<1x16x16xbf16> to vector<16x16xbf16>
    %254 = arith.truncf %251 : vector<16x16xf32> to vector<16x16xbf16>
    %cst_218 = arith.constant dense<0.000000e+00> : vector<16x16xf32>
    %255 = tpu.matmul %253, %254, %cst_218 {dimension_numbers = #tpu.dot_dimension_numbers<[1], [0], [0], [1], [0, 0, 1, 1], [], []>} : vector<16x16xbf16>, vector<16x16xbf16>, vector<16x16xf32> -> vector<16x16xf32>
    %256 = arith.addf %247, %255 : vector<16x16xf32>
    %c0_219 = arith.constant 0 : index
    %c133_220 = arith.constant 133 : index
    %257 = vector.load %arg13[%c0_219, %c133_220] : memref<16x272xf32, #tpu.memory_space<vmem>>, vector<16x16xf32>
    %c8_221 = arith.constant 8 : index
    %c0_222 = arith.constant 0 : index
    %258 = vector.load %arg4[%c8_221, %c0_222] : memref<9x16xf32, #tpu.memory_space<vmem>>, vector<1x16xf32>
    %259 = vector.broadcast %258 : vector<1x16xf32> to vector<16x16xf32>
    %260 = arith.mulf %257, %259 : vector<16x16xf32>
    %c8_223 = arith.constant 8 : index
    %c0_224 = arith.constant 0 : index
    %c0_225 = arith.constant 0 : index
    %261 = vector.load %arg8[%c8_223, %c0_224, %c0_225] : memref<9x16x16xbf16, #tpu.memory_space<vmem>>, vector<1x16x16xbf16>
    %262 = vector.shape_cast %261 : vector<1x16x16xbf16> to vector<16x16xbf16>
    %263 = arith.truncf %260 : vector<16x16xf32> to vector<16x16xbf16>
    %cst_226 = arith.constant dense<0.000000e+00> : vector<16x16xf32>
    %264 = tpu.matmul %262, %263, %cst_226 {dimension_numbers = #tpu.dot_dimension_numbers<[1], [0], [0], [1], [0, 0, 1, 1], [], []>} : vector<16x16xbf16>, vector<16x16xbf16>, vector<16x16xf32> -> vector<16x16xf32>
    %265 = arith.addf %256, %264 : vector<16x16xf32>
    %266 = arith.addf %183, %265 : vector<16x16xf32>
    %c0_227 = arith.constant 0 : index
    %c0_228 = arith.constant 0 : index
    %267 = vector.load %arg9[%c0_227, %c0_228] : memref<16x1xf32, #tpu.memory_space<vmem>>, vector<16x1xf32>
    %268 = vector.broadcast %267 : vector<16x1xf32> to vector<16x16xf32>
    %269 = arith.addf %266, %268 : vector<16x16xf32>
    %c0_229 = arith.constant 0 : index
    %c0_230 = arith.constant 0 : index
    %c0_231 = arith.constant 0 : index
    %270 = vector.load %arg10[%c0_229, %c0_230, %c0_231] : memref<1x16x16xf32, #tpu.memory_space<vmem>>, vector<1x16x16xf32>
    %271 = vector.shape_cast %270 : vector<1x16x16xf32> to vector<16x16xf32>
    %272 = vector.shape_cast %269 : vector<16x16xf32> to vector<1x16x16xf32>
    tpu.vector_store %arg10[%c0_229, %c0_230, %c0_231], %272 {strides = array<i32>} : memref<1x16x16xf32, #tpu.memory_space<vmem>>, vector<1x16x16xf32>,
    return
  }
  func.func @transform_0(%arg0: i32) -> (i32, i32, i32) {
    %c0_i32 = arith.constant 0 : i32
    %c0_i32_0 = arith.constant 0 : i32
    %c0_i32_1 = arith.constant 0 : i32
    return %arg0, %c0_i32, %c0_i32_0 : i32, i32, i32
  }
  func.func @transform_1(%arg0: i32) -> (i32, i32, i32) {
    %c0_i32 = arith.constant 0 : i32
    %c0_i32_0 = arith.constant 0 : i32
    %c0_i32_1 = arith.constant 0 : i32
    return %arg0, %c0_i32, %c0_i32_0 : i32, i32, i32
  }
  func.func @transform_2(%arg0: i32) -> (i32, i32) {
    %c0_i32 = arith.constant 0 : i32
    %c0_i32_0 = arith.constant 0 : i32
    %c0_i32_1 = arith.constant 0 : i32
    return %c0_i32, %c0_i32_0 : i32, i32
  }
  func.func @transform_3(%arg0: i32) -> (i32, i32) {
    %c0_i32 = arith.constant 0 : i32
    %c0_i32_0 = arith.constant 0 : i32
    %c0_i32_1 = arith.constant 0 : i32
    return %c0_i32, %c0_i32_0 : i32, i32
  }
  func.func @transform_4(%arg0: i32) -> (i32, i32, i32) {
    %c0_i32 = arith.constant 0 : i32
    %c0_i32_0 = arith.constant 0 : i32
    %c0_i32_1 = arith.constant 0 : i32
    %c0_i32_2 = arith.constant 0 : i32
    return %c0_i32, %c0_i32_0, %c0_i32_1 : i32, i32, i32
  }
  func.func @transform_5(%arg0: i32) -> (i32, i32) {
    %c0_i32 = arith.constant 0 : i32
    %c0_i32_0 = arith.constant 0 : i32
    %c0_i32_1 = arith.constant 0 : i32
    return %c0_i32, %c0_i32_0 : i32, i32
  }
  func.func @transform_6(%arg0: i32) -> (i32, i32, i32) {
    %c0_i32 = arith.constant 0 : i32
    %c0_i32_0 = arith.constant 0 : i32
    %c0_i32_1 = arith.constant 0 : i32
    %c0_i32_2 = arith.constant 0 : i32
    return %c0_i32, %c0_i32_0, %c0_i32_1 : i32, i32, i32
  }
  func.func @transform_7(%arg0: i32) -> (i32, i32, i32) {
    %c0_i32 = arith.constant 0 : i32
    %c0_i32_0 = arith.constant 0 : i32
    %c0_i32_1 = arith.constant 0 : i32
    %c0_i32_2 = arith.constant 0 : i32
    return %c0_i32, %c0_i32_0, %c0_i32_1 : i32, i32, i32
  }
  func.func @transform_8(%arg0: i32) -> (i32, i32) {
    %c0_i32 = arith.constant 0 : i32
    %c0_i32_0 = arith.constant 0 : i32
    %c0_i32_1 = arith.constant 0 : i32
    return %c0_i32, %c0_i32_0 : i32, i32
  }
  func.func @transform_9(%arg0: i32) -> (i32, i32, i32) {
    %c0_i32 = arith.constant 0 : i32
    %c0_i32_0 = arith.constant 0 : i32
    %c0_i32_1 = arith.constant 0 : i32
    return %arg0, %c0_i32, %c0_i32_0 : i32, i32, i32
  }
}

module attributes {stable_mosaic.version = 11 : i64} {
  func.func @_up_block_kernel(%arg0: i32, %arg1: memref<1x16x16xf32, #tpu.memory_space<vmem>>, %arg2: memref<1x8x64xf32, #tpu.memory_space<vmem>>, %arg3: memref<16x64xf32, #tpu.memory_space<vmem>>, %arg4: memref<9x64xf32, #tpu.memory_space<vmem>>, %arg5: memref<9x16x16xbf16, #tpu.memory_space<vmem>>, %arg6: memref<16x1xf32, #tpu.memory_space<vmem>>, %arg7: memref<9x8x16xbf16, #tpu.memory_space<vmem>>, %arg8: memref<9x8x8xbf16, #tpu.memory_space<vmem>>, %arg9: memref<8x1xf32, #tpu.memory_space<vmem>>, %arg10: memref<1x8x64xf32, #tpu.memory_space<vmem>>, %arg11: memref<16x320xf32, #tpu.memory_space<vmem>>, %arg12: memref<16x320xf32, #tpu.memory_space<vmem>>, %arg13: memref<8x320xf32, #tpu.memory_space<vmem>>) attributes {dimension_semantics = [#tpu.dimension_semantics<parallel>], iteration_bounds = array<i64: 2>, scalar_prefetch = 0 : i64, scratch_operands = 3 : i64, tpu.core_type = #tpu.core_type<tc>, window_params = [{transform_indices = @transform_0, window_bounds = array<i64: 1, 16, 16>}, {transform_indices = @transform_1, window_bounds = array<i64: 1, 8, 64>}, {pipeline_mode = #tpu.pipeline_mode<synchronous>, transform_indices = @transform_2, window_bounds = array<i64: 16, 64>}, {pipeline_mode = #tpu.pipeline_mode<synchronous>, transform_indices = @transform_3, window_bounds = array<i64: 9, 64>}, {pipeline_mode = #tpu.pipeline_mode<synchronous>, transform_indices = @transform_4, window_bounds = array<i64: 9, 16, 16>}, {pipeline_mode = #tpu.pipeline_mode<synchronous>, transform_indices = @transform_5, window_bounds = array<i64: 16, 1>}, {pipeline_mode = #tpu.pipeline_mode<synchronous>, transform_indices = @transform_6, window_bounds = array<i64: 9, 8, 16>}, {pipeline_mode = #tpu.pipeline_mode<synchronous>, transform_indices = @transform_7, window_bounds = array<i64: 9, 8, 8>}, {pipeline_mode = #tpu.pipeline_mode<synchronous>, transform_indices = @transform_8, window_bounds = array<i64: 8, 1>}, {transform_indices = @transform_9, window_bounds = array<i64: 1, 8, 64>}]} {
    %c0 = arith.constant 0 : index
    %c0_0 = arith.constant 0 : index
    %c0_1 = arith.constant 0 : index
    %0 = vector.load %arg1[%c0, %c0_0, %c0_1] : memref<1x16x16xf32, #tpu.memory_space<vmem>>, vector<1x16x16xf32>
    %1 = vector.shape_cast %0 : vector<1x16x16xf32> to vector<16x16xf32>
    %c0_2 = arith.constant 0 : index
    %c0_3 = arith.constant 0 : index
    %2 = vector.load %arg3[%c0_2, %c0_3] : memref<16x64xf32, #tpu.memory_space<vmem>>, vector<16x64xf32>
    %cst = arith.constant dense<0.000000e+00> : vector<16x64xf32>
    %3 = tpu.matmul %1, %2, %cst {dimension_numbers = #tpu.dot_dimension_numbers<[1], [0], [0], [1], [0, 0, 1, 1], [], []>} : vector<16x16xf32>, vector<16x64xf32>, vector<16x64xf32> -> vector<16x64xf32>
    %cst_4 = arith.constant 0.000000e+00 : f32
    %4 = vector.broadcast %cst_4 : f32 to vector<16x320xf32>
    %c0_5 = arith.constant 0 : index
    %c0_6 = arith.constant 0 : index
    %5 = vector.load %arg11[%c0_5, %c0_6] : memref<16x320xf32, #tpu.memory_space<vmem>>, vector<16x320xf32>
    tpu.vector_store %arg11[%c0_5, %c0_6], %4 {strides = array<i32>} : memref<16x320xf32, #tpu.memory_space<vmem>>, vector<16x320xf32>,
    %c0_7 = arith.constant 0 : index
    %c128 = arith.constant 128 : index
    %6 = vector.load %arg11[%c0_7, %c128] : memref<16x320xf32, #tpu.memory_space<vmem>>, vector<16x64xf32>
    tpu.vector_store %arg11[%c0_7, %c128], %3 {strides = array<i32>} : memref<16x320xf32, #tpu.memory_space<vmem>>, vector<16x64xf32>,
    %cst_8 = arith.constant 0.000000e+00 : f32
    %7 = vector.broadcast %cst_8 : f32 to vector<16x64xf32>
    %c0_9 = arith.constant 0 : index
    %c119 = arith.constant 119 : index
    %8 = vector.load %arg11[%c0_9, %c119] : memref<16x320xf32, #tpu.memory_space<vmem>>, vector<16x64xf32>
    %c0_10 = arith.constant 0 : index
    %c0_11 = arith.constant 0 : index
    %9 = vector.load %arg4[%c0_10, %c0_11] : memref<9x64xf32, #tpu.memory_space<vmem>>, vector<1x64xf32>
    %10 = vector.broadcast %9 : vector<1x64xf32> to vector<16x64xf32>
    %11 = arith.mulf %8, %10 : vector<16x64xf32>
    %c0_12 = arith.constant 0 : index
    %c0_13 = arith.constant 0 : index
    %c0_14 = arith.constant 0 : index
    %12 = vector.load %arg5[%c0_12, %c0_13, %c0_14] : memref<9x16x16xbf16, #tpu.memory_space<vmem>>, vector<1x16x16xbf16>
    %13 = vector.shape_cast %12 : vector<1x16x16xbf16> to vector<16x16xbf16>
    %14 = arith.truncf %11 : vector<16x64xf32> to vector<16x64xbf16>
    %cst_15 = arith.constant dense<0.000000e+00> : vector<16x64xf32>
    %15 = tpu.matmul %13, %14, %cst_15 {dimension_numbers = #tpu.dot_dimension_numbers<[1], [0], [0], [1], [0, 0, 1, 1], [], []>} : vector<16x16xbf16>, vector<16x64xbf16>, vector<16x64xf32> -> vector<16x64xf32>
    %16 = arith.addf %7, %15 : vector<16x64xf32>
    %c0_16 = arith.constant 0 : index
    %c120 = arith.constant 120 : index
    %17 = vector.load %arg11[%c0_16, %c120] : memref<16x320xf32, #tpu.memory_space<vmem>>, vector<16x64xf32>
    %c1 = arith.constant 1 : index
    %c0_17 = arith.constant 0 : index
    %18 = vector.load %arg4[%c1, %c0_17] : memref<9x64xf32, #tpu.memory_space<vmem>>, vector<1x64xf32>
    %19 = vector.broadcast %18 : vector<1x64xf32> to vector<16x64xf32>
    %20 = arith.mulf %17, %19 : vector<16x64xf32>
    %c1_18 = arith.constant 1 : index
    %c0_19 = arith.constant 0 : index
    %c0_20 = arith.constant 0 : index
    %21 = vector.load %arg5[%c1_18, %c0_19, %c0_20] : memref<9x16x16xbf16, #tpu.memory_space<vmem>>, vector<1x16x16xbf16>
    %22 = vector.shape_cast %21 : vector<1x16x16xbf16> to vector<16x16xbf16>
    %23 = arith.truncf %20 : vector<16x64xf32> to vector<16x64xbf16>
    %cst_21 = arith.constant dense<0.000000e+00> : vector<16x64xf32>
    %24 = tpu.matmul %22, %23, %cst_21 {dimension_numbers = #tpu.dot_dimension_numbers<[1], [0], [0], [1], [0, 0, 1, 1], [], []>} : vector<16x16xbf16>, vector<16x64xbf16>, vector<16x64xf32> -> vector<16x64xf32>
    %25 = arith.addf %16, %24 : vector<16x64xf32>
    %c0_22 = arith.constant 0 : index
    %c121 = arith.constant 121 : index
    %26 = vector.load %arg11[%c0_22, %c121] : memref<16x320xf32, #tpu.memory_space<vmem>>, vector<16x64xf32>
    %c2 = arith.constant 2 : index
    %c0_23 = arith.constant 0 : index
    %27 = vector.load %arg4[%c2, %c0_23] : memref<9x64xf32, #tpu.memory_space<vmem>>, vector<1x64xf32>
    %28 = vector.broadcast %27 : vector<1x64xf32> to vector<16x64xf32>
    %29 = arith.mulf %26, %28 : vector<16x64xf32>
    %c2_24 = arith.constant 2 : index
    %c0_25 = arith.constant 0 : index
    %c0_26 = arith.constant 0 : index
    %30 = vector.load %arg5[%c2_24, %c0_25, %c0_26] : memref<9x16x16xbf16, #tpu.memory_space<vmem>>, vector<1x16x16xbf16>
    %31 = vector.shape_cast %30 : vector<1x16x16xbf16> to vector<16x16xbf16>
    %32 = arith.truncf %29 : vector<16x64xf32> to vector<16x64xbf16>
    %cst_27 = arith.constant dense<0.000000e+00> : vector<16x64xf32>
    %33 = tpu.matmul %31, %32, %cst_27 {dimension_numbers = #tpu.dot_dimension_numbers<[1], [0], [0], [1], [0, 0, 1, 1], [], []>} : vector<16x16xbf16>, vector<16x64xbf16>, vector<16x64xf32> -> vector<16x64xf32>
    %34 = arith.addf %25, %33 : vector<16x64xf32>
    %c0_28 = arith.constant 0 : index
    %c127 = arith.constant 127 : index
    %35 = vector.load %arg11[%c0_28, %c127] : memref<16x320xf32, #tpu.memory_space<vmem>>, vector<16x64xf32>
    %c3 = arith.constant 3 : index
    %c0_29 = arith.constant 0 : index
    %36 = vector.load %arg4[%c3, %c0_29] : memref<9x64xf32, #tpu.memory_space<vmem>>, vector<1x64xf32>
    %37 = vector.broadcast %36 : vector<1x64xf32> to vector<16x64xf32>
    %38 = arith.mulf %35, %37 : vector<16x64xf32>
    %c3_30 = arith.constant 3 : index
    %c0_31 = arith.constant 0 : index
    %c0_32 = arith.constant 0 : index
    %39 = vector.load %arg5[%c3_30, %c0_31, %c0_32] : memref<9x16x16xbf16, #tpu.memory_space<vmem>>, vector<1x16x16xbf16>
    %40 = vector.shape_cast %39 : vector<1x16x16xbf16> to vector<16x16xbf16>
    %41 = arith.truncf %38 : vector<16x64xf32> to vector<16x64xbf16>
    %cst_33 = arith.constant dense<0.000000e+00> : vector<16x64xf32>
    %42 = tpu.matmul %40, %41, %cst_33 {dimension_numbers = #tpu.dot_dimension_numbers<[1], [0], [0], [1], [0, 0, 1, 1], [], []>} : vector<16x16xbf16>, vector<16x64xbf16>, vector<16x64xf32> -> vector<16x64xf32>
    %43 = arith.addf %34, %42 : vector<16x64xf32>
    %c0_34 = arith.constant 0 : index
    %c128_35 = arith.constant 128 : index
    %44 = vector.load %arg11[%c0_34, %c128_35] : memref<16x320xf32, #tpu.memory_space<vmem>>, vector<16x64xf32>
    %c4 = arith.constant 4 : index
    %c0_36 = arith.constant 0 : index
    %45 = vector.load %arg4[%c4, %c0_36] : memref<9x64xf32, #tpu.memory_space<vmem>>, vector<1x64xf32>
    %46 = vector.broadcast %45 : vector<1x64xf32> to vector<16x64xf32>
    %47 = arith.mulf %44, %46 : vector<16x64xf32>
    %c4_37 = arith.constant 4 : index
    %c0_38 = arith.constant 0 : index
    %c0_39 = arith.constant 0 : index
    %48 = vector.load %arg5[%c4_37, %c0_38, %c0_39] : memref<9x16x16xbf16, #tpu.memory_space<vmem>>, vector<1x16x16xbf16>
    %49 = vector.shape_cast %48 : vector<1x16x16xbf16> to vector<16x16xbf16>
    %50 = arith.truncf %47 : vector<16x64xf32> to vector<16x64xbf16>
    %cst_40 = arith.constant dense<0.000000e+00> : vector<16x64xf32>
    %51 = tpu.matmul %49, %50, %cst_40 {dimension_numbers = #tpu.dot_dimension_numbers<[1], [0], [0], [1], [0, 0, 1, 1], [], []>} : vector<16x16xbf16>, vector<16x64xbf16>, vector<16x64xf32> -> vector<16x64xf32>
    %52 = arith.addf %43, %51 : vector<16x64xf32>
    %c0_41 = arith.constant 0 : index
    %c129 = arith.constant 129 : index
    %53 = vector.load %arg11[%c0_41, %c129] : memref<16x320xf32, #tpu.memory_space<vmem>>, vector<16x64xf32>
    %c5 = arith.constant 5 : index
    %c0_42 = arith.constant 0 : index
    %54 = vector.load %arg4[%c5, %c0_42] : memref<9x64xf32, #tpu.memory_space<vmem>>, vector<1x64xf32>
    %55 = vector.broadcast %54 : vector<1x64xf32> to vector<16x64xf32>
    %56 = arith.mulf %53, %55 : vector<16x64xf32>
    %c5_43 = arith.constant 5 : index
    %c0_44 = arith.constant 0 : index
    %c0_45 = arith.constant 0 : index
    %57 = vector.load %arg5[%c5_43, %c0_44, %c0_45] : memref<9x16x16xbf16, #tpu.memory_space<vmem>>, vector<1x16x16xbf16>
    %58 = vector.shape_cast %57 : vector<1x16x16xbf16> to vector<16x16xbf16>
    %59 = arith.truncf %56 : vector<16x64xf32> to vector<16x64xbf16>
    %cst_46 = arith.constant dense<0.000000e+00> : vector<16x64xf32>
    %60 = tpu.matmul %58, %59, %cst_46 {dimension_numbers = #tpu.dot_dimension_numbers<[1], [0], [0], [1], [0, 0, 1, 1], [], []>} : vector<16x16xbf16>, vector<16x64xbf16>, vector<16x64xf32> -> vector<16x64xf32>
    %61 = arith.addf %52, %60 : vector<16x64xf32>
    %c0_47 = arith.constant 0 : index
    %c135 = arith.constant 135 : index
    %62 = vector.load %arg11[%c0_47, %c135] : memref<16x320xf32, #tpu.memory_space<vmem>>, vector<16x64xf32>
    %c6 = arith.constant 6 : index
    %c0_48 = arith.constant 0 : index
    %63 = vector.load %arg4[%c6, %c0_48] : memref<9x64xf32, #tpu.memory_space<vmem>>, vector<1x64xf32>
    %64 = vector.broadcast %63 : vector<1x64xf32> to vector<16x64xf32>
    %65 = arith.mulf %62, %64 : vector<16x64xf32>
    %c6_49 = arith.constant 6 : index
    %c0_50 = arith.constant 0 : index
    %c0_51 = arith.constant 0 : index
    %66 = vector.load %arg5[%c6_49, %c0_50, %c0_51] : memref<9x16x16xbf16, #tpu.memory_space<vmem>>, vector<1x16x16xbf16>
    %67 = vector.shape_cast %66 : vector<1x16x16xbf16> to vector<16x16xbf16>
    %68 = arith.truncf %65 : vector<16x64xf32> to vector<16x64xbf16>
    %cst_52 = arith.constant dense<0.000000e+00> : vector<16x64xf32>
    %69 = tpu.matmul %67, %68, %cst_52 {dimension_numbers = #tpu.dot_dimension_numbers<[1], [0], [0], [1], [0, 0, 1, 1], [], []>} : vector<16x16xbf16>, vector<16x64xbf16>, vector<16x64xf32> -> vector<16x64xf32>
    %70 = arith.addf %61, %69 : vector<16x64xf32>
    %c0_53 = arith.constant 0 : index
    %c136 = arith.constant 136 : index
    %71 = vector.load %arg11[%c0_53, %c136] : memref<16x320xf32, #tpu.memory_space<vmem>>, vector<16x64xf32>
    %c7 = arith.constant 7 : index
    %c0_54 = arith.constant 0 : index
    %72 = vector.load %arg4[%c7, %c0_54] : memref<9x64xf32, #tpu.memory_space<vmem>>, vector<1x64xf32>
    %73 = vector.broadcast %72 : vector<1x64xf32> to vector<16x64xf32>
    %74 = arith.mulf %71, %73 : vector<16x64xf32>
    %c7_55 = arith.constant 7 : index
    %c0_56 = arith.constant 0 : index
    %c0_57 = arith.constant 0 : index
    %75 = vector.load %arg5[%c7_55, %c0_56, %c0_57] : memref<9x16x16xbf16, #tpu.memory_space<vmem>>, vector<1x16x16xbf16>
    %76 = vector.shape_cast %75 : vector<1x16x16xbf16> to vector<16x16xbf16>
    %77 = arith.truncf %74 : vector<16x64xf32> to vector<16x64xbf16>
    %cst_58 = arith.constant dense<0.000000e+00> : vector<16x64xf32>
    %78 = tpu.matmul %76, %77, %cst_58 {dimension_numbers = #tpu.dot_dimension_numbers<[1], [0], [0], [1], [0, 0, 1, 1], [], []>} : vector<16x16xbf16>, vector<16x64xbf16>, vector<16x64xf32> -> vector<16x64xf32>
    %79 = arith.addf %70, %78 : vector<16x64xf32>
    %c0_59 = arith.constant 0 : index
    %c137 = arith.constant 137 : index
    %80 = vector.load %arg11[%c0_59, %c137] : memref<16x320xf32, #tpu.memory_space<vmem>>, vector<16x64xf32>
    %c8 = arith.constant 8 : index
    %c0_60 = arith.constant 0 : index
    %81 = vector.load %arg4[%c8, %c0_60] : memref<9x64xf32, #tpu.memory_space<vmem>>, vector<1x64xf32>
    %82 = vector.broadcast %81 : vector<1x64xf32> to vector<16x64xf32>
    %83 = arith.mulf %80, %82 : vector<16x64xf32>
    %c8_61 = arith.constant 8 : index
    %c0_62 = arith.constant 0 : index
    %c0_63 = arith.constant 0 : index
    %84 = vector.load %arg5[%c8_61, %c0_62, %c0_63] : memref<9x16x16xbf16, #tpu.memory_space<vmem>>, vector<1x16x16xbf16>
    %85 = vector.shape_cast %84 : vector<1x16x16xbf16> to vector<16x16xbf16>
    %86 = arith.truncf %83 : vector<16x64xf32> to vector<16x64xbf16>
    %cst_64 = arith.constant dense<0.000000e+00> : vector<16x64xf32>
    %87 = tpu.matmul %85, %86, %cst_64 {dimension_numbers = #tpu.dot_dimension_numbers<[1], [0], [0], [1], [0, 0, 1, 1], [], []>} : vector<16x16xbf16>, vector<16x64xbf16>, vector<16x64xf32> -> vector<16x64xf32>
    %88 = arith.addf %79, %87 : vector<16x64xf32>
    %c0_65 = arith.constant 0 : index
    %c0_66 = arith.constant 0 : index
    %89 = vector.load %arg6[%c0_65, %c0_66] : memref<16x1xf32, #tpu.memory_space<vmem>>, vector<16x1xf32>
    %90 = vector.broadcast %89 : vector<16x1xf32> to vector<16x64xf32>
    %91 = arith.addf %88, %90 : vector<16x64xf32>
    %cst_67 = arith.constant 0.000000e+00 : f32
    %92 = vector.broadcast %cst_67 : f32 to vector<16x64xf32>
    %93 = arith.maximumf %91, %92 : vector<16x64xf32>
    %cst_68 = arith.constant 0.000000e+00 : f32
    %94 = vector.broadcast %cst_68 : f32 to vector<16x320xf32>
    %c0_69 = arith.constant 0 : index
    %c0_70 = arith.constant 0 : index
    %95 = vector.load %arg12[%c0_69, %c0_70] : memref<16x320xf32, #tpu.memory_space<vmem>>, vector<16x320xf32>
    tpu.vector_store %arg12[%c0_69, %c0_70], %94 {strides = array<i32>} : memref<16x320xf32, #tpu.memory_space<vmem>>, vector<16x320xf32>,
    %c0_71 = arith.constant 0 : index
    %c128_72 = arith.constant 128 : index
    %96 = vector.load %arg12[%c0_71, %c128_72] : memref<16x320xf32, #tpu.memory_space<vmem>>, vector<16x64xf32>
    tpu.vector_store %arg12[%c0_71, %c128_72], %93 {strides = array<i32>} : memref<16x320xf32, #tpu.memory_space<vmem>>, vector<16x64xf32>,
    %cst_73 = arith.constant 0.000000e+00 : f32
    %97 = vector.broadcast %cst_73 : f32 to vector<8x320xf32>
    %c0_74 = arith.constant 0 : index
    %c0_75 = arith.constant 0 : index
    %98 = vector.load %arg13[%c0_74, %c0_75] : memref<8x320xf32, #tpu.memory_space<vmem>>, vector<8x320xf32>
    tpu.vector_store %arg13[%c0_74, %c0_75], %97 {strides = array<i32>} : memref<8x320xf32, #tpu.memory_space<vmem>>, vector<8x320xf32>,
    %c0_76 = arith.constant 0 : index
    %c0_77 = arith.constant 0 : index
    %c0_78 = arith.constant 0 : index
    %99 = vector.load %arg2[%c0_76, %c0_77, %c0_78] : memref<1x8x64xf32, #tpu.memory_space<vmem>>, vector<1x8x64xf32>
    %100 = vector.shape_cast %99 : vector<1x8x64xf32> to vector<8x64xf32>
    %c0_79 = arith.constant 0 : index
    %c128_80 = arith.constant 128 : index
    %101 = vector.load %arg13[%c0_79, %c128_80] : memref<8x320xf32, #tpu.memory_space<vmem>>, vector<8x64xf32>
    tpu.vector_store %arg13[%c0_79, %c128_80], %100 {strides = array<i32>} : memref<8x320xf32, #tpu.memory_space<vmem>>, vector<8x64xf32>,
    %cst_81 = arith.constant 0.000000e+00 : f32
    %102 = vector.broadcast %cst_81 : f32 to vector<8x64xf32>
    %c0_82 = arith.constant 0 : index
    %c119_83 = arith.constant 119 : index
    %103 = vector.load %arg12[%c0_82, %c119_83] : memref<16x320xf32, #tpu.memory_space<vmem>>, vector<16x64xf32>
    %c0_84 = arith.constant 0 : index
    %c0_85 = arith.constant 0 : index
    %104 = vector.load %arg4[%c0_84, %c0_85] : memref<9x64xf32, #tpu.memory_space<vmem>>, vector<1x64xf32>
    %105 = vector.broadcast %104 : vector<1x64xf32> to vector<16x64xf32>
    %106 = arith.mulf %103, %105 : vector<16x64xf32>
    %c0_86 = arith.constant 0 : index
    %c0_87 = arith.constant 0 : index
    %c0_88 = arith.constant 0 : index
    %107 = vector.load %arg7[%c0_86, %c0_87, %c0_88] : memref<9x8x16xbf16, #tpu.memory_space<vmem>>, vector<1x8x16xbf16>
    %108 = vector.shape_cast %107 : vector<1x8x16xbf16> to vector<8x16xbf16>
    %109 = arith.truncf %106 : vector<16x64xf32> to vector<16x64xbf16>
    %cst_89 = arith.constant dense<0.000000e+00> : vector<8x64xf32>
    %110 = tpu.matmul %108, %109, %cst_89 {dimension_numbers = #tpu.dot_dimension_numbers<[1], [0], [0], [1], [0, 0, 1, 1], [], []>} : vector<8x16xbf16>, vector<16x64xbf16>, vector<8x64xf32> -> vector<8x64xf32>
    %111 = arith.addf %102, %110 : vector<8x64xf32>
    %c0_90 = arith.constant 0 : index
    %c120_91 = arith.constant 120 : index
    %112 = vector.load %arg12[%c0_90, %c120_91] : memref<16x320xf32, #tpu.memory_space<vmem>>, vector<16x64xf32>
    %c1_92 = arith.constant 1 : index
    %c0_93 = arith.constant 0 : index
    %113 = vector.load %arg4[%c1_92, %c0_93] : memref<9x64xf32, #tpu.memory_space<vmem>>, vector<1x64xf32>
    %114 = vector.broadcast %113 : vector<1x64xf32> to vector<16x64xf32>
    %115 = arith.mulf %112, %114 : vector<16x64xf32>
    %c1_94 = arith.constant 1 : index
    %c0_95 = arith.constant 0 : index
    %c0_96 = arith.constant 0 : index
    %116 = vector.load %arg7[%c1_94, %c0_95, %c0_96] : memref<9x8x16xbf16, #tpu.memory_space<vmem>>, vector<1x8x16xbf16>
    %117 = vector.shape_cast %116 : vector<1x8x16xbf16> to vector<8x16xbf16>
    %118 = arith.truncf %115 : vector<16x64xf32> to vector<16x64xbf16>
    %cst_97 = arith.constant dense<0.000000e+00> : vector<8x64xf32>
    %119 = tpu.matmul %117, %118, %cst_97 {dimension_numbers = #tpu.dot_dimension_numbers<[1], [0], [0], [1], [0, 0, 1, 1], [], []>} : vector<8x16xbf16>, vector<16x64xbf16>, vector<8x64xf32> -> vector<8x64xf32>
    %120 = arith.addf %111, %119 : vector<8x64xf32>
    %c0_98 = arith.constant 0 : index
    %c121_99 = arith.constant 121 : index
    %121 = vector.load %arg12[%c0_98, %c121_99] : memref<16x320xf32, #tpu.memory_space<vmem>>, vector<16x64xf32>
    %c2_100 = arith.constant 2 : index
    %c0_101 = arith.constant 0 : index
    %122 = vector.load %arg4[%c2_100, %c0_101] : memref<9x64xf32, #tpu.memory_space<vmem>>, vector<1x64xf32>
    %123 = vector.broadcast %122 : vector<1x64xf32> to vector<16x64xf32>
    %124 = arith.mulf %121, %123 : vector<16x64xf32>
    %c2_102 = arith.constant 2 : index
    %c0_103 = arith.constant 0 : index
    %c0_104 = arith.constant 0 : index
    %125 = vector.load %arg7[%c2_102, %c0_103, %c0_104] : memref<9x8x16xbf16, #tpu.memory_space<vmem>>, vector<1x8x16xbf16>
    %126 = vector.shape_cast %125 : vector<1x8x16xbf16> to vector<8x16xbf16>
    %127 = arith.truncf %124 : vector<16x64xf32> to vector<16x64xbf16>
    %cst_105 = arith.constant dense<0.000000e+00> : vector<8x64xf32>
    %128 = tpu.matmul %126, %127, %cst_105 {dimension_numbers = #tpu.dot_dimension_numbers<[1], [0], [0], [1], [0, 0, 1, 1], [], []>} : vector<8x16xbf16>, vector<16x64xbf16>, vector<8x64xf32> -> vector<8x64xf32>
    %129 = arith.addf %120, %128 : vector<8x64xf32>
    %c0_106 = arith.constant 0 : index
    %c127_107 = arith.constant 127 : index
    %130 = vector.load %arg12[%c0_106, %c127_107] : memref<16x320xf32, #tpu.memory_space<vmem>>, vector<16x64xf32>
    %c3_108 = arith.constant 3 : index
    %c0_109 = arith.constant 0 : index
    %131 = vector.load %arg4[%c3_108, %c0_109] : memref<9x64xf32, #tpu.memory_space<vmem>>, vector<1x64xf32>
    %132 = vector.broadcast %131 : vector<1x64xf32> to vector<16x64xf32>
    %133 = arith.mulf %130, %132 : vector<16x64xf32>
    %c3_110 = arith.constant 3 : index
    %c0_111 = arith.constant 0 : index
    %c0_112 = arith.constant 0 : index
    %134 = vector.load %arg7[%c3_110, %c0_111, %c0_112] : memref<9x8x16xbf16, #tpu.memory_space<vmem>>, vector<1x8x16xbf16>
    %135 = vector.shape_cast %134 : vector<1x8x16xbf16> to vector<8x16xbf16>
    %136 = arith.truncf %133 : vector<16x64xf32> to vector<16x64xbf16>
    %cst_113 = arith.constant dense<0.000000e+00> : vector<8x64xf32>
    %137 = tpu.matmul %135, %136, %cst_113 {dimension_numbers = #tpu.dot_dimension_numbers<[1], [0], [0], [1], [0, 0, 1, 1], [], []>} : vector<8x16xbf16>, vector<16x64xbf16>, vector<8x64xf32> -> vector<8x64xf32>
    %138 = arith.addf %129, %137 : vector<8x64xf32>
    %c0_114 = arith.constant 0 : index
    %c128_115 = arith.constant 128 : index
    %139 = vector.load %arg12[%c0_114, %c128_115] : memref<16x320xf32, #tpu.memory_space<vmem>>, vector<16x64xf32>
    %c4_116 = arith.constant 4 : index
    %c0_117 = arith.constant 0 : index
    %140 = vector.load %arg4[%c4_116, %c0_117] : memref<9x64xf32, #tpu.memory_space<vmem>>, vector<1x64xf32>
    %141 = vector.broadcast %140 : vector<1x64xf32> to vector<16x64xf32>
    %142 = arith.mulf %139, %141 : vector<16x64xf32>
    %c4_118 = arith.constant 4 : index
    %c0_119 = arith.constant 0 : index
    %c0_120 = arith.constant 0 : index
    %143 = vector.load %arg7[%c4_118, %c0_119, %c0_120] : memref<9x8x16xbf16, #tpu.memory_space<vmem>>, vector<1x8x16xbf16>
    %144 = vector.shape_cast %143 : vector<1x8x16xbf16> to vector<8x16xbf16>
    %145 = arith.truncf %142 : vector<16x64xf32> to vector<16x64xbf16>
    %cst_121 = arith.constant dense<0.000000e+00> : vector<8x64xf32>
    %146 = tpu.matmul %144, %145, %cst_121 {dimension_numbers = #tpu.dot_dimension_numbers<[1], [0], [0], [1], [0, 0, 1, 1], [], []>} : vector<8x16xbf16>, vector<16x64xbf16>, vector<8x64xf32> -> vector<8x64xf32>
    %147 = arith.addf %138, %146 : vector<8x64xf32>
    %c0_122 = arith.constant 0 : index
    %c129_123 = arith.constant 129 : index
    %148 = vector.load %arg12[%c0_122, %c129_123] : memref<16x320xf32, #tpu.memory_space<vmem>>, vector<16x64xf32>
    %c5_124 = arith.constant 5 : index
    %c0_125 = arith.constant 0 : index
    %149 = vector.load %arg4[%c5_124, %c0_125] : memref<9x64xf32, #tpu.memory_space<vmem>>, vector<1x64xf32>
    %150 = vector.broadcast %149 : vector<1x64xf32> to vector<16x64xf32>
    %151 = arith.mulf %148, %150 : vector<16x64xf32>
    %c5_126 = arith.constant 5 : index
    %c0_127 = arith.constant 0 : index
    %c0_128 = arith.constant 0 : index
    %152 = vector.load %arg7[%c5_126, %c0_127, %c0_128] : memref<9x8x16xbf16, #tpu.memory_space<vmem>>, vector<1x8x16xbf16>
    %153 = vector.shape_cast %152 : vector<1x8x16xbf16> to vector<8x16xbf16>
    %154 = arith.truncf %151 : vector<16x64xf32> to vector<16x64xbf16>
    %cst_129 = arith.constant dense<0.000000e+00> : vector<8x64xf32>
    %155 = tpu.matmul %153, %154, %cst_129 {dimension_numbers = #tpu.dot_dimension_numbers<[1], [0], [0], [1], [0, 0, 1, 1], [], []>} : vector<8x16xbf16>, vector<16x64xbf16>, vector<8x64xf32> -> vector<8x64xf32>
    %156 = arith.addf %147, %155 : vector<8x64xf32>
    %c0_130 = arith.constant 0 : index
    %c135_131 = arith.constant 135 : index
    %157 = vector.load %arg12[%c0_130, %c135_131] : memref<16x320xf32, #tpu.memory_space<vmem>>, vector<16x64xf32>
    %c6_132 = arith.constant 6 : index
    %c0_133 = arith.constant 0 : index
    %158 = vector.load %arg4[%c6_132, %c0_133] : memref<9x64xf32, #tpu.memory_space<vmem>>, vector<1x64xf32>
    %159 = vector.broadcast %158 : vector<1x64xf32> to vector<16x64xf32>
    %160 = arith.mulf %157, %159 : vector<16x64xf32>
    %c6_134 = arith.constant 6 : index
    %c0_135 = arith.constant 0 : index
    %c0_136 = arith.constant 0 : index
    %161 = vector.load %arg7[%c6_134, %c0_135, %c0_136] : memref<9x8x16xbf16, #tpu.memory_space<vmem>>, vector<1x8x16xbf16>
    %162 = vector.shape_cast %161 : vector<1x8x16xbf16> to vector<8x16xbf16>
    %163 = arith.truncf %160 : vector<16x64xf32> to vector<16x64xbf16>
    %cst_137 = arith.constant dense<0.000000e+00> : vector<8x64xf32>
    %164 = tpu.matmul %162, %163, %cst_137 {dimension_numbers = #tpu.dot_dimension_numbers<[1], [0], [0], [1], [0, 0, 1, 1], [], []>} : vector<8x16xbf16>, vector<16x64xbf16>, vector<8x64xf32> -> vector<8x64xf32>
    %165 = arith.addf %156, %164 : vector<8x64xf32>
    %c0_138 = arith.constant 0 : index
    %c136_139 = arith.constant 136 : index
    %166 = vector.load %arg12[%c0_138, %c136_139] : memref<16x320xf32, #tpu.memory_space<vmem>>, vector<16x64xf32>
    %c7_140 = arith.constant 7 : index
    %c0_141 = arith.constant 0 : index
    %167 = vector.load %arg4[%c7_140, %c0_141] : memref<9x64xf32, #tpu.memory_space<vmem>>, vector<1x64xf32>
    %168 = vector.broadcast %167 : vector<1x64xf32> to vector<16x64xf32>
    %169 = arith.mulf %166, %168 : vector<16x64xf32>
    %c7_142 = arith.constant 7 : index
    %c0_143 = arith.constant 0 : index
    %c0_144 = arith.constant 0 : index
    %170 = vector.load %arg7[%c7_142, %c0_143, %c0_144] : memref<9x8x16xbf16, #tpu.memory_space<vmem>>, vector<1x8x16xbf16>
    %171 = vector.shape_cast %170 : vector<1x8x16xbf16> to vector<8x16xbf16>
    %172 = arith.truncf %169 : vector<16x64xf32> to vector<16x64xbf16>
    %cst_145 = arith.constant dense<0.000000e+00> : vector<8x64xf32>
    %173 = tpu.matmul %171, %172, %cst_145 {dimension_numbers = #tpu.dot_dimension_numbers<[1], [0], [0], [1], [0, 0, 1, 1], [], []>} : vector<8x16xbf16>, vector<16x64xbf16>, vector<8x64xf32> -> vector<8x64xf32>
    %174 = arith.addf %165, %173 : vector<8x64xf32>
    %c0_146 = arith.constant 0 : index
    %c137_147 = arith.constant 137 : index
    %175 = vector.load %arg12[%c0_146, %c137_147] : memref<16x320xf32, #tpu.memory_space<vmem>>, vector<16x64xf32>
    %c8_148 = arith.constant 8 : index
    %c0_149 = arith.constant 0 : index
    %176 = vector.load %arg4[%c8_148, %c0_149] : memref<9x64xf32, #tpu.memory_space<vmem>>, vector<1x64xf32>
    %177 = vector.broadcast %176 : vector<1x64xf32> to vector<16x64xf32>
    %178 = arith.mulf %175, %177 : vector<16x64xf32>
    %c8_150 = arith.constant 8 : index
    %c0_151 = arith.constant 0 : index
    %c0_152 = arith.constant 0 : index
    %179 = vector.load %arg7[%c8_150, %c0_151, %c0_152] : memref<9x8x16xbf16, #tpu.memory_space<vmem>>, vector<1x8x16xbf16>
    %180 = vector.shape_cast %179 : vector<1x8x16xbf16> to vector<8x16xbf16>
    %181 = arith.truncf %178 : vector<16x64xf32> to vector<16x64xbf16>
    %cst_153 = arith.constant dense<0.000000e+00> : vector<8x64xf32>
    %182 = tpu.matmul %180, %181, %cst_153 {dimension_numbers = #tpu.dot_dimension_numbers<[1], [0], [0], [1], [0, 0, 1, 1], [], []>} : vector<8x16xbf16>, vector<16x64xbf16>, vector<8x64xf32> -> vector<8x64xf32>
    %183 = arith.addf %174, %182 : vector<8x64xf32>
    %cst_154 = arith.constant 0.000000e+00 : f32
    %184 = vector.broadcast %cst_154 : f32 to vector<8x64xf32>
    %c0_155 = arith.constant 0 : index
    %c119_156 = arith.constant 119 : index
    %185 = vector.load %arg13[%c0_155, %c119_156] : memref<8x320xf32, #tpu.memory_space<vmem>>, vector<8x64xf32>
    %c0_157 = arith.constant 0 : index
    %c0_158 = arith.constant 0 : index
    %186 = vector.load %arg4[%c0_157, %c0_158] : memref<9x64xf32, #tpu.memory_space<vmem>>, vector<1x64xf32>
    %187 = vector.broadcast %186 : vector<1x64xf32> to vector<8x64xf32>
    %188 = arith.mulf %185, %187 : vector<8x64xf32>
    %c0_159 = arith.constant 0 : index
    %c0_160 = arith.constant 0 : index
    %c0_161 = arith.constant 0 : index
    %189 = vector.load %arg8[%c0_159, %c0_160, %c0_161] : memref<9x8x8xbf16, #tpu.memory_space<vmem>>, vector<1x8x8xbf16>
    %190 = vector.shape_cast %189 : vector<1x8x8xbf16> to vector<8x8xbf16>
    %191 = arith.truncf %188 : vector<8x64xf32> to vector<8x64xbf16>
    %cst_162 = arith.constant dense<0.000000e+00> : vector<8x64xf32>
    %192 = tpu.matmul %190, %191, %cst_162 {dimension_numbers = #tpu.dot_dimension_numbers<[1], [0], [0], [1], [0, 0, 1, 1], [], []>} : vector<8x8xbf16>, vector<8x64xbf16>, vector<8x64xf32> -> vector<8x64xf32>
    %193 = arith.addf %184, %192 : vector<8x64xf32>
    %c0_163 = arith.constant 0 : index
    %c120_164 = arith.constant 120 : index
    %194 = vector.load %arg13[%c0_163, %c120_164] : memref<8x320xf32, #tpu.memory_space<vmem>>, vector<8x64xf32>
    %c1_165 = arith.constant 1 : index
    %c0_166 = arith.constant 0 : index
    %195 = vector.load %arg4[%c1_165, %c0_166] : memref<9x64xf32, #tpu.memory_space<vmem>>, vector<1x64xf32>
    %196 = vector.broadcast %195 : vector<1x64xf32> to vector<8x64xf32>
    %197 = arith.mulf %194, %196 : vector<8x64xf32>
    %c1_167 = arith.constant 1 : index
    %c0_168 = arith.constant 0 : index
    %c0_169 = arith.constant 0 : index
    %198 = vector.load %arg8[%c1_167, %c0_168, %c0_169] : memref<9x8x8xbf16, #tpu.memory_space<vmem>>, vector<1x8x8xbf16>
    %199 = vector.shape_cast %198 : vector<1x8x8xbf16> to vector<8x8xbf16>
    %200 = arith.truncf %197 : vector<8x64xf32> to vector<8x64xbf16>
    %cst_170 = arith.constant dense<0.000000e+00> : vector<8x64xf32>
    %201 = tpu.matmul %199, %200, %cst_170 {dimension_numbers = #tpu.dot_dimension_numbers<[1], [0], [0], [1], [0, 0, 1, 1], [], []>} : vector<8x8xbf16>, vector<8x64xbf16>, vector<8x64xf32> -> vector<8x64xf32>
    %202 = arith.addf %193, %201 : vector<8x64xf32>
    %c0_171 = arith.constant 0 : index
    %c121_172 = arith.constant 121 : index
    %203 = vector.load %arg13[%c0_171, %c121_172] : memref<8x320xf32, #tpu.memory_space<vmem>>, vector<8x64xf32>
    %c2_173 = arith.constant 2 : index
    %c0_174 = arith.constant 0 : index
    %204 = vector.load %arg4[%c2_173, %c0_174] : memref<9x64xf32, #tpu.memory_space<vmem>>, vector<1x64xf32>
    %205 = vector.broadcast %204 : vector<1x64xf32> to vector<8x64xf32>
    %206 = arith.mulf %203, %205 : vector<8x64xf32>
    %c2_175 = arith.constant 2 : index
    %c0_176 = arith.constant 0 : index
    %c0_177 = arith.constant 0 : index
    %207 = vector.load %arg8[%c2_175, %c0_176, %c0_177] : memref<9x8x8xbf16, #tpu.memory_space<vmem>>, vector<1x8x8xbf16>
    %208 = vector.shape_cast %207 : vector<1x8x8xbf16> to vector<8x8xbf16>
    %209 = arith.truncf %206 : vector<8x64xf32> to vector<8x64xbf16>
    %cst_178 = arith.constant dense<0.000000e+00> : vector<8x64xf32>
    %210 = tpu.matmul %208, %209, %cst_178 {dimension_numbers = #tpu.dot_dimension_numbers<[1], [0], [0], [1], [0, 0, 1, 1], [], []>} : vector<8x8xbf16>, vector<8x64xbf16>, vector<8x64xf32> -> vector<8x64xf32>
    %211 = arith.addf %202, %210 : vector<8x64xf32>
    %c0_179 = arith.constant 0 : index
    %c127_180 = arith.constant 127 : index
    %212 = vector.load %arg13[%c0_179, %c127_180] : memref<8x320xf32, #tpu.memory_space<vmem>>, vector<8x64xf32>
    %c3_181 = arith.constant 3 : index
    %c0_182 = arith.constant 0 : index
    %213 = vector.load %arg4[%c3_181, %c0_182] : memref<9x64xf32, #tpu.memory_space<vmem>>, vector<1x64xf32>
    %214 = vector.broadcast %213 : vector<1x64xf32> to vector<8x64xf32>
    %215 = arith.mulf %212, %214 : vector<8x64xf32>
    %c3_183 = arith.constant 3 : index
    %c0_184 = arith.constant 0 : index
    %c0_185 = arith.constant 0 : index
    %216 = vector.load %arg8[%c3_183, %c0_184, %c0_185] : memref<9x8x8xbf16, #tpu.memory_space<vmem>>, vector<1x8x8xbf16>
    %217 = vector.shape_cast %216 : vector<1x8x8xbf16> to vector<8x8xbf16>
    %218 = arith.truncf %215 : vector<8x64xf32> to vector<8x64xbf16>
    %cst_186 = arith.constant dense<0.000000e+00> : vector<8x64xf32>
    %219 = tpu.matmul %217, %218, %cst_186 {dimension_numbers = #tpu.dot_dimension_numbers<[1], [0], [0], [1], [0, 0, 1, 1], [], []>} : vector<8x8xbf16>, vector<8x64xbf16>, vector<8x64xf32> -> vector<8x64xf32>
    %220 = arith.addf %211, %219 : vector<8x64xf32>
    %c0_187 = arith.constant 0 : index
    %c128_188 = arith.constant 128 : index
    %221 = vector.load %arg13[%c0_187, %c128_188] : memref<8x320xf32, #tpu.memory_space<vmem>>, vector<8x64xf32>
    %c4_189 = arith.constant 4 : index
    %c0_190 = arith.constant 0 : index
    %222 = vector.load %arg4[%c4_189, %c0_190] : memref<9x64xf32, #tpu.memory_space<vmem>>, vector<1x64xf32>
    %223 = vector.broadcast %222 : vector<1x64xf32> to vector<8x64xf32>
    %224 = arith.mulf %221, %223 : vector<8x64xf32>
    %c4_191 = arith.constant 4 : index
    %c0_192 = arith.constant 0 : index
    %c0_193 = arith.constant 0 : index
    %225 = vector.load %arg8[%c4_191, %c0_192, %c0_193] : memref<9x8x8xbf16, #tpu.memory_space<vmem>>, vector<1x8x8xbf16>
    %226 = vector.shape_cast %225 : vector<1x8x8xbf16> to vector<8x8xbf16>
    %227 = arith.truncf %224 : vector<8x64xf32> to vector<8x64xbf16>
    %cst_194 = arith.constant dense<0.000000e+00> : vector<8x64xf32>
    %228 = tpu.matmul %226, %227, %cst_194 {dimension_numbers = #tpu.dot_dimension_numbers<[1], [0], [0], [1], [0, 0, 1, 1], [], []>} : vector<8x8xbf16>, vector<8x64xbf16>, vector<8x64xf32> -> vector<8x64xf32>
    %229 = arith.addf %220, %228 : vector<8x64xf32>
    %c0_195 = arith.constant 0 : index
    %c129_196 = arith.constant 129 : index
    %230 = vector.load %arg13[%c0_195, %c129_196] : memref<8x320xf32, #tpu.memory_space<vmem>>, vector<8x64xf32>
    %c5_197 = arith.constant 5 : index
    %c0_198 = arith.constant 0 : index
    %231 = vector.load %arg4[%c5_197, %c0_198] : memref<9x64xf32, #tpu.memory_space<vmem>>, vector<1x64xf32>
    %232 = vector.broadcast %231 : vector<1x64xf32> to vector<8x64xf32>
    %233 = arith.mulf %230, %232 : vector<8x64xf32>
    %c5_199 = arith.constant 5 : index
    %c0_200 = arith.constant 0 : index
    %c0_201 = arith.constant 0 : index
    %234 = vector.load %arg8[%c5_199, %c0_200, %c0_201] : memref<9x8x8xbf16, #tpu.memory_space<vmem>>, vector<1x8x8xbf16>
    %235 = vector.shape_cast %234 : vector<1x8x8xbf16> to vector<8x8xbf16>
    %236 = arith.truncf %233 : vector<8x64xf32> to vector<8x64xbf16>
    %cst_202 = arith.constant dense<0.000000e+00> : vector<8x64xf32>
    %237 = tpu.matmul %235, %236, %cst_202 {dimension_numbers = #tpu.dot_dimension_numbers<[1], [0], [0], [1], [0, 0, 1, 1], [], []>} : vector<8x8xbf16>, vector<8x64xbf16>, vector<8x64xf32> -> vector<8x64xf32>
    %238 = arith.addf %229, %237 : vector<8x64xf32>
    %c0_203 = arith.constant 0 : index
    %c135_204 = arith.constant 135 : index
    %239 = vector.load %arg13[%c0_203, %c135_204] : memref<8x320xf32, #tpu.memory_space<vmem>>, vector<8x64xf32>
    %c6_205 = arith.constant 6 : index
    %c0_206 = arith.constant 0 : index
    %240 = vector.load %arg4[%c6_205, %c0_206] : memref<9x64xf32, #tpu.memory_space<vmem>>, vector<1x64xf32>
    %241 = vector.broadcast %240 : vector<1x64xf32> to vector<8x64xf32>
    %242 = arith.mulf %239, %241 : vector<8x64xf32>
    %c6_207 = arith.constant 6 : index
    %c0_208 = arith.constant 0 : index
    %c0_209 = arith.constant 0 : index
    %243 = vector.load %arg8[%c6_207, %c0_208, %c0_209] : memref<9x8x8xbf16, #tpu.memory_space<vmem>>, vector<1x8x8xbf16>
    %244 = vector.shape_cast %243 : vector<1x8x8xbf16> to vector<8x8xbf16>
    %245 = arith.truncf %242 : vector<8x64xf32> to vector<8x64xbf16>
    %cst_210 = arith.constant dense<0.000000e+00> : vector<8x64xf32>
    %246 = tpu.matmul %244, %245, %cst_210 {dimension_numbers = #tpu.dot_dimension_numbers<[1], [0], [0], [1], [0, 0, 1, 1], [], []>} : vector<8x8xbf16>, vector<8x64xbf16>, vector<8x64xf32> -> vector<8x64xf32>
    %247 = arith.addf %238, %246 : vector<8x64xf32>
    %c0_211 = arith.constant 0 : index
    %c136_212 = arith.constant 136 : index
    %248 = vector.load %arg13[%c0_211, %c136_212] : memref<8x320xf32, #tpu.memory_space<vmem>>, vector<8x64xf32>
    %c7_213 = arith.constant 7 : index
    %c0_214 = arith.constant 0 : index
    %249 = vector.load %arg4[%c7_213, %c0_214] : memref<9x64xf32, #tpu.memory_space<vmem>>, vector<1x64xf32>
    %250 = vector.broadcast %249 : vector<1x64xf32> to vector<8x64xf32>
    %251 = arith.mulf %248, %250 : vector<8x64xf32>
    %c7_215 = arith.constant 7 : index
    %c0_216 = arith.constant 0 : index
    %c0_217 = arith.constant 0 : index
    %252 = vector.load %arg8[%c7_215, %c0_216, %c0_217] : memref<9x8x8xbf16, #tpu.memory_space<vmem>>, vector<1x8x8xbf16>
    %253 = vector.shape_cast %252 : vector<1x8x8xbf16> to vector<8x8xbf16>
    %254 = arith.truncf %251 : vector<8x64xf32> to vector<8x64xbf16>
    %cst_218 = arith.constant dense<0.000000e+00> : vector<8x64xf32>
    %255 = tpu.matmul %253, %254, %cst_218 {dimension_numbers = #tpu.dot_dimension_numbers<[1], [0], [0], [1], [0, 0, 1, 1], [], []>} : vector<8x8xbf16>, vector<8x64xbf16>, vector<8x64xf32> -> vector<8x64xf32>
    %256 = arith.addf %247, %255 : vector<8x64xf32>
    %c0_219 = arith.constant 0 : index
    %c137_220 = arith.constant 137 : index
    %257 = vector.load %arg13[%c0_219, %c137_220] : memref<8x320xf32, #tpu.memory_space<vmem>>, vector<8x64xf32>
    %c8_221 = arith.constant 8 : index
    %c0_222 = arith.constant 0 : index
    %258 = vector.load %arg4[%c8_221, %c0_222] : memref<9x64xf32, #tpu.memory_space<vmem>>, vector<1x64xf32>
    %259 = vector.broadcast %258 : vector<1x64xf32> to vector<8x64xf32>
    %260 = arith.mulf %257, %259 : vector<8x64xf32>
    %c8_223 = arith.constant 8 : index
    %c0_224 = arith.constant 0 : index
    %c0_225 = arith.constant 0 : index
    %261 = vector.load %arg8[%c8_223, %c0_224, %c0_225] : memref<9x8x8xbf16, #tpu.memory_space<vmem>>, vector<1x8x8xbf16>
    %262 = vector.shape_cast %261 : vector<1x8x8xbf16> to vector<8x8xbf16>
    %263 = arith.truncf %260 : vector<8x64xf32> to vector<8x64xbf16>
    %cst_226 = arith.constant dense<0.000000e+00> : vector<8x64xf32>
    %264 = tpu.matmul %262, %263, %cst_226 {dimension_numbers = #tpu.dot_dimension_numbers<[1], [0], [0], [1], [0, 0, 1, 1], [], []>} : vector<8x8xbf16>, vector<8x64xbf16>, vector<8x64xf32> -> vector<8x64xf32>
    %265 = arith.addf %256, %264 : vector<8x64xf32>
    %266 = arith.addf %183, %265 : vector<8x64xf32>
    %c0_227 = arith.constant 0 : index
    %c0_228 = arith.constant 0 : index
    %267 = vector.load %arg9[%c0_227, %c0_228] : memref<8x1xf32, #tpu.memory_space<vmem>>, vector<8x1xf32>
    %268 = vector.broadcast %267 : vector<8x1xf32> to vector<8x64xf32>
    %269 = arith.addf %266, %268 : vector<8x64xf32>
    %c0_229 = arith.constant 0 : index
    %c0_230 = arith.constant 0 : index
    %c0_231 = arith.constant 0 : index
    %270 = vector.load %arg10[%c0_229, %c0_230, %c0_231] : memref<1x8x64xf32, #tpu.memory_space<vmem>>, vector<1x8x64xf32>
    %271 = vector.shape_cast %270 : vector<1x8x64xf32> to vector<8x64xf32>
    %272 = vector.shape_cast %269 : vector<8x64xf32> to vector<1x8x64xf32>
    tpu.vector_store %arg10[%c0_229, %c0_230, %c0_231], %272 {strides = array<i32>} : memref<1x8x64xf32, #tpu.memory_space<vmem>>, vector<1x8x64xf32>,
    return
  }
  func.func @transform_0(%arg0: i32) -> (i32, i32, i32) {
    %c0_i32 = arith.constant 0 : i32
    %c0_i32_0 = arith.constant 0 : i32
    %c0_i32_1 = arith.constant 0 : i32
    return %arg0, %c0_i32, %c0_i32_0 : i32, i32, i32
  }
  func.func @transform_1(%arg0: i32) -> (i32, i32, i32) {
    %c0_i32 = arith.constant 0 : i32
    %c0_i32_0 = arith.constant 0 : i32
    %c0_i32_1 = arith.constant 0 : i32
    return %arg0, %c0_i32, %c0_i32_0 : i32, i32, i32
  }
  func.func @transform_2(%arg0: i32) -> (i32, i32) {
    %c0_i32 = arith.constant 0 : i32
    %c0_i32_0 = arith.constant 0 : i32
    %c0_i32_1 = arith.constant 0 : i32
    return %c0_i32, %c0_i32_0 : i32, i32
  }
  func.func @transform_3(%arg0: i32) -> (i32, i32) {
    %c0_i32 = arith.constant 0 : i32
    %c0_i32_0 = arith.constant 0 : i32
    %c0_i32_1 = arith.constant 0 : i32
    return %c0_i32, %c0_i32_0 : i32, i32
  }
  func.func @transform_4(%arg0: i32) -> (i32, i32, i32) {
    %c0_i32 = arith.constant 0 : i32
    %c0_i32_0 = arith.constant 0 : i32
    %c0_i32_1 = arith.constant 0 : i32
    %c0_i32_2 = arith.constant 0 : i32
    return %c0_i32, %c0_i32_0, %c0_i32_1 : i32, i32, i32
  }
  func.func @transform_5(%arg0: i32) -> (i32, i32) {
    %c0_i32 = arith.constant 0 : i32
    %c0_i32_0 = arith.constant 0 : i32
    %c0_i32_1 = arith.constant 0 : i32
    return %c0_i32, %c0_i32_0 : i32, i32
  }
  func.func @transform_6(%arg0: i32) -> (i32, i32, i32) {
    %c0_i32 = arith.constant 0 : i32
    %c0_i32_0 = arith.constant 0 : i32
    %c0_i32_1 = arith.constant 0 : i32
    %c0_i32_2 = arith.constant 0 : i32
    return %c0_i32, %c0_i32_0, %c0_i32_1 : i32, i32, i32
  }
  func.func @transform_7(%arg0: i32) -> (i32, i32, i32) {
    %c0_i32 = arith.constant 0 : i32
    %c0_i32_0 = arith.constant 0 : i32
    %c0_i32_1 = arith.constant 0 : i32
    %c0_i32_2 = arith.constant 0 : i32
    return %c0_i32, %c0_i32_0, %c0_i32_1 : i32, i32, i32
  }
  func.func @transform_8(%arg0: i32) -> (i32, i32) {
    %c0_i32 = arith.constant 0 : i32
    %c0_i32_0 = arith.constant 0 : i32
    %c0_i32_1 = arith.constant 0 : i32
    return %c0_i32, %c0_i32_0 : i32, i32
  }
  func.func @transform_9(%arg0: i32) -> (i32, i32, i32) {
    %c0_i32 = arith.constant 0 : i32
    %c0_i32_0 = arith.constant 0 : i32
    %c0_i32_1 = arith.constant 0 : i32
    return %arg0, %c0_i32, %c0_i32_0 : i32, i32, i32
  }
}

module attributes {stable_mosaic.version = 11 : i64} {
  func.func @_up_block_kernel(%arg0: i32, %arg1: memref<1x8x64xf32, #tpu.memory_space<vmem>>, %arg2: memref<1x4x256xf32, #tpu.memory_space<vmem>>, %arg3: memref<64x256xf32, #tpu.memory_space<vmem>>, %arg4: memref<9x256xf32, #tpu.memory_space<vmem>>, %arg5: memref<9x8x8xbf16, #tpu.memory_space<vmem>>, %arg6: memref<8x1xf32, #tpu.memory_space<vmem>>, %arg7: memref<9x4x8xbf16, #tpu.memory_space<vmem>>, %arg8: memref<9x4x4xbf16, #tpu.memory_space<vmem>>, %arg9: memref<4x1xf32, #tpu.memory_space<vmem>>, %arg10: memref<1x4xbf16, #tpu.memory_space<vmem>>, %arg11: memref<1x1xf32, #tpu.memory_space<vmem>>, %arg12: memref<1x1x256xf32, #tpu.memory_space<vmem>>, %arg13: memref<8x512xf32, #tpu.memory_space<vmem>>, %arg14: memref<8x512xf32, #tpu.memory_space<vmem>>, %arg15: memref<4x512xf32, #tpu.memory_space<vmem>>) attributes {dimension_semantics = [#tpu.dimension_semantics<parallel>], iteration_bounds = array<i64: 2>, scalar_prefetch = 0 : i64, scratch_operands = 3 : i64, tpu.core_type = #tpu.core_type<tc>, window_params = [{transform_indices = @transform_0, window_bounds = array<i64: 1, 8, 64>}, {transform_indices = @transform_1, window_bounds = array<i64: 1, 4, 256>}, {pipeline_mode = #tpu.pipeline_mode<synchronous>, transform_indices = @transform_2, window_bounds = array<i64: 64, 256>}, {pipeline_mode = #tpu.pipeline_mode<synchronous>, transform_indices = @transform_3, window_bounds = array<i64: 9, 256>}, {pipeline_mode = #tpu.pipeline_mode<synchronous>, transform_indices = @transform_4, window_bounds = array<i64: 9, 8, 8>}, {pipeline_mode = #tpu.pipeline_mode<synchronous>, transform_indices = @transform_5, window_bounds = array<i64: 8, 1>}, {pipeline_mode = #tpu.pipeline_mode<synchronous>, transform_indices = @transform_6, window_bounds = array<i64: 9, 4, 8>}, {pipeline_mode = #tpu.pipeline_mode<synchronous>, transform_indices = @transform_7, window_bounds = array<i64: 9, 4, 4>}, {pipeline_mode = #tpu.pipeline_mode<synchronous>, transform_indices = @transform_8, window_bounds = array<i64: 4, 1>}, {pipeline_mode = #tpu.pipeline_mode<synchronous>, transform_indices = @transform_9, window_bounds = array<i64: 1, 4>}, {pipeline_mode = #tpu.pipeline_mode<synchronous>, transform_indices = @transform_10, window_bounds = array<i64: 1, 1>}, {transform_indices = @transform_11, window_bounds = array<i64: 1, 1, 256>}]} {
    %c0 = arith.constant 0 : index
    %c0_0 = arith.constant 0 : index
    %c0_1 = arith.constant 0 : index
    %0 = vector.load %arg1[%c0, %c0_0, %c0_1] : memref<1x8x64xf32, #tpu.memory_space<vmem>>, vector<1x8x64xf32>
    %1 = vector.shape_cast %0 : vector<1x8x64xf32> to vector<8x64xf32>
    %c0_2 = arith.constant 0 : index
    %c0_3 = arith.constant 0 : index
    %2 = vector.load %arg3[%c0_2, %c0_3] : memref<64x256xf32, #tpu.memory_space<vmem>>, vector<64x256xf32>
    %cst = arith.constant dense<0.000000e+00> : vector<8x256xf32>
    %3 = tpu.matmul %1, %2, %cst {dimension_numbers = #tpu.dot_dimension_numbers<[1], [0], [0], [1], [0, 0, 1, 1], [], []>} : vector<8x64xf32>, vector<64x256xf32>, vector<8x256xf32> -> vector<8x256xf32>
    %cst_4 = arith.constant 0.000000e+00 : f32
    %4 = vector.broadcast %cst_4 : f32 to vector<8x512xf32>
    %c0_5 = arith.constant 0 : index
    %c0_6 = arith.constant 0 : index
    %5 = vector.load %arg13[%c0_5, %c0_6] : memref<8x512xf32, #tpu.memory_space<vmem>>, vector<8x512xf32>
    tpu.vector_store %arg13[%c0_5, %c0_6], %4 {strides = array<i32>} : memref<8x512xf32, #tpu.memory_space<vmem>>, vector<8x512xf32>,
    %c0_7 = arith.constant 0 : index
    %c128 = arith.constant 128 : index
    %6 = vector.load %arg13[%c0_7, %c128] : memref<8x512xf32, #tpu.memory_space<vmem>>, vector<8x256xf32>
    tpu.vector_store %arg13[%c0_7, %c128], %3 {strides = array<i32>} : memref<8x512xf32, #tpu.memory_space<vmem>>, vector<8x256xf32>,
    %cst_8 = arith.constant 0.000000e+00 : f32
    %7 = vector.broadcast %cst_8 : f32 to vector<8x256xf32>
    %c0_9 = arith.constant 0 : index
    %c111 = arith.constant 111 : index
    %8 = vector.load %arg13[%c0_9, %c111] : memref<8x512xf32, #tpu.memory_space<vmem>>, vector<8x256xf32>
    %c0_10 = arith.constant 0 : index
    %c0_11 = arith.constant 0 : index
    %9 = vector.load %arg4[%c0_10, %c0_11] : memref<9x256xf32, #tpu.memory_space<vmem>>, vector<1x256xf32>
    %10 = vector.broadcast %9 : vector<1x256xf32> to vector<8x256xf32>
    %11 = arith.mulf %8, %10 : vector<8x256xf32>
    %c0_12 = arith.constant 0 : index
    %c0_13 = arith.constant 0 : index
    %c0_14 = arith.constant 0 : index
    %12 = vector.load %arg5[%c0_12, %c0_13, %c0_14] : memref<9x8x8xbf16, #tpu.memory_space<vmem>>, vector<1x8x8xbf16>
    %13 = vector.shape_cast %12 : vector<1x8x8xbf16> to vector<8x8xbf16>
    %14 = arith.truncf %11 : vector<8x256xf32> to vector<8x256xbf16>
    %cst_15 = arith.constant dense<0.000000e+00> : vector<8x256xf32>
    %15 = tpu.matmul %13, %14, %cst_15 {dimension_numbers = #tpu.dot_dimension_numbers<[1], [0], [0], [1], [0, 0, 1, 1], [], []>} : vector<8x8xbf16>, vector<8x256xbf16>, vector<8x256xf32> -> vector<8x256xf32>
    %16 = arith.addf %7, %15 : vector<8x256xf32>
    %c0_16 = arith.constant 0 : index
    %c112 = arith.constant 112 : index
    %17 = vector.load %arg13[%c0_16, %c112] : memref<8x512xf32, #tpu.memory_space<vmem>>, vector<8x256xf32>
    %c1 = arith.constant 1 : index
    %c0_17 = arith.constant 0 : index
    %18 = vector.load %arg4[%c1, %c0_17] : memref<9x256xf32, #tpu.memory_space<vmem>>, vector<1x256xf32>
    %19 = vector.broadcast %18 : vector<1x256xf32> to vector<8x256xf32>
    %20 = arith.mulf %17, %19 : vector<8x256xf32>
    %c1_18 = arith.constant 1 : index
    %c0_19 = arith.constant 0 : index
    %c0_20 = arith.constant 0 : index
    %21 = vector.load %arg5[%c1_18, %c0_19, %c0_20] : memref<9x8x8xbf16, #tpu.memory_space<vmem>>, vector<1x8x8xbf16>
    %22 = vector.shape_cast %21 : vector<1x8x8xbf16> to vector<8x8xbf16>
    %23 = arith.truncf %20 : vector<8x256xf32> to vector<8x256xbf16>
    %cst_21 = arith.constant dense<0.000000e+00> : vector<8x256xf32>
    %24 = tpu.matmul %22, %23, %cst_21 {dimension_numbers = #tpu.dot_dimension_numbers<[1], [0], [0], [1], [0, 0, 1, 1], [], []>} : vector<8x8xbf16>, vector<8x256xbf16>, vector<8x256xf32> -> vector<8x256xf32>
    %25 = arith.addf %16, %24 : vector<8x256xf32>
    %c0_22 = arith.constant 0 : index
    %c113 = arith.constant 113 : index
    %26 = vector.load %arg13[%c0_22, %c113] : memref<8x512xf32, #tpu.memory_space<vmem>>, vector<8x256xf32>
    %c2 = arith.constant 2 : index
    %c0_23 = arith.constant 0 : index
    %27 = vector.load %arg4[%c2, %c0_23] : memref<9x256xf32, #tpu.memory_space<vmem>>, vector<1x256xf32>
    %28 = vector.broadcast %27 : vector<1x256xf32> to vector<8x256xf32>
    %29 = arith.mulf %26, %28 : vector<8x256xf32>
    %c2_24 = arith.constant 2 : index
    %c0_25 = arith.constant 0 : index
    %c0_26 = arith.constant 0 : index
    %30 = vector.load %arg5[%c2_24, %c0_25, %c0_26] : memref<9x8x8xbf16, #tpu.memory_space<vmem>>, vector<1x8x8xbf16>
    %31 = vector.shape_cast %30 : vector<1x8x8xbf16> to vector<8x8xbf16>
    %32 = arith.truncf %29 : vector<8x256xf32> to vector<8x256xbf16>
    %cst_27 = arith.constant dense<0.000000e+00> : vector<8x256xf32>
    %33 = tpu.matmul %31, %32, %cst_27 {dimension_numbers = #tpu.dot_dimension_numbers<[1], [0], [0], [1], [0, 0, 1, 1], [], []>} : vector<8x8xbf16>, vector<8x256xbf16>, vector<8x256xf32> -> vector<8x256xf32>
    %34 = arith.addf %25, %33 : vector<8x256xf32>
    %c0_28 = arith.constant 0 : index
    %c127 = arith.constant 127 : index
    %35 = vector.load %arg13[%c0_28, %c127] : memref<8x512xf32, #tpu.memory_space<vmem>>, vector<8x256xf32>
    %c3 = arith.constant 3 : index
    %c0_29 = arith.constant 0 : index
    %36 = vector.load %arg4[%c3, %c0_29] : memref<9x256xf32, #tpu.memory_space<vmem>>, vector<1x256xf32>
    %37 = vector.broadcast %36 : vector<1x256xf32> to vector<8x256xf32>
    %38 = arith.mulf %35, %37 : vector<8x256xf32>
    %c3_30 = arith.constant 3 : index
    %c0_31 = arith.constant 0 : index
    %c0_32 = arith.constant 0 : index
    %39 = vector.load %arg5[%c3_30, %c0_31, %c0_32] : memref<9x8x8xbf16, #tpu.memory_space<vmem>>, vector<1x8x8xbf16>
    %40 = vector.shape_cast %39 : vector<1x8x8xbf16> to vector<8x8xbf16>
    %41 = arith.truncf %38 : vector<8x256xf32> to vector<8x256xbf16>
    %cst_33 = arith.constant dense<0.000000e+00> : vector<8x256xf32>
    %42 = tpu.matmul %40, %41, %cst_33 {dimension_numbers = #tpu.dot_dimension_numbers<[1], [0], [0], [1], [0, 0, 1, 1], [], []>} : vector<8x8xbf16>, vector<8x256xbf16>, vector<8x256xf32> -> vector<8x256xf32>
    %43 = arith.addf %34, %42 : vector<8x256xf32>
    %c0_34 = arith.constant 0 : index
    %c128_35 = arith.constant 128 : index
    %44 = vector.load %arg13[%c0_34, %c128_35] : memref<8x512xf32, #tpu.memory_space<vmem>>, vector<8x256xf32>
    %c4 = arith.constant 4 : index
    %c0_36 = arith.constant 0 : index
    %45 = vector.load %arg4[%c4, %c0_36] : memref<9x256xf32, #tpu.memory_space<vmem>>, vector<1x256xf32>
    %46 = vector.broadcast %45 : vector<1x256xf32> to vector<8x256xf32>
    %47 = arith.mulf %44, %46 : vector<8x256xf32>
    %c4_37 = arith.constant 4 : index
    %c0_38 = arith.constant 0 : index
    %c0_39 = arith.constant 0 : index
    %48 = vector.load %arg5[%c4_37, %c0_38, %c0_39] : memref<9x8x8xbf16, #tpu.memory_space<vmem>>, vector<1x8x8xbf16>
    %49 = vector.shape_cast %48 : vector<1x8x8xbf16> to vector<8x8xbf16>
    %50 = arith.truncf %47 : vector<8x256xf32> to vector<8x256xbf16>
    %cst_40 = arith.constant dense<0.000000e+00> : vector<8x256xf32>
    %51 = tpu.matmul %49, %50, %cst_40 {dimension_numbers = #tpu.dot_dimension_numbers<[1], [0], [0], [1], [0, 0, 1, 1], [], []>} : vector<8x8xbf16>, vector<8x256xbf16>, vector<8x256xf32> -> vector<8x256xf32>
    %52 = arith.addf %43, %51 : vector<8x256xf32>
    %c0_41 = arith.constant 0 : index
    %c129 = arith.constant 129 : index
    %53 = vector.load %arg13[%c0_41, %c129] : memref<8x512xf32, #tpu.memory_space<vmem>>, vector<8x256xf32>
    %c5 = arith.constant 5 : index
    %c0_42 = arith.constant 0 : index
    %54 = vector.load %arg4[%c5, %c0_42] : memref<9x256xf32, #tpu.memory_space<vmem>>, vector<1x256xf32>
    %55 = vector.broadcast %54 : vector<1x256xf32> to vector<8x256xf32>
    %56 = arith.mulf %53, %55 : vector<8x256xf32>
    %c5_43 = arith.constant 5 : index
    %c0_44 = arith.constant 0 : index
    %c0_45 = arith.constant 0 : index
    %57 = vector.load %arg5[%c5_43, %c0_44, %c0_45] : memref<9x8x8xbf16, #tpu.memory_space<vmem>>, vector<1x8x8xbf16>
    %58 = vector.shape_cast %57 : vector<1x8x8xbf16> to vector<8x8xbf16>
    %59 = arith.truncf %56 : vector<8x256xf32> to vector<8x256xbf16>
    %cst_46 = arith.constant dense<0.000000e+00> : vector<8x256xf32>
    %60 = tpu.matmul %58, %59, %cst_46 {dimension_numbers = #tpu.dot_dimension_numbers<[1], [0], [0], [1], [0, 0, 1, 1], [], []>} : vector<8x8xbf16>, vector<8x256xbf16>, vector<8x256xf32> -> vector<8x256xf32>
    %61 = arith.addf %52, %60 : vector<8x256xf32>
    %c0_47 = arith.constant 0 : index
    %c143 = arith.constant 143 : index
    %62 = vector.load %arg13[%c0_47, %c143] : memref<8x512xf32, #tpu.memory_space<vmem>>, vector<8x256xf32>
    %c6 = arith.constant 6 : index
    %c0_48 = arith.constant 0 : index
    %63 = vector.load %arg4[%c6, %c0_48] : memref<9x256xf32, #tpu.memory_space<vmem>>, vector<1x256xf32>
    %64 = vector.broadcast %63 : vector<1x256xf32> to vector<8x256xf32>
    %65 = arith.mulf %62, %64 : vector<8x256xf32>
    %c6_49 = arith.constant 6 : index
    %c0_50 = arith.constant 0 : index
    %c0_51 = arith.constant 0 : index
    %66 = vector.load %arg5[%c6_49, %c0_50, %c0_51] : memref<9x8x8xbf16, #tpu.memory_space<vmem>>, vector<1x8x8xbf16>
    %67 = vector.shape_cast %66 : vector<1x8x8xbf16> to vector<8x8xbf16>
    %68 = arith.truncf %65 : vector<8x256xf32> to vector<8x256xbf16>
    %cst_52 = arith.constant dense<0.000000e+00> : vector<8x256xf32>
    %69 = tpu.matmul %67, %68, %cst_52 {dimension_numbers = #tpu.dot_dimension_numbers<[1], [0], [0], [1], [0, 0, 1, 1], [], []>} : vector<8x8xbf16>, vector<8x256xbf16>, vector<8x256xf32> -> vector<8x256xf32>
    %70 = arith.addf %61, %69 : vector<8x256xf32>
    %c0_53 = arith.constant 0 : index
    %c144 = arith.constant 144 : index
    %71 = vector.load %arg13[%c0_53, %c144] : memref<8x512xf32, #tpu.memory_space<vmem>>, vector<8x256xf32>
    %c7 = arith.constant 7 : index
    %c0_54 = arith.constant 0 : index
    %72 = vector.load %arg4[%c7, %c0_54] : memref<9x256xf32, #tpu.memory_space<vmem>>, vector<1x256xf32>
    %73 = vector.broadcast %72 : vector<1x256xf32> to vector<8x256xf32>
    %74 = arith.mulf %71, %73 : vector<8x256xf32>
    %c7_55 = arith.constant 7 : index
    %c0_56 = arith.constant 0 : index
    %c0_57 = arith.constant 0 : index
    %75 = vector.load %arg5[%c7_55, %c0_56, %c0_57] : memref<9x8x8xbf16, #tpu.memory_space<vmem>>, vector<1x8x8xbf16>
    %76 = vector.shape_cast %75 : vector<1x8x8xbf16> to vector<8x8xbf16>
    %77 = arith.truncf %74 : vector<8x256xf32> to vector<8x256xbf16>
    %cst_58 = arith.constant dense<0.000000e+00> : vector<8x256xf32>
    %78 = tpu.matmul %76, %77, %cst_58 {dimension_numbers = #tpu.dot_dimension_numbers<[1], [0], [0], [1], [0, 0, 1, 1], [], []>} : vector<8x8xbf16>, vector<8x256xbf16>, vector<8x256xf32> -> vector<8x256xf32>
    %79 = arith.addf %70, %78 : vector<8x256xf32>
    %c0_59 = arith.constant 0 : index
    %c145 = arith.constant 145 : index
    %80 = vector.load %arg13[%c0_59, %c145] : memref<8x512xf32, #tpu.memory_space<vmem>>, vector<8x256xf32>
    %c8 = arith.constant 8 : index
    %c0_60 = arith.constant 0 : index
    %81 = vector.load %arg4[%c8, %c0_60] : memref<9x256xf32, #tpu.memory_space<vmem>>, vector<1x256xf32>
    %82 = vector.broadcast %81 : vector<1x256xf32> to vector<8x256xf32>
    %83 = arith.mulf %80, %82 : vector<8x256xf32>
    %c8_61 = arith.constant 8 : index
    %c0_62 = arith.constant 0 : index
    %c0_63 = arith.constant 0 : index
    %84 = vector.load %arg5[%c8_61, %c0_62, %c0_63] : memref<9x8x8xbf16, #tpu.memory_space<vmem>>, vector<1x8x8xbf16>
    %85 = vector.shape_cast %84 : vector<1x8x8xbf16> to vector<8x8xbf16>
    %86 = arith.truncf %83 : vector<8x256xf32> to vector<8x256xbf16>
    %cst_64 = arith.constant dense<0.000000e+00> : vector<8x256xf32>
    %87 = tpu.matmul %85, %86, %cst_64 {dimension_numbers = #tpu.dot_dimension_numbers<[1], [0], [0], [1], [0, 0, 1, 1], [], []>} : vector<8x8xbf16>, vector<8x256xbf16>, vector<8x256xf32> -> vector<8x256xf32>
    %88 = arith.addf %79, %87 : vector<8x256xf32>
    %c0_65 = arith.constant 0 : index
    %c0_66 = arith.constant 0 : index
    %89 = vector.load %arg6[%c0_65, %c0_66] : memref<8x1xf32, #tpu.memory_space<vmem>>, vector<8x1xf32>
    %90 = vector.broadcast %89 : vector<8x1xf32> to vector<8x256xf32>
    %91 = arith.addf %88, %90 : vector<8x256xf32>
    %cst_67 = arith.constant 0.000000e+00 : f32
    %92 = vector.broadcast %cst_67 : f32 to vector<8x256xf32>
    %93 = arith.maximumf %91, %92 : vector<8x256xf32>
    %cst_68 = arith.constant 0.000000e+00 : f32
    %94 = vector.broadcast %cst_68 : f32 to vector<8x512xf32>
    %c0_69 = arith.constant 0 : index
    %c0_70 = arith.constant 0 : index
    %95 = vector.load %arg14[%c0_69, %c0_70] : memref<8x512xf32, #tpu.memory_space<vmem>>, vector<8x512xf32>
    tpu.vector_store %arg14[%c0_69, %c0_70], %94 {strides = array<i32>} : memref<8x512xf32, #tpu.memory_space<vmem>>, vector<8x512xf32>,
    %c0_71 = arith.constant 0 : index
    %c128_72 = arith.constant 128 : index
    %96 = vector.load %arg14[%c0_71, %c128_72] : memref<8x512xf32, #tpu.memory_space<vmem>>, vector<8x256xf32>
    tpu.vector_store %arg14[%c0_71, %c128_72], %93 {strides = array<i32>} : memref<8x512xf32, #tpu.memory_space<vmem>>, vector<8x256xf32>,
    %cst_73 = arith.constant 0.000000e+00 : f32
    %97 = vector.broadcast %cst_73 : f32 to vector<4x512xf32>
    %c0_74 = arith.constant 0 : index
    %c0_75 = arith.constant 0 : index
    %98 = vector.load %arg15[%c0_74, %c0_75] : memref<4x512xf32, #tpu.memory_space<vmem>>, vector<4x512xf32>
    tpu.vector_store %arg15[%c0_74, %c0_75], %97 {strides = array<i32>} : memref<4x512xf32, #tpu.memory_space<vmem>>, vector<4x512xf32>,
    %c0_76 = arith.constant 0 : index
    %c0_77 = arith.constant 0 : index
    %c0_78 = arith.constant 0 : index
    %99 = vector.load %arg2[%c0_76, %c0_77, %c0_78] : memref<1x4x256xf32, #tpu.memory_space<vmem>>, vector<1x4x256xf32>
    %100 = vector.shape_cast %99 : vector<1x4x256xf32> to vector<4x256xf32>
    %c0_79 = arith.constant 0 : index
    %c128_80 = arith.constant 128 : index
    %101 = vector.load %arg15[%c0_79, %c128_80] : memref<4x512xf32, #tpu.memory_space<vmem>>, vector<4x256xf32>
    tpu.vector_store %arg15[%c0_79, %c128_80], %100 {strides = array<i32>} : memref<4x512xf32, #tpu.memory_space<vmem>>, vector<4x256xf32>,
    %cst_81 = arith.constant 0.000000e+00 : f32
    %102 = vector.broadcast %cst_81 : f32 to vector<4x256xf32>
    %c0_82 = arith.constant 0 : index
    %c111_83 = arith.constant 111 : index
    %103 = vector.load %arg14[%c0_82, %c111_83] : memref<8x512xf32, #tpu.memory_space<vmem>>, vector<8x256xf32>
    %c0_84 = arith.constant 0 : index
    %c0_85 = arith.constant 0 : index
    %104 = vector.load %arg4[%c0_84, %c0_85] : memref<9x256xf32, #tpu.memory_space<vmem>>, vector<1x256xf32>
    %105 = vector.broadcast %104 : vector<1x256xf32> to vector<8x256xf32>
    %106 = arith.mulf %103, %105 : vector<8x256xf32>
    %c0_86 = arith.constant 0 : index
    %c0_87 = arith.constant 0 : index
    %c0_88 = arith.constant 0 : index
    %107 = vector.load %arg7[%c0_86, %c0_87, %c0_88] : memref<9x4x8xbf16, #tpu.memory_space<vmem>>, vector<1x4x8xbf16>
    %108 = vector.shape_cast %107 : vector<1x4x8xbf16> to vector<4x8xbf16>
    %109 = arith.truncf %106 : vector<8x256xf32> to vector<8x256xbf16>
    %cst_89 = arith.constant dense<0.000000e+00> : vector<4x256xf32>
    %110 = tpu.matmul %108, %109, %cst_89 {dimension_numbers = #tpu.dot_dimension_numbers<[1], [0], [0], [1], [0, 0, 1, 1], [], []>} : vector<4x8xbf16>, vector<8x256xbf16>, vector<4x256xf32> -> vector<4x256xf32>
    %111 = arith.addf %102, %110 : vector<4x256xf32>
    %c0_90 = arith.constant 0 : index
    %c112_91 = arith.constant 112 : index
    %112 = vector.load %arg14[%c0_90, %c112_91] : memref<8x512xf32, #tpu.memory_space<vmem>>, vector<8x256xf32>
    %c1_92 = arith.constant 1 : index
    %c0_93 = arith.constant 0 : index
    %113 = vector.load %arg4[%c1_92, %c0_93] : memref<9x256xf32, #tpu.memory_space<vmem>>, vector<1x256xf32>
    %114 = vector.broadcast %113 : vector<1x256xf32> to vector<8x256xf32>
    %115 = arith.mulf %112, %114 : vector<8x256xf32>
    %c1_94 = arith.constant 1 : index
    %c0_95 = arith.constant 0 : index
    %c0_96 = arith.constant 0 : index
    %116 = vector.load %arg7[%c1_94, %c0_95, %c0_96] : memref<9x4x8xbf16, #tpu.memory_space<vmem>>, vector<1x4x8xbf16>
    %117 = vector.shape_cast %116 : vector<1x4x8xbf16> to vector<4x8xbf16>
    %118 = arith.truncf %115 : vector<8x256xf32> to vector<8x256xbf16>
    %cst_97 = arith.constant dense<0.000000e+00> : vector<4x256xf32>
    %119 = tpu.matmul %117, %118, %cst_97 {dimension_numbers = #tpu.dot_dimension_numbers<[1], [0], [0], [1], [0, 0, 1, 1], [], []>} : vector<4x8xbf16>, vector<8x256xbf16>, vector<4x256xf32> -> vector<4x256xf32>
    %120 = arith.addf %111, %119 : vector<4x256xf32>
    %c0_98 = arith.constant 0 : index
    %c113_99 = arith.constant 113 : index
    %121 = vector.load %arg14[%c0_98, %c113_99] : memref<8x512xf32, #tpu.memory_space<vmem>>, vector<8x256xf32>
    %c2_100 = arith.constant 2 : index
    %c0_101 = arith.constant 0 : index
    %122 = vector.load %arg4[%c2_100, %c0_101] : memref<9x256xf32, #tpu.memory_space<vmem>>, vector<1x256xf32>
    %123 = vector.broadcast %122 : vector<1x256xf32> to vector<8x256xf32>
    %124 = arith.mulf %121, %123 : vector<8x256xf32>
    %c2_102 = arith.constant 2 : index
    %c0_103 = arith.constant 0 : index
    %c0_104 = arith.constant 0 : index
    %125 = vector.load %arg7[%c2_102, %c0_103, %c0_104] : memref<9x4x8xbf16, #tpu.memory_space<vmem>>, vector<1x4x8xbf16>
    %126 = vector.shape_cast %125 : vector<1x4x8xbf16> to vector<4x8xbf16>
    %127 = arith.truncf %124 : vector<8x256xf32> to vector<8x256xbf16>
    %cst_105 = arith.constant dense<0.000000e+00> : vector<4x256xf32>
    %128 = tpu.matmul %126, %127, %cst_105 {dimension_numbers = #tpu.dot_dimension_numbers<[1], [0], [0], [1], [0, 0, 1, 1], [], []>} : vector<4x8xbf16>, vector<8x256xbf16>, vector<4x256xf32> -> vector<4x256xf32>
    %129 = arith.addf %120, %128 : vector<4x256xf32>
    %c0_106 = arith.constant 0 : index
    %c127_107 = arith.constant 127 : index
    %130 = vector.load %arg14[%c0_106, %c127_107] : memref<8x512xf32, #tpu.memory_space<vmem>>, vector<8x256xf32>
    %c3_108 = arith.constant 3 : index
    %c0_109 = arith.constant 0 : index
    %131 = vector.load %arg4[%c3_108, %c0_109] : memref<9x256xf32, #tpu.memory_space<vmem>>, vector<1x256xf32>
    %132 = vector.broadcast %131 : vector<1x256xf32> to vector<8x256xf32>
    %133 = arith.mulf %130, %132 : vector<8x256xf32>
    %c3_110 = arith.constant 3 : index
    %c0_111 = arith.constant 0 : index
    %c0_112 = arith.constant 0 : index
    %134 = vector.load %arg7[%c3_110, %c0_111, %c0_112] : memref<9x4x8xbf16, #tpu.memory_space<vmem>>, vector<1x4x8xbf16>
    %135 = vector.shape_cast %134 : vector<1x4x8xbf16> to vector<4x8xbf16>
    %136 = arith.truncf %133 : vector<8x256xf32> to vector<8x256xbf16>
    %cst_113 = arith.constant dense<0.000000e+00> : vector<4x256xf32>
    %137 = tpu.matmul %135, %136, %cst_113 {dimension_numbers = #tpu.dot_dimension_numbers<[1], [0], [0], [1], [0, 0, 1, 1], [], []>} : vector<4x8xbf16>, vector<8x256xbf16>, vector<4x256xf32> -> vector<4x256xf32>
    %138 = arith.addf %129, %137 : vector<4x256xf32>
    %c0_114 = arith.constant 0 : index
    %c128_115 = arith.constant 128 : index
    %139 = vector.load %arg14[%c0_114, %c128_115] : memref<8x512xf32, #tpu.memory_space<vmem>>, vector<8x256xf32>
    %c4_116 = arith.constant 4 : index
    %c0_117 = arith.constant 0 : index
    %140 = vector.load %arg4[%c4_116, %c0_117] : memref<9x256xf32, #tpu.memory_space<vmem>>, vector<1x256xf32>
    %141 = vector.broadcast %140 : vector<1x256xf32> to vector<8x256xf32>
    %142 = arith.mulf %139, %141 : vector<8x256xf32>
    %c4_118 = arith.constant 4 : index
    %c0_119 = arith.constant 0 : index
    %c0_120 = arith.constant 0 : index
    %143 = vector.load %arg7[%c4_118, %c0_119, %c0_120] : memref<9x4x8xbf16, #tpu.memory_space<vmem>>, vector<1x4x8xbf16>
    %144 = vector.shape_cast %143 : vector<1x4x8xbf16> to vector<4x8xbf16>
    %145 = arith.truncf %142 : vector<8x256xf32> to vector<8x256xbf16>
    %cst_121 = arith.constant dense<0.000000e+00> : vector<4x256xf32>
    %146 = tpu.matmul %144, %145, %cst_121 {dimension_numbers = #tpu.dot_dimension_numbers<[1], [0], [0], [1], [0, 0, 1, 1], [], []>} : vector<4x8xbf16>, vector<8x256xbf16>, vector<4x256xf32> -> vector<4x256xf32>
    %147 = arith.addf %138, %146 : vector<4x256xf32>
    %c0_122 = arith.constant 0 : index
    %c129_123 = arith.constant 129 : index
    %148 = vector.load %arg14[%c0_122, %c129_123] : memref<8x512xf32, #tpu.memory_space<vmem>>, vector<8x256xf32>
    %c5_124 = arith.constant 5 : index
    %c0_125 = arith.constant 0 : index
    %149 = vector.load %arg4[%c5_124, %c0_125] : memref<9x256xf32, #tpu.memory_space<vmem>>, vector<1x256xf32>
    %150 = vector.broadcast %149 : vector<1x256xf32> to vector<8x256xf32>
    %151 = arith.mulf %148, %150 : vector<8x256xf32>
    %c5_126 = arith.constant 5 : index
    %c0_127 = arith.constant 0 : index
    %c0_128 = arith.constant 0 : index
    %152 = vector.load %arg7[%c5_126, %c0_127, %c0_128] : memref<9x4x8xbf16, #tpu.memory_space<vmem>>, vector<1x4x8xbf16>
    %153 = vector.shape_cast %152 : vector<1x4x8xbf16> to vector<4x8xbf16>
    %154 = arith.truncf %151 : vector<8x256xf32> to vector<8x256xbf16>
    %cst_129 = arith.constant dense<0.000000e+00> : vector<4x256xf32>
    %155 = tpu.matmul %153, %154, %cst_129 {dimension_numbers = #tpu.dot_dimension_numbers<[1], [0], [0], [1], [0, 0, 1, 1], [], []>} : vector<4x8xbf16>, vector<8x256xbf16>, vector<4x256xf32> -> vector<4x256xf32>
    %156 = arith.addf %147, %155 : vector<4x256xf32>
    %c0_130 = arith.constant 0 : index
    %c143_131 = arith.constant 143 : index
    %157 = vector.load %arg14[%c0_130, %c143_131] : memref<8x512xf32, #tpu.memory_space<vmem>>, vector<8x256xf32>
    %c6_132 = arith.constant 6 : index
    %c0_133 = arith.constant 0 : index
    %158 = vector.load %arg4[%c6_132, %c0_133] : memref<9x256xf32, #tpu.memory_space<vmem>>, vector<1x256xf32>
    %159 = vector.broadcast %158 : vector<1x256xf32> to vector<8x256xf32>
    %160 = arith.mulf %157, %159 : vector<8x256xf32>
    %c6_134 = arith.constant 6 : index
    %c0_135 = arith.constant 0 : index
    %c0_136 = arith.constant 0 : index
    %161 = vector.load %arg7[%c6_134, %c0_135, %c0_136] : memref<9x4x8xbf16, #tpu.memory_space<vmem>>, vector<1x4x8xbf16>
    %162 = vector.shape_cast %161 : vector<1x4x8xbf16> to vector<4x8xbf16>
    %163 = arith.truncf %160 : vector<8x256xf32> to vector<8x256xbf16>
    %cst_137 = arith.constant dense<0.000000e+00> : vector<4x256xf32>
    %164 = tpu.matmul %162, %163, %cst_137 {dimension_numbers = #tpu.dot_dimension_numbers<[1], [0], [0], [1], [0, 0, 1, 1], [], []>} : vector<4x8xbf16>, vector<8x256xbf16>, vector<4x256xf32> -> vector<4x256xf32>
    %165 = arith.addf %156, %164 : vector<4x256xf32>
    %c0_138 = arith.constant 0 : index
    %c144_139 = arith.constant 144 : index
    %166 = vector.load %arg14[%c0_138, %c144_139] : memref<8x512xf32, #tpu.memory_space<vmem>>, vector<8x256xf32>
    %c7_140 = arith.constant 7 : index
    %c0_141 = arith.constant 0 : index
    %167 = vector.load %arg4[%c7_140, %c0_141] : memref<9x256xf32, #tpu.memory_space<vmem>>, vector<1x256xf32>
    %168 = vector.broadcast %167 : vector<1x256xf32> to vector<8x256xf32>
    %169 = arith.mulf %166, %168 : vector<8x256xf32>
    %c7_142 = arith.constant 7 : index
    %c0_143 = arith.constant 0 : index
    %c0_144 = arith.constant 0 : index
    %170 = vector.load %arg7[%c7_142, %c0_143, %c0_144] : memref<9x4x8xbf16, #tpu.memory_space<vmem>>, vector<1x4x8xbf16>
    %171 = vector.shape_cast %170 : vector<1x4x8xbf16> to vector<4x8xbf16>
    %172 = arith.truncf %169 : vector<8x256xf32> to vector<8x256xbf16>
    %cst_145 = arith.constant dense<0.000000e+00> : vector<4x256xf32>
    %173 = tpu.matmul %171, %172, %cst_145 {dimension_numbers = #tpu.dot_dimension_numbers<[1], [0], [0], [1], [0, 0, 1, 1], [], []>} : vector<4x8xbf16>, vector<8x256xbf16>, vector<4x256xf32> -> vector<4x256xf32>
    %174 = arith.addf %165, %173 : vector<4x256xf32>
    %c0_146 = arith.constant 0 : index
    %c145_147 = arith.constant 145 : index
    %175 = vector.load %arg14[%c0_146, %c145_147] : memref<8x512xf32, #tpu.memory_space<vmem>>, vector<8x256xf32>
    %c8_148 = arith.constant 8 : index
    %c0_149 = arith.constant 0 : index
    %176 = vector.load %arg4[%c8_148, %c0_149] : memref<9x256xf32, #tpu.memory_space<vmem>>, vector<1x256xf32>
    %177 = vector.broadcast %176 : vector<1x256xf32> to vector<8x256xf32>
    %178 = arith.mulf %175, %177 : vector<8x256xf32>
    %c8_150 = arith.constant 8 : index
    %c0_151 = arith.constant 0 : index
    %c0_152 = arith.constant 0 : index
    %179 = vector.load %arg7[%c8_150, %c0_151, %c0_152] : memref<9x4x8xbf16, #tpu.memory_space<vmem>>, vector<1x4x8xbf16>
    %180 = vector.shape_cast %179 : vector<1x4x8xbf16> to vector<4x8xbf16>
    %181 = arith.truncf %178 : vector<8x256xf32> to vector<8x256xbf16>
    %cst_153 = arith.constant dense<0.000000e+00> : vector<4x256xf32>
    %182 = tpu.matmul %180, %181, %cst_153 {dimension_numbers = #tpu.dot_dimension_numbers<[1], [0], [0], [1], [0, 0, 1, 1], [], []>} : vector<4x8xbf16>, vector<8x256xbf16>, vector<4x256xf32> -> vector<4x256xf32>
    %183 = arith.addf %174, %182 : vector<4x256xf32>
    %cst_154 = arith.constant 0.000000e+00 : f32
    %184 = vector.broadcast %cst_154 : f32 to vector<4x256xf32>
    %c0_155 = arith.constant 0 : index
    %c111_156 = arith.constant 111 : index
    %185 = vector.load %arg15[%c0_155, %c111_156] : memref<4x512xf32, #tpu.memory_space<vmem>>, vector<4x256xf32>
    %c0_157 = arith.constant 0 : index
    %c0_158 = arith.constant 0 : index
    %186 = vector.load %arg4[%c0_157, %c0_158] : memref<9x256xf32, #tpu.memory_space<vmem>>, vector<1x256xf32>
    %187 = vector.broadcast %186 : vector<1x256xf32> to vector<4x256xf32>
    %188 = arith.mulf %185, %187 : vector<4x256xf32>
    %c0_159 = arith.constant 0 : index
    %c0_160 = arith.constant 0 : index
    %c0_161 = arith.constant 0 : index
    %189 = vector.load %arg8[%c0_159, %c0_160, %c0_161] : memref<9x4x4xbf16, #tpu.memory_space<vmem>>, vector<1x4x4xbf16>
    %190 = vector.shape_cast %189 : vector<1x4x4xbf16> to vector<4x4xbf16>
    %191 = arith.truncf %188 : vector<4x256xf32> to vector<4x256xbf16>
    %cst_162 = arith.constant dense<0.000000e+00> : vector<4x256xf32>
    %192 = tpu.matmul %190, %191, %cst_162 {dimension_numbers = #tpu.dot_dimension_numbers<[1], [0], [0], [1], [0, 0, 1, 1], [], []>} : vector<4x4xbf16>, vector<4x256xbf16>, vector<4x256xf32> -> vector<4x256xf32>
    %193 = arith.addf %184, %192 : vector<4x256xf32>
    %c0_163 = arith.constant 0 : index
    %c112_164 = arith.constant 112 : index
    %194 = vector.load %arg15[%c0_163, %c112_164] : memref<4x512xf32, #tpu.memory_space<vmem>>, vector<4x256xf32>
    %c1_165 = arith.constant 1 : index
    %c0_166 = arith.constant 0 : index
    %195 = vector.load %arg4[%c1_165, %c0_166] : memref<9x256xf32, #tpu.memory_space<vmem>>, vector<1x256xf32>
    %196 = vector.broadcast %195 : vector<1x256xf32> to vector<4x256xf32>
    %197 = arith.mulf %194, %196 : vector<4x256xf32>
    %c1_167 = arith.constant 1 : index
    %c0_168 = arith.constant 0 : index
    %c0_169 = arith.constant 0 : index
    %198 = vector.load %arg8[%c1_167, %c0_168, %c0_169] : memref<9x4x4xbf16, #tpu.memory_space<vmem>>, vector<1x4x4xbf16>
    %199 = vector.shape_cast %198 : vector<1x4x4xbf16> to vector<4x4xbf16>
    %200 = arith.truncf %197 : vector<4x256xf32> to vector<4x256xbf16>
    %cst_170 = arith.constant dense<0.000000e+00> : vector<4x256xf32>
    %201 = tpu.matmul %199, %200, %cst_170 {dimension_numbers = #tpu.dot_dimension_numbers<[1], [0], [0], [1], [0, 0, 1, 1], [], []>} : vector<4x4xbf16>, vector<4x256xbf16>, vector<4x256xf32> -> vector<4x256xf32>
    %202 = arith.addf %193, %201 : vector<4x256xf32>
    %c0_171 = arith.constant 0 : index
    %c113_172 = arith.constant 113 : index
    %203 = vector.load %arg15[%c0_171, %c113_172] : memref<4x512xf32, #tpu.memory_space<vmem>>, vector<4x256xf32>
    %c2_173 = arith.constant 2 : index
    %c0_174 = arith.constant 0 : index
    %204 = vector.load %arg4[%c2_173, %c0_174] : memref<9x256xf32, #tpu.memory_space<vmem>>, vector<1x256xf32>
    %205 = vector.broadcast %204 : vector<1x256xf32> to vector<4x256xf32>
    %206 = arith.mulf %203, %205 : vector<4x256xf32>
    %c2_175 = arith.constant 2 : index
    %c0_176 = arith.constant 0 : index
    %c0_177 = arith.constant 0 : index
    %207 = vector.load %arg8[%c2_175, %c0_176, %c0_177] : memref<9x4x4xbf16, #tpu.memory_space<vmem>>, vector<1x4x4xbf16>
    %208 = vector.shape_cast %207 : vector<1x4x4xbf16> to vector<4x4xbf16>
    %209 = arith.truncf %206 : vector<4x256xf32> to vector<4x256xbf16>
    %cst_178 = arith.constant dense<0.000000e+00> : vector<4x256xf32>
    %210 = tpu.matmul %208, %209, %cst_178 {dimension_numbers = #tpu.dot_dimension_numbers<[1], [0], [0], [1], [0, 0, 1, 1], [], []>} : vector<4x4xbf16>, vector<4x256xbf16>, vector<4x256xf32> -> vector<4x256xf32>
    %211 = arith.addf %202, %210 : vector<4x256xf32>
    %c0_179 = arith.constant 0 : index
    %c127_180 = arith.constant 127 : index
    %212 = vector.load %arg15[%c0_179, %c127_180] : memref<4x512xf32, #tpu.memory_space<vmem>>, vector<4x256xf32>
    %c3_181 = arith.constant 3 : index
    %c0_182 = arith.constant 0 : index
    %213 = vector.load %arg4[%c3_181, %c0_182] : memref<9x256xf32, #tpu.memory_space<vmem>>, vector<1x256xf32>
    %214 = vector.broadcast %213 : vector<1x256xf32> to vector<4x256xf32>
    %215 = arith.mulf %212, %214 : vector<4x256xf32>
    %c3_183 = arith.constant 3 : index
    %c0_184 = arith.constant 0 : index
    %c0_185 = arith.constant 0 : index
    %216 = vector.load %arg8[%c3_183, %c0_184, %c0_185] : memref<9x4x4xbf16, #tpu.memory_space<vmem>>, vector<1x4x4xbf16>
    %217 = vector.shape_cast %216 : vector<1x4x4xbf16> to vector<4x4xbf16>
    %218 = arith.truncf %215 : vector<4x256xf32> to vector<4x256xbf16>
    %cst_186 = arith.constant dense<0.000000e+00> : vector<4x256xf32>
    %219 = tpu.matmul %217, %218, %cst_186 {dimension_numbers = #tpu.dot_dimension_numbers<[1], [0], [0], [1], [0, 0, 1, 1], [], []>} : vector<4x4xbf16>, vector<4x256xbf16>, vector<4x256xf32> -> vector<4x256xf32>
    %220 = arith.addf %211, %219 : vector<4x256xf32>
    %c0_187 = arith.constant 0 : index
    %c128_188 = arith.constant 128 : index
    %221 = vector.load %arg15[%c0_187, %c128_188] : memref<4x512xf32, #tpu.memory_space<vmem>>, vector<4x256xf32>
    %c4_189 = arith.constant 4 : index
    %c0_190 = arith.constant 0 : index
    %222 = vector.load %arg4[%c4_189, %c0_190] : memref<9x256xf32, #tpu.memory_space<vmem>>, vector<1x256xf32>
    %223 = vector.broadcast %222 : vector<1x256xf32> to vector<4x256xf32>
    %224 = arith.mulf %221, %223 : vector<4x256xf32>
    %c4_191 = arith.constant 4 : index
    %c0_192 = arith.constant 0 : index
    %c0_193 = arith.constant 0 : index
    %225 = vector.load %arg8[%c4_191, %c0_192, %c0_193] : memref<9x4x4xbf16, #tpu.memory_space<vmem>>, vector<1x4x4xbf16>
    %226 = vector.shape_cast %225 : vector<1x4x4xbf16> to vector<4x4xbf16>
    %227 = arith.truncf %224 : vector<4x256xf32> to vector<4x256xbf16>
    %cst_194 = arith.constant dense<0.000000e+00> : vector<4x256xf32>
    %228 = tpu.matmul %226, %227, %cst_194 {dimension_numbers = #tpu.dot_dimension_numbers<[1], [0], [0], [1], [0, 0, 1, 1], [], []>} : vector<4x4xbf16>, vector<4x256xbf16>, vector<4x256xf32> -> vector<4x256xf32>
    %229 = arith.addf %220, %228 : vector<4x256xf32>
    %c0_195 = arith.constant 0 : index
    %c129_196 = arith.constant 129 : index
    %230 = vector.load %arg15[%c0_195, %c129_196] : memref<4x512xf32, #tpu.memory_space<vmem>>, vector<4x256xf32>
    %c5_197 = arith.constant 5 : index
    %c0_198 = arith.constant 0 : index
    %231 = vector.load %arg4[%c5_197, %c0_198] : memref<9x256xf32, #tpu.memory_space<vmem>>, vector<1x256xf32>
    %232 = vector.broadcast %231 : vector<1x256xf32> to vector<4x256xf32>
    %233 = arith.mulf %230, %232 : vector<4x256xf32>
    %c5_199 = arith.constant 5 : index
    %c0_200 = arith.constant 0 : index
    %c0_201 = arith.constant 0 : index
    %234 = vector.load %arg8[%c5_199, %c0_200, %c0_201] : memref<9x4x4xbf16, #tpu.memory_space<vmem>>, vector<1x4x4xbf16>
    %235 = vector.shape_cast %234 : vector<1x4x4xbf16> to vector<4x4xbf16>
    %236 = arith.truncf %233 : vector<4x256xf32> to vector<4x256xbf16>
    %cst_202 = arith.constant dense<0.000000e+00> : vector<4x256xf32>
    %237 = tpu.matmul %235, %236, %cst_202 {dimension_numbers = #tpu.dot_dimension_numbers<[1], [0], [0], [1], [0, 0, 1, 1], [], []>} : vector<4x4xbf16>, vector<4x256xbf16>, vector<4x256xf32> -> vector<4x256xf32>
    %238 = arith.addf %229, %237 : vector<4x256xf32>
    %c0_203 = arith.constant 0 : index
    %c143_204 = arith.constant 143 : index
    %239 = vector.load %arg15[%c0_203, %c143_204] : memref<4x512xf32, #tpu.memory_space<vmem>>, vector<4x256xf32>
    %c6_205 = arith.constant 6 : index
    %c0_206 = arith.constant 0 : index
    %240 = vector.load %arg4[%c6_205, %c0_206] : memref<9x256xf32, #tpu.memory_space<vmem>>, vector<1x256xf32>
    %241 = vector.broadcast %240 : vector<1x256xf32> to vector<4x256xf32>
    %242 = arith.mulf %239, %241 : vector<4x256xf32>
    %c6_207 = arith.constant 6 : index
    %c0_208 = arith.constant 0 : index
    %c0_209 = arith.constant 0 : index
    %243 = vector.load %arg8[%c6_207, %c0_208, %c0_209] : memref<9x4x4xbf16, #tpu.memory_space<vmem>>, vector<1x4x4xbf16>
    %244 = vector.shape_cast %243 : vector<1x4x4xbf16> to vector<4x4xbf16>
    %245 = arith.truncf %242 : vector<4x256xf32> to vector<4x256xbf16>
    %cst_210 = arith.constant dense<0.000000e+00> : vector<4x256xf32>
    %246 = tpu.matmul %244, %245, %cst_210 {dimension_numbers = #tpu.dot_dimension_numbers<[1], [0], [0], [1], [0, 0, 1, 1], [], []>} : vector<4x4xbf16>, vector<4x256xbf16>, vector<4x256xf32> -> vector<4x256xf32>
    %247 = arith.addf %238, %246 : vector<4x256xf32>
    %c0_211 = arith.constant 0 : index
    %c144_212 = arith.constant 144 : index
    %248 = vector.load %arg15[%c0_211, %c144_212] : memref<4x512xf32, #tpu.memory_space<vmem>>, vector<4x256xf32>
    %c7_213 = arith.constant 7 : index
    %c0_214 = arith.constant 0 : index
    %249 = vector.load %arg4[%c7_213, %c0_214] : memref<9x256xf32, #tpu.memory_space<vmem>>, vector<1x256xf32>
    %250 = vector.broadcast %249 : vector<1x256xf32> to vector<4x256xf32>
    %251 = arith.mulf %248, %250 : vector<4x256xf32>
    %c7_215 = arith.constant 7 : index
    %c0_216 = arith.constant 0 : index
    %c0_217 = arith.constant 0 : index
    %252 = vector.load %arg8[%c7_215, %c0_216, %c0_217] : memref<9x4x4xbf16, #tpu.memory_space<vmem>>, vector<1x4x4xbf16>
    %253 = vector.shape_cast %252 : vector<1x4x4xbf16> to vector<4x4xbf16>
    %254 = arith.truncf %251 : vector<4x256xf32> to vector<4x256xbf16>
    %cst_218 = arith.constant dense<0.000000e+00> : vector<4x256xf32>
    %255 = tpu.matmul %253, %254, %cst_218 {dimension_numbers = #tpu.dot_dimension_numbers<[1], [0], [0], [1], [0, 0, 1, 1], [], []>} : vector<4x4xbf16>, vector<4x256xbf16>, vector<4x256xf32> -> vector<4x256xf32>
    %256 = arith.addf %247, %255 : vector<4x256xf32>
    %c0_219 = arith.constant 0 : index
    %c145_220 = arith.constant 145 : index
    %257 = vector.load %arg15[%c0_219, %c145_220] : memref<4x512xf32, #tpu.memory_space<vmem>>, vector<4x256xf32>
    %c8_221 = arith.constant 8 : index
    %c0_222 = arith.constant 0 : index
    %258 = vector.load %arg4[%c8_221, %c0_222] : memref<9x256xf32, #tpu.memory_space<vmem>>, vector<1x256xf32>
    %259 = vector.broadcast %258 : vector<1x256xf32> to vector<4x256xf32>
    %260 = arith.mulf %257, %259 : vector<4x256xf32>
    %c8_223 = arith.constant 8 : index
    %c0_224 = arith.constant 0 : index
    %c0_225 = arith.constant 0 : index
    %261 = vector.load %arg8[%c8_223, %c0_224, %c0_225] : memref<9x4x4xbf16, #tpu.memory_space<vmem>>, vector<1x4x4xbf16>
    %262 = vector.shape_cast %261 : vector<1x4x4xbf16> to vector<4x4xbf16>
    %263 = arith.truncf %260 : vector<4x256xf32> to vector<4x256xbf16>
    %cst_226 = arith.constant dense<0.000000e+00> : vector<4x256xf32>
    %264 = tpu.matmul %262, %263, %cst_226 {dimension_numbers = #tpu.dot_dimension_numbers<[1], [0], [0], [1], [0, 0, 1, 1], [], []>} : vector<4x4xbf16>, vector<4x256xbf16>, vector<4x256xf32> -> vector<4x256xf32>
    %265 = arith.addf %256, %264 : vector<4x256xf32>
    %266 = arith.addf %183, %265 : vector<4x256xf32>
    %c0_227 = arith.constant 0 : index
    %c0_228 = arith.constant 0 : index
    %267 = vector.load %arg9[%c0_227, %c0_228] : memref<4x1xf32, #tpu.memory_space<vmem>>, vector<4x1xf32>
    %268 = vector.broadcast %267 : vector<4x1xf32> to vector<4x256xf32>
    %269 = arith.addf %266, %268 : vector<4x256xf32>
    %c0_229 = arith.constant 0 : index
    %c0_230 = arith.constant 0 : index
    %270 = vector.load %arg10[%c0_229, %c0_230] : memref<1x4xbf16, #tpu.memory_space<vmem>>, vector<1x4xbf16>
    %271 = arith.truncf %269 : vector<4x256xf32> to vector<4x256xbf16>
    %cst_231 = arith.constant dense<0.000000e+00> : vector<1x256xf32>
    %272 = tpu.matmul %270, %271, %cst_231 {dimension_numbers = #tpu.dot_dimension_numbers<[1], [0], [0], [1], [0, 0, 1, 1], [], []>} : vector<1x4xbf16>, vector<4x256xbf16>, vector<1x256xf32> -> vector<1x256xf32>
    %c0_232 = arith.constant 0 : index
    %c0_233 = arith.constant 0 : index
    %273 = vector.load %arg11[%c0_232, %c0_233] : memref<1x1xf32, #tpu.memory_space<vmem>>, vector<1x1xf32>
    %274 = vector.broadcast %273 : vector<1x1xf32> to vector<1x256xf32>
    %275 = arith.addf %272, %274 : vector<1x256xf32>
    %c0_234 = arith.constant 0 : index
    %c0_235 = arith.constant 0 : index
    %c0_236 = arith.constant 0 : index
    %276 = vector.load %arg12[%c0_234, %c0_235, %c0_236] : memref<1x1x256xf32, #tpu.memory_space<vmem>>, vector<1x1x256xf32>
    %277 = vector.shape_cast %276 : vector<1x1x256xf32> to vector<1x256xf32>
    %278 = vector.shape_cast %275 : vector<1x256xf32> to vector<1x1x256xf32>
    tpu.vector_store %arg12[%c0_234, %c0_235, %c0_236], %278 {strides = array<i32>} : memref<1x1x256xf32, #tpu.memory_space<vmem>>, vector<1x1x256xf32>,
    return
  }
  func.func @transform_0(%arg0: i32) -> (i32, i32, i32) {
    %c0_i32 = arith.constant 0 : i32
    %c0_i32_0 = arith.constant 0 : i32
    %c0_i32_1 = arith.constant 0 : i32
    return %arg0, %c0_i32, %c0_i32_0 : i32, i32, i32
  }
  func.func @transform_1(%arg0: i32) -> (i32, i32, i32) {
    %c0_i32 = arith.constant 0 : i32
    %c0_i32_0 = arith.constant 0 : i32
    %c0_i32_1 = arith.constant 0 : i32
    return %arg0, %c0_i32, %c0_i32_0 : i32, i32, i32
  }
  func.func @transform_2(%arg0: i32) -> (i32, i32) {
    %c0_i32 = arith.constant 0 : i32
    %c0_i32_0 = arith.constant 0 : i32
    %c0_i32_1 = arith.constant 0 : i32
    return %c0_i32, %c0_i32_0 : i32, i32
  }
  func.func @transform_3(%arg0: i32) -> (i32, i32) {
    %c0_i32 = arith.constant 0 : i32
    %c0_i32_0 = arith.constant 0 : i32
    %c0_i32_1 = arith.constant 0 : i32
    return %c0_i32, %c0_i32_0 : i32, i32
  }
  func.func @transform_4(%arg0: i32) -> (i32, i32, i32) {
    %c0_i32 = arith.constant 0 : i32
    %c0_i32_0 = arith.constant 0 : i32
    %c0_i32_1 = arith.constant 0 : i32
    %c0_i32_2 = arith.constant 0 : i32
    return %c0_i32, %c0_i32_0, %c0_i32_1 : i32, i32, i32
  }
  func.func @transform_5(%arg0: i32) -> (i32, i32) {
    %c0_i32 = arith.constant 0 : i32
    %c0_i32_0 = arith.constant 0 : i32
    %c0_i32_1 = arith.constant 0 : i32
    return %c0_i32, %c0_i32_0 : i32, i32
  }
  func.func @transform_6(%arg0: i32) -> (i32, i32, i32) {
    %c0_i32 = arith.constant 0 : i32
    %c0_i32_0 = arith.constant 0 : i32
    %c0_i32_1 = arith.constant 0 : i32
    %c0_i32_2 = arith.constant 0 : i32
    return %c0_i32, %c0_i32_0, %c0_i32_1 : i32, i32, i32
  }
  func.func @transform_7(%arg0: i32) -> (i32, i32, i32) {
    %c0_i32 = arith.constant 0 : i32
    %c0_i32_0 = arith.constant 0 : i32
    %c0_i32_1 = arith.constant 0 : i32
    %c0_i32_2 = arith.constant 0 : i32
    return %c0_i32, %c0_i32_0, %c0_i32_1 : i32, i32, i32
  }
  func.func @transform_8(%arg0: i32) -> (i32, i32) {
    %c0_i32 = arith.constant 0 : i32
    %c0_i32_0 = arith.constant 0 : i32
    %c0_i32_1 = arith.constant 0 : i32
    return %c0_i32, %c0_i32_0 : i32, i32
  }
  func.func @transform_9(%arg0: i32) -> (i32, i32) {
    %c0_i32 = arith.constant 0 : i32
    %c0_i32_0 = arith.constant 0 : i32
    %c0_i32_1 = arith.constant 0 : i32
    return %c0_i32, %c0_i32_0 : i32, i32
  }
  func.func @transform_10(%arg0: i32) -> (i32, i32) {
    %c0_i32 = arith.constant 0 : i32
    %c0_i32_0 = arith.constant 0 : i32
    %c0_i32_1 = arith.constant 0 : i32
    return %c0_i32, %c0_i32_0 : i32, i32
  }
  func.func @transform_11(%arg0: i32) -> (i32, i32, i32) {
    %c0_i32 = arith.constant 0 : i32
    %c0_i32_0 = arith.constant 0 : i32
    %c0_i32_1 = arith.constant 0 : i32
    return %arg0, %c0_i32, %c0_i32_0 : i32, i32, i32
  }
}

</mosaic_0001>

<bundles_post_ra>
// kernel: unet_forward.7
= control target key start
LH: loop header
LB: loop body
LE: loop exit
PB: predicated region body
PF: predicated region fallthrough
CT: control target
= control target key end

     0   :  { %s1313_s18 = smov 0   ;;  %s1494_s0 = inlined_call_operand.vmem [shape: f32[2,8,64], index: 0, kind: input, shape index: {}]   ;;  %s1495_s1 = inlined_call_operand.vmem [shape: f32[9,64], index: 1, kind: input, shape index: {}]   ;;  %s1496_s2 = inlined_call_operand.vmem [shape: f32[55,16], index: 2, kind: input, shape index: {}]   ;;  %s1497_s3 = inlined_call_operand.vmem [shape: bf16[9,16,8], index: 3, kind: input, shape index: {}]   ;;  %s1498_s4 = inlined_call_operand.vmem [shape: f32[16,1], index: 4, kind: input, shape index: {}]   ;;  %s1499_s5 = inlined_call_operand.vmem [shape: f32[2,16,16], index: 5, kind: output, shape index: {}]  }
   0x1 LB: > { %s1079_s19 = sadd.s32 4294967295, %s1270_s18   ;;  %p1083_p0 = scmp.ge.s32.totalorder %s1270_s18, 1  ;;  %s1270_s18 = sphi %s1313_s18, %s15_s18  }
   0x2   : > { %p186_p1 = scmp.lt.s32.totalorder %s1270_s18, 3 }
   0x4   : > { %p187_p2 = pnand %p1083_p0, %p186_p1 }
   0x5   : > { %s1272_s22 = smov (!%p187_p2), 120   ;;  %s1273_s27 = smov (!%p187_p2), 121  }
   0x6   : > { %190 = sbr.rel (%p187_p2) target bundleno = 924 (0x39c), region = 40  ;;  %p213_p3 = scmp.lt.s32.totalorder (!%p187_p2), %s1079_s19, 1 }
   0x7   : > { %s1274_s7 = smov (!%p187_p2), 119   ;;  %s1276_s10 = smov (!%p187_p2), 127  }
   0x8   : > { %s1277_s14 = smov (!%p187_p2), 1   ;;  %s1278_s20 = smov (!%p187_p2), 7  }
   0x9   : > { %s1279_s24 = smov (!%p187_p2), 8   ;;  %s1280_s25 = smov (!%p187_p2), 9  }
   0xb   : > { %v1088_v0 = vld [vmem:[%s1495_s1 + $0x1] ss:$0 sm:$0xff]  ;;  %v1095_v1 = vld [vmem:[%s1495_s1 + $0x2] ss:$0 sm:$0xff]  ;;  %v1087_v2 = vld [vmem:[%s1495_s1] ss:$0 sm:$0xff] }
   0xc   : > { %252 = vrot.lane.b32.xlu0 %v1088_v0, %s1272_s22  ;;  %390 = vrot.lane.b32.xlu1 %v1095_v1, %s1273_s27  ;;  %v1100_v3 = vld [vmem:[%s1495_s1 + $0x3] ss:$0 sm:$0xff]  ;;  %v1110_v4 = vld [vmem:[%s1495_s1 + $0x5] ss:$0 sm:$0xff]  ;;  %vm225_vm0 = vcmask 523264   ;;  %v1275_v6 = vmov 0.0  }
   0xd   : > { %v1115_v5 = vld [vmem:[%s1495_s1 + $0x6] ss:$0 sm:$0xff]  ;;  %224 = vst [vmem:[#allocation2 + $0x8] sm:$0xff] %v1275_v6  ;;  %1163 = vmatprep.subr.bf16.mxu0 %v1275_v6  ;;  %s1501_s19 = smov (!%p213_p3, %s1079_s19), 1  ;;  %1169 = vmatprep.subr.bf16.mxu1 %v1275_v6  ;;  %v1120_v7 = vld [vmem:[%s1495_s1 + $0x7] ss:$0 sm:$0xff] }
   0xe   : > { %s1084_s13 = sshll.u32 %s1501_s19, 3  ;;  %v1125_v9 = vld [vmem:[%s1495_s1 + $0x8] ss:$0 sm:$0xff]  ;;  %vm1281_vm1 = vmmov 0   ;;  %v888_v43 = vld [vmem:[%s1498_s4] sm:$0xff]  ;;  %v1282_v45 = vmov 0  }
   0xf   : > { %s216_s17 = scalar_lea.vmem %s1494_s0, %s1084_s13  ;;  %1165 = vmatprep.mubr.msk.bf16.mxu0 %vm1281_vm1, %v1275_v6  ;;  %1171 = vmatprep.mubr.msk.bf16.mxu1 %vm1281_vm1, %v1275_v6  ;;  %v889_v44 = vld [vmem:[%s1498_s4 + $0x8] sm:$0xff]  ;;  %vm273_vm2 = vcmask 64512   ;;  %vm279_vm3 = vcmask 1043456   ;;  %v1105_v49 = vld [vmem:[%s1495_s1 + $0x4] ss:$0 sm:$0xff]  ;;  %vm335_vm4 = vcmask 72704  }
  0x10   : > { %237 = vrot.lane.b32.xlu0 %v1087_v2, %s1274_s7  ;;  %468 = vrot.lane.b32.xlu1 %v1100_v3, %s1276_s10  ;;  %v227_v8 = vld [vmem:[%s216_s17] sm:$0xff]  ;;  %v1255_v51 = vld [vmem:[%s1497_s3 + $0x8] sm:$0xff]   ;;  %vm411_vm5 = vcmask 56320   ;;  %vm489_vm6 = vcmask 7168   ;;  %vm942_vm7 = vcmask 1046528   ;;  %vm935_vm8 = vcmask 449536  }
  0x11   : > { %228 = vst.msk [vmem:[#allocation2 + $0x8] sm:$0xff] %vm225_vm0, %v227_v8  ;;  %1253 = vset.pattern.permute.xlu0 %v1282_v45  ;;  %1254 = vset.pattern.permute.xlu1 %v1282_v45  ;;  %v1256_v57 = vld [vmem:[%s1497_s3] sm:$0xff]   ;;  %v1257_v63 = vld [vmem:[%s1497_s3 + $0x10] sm:$0xff]   ;;  %vm1021_vm9 = vcmask 130048  }
  0x14   : > { %610 = vrot.lane.b32.xlu0 %v1110_v4, %s1277_s14  ;;  %681 = vrot.lane.b32.xlu1 %v1115_v5, %s1278_s20  ;;  %v1258_v5 = vld [vmem:[%s1497_s3 + $0x18] sm:$0xff]  }
  0x18   : > { %752 = vrot.lane.b32.xlu0 %v1120_v7, %s1279_s24  ;;  %823 = vrot.lane.b32.xlu1 %v1125_v9, %s1280_s25  ;;  %v1365_v10 = vld [vmem:[#allocation2 + $0x8] sm:$0xff] }
  0x19   : > { %v545_v54 = vmul.f32 %v1105_v49, %v1365_v10 }
  0x1b   : > { %v549_v60 = vpack.c.bf16 %v545_v54, %v545_v54 }
  0x1d   : > { %v559_v2 = vsel %vm279_vm3, %v549_v60, 0 }
  0x7e   : > { %v253_v11 = vpop.permute.xlu0 %252  ;;  %v391_v14 = vpop.permute.xlu1 %390 }
  0x7f   : > { %v255_v12 = vmul.f32 0.0, %v253_v11  ;;  %v256_v13 = vmul.f32 %v253_v11, %v1365_v10  ;;  %v393_v18 = vmul.f32 0.0, %v391_v14  ;;  %v394_v21 = vmul.f32 %v391_v14, %v1365_v10 }
  0x81   : > { %v260_v15 = vpack.c.bf16 %v255_v12, %v255_v12  ;;  %v261_v16 = vpack.c.bf16 %v256_v13, %v256_v13  ;;  %v398_v25 = vpack.c.bf16 %v393_v18, %v393_v18  ;;  %v399_v26 = vpack.c.bf16 %v394_v21, %v394_v21  ;;  %v1260_v13 = vld [vmem:[%s1497_s3 + $0x28] sm:$0xff]   ;;  %v1262_v18 = vld [vmem:[%s1497_s3 + $0x38] sm:$0xff]  }
  0x82   : > { %v238_v17 = vpop.permute.xlu0 %237  ;;  %v469_v22 = vpop.permute.xlu1 %468 }
  0x83   : > { %v240_v19 = vmul.f32 0.0, %v238_v17  ;;  %v241_v20 = vmul.f32 %v238_v17, %v1365_v10  ;;  %269 = vrot.lane.b32.xlu0 %v260_v15, %s1279_s24  ;;  %271 = vrot.lane.b32.xlu1 %v261_v16, %s1279_s24  ;;  %v471_v27 = vmul.f32 0.0, %v469_v22  ;;  %v472_v28 = vmul.f32 %v469_v22, %v1365_v10  ;;  %v1261_v16 = vld [vmem:[%s1497_s3 + $0x30] sm:$0xff]  }
  0x85   : > { %v244_v23 = vpack.c.bf16 %v240_v19, %v240_v19  ;;  %v245_v24 = vpack.c.bf16 %v241_v20, %v241_v20  ;;  %v476_v32 = vpack.c.bf16 %v471_v27, %v471_v27  ;;  %v477_v33 = vpack.c.bf16 %v472_v28, %v472_v28  ;;  %v1263_v19 = vld [vmem:[%s1497_s3 + $0x40] sm:$0xff]  }
  0x86   : > { %v611_v29 = vpop.permute.xlu0 %610  ;;  %v682_v30 = vpop.permute.xlu1 %681 }
  0x87   : > { %331 = vrot.lane.b32.xlu0 %v244_v23, %s1280_s25  ;;  %333 = vrot.lane.b32.xlu1 %v245_v24, %s1280_s25  ;;  %v613_v31 = vmul.f32 %v611_v29, %v1365_v10  ;;  %v684_v34 = vmul.f32 %v682_v30, %v1365_v10 }
  0x89   : > { %v617_v37 = vpack.c.bf16 %v613_v31, %v613_v31  ;;  %v688_v38 = vpack.c.bf16 %v684_v34, %v684_v34 }
  0x8a   : > { %v753_v35 = vpop.permute.xlu0 %752  ;;  %v824_v36 = vpop.permute.xlu1 %823 }
  0x8b   : > { %407 = vrot.lane.b32.xlu0 %v398_v25, %s1278_s20  ;;  %409 = vrot.lane.b32.xlu1 %v399_v26, %s1278_s20  ;;  %v755_v39 = vmul.f32 %v753_v35, %v1365_v10  ;;  %v826_v40 = vmul.f32 %v824_v36, %v1365_v10  ;;  %v1259_v10 = vld [vmem:[%s1497_s3 + $0x20] sm:$0xff]  }
  0x8d   : > { %v759_v41 = vpack.c.bf16 %v755_v39, %v755_v39  ;;  %v830_v42 = vpack.c.bf16 %v826_v40, %v826_v40 }
  0x8f   : > { %485 = vrot.lane.b32.xlu0 %v476_v32, %s1277_s14  ;;  %487 = vrot.lane.b32.xlu1 %v477_v33, %s1277_s14 }
  0x93   : > { %624 = vrot.lane.b32.xlu0 %v617_v37, %s1276_s10  ;;  %695 = vrot.lane.b32.xlu1 %v688_v38, %s1273_s27 }
  0x97   : > { %766 = vrot.lane.b32.xlu0 %v759_v41, %s1272_s22  ;;  %837 = vrot.lane.b32.xlu1 %v830_v42, %s1274_s7 }
  0x9b   : > { %892 = vperm.xlu0 %1253, %v888_v43   ;;  %897 = vperm.xlu1 %1254, %v889_v44  }
  0xf5   : > { %v270_v46 = vpop.permute.xlu0 %269  ;;  %v272_v47 = vpop.permute.xlu1 %271 }
  0xf6   : > { %v274_v48 = vsel %vm273_vm2, %v270_v46, %v272_v47 }
  0xf7   : > { %v281_v50 = vsel %vm279_vm3, %v274_v48, 0 }
  0xf8   : > { %1164 = vmatpush3.bf16.msra.mxu0 %v281_v50 }
  0xf9   : > { %v332_v52 = vpop.permute.xlu0 %331  ;;  %v334_v53 = vpop.permute.xlu1 %333  ;;  %1175 = vmatprep.subr.bf16.mxu0 %v1275_v6 }
  0xfa   : > { %v336_v55 = vsel %vm335_vm4, %v332_v52, %v334_v53 }
  0xfb   : > { %1166 = vmatmul.mubr.msk.bf16.vlgmr.msra.gmra.mxu0 %vm273_vm2, %v1255_v51  ;;  %v341_v56 = vsel %vm279_vm3, %v336_v55, 0 }
  0xfc   : > { %1170 = vmatpush3.bf16.msra.mxu1 %v341_v56  ;;  %1177 = vmatprep.mubr.msk.bf16.mxu0 %vm1281_vm1, %v1275_v6 }
  0xfd   : > { %v408_v58 = vpop.permute.xlu0 %407  ;;  %v410_v59 = vpop.permute.xlu1 %409  ;;  %1181 = vmatprep.subr.bf16.mxu1 %v1275_v6 }
  0xfe   : > { %v412_v61 = vsel %vm411_vm5, %v408_v58, %v410_v59 }
  0xff   : > { %v417_v62 = vsel %vm279_vm3, %v412_v61, 0  ;;  %1172 = vmatmul.mubr.msk.bf16.vlgmr.msra.gmra.mxu1 %vm273_vm2, %v1256_v57 }
 0x100   : > { %1176 = vmatpush3.bf16.msra.mxu0 %v417_v62  ;;  %1183 = vmatprep.mubr.msk.bf16.mxu1 %vm1281_vm1, %v1275_v6 }
 0x101   : > { %v486_v0 = vpop.permute.xlu0 %485  ;;  %v488_v1 = vpop.permute.xlu1 %487  ;;  %1187 = vmatprep.subr.bf16.mxu0 %v1275_v6 }
 0x102   : > { %v490_v3 = vsel %vm489_vm6, %v486_v0, %v488_v1 }
 0x103   : > { %v495_v4 = vsel %vm279_vm3, %v490_v3, 0  ;;  %1178 = vmatmul.mubr.msk.bf16.vlgmr.msra.gmra.mxu0 %vm273_vm2, %v1257_v63 }
 0x104   : > { %1182 = vmatpush3.bf16.msra.mxu1 %v495_v4  ;;  %1188 = vmatpush3.bf16.msra.mxu0 %v559_v2 }
 0x105   : > { %v625_v7 = vpop.permute.xlu0 %624  ;;  %1189 = vmatprep.mubr.msk.bf16.mxu0 %vm1281_vm1, %v1275_v6  ;;  %1193 = vmatprep.subr.bf16.mxu1 %v1275_v6  ;;  %v696_v9 = vpop.permute.xlu1 %695 }
 0x106   : > { %v630_v8 = vsel %vm279_vm3, %v625_v7, 0  ;;  %1199 = vmatprep.subr.bf16.mxu0 %v1275_v6  ;;  %v701_v11 = vsel %vm279_vm3, %v696_v9, 0 }
 0x107   : > { %1184 = vmatmul.mubr.msk.bf16.vlgmr.msra.gmra.mxu1 %vm273_vm2, %v1258_v5 }
 0x108   : > { %1194 = vmatpush3.bf16.msra.mxu1 %v630_v8  ;;  %1195 = vmatprep.mubr.msk.bf16.mxu1 %vm1281_vm1, %v1275_v6 }
 0x109   : > { %1205 = vmatprep.subr.bf16.mxu1 %v1275_v6  ;;  %v767_v12 = vpop.permute.xlu0 %766  ;;  %v838_v15 = vpop.permute.xlu1 %837 }
 0x10a   : > { %v772_v14 = vsel %vm279_vm3, %v767_v12, 0  ;;  %v843_v17 = vsel %vm279_vm3, %v838_v15, 0 }
 0x10b   : > { %1190 = vmatmul.mubr.msk.bf16.vlgmr.msra.gmra.mxu0 %vm273_vm2, %v1259_v10 }
 0x10c   : > { %1200 = vmatpush3.bf16.msra.mxu0 %v701_v11  ;;  %1201 = vmatprep.mubr.msk.bf16.mxu0 %vm1281_vm1, %v1275_v6 }
 0x10d   : > { %1211 = vmatprep.subr.bf16.mxu0 %v1275_v6 }
 0x10f   : > { %1196 = vmatmul.mubr.msk.bf16.vlgmr.msra.gmra.mxu1 %vm273_vm2, %v1260_v13  ;;  %v934_v13 = vld [vmem:[%s1496_s2 + $0x30] sm:$0x7f] }
 0x110   : > { %1206 = vmatpush3.bf16.msra.mxu1 %v772_v14  ;;  %1207 = vmatprep.mubr.msk.bf16.mxu1 %vm1281_vm1, %v1275_v6  ;;  %v933_v14 = vld [vmem:[%s1496_s2 + $0x28] sm:$0xff] }
 0x111   : > { %1217 = vmatprep.subr.msk.mxu1 %vm942_vm7, %v934_v13 }
 0x113   : > { %1202 = vmatmul.mubr.msk.bf16.vlgmr.msra.gmra.mxu0 %vm273_vm2, %v1261_v16  ;;  %v932_v16 = vld [vmem:[%s1496_s2 + $0x20] sm:$0xff] }
 0x114   : > { %1212 = vmatpush3.bf16.msra.mxu0 %v843_v17  ;;  %1213 = vmatprep.mubr.msk.bf16.mxu0 %vm1281_vm1, %v1275_v6  ;;  %v931_v17 = vld [vmem:[%s1496_s2 + $0x18] sm:$0xff] }
 0x116   : > { %v893_v61 = vpop.permute.xlu0 %892  ;;  %v898_v8 = vpop.permute.xlu1 %897 }
 0x117   : > { %1208 = vmatmul.mubr.msk.bf16.vlgmr.msra.gmra.mxu1 %vm273_vm2, %v1262_v18 }
 0x118   : > { %1218 = vmatpush3.msk.msra.mxu1 %vm942_vm7, %v934_v13 }
 0x119   : > { %1219 = vmatprep.subr.mxu1 %v933_v14 }
 0x11a   : > { %1220 = vmatpush3.msra.mxu1 %v933_v14 }
 0x11b   : > { %1214 = vmatmul.mubr.msk.bf16.vlgmr.msra.gmra.mxu0 %vm273_vm2, %v1263_v19  ;;  %1221 = vmatprep.subr.mxu1 %v932_v16 }
 0x11c   : > { %1222 = vmatpush3.msra.mxu1 %v932_v16 }
 0x11d   : > { %1223 = vmatprep.subr.mxu1 %v931_v17 }
 0x11e   : > { %1224 = vmatpush3.msra.mxu1 %v931_v17 }
 0x1bb   : > { %v317_v20 = vpop.f32.mrf.mxu0 }
 0x1bd   : > { %v1167_v21 = vpop.f32.mrf.mxu0 }
 0x1be   : > { %v929_v21 = vld [vmem:[%s1496_s2 + $0x8] sm:$0xff] }
 0x1bf   : > { %v320_v22 = vpop.f32.mrf.mxu0  ;;  %v377_v23 = vpop.f32.mrf.mxu1 }
 0x1c0   : > { %v378_v37 = vadd.f32 %v377_v23, %v317_v20  ;;  %v930_v20 = vld [vmem:[%s1496_s2 + $0x10] sm:$0xff] }
 0x1c1   : > { %v1168_v24 = vpop.f32.mrf.mxu0  ;;  %v1173_v25 = vpop.f32.mrf.mxu1  ;;  %1225 = vmatprep.subr.mxu1 %v930_v20 }
 0x1c2   : > { %1226 = vmatpush3.msra.mxu1 %v930_v20 }
 0x1c3   : > { %v380_v26 = vpop.f32.mrf.mxu1  ;;  %v453_v27 = vpop.f32.mrf.mxu0  ;;  %1227 = vmatprep.subr.mxu1 %v929_v21 }
 0x1c4   : > { %v460_v40 = vadd.f32 %v453_v27, %v378_v37  ;;  %v381_v43 = vadd.f32 %v380_v26, %v320_v22  ;;  %1228 = vmatpush3.msra.mxu1 %v929_v21  ;;  %v928_v22 = vld [vmem:[%s1496_s2] sm:$0xff] }
 0x1c5   : > { %v1174_v28 = vpop.f32.mrf.mxu1  ;;  %v1179_v29 = vpop.f32.mrf.mxu0  ;;  %1229 = vmatprep.subr.mxu1 %v928_v22 }
 0x1c6   : > { %1230 = vmatpush3.msra.mxu1 %v928_v22 }
 0x1c7   : > { %v456_v30 = vpop.f32.mrf.mxu0  ;;  %v531_v6 = vpop.f32.mrf.mxu1 }
 0x1c8   : > { %v538_v44 = vadd.f32 %v531_v6, %v460_v40  ;;  %v461_v47 = vadd.f32 %v456_v30, %v381_v43 }
 0x1c9   : > { %v1180_v31 = vpop.f32.mrf.mxu0  ;;  %v1185_v32 = vpop.f32.mrf.mxu1 }
 0x1cb   : > { %v534_v33 = vpop.f32.mrf.mxu1  ;;  %v595_v34 = vpop.f32.mrf.mxu0 }
 0x1cc   : > { %v602_v48 = vadd.f32 %v595_v34, %v538_v44  ;;  %v539_v51 = vadd.f32 %v534_v33, %v461_v47 }
 0x1cd   : > { %v1186_v35 = vpop.f32.mrf.mxu1  ;;  %v1191_v36 = vpop.f32.mrf.mxu0 }
 0x1cf   : > { %v598_v38 = vpop.f32.mrf.mxu0  ;;  %v666_v39 = vpop.f32.mrf.mxu1 }
 0x1d0   : > { %v673_v52 = vadd.f32 %v666_v39, %v602_v48  ;;  %v603_v55 = vadd.f32 %v598_v38, %v539_v51 }
 0x1d1   : > { %v1192_v41 = vpop.f32.mrf.mxu0  ;;  %v1197_v42 = vpop.f32.mrf.mxu1 }
 0x1d3   : > { %v669_v45 = vpop.f32.mrf.mxu1  ;;  %v737_v46 = vpop.f32.mrf.mxu0 }
 0x1d4   : > { %v744_v56 = vadd.f32 %v737_v46, %v673_v52  ;;  %v674_v59 = vadd.f32 %v669_v45, %v603_v55 }
 0x1d5   : > { %v1198_v49 = vpop.f32.mrf.mxu1  ;;  %v1203_v50 = vpop.f32.mrf.mxu0 }
 0x1d7   : > { %v740_v53 = vpop.f32.mrf.mxu0  ;;  %v808_v54 = vpop.f32.mrf.mxu1 }
 0x1d8   : > { %v815_v60 = vadd.f32 %v808_v54, %v744_v56  ;;  %v745_v0 = vadd.f32 %v740_v53, %v674_v59 }
 0x1d9   : > { %v1204_v57 = vpop.f32.mrf.mxu0  ;;  %v1209_v58 = vpop.f32.mrf.mxu1 }
 0x1db   : > { %v811_v62 = vpop.f32.mrf.mxu1  ;;  %v879_v63 = vpop.f32.mrf.mxu0 }
 0x1dc   : > { %v886_v1 = vadd.f32 %v879_v63, %v815_v60  ;;  %v816_v4 = vadd.f32 %v811_v62, %v745_v0 }
 0x1dd   : > { %v1215_v2 = vpop.f32.mrf.mxu0  ;;  %v1210_v3 = vpop.f32.mrf.mxu1 }
 0x1de   : > { %v900_v5 = vadd.f32 %v893_v61, %v886_v1 }
 0x1df   : > { %v882_v7 = vpop.f32.mrf.mxu0 }
 0x1e0   : > { %v902_v9 = vmax.f32 %v900_v5, 0.0  ;;  %v887_v10 = vadd.f32 %v882_v7, %v816_v4 }
 0x1e1   : > { %v1216_v11 = vpop.f32.mrf.mxu0 }
 0x1e2   : > { %904 = vst.msk [vmem:[#allocation3] sm:$0xff] %vm225_vm0, %v902_v9  ;;  %v901_v12 = vadd.f32 %v898_v8, %v887_v10 }
 0x1e4   : > { %v903_v15 = vmax.f32 %v901_v12, 0.0 }
 0x1e6   : > { %905 = vst.msk [vmem:[#allocation3 + $0x8] sm:$0xff] %vm225_vm0, %v903_v15 }
 0x1e9   : > { %v906_v18 = vld [vmem:[#allocation3] sm:$0xff] }
 0x1ea   : > { %910 = vrot.lane.b32.xlu1 %v906_v18, %s1276_s10 }
 0x1ed   : > { %v907_v19 = vld [vmem:[#allocation3 + $0x8] sm:$0xff] }
 0x1ee   : > { %912 = vrot.lane.b32.xlu0 %v907_v19, %s1276_s10  ;;  %s1135_s10 = sshll.u32 %s1501_s19, 4 }
 0x1ef   : > { %s221_s24 = scalar_lea.vmem %s1499_s5, %s1135_s10 }
 0x25c   : > { %v911_v23 = vpop.permute.xlu1 %910 }
 0x25d   : > { %v916_v24 = vmax.f32 %v906_v18, %v911_v23 }
 0x25f   : > { %920 = vrot.lane.b32.xlu1 %v916_v24, %s1272_s22 }
 0x260   : > { %v913_v25 = vpop.permute.xlu0 %912 }
 0x261   : > { %v917_v26 = vmax.f32 %v907_v19, %v913_v25 }
 0x263   : > { %922 = vrot.lane.b32.xlu0 %v917_v26, %s1272_s22 }
 0x2d1   : > { %v921_v27 = vpop.permute.xlu1 %920 }
 0x2d2   : > { %v926_v28 = vmax.f32 %v916_v24, %v921_v27 }
 0x2d4   : > { %1231 = vmatprep.mubr.msk.f32.mxu1 %vm935_vm8, %v926_v28 }
 0x2d5   : > { %v923_v29 = vpop.permute.xlu0 %922 }
 0x2d6   : > { %v927_v30 = vmax.f32 %v917_v26, %v923_v29 }
 0x2d8   : > { %1232 = vmatmul.mubr.msk.f32.vlgmr.msra.gmra.mxu1 %vm935_vm8, %v927_v30 }
 0x398   : > { %v1233_v6 = vpop.f32.mrf.mxu1 }
 0x399   : > { %1023 = vst.msk [vmem:[%s221_s24 + $0x8] sm:$0xff] %vm1021_vm9, %v1233_v6 }
 0x39a   : > { %v1012_v31 = vpop.f32.mrf.mxu1 }
 0x39b   : > { %1022 = vst.msk [vmem:[%s221_s24] sm:$0xff] %vm1021_vm9, %v1012_v31 }
 0x39c PF: > { %s15_s18 = sadd.s32 1, %s1270_s18  }
 0x39d   : > { %p12_p4 = scmp.ge.s32.totalorder %s15_s18, 4  }
 0x39f   :  { %14 = sbr.rel (!%p12_p4) target bundleno = 1 (0x1), region = 78 }

// kernel: unet_forward.6
= control target key start
LH: loop header
LB: loop body
LE: loop exit
PB: predicated region body
PF: predicated region fallthrough
CT: control target
= control target key end

     0   :  { %s1368_s18 = smov 0   ;;  %s1715_s0 = inlined_call_operand.vmem [shape: f32[2,4,256], index: 0, kind: input, shape index: {}]   ;;  %s1716_s1 = inlined_call_operand.vmem [shape: f32[9,256], index: 1, kind: input, shape index: {}]   ;;  %s1717_s2 = inlined_call_operand.vmem [shape: f32[239,64], index: 2, kind: input, shape index: {}]   ;;  %s1718_s3 = inlined_call_operand.vmem [shape: bf16[9,8,4], index: 3, kind: input, shape index: {}]   ;;  %s1719_s4 = inlined_call_operand.vmem [shape: f32[8,1], index: 4, kind: input, shape index: {}]   ;;  %s1720_s5 = inlined_call_operand.vmem [shape: f32[2,8,64], index: 5, kind: output, shape index: {}]  }
   0x1 LB: > { %s1254_s19 = sadd.s32 4294967295, %s1326_s18   ;;  %p1258_p0 = scmp.ge.s32.totalorder %s1326_s18, 1  ;;  %s1326_s18 = sphi %s1368_s18, %s15_s18  }
   0x2   : > { %p187_p1 = scmp.lt.s32.totalorder %s1326_s18, 3 }
   0x4   : > { %p188_p2 = pnand %p1258_p0, %p187_p1 }
   0x5   : > { %p214_p3 = scmp.lt.s32.totalorder (!%p188_p2), %s1254_s19, 1  ;;  %s1329_s8 = smov (!%p188_p2), 112  }
   0x6   : > { %191 = sbr.rel (%p188_p2) target bundleno = 957 (0x3bd), region = 40  ;;  %s1330_s12 = smov (!%p188_p2), 113  }
   0x7   : > { %s1331_s17 = smov (!%p188_p2), 111   ;;  %s1332_s20 = smov (!%p188_p2), 127  }
   0x8   : > { %s1333_s21 = smov (!%p188_p2), 1   ;;  %s1334_s22 = smov (!%p188_p2), 15  }
   0x9   : > { %s1335_s23 = smov (!%p188_p2), 16   ;;  %s1336_s24 = smov (!%p188_p2), 17  }
   0xb   : > { %v232_v0 = vlaneseq  ;;  %v1262_v1 = vld [vmem:[%s1716_s1 + $0x1] ss:$8 sm:$0x3]  ;;  %v230_v3 = vld [vmem:[%s1716_s1] ss:$8 sm:$0x3] }
   0xc   : > { %v1268_v4 = vld [vmem:[%s1716_s1 + $0x2] ss:$8 sm:$0x3]  ;;  %v1272_v7 = vld [vmem:[%s1716_s1 + $0x3] ss:$8 sm:$0x3] }
   0xd   : > { %v233_v2 = vshrl.u32 %v232_v0, 7  ;;  %v1328_v8 = vmov 0.0   ;;  %v1280_v17 = vld [vmem:[%s1716_s1 + $0x5] ss:$8 sm:$0x3]  ;;  %s1722_s19 = smov (!%p214_p3, %s1254_s19), 1 }
   0xe   : > { %224 = vst [vmem:[#allocation2] sm:$0xff] %v1328_v8  ;;  %225 = vst [vmem:[#allocation2 + $0x8] sm:$0xff] %v1328_v8  ;;  %v1284_v19 = vld [vmem:[%s1716_s1 + $0x6] ss:$8 sm:$0x3]  ;;  %s1300_s7 = sshll.u32 %s1722_s19, 3 }
   0xf   : > { %v1385_v5 = vsub.s32 0, %v233_v2  ;;  %v1387_v6 = vsub.s32 1, %v233_v2  ;;  %s218_s11 = scalar_lea.vmem %s1715_s0, %s1300_s7  ;;  %v1288_v27 = vld [vmem:[%s1716_s1 + $0x7] ss:$8 sm:$0x3]  ;;  %vm272_vm0 = vcmask 916480   ;;  %s222_s26 = scalar_lea.vmem %s1720_s5, %s1300_s7 }
  0x10   : > { %v1425_v28 = vld [vmem:[%s218_s11] sm:$0xff]  ;;  %v1292_v29 = vld [vmem:[%s1716_s1 + $0x10] ss:$8 sm:$0x3]  ;;  %v1337_v45 = vmov 0   ;;  %vm244_vm1 = vcmask 908288  }
  0x11   : > { %v263_v9 = vrot.slane %v1262_v1, %v1385_v5  ;;  %v267_v10 = vrot.slane %v1262_v1, %v1387_v6  ;;  %v235_v11 = vrot.slane %v230_v3, %v1385_v5  ;;  %v239_v12 = vrot.slane %v230_v3, %v1387_v6  ;;  %227 = vst [vmem:[#allocation2 + $0x4] sm:$0xff] %v1425_v28 }
  0x12   : > { %v420_v13 = vrot.slane %v1268_v4, %v1385_v5  ;;  %v424_v14 = vrot.slane %v1268_v4, %v1387_v6  ;;  %v515_v15 = vrot.slane %v1272_v7, %v1385_v5  ;;  %v519_v16 = vrot.slane %v1272_v7, %v1387_v6  ;;  %341 = vmatprep.mubr.bf16.mxu0 %v1337_v45 }
  0x13   : > { %v268_v18 = vcombine.low %v263_v9, %v267_v10  ;;  %v240_v21 = vcombine.low %v235_v11, %v239_v12  ;;  %v684_v22 = vrot.slane %v1280_v17, %v1385_v5  ;;  %v688_v23 = vrot.slane %v1280_v17, %v1387_v6  ;;  %950 = vmatprep.mubr.bf16.mxu1 %v1337_v45 }
  0x14   : > { %v425_v20 = vcombine.low %v420_v13, %v424_v14  ;;  %v520_v24 = vcombine.low %v515_v15, %v519_v16  ;;  %v779_v25 = vrot.slane %v1284_v19, %v1385_v5  ;;  %v783_v26 = vrot.slane %v1284_v19, %v1387_v6  ;;  %1319 = vset.pattern.permute.xlu0 %v1337_v45 }
  0x15   : > { %269 = vrot.lane.b32.xlu0 %v268_v18, %s1329_s8  ;;  %v689_v30 = vcombine.low %v684_v22, %v688_v23  ;;  %v874_v31 = vrot.slane %v1288_v27, %v1385_v5  ;;  %v878_v32 = vrot.slane %v1288_v27, %v1387_v6  ;;  %v969_v34 = vrot.slane %v1292_v29, %v1385_v5 }
  0x16   : > { %426 = vrot.lane.b32.xlu1 %v425_v20, %s1330_s12  ;;  %v784_v33 = vcombine.low %v779_v25, %v783_v26  ;;  %v973_v35 = vrot.slane %v1292_v29, %v1387_v6  ;;  %vm429_vm2 = vcmask 924672   ;;  %vm524_vm3 = vcmask 1039360   ;;  %v677_v25 = vld [vmem:[#allocation2 + $0xc] sm:$0xf] }
  0x17   : > { %v879_v36 = vcombine.low %v874_v31, %v878_v32  ;;  %vm547_vm4 = vcmask 7168   ;;  %vm452_vm5 = vcmask 121856   ;;  %vm295_vm6 = vcmask 130048  }
  0x18   : > { %v974_v37 = vcombine.low %v969_v34, %v973_v35  ;;  %v228_v39 = vld [vmem:[#allocation2] sm:$0xff]  ;;  %v229_v42 = vld [vmem:[#allocation2 + $0x8] sm:$0xf]  ;;  %vm359_vm7 = vcmask 138240   ;;  %vm302_vm8 = vcmask 1041408   ;;  %vm298_vm9 = vcmask 31744  }
  0x19   : > { %241 = vrot.lane.b32.xlu0 %v240_v21, %s1331_s17  ;;  %v413_v0 = vld [vmem:[#allocation2 + $0x8] sm:$0xf]  ;;  %vm1125_vm10 = vcmask 1046528   ;;  %vm1199_vm11 = vcmask 523264  }
  0x1a   : > { %521 = vrot.lane.b32.xlu1 %v520_v24, %s1332_s20  ;;  %v508_v14 = vld [vmem:[#allocation2 + $0x8] sm:$0xf] }
  0x1d   : > { %690 = vrot.lane.b32.xlu0 %v689_v30, %s1333_s21 }
  0x1e   : > { %785 = vrot.lane.b32.xlu1 %v784_v33, %s1334_s22 }
  0x21   : > { %880 = vrot.lane.b32.xlu0 %v879_v36, %s1335_s23  ;;  %v772_v36 = vld [vmem:[#allocation2 + $0xc] sm:$0xf] }
  0x22   : > { %975 = vrot.lane.b32.xlu1 %v974_v37, %s1336_s24 }
  0x87   : > { %v270_v38 = vpop.permute.xlu0 %269 }
  0x88   : > { %v271_v40 = vrot.slane %v270_v38, 4  ;;  %v427_v41 = vpop.permute.xlu1 %426 }
  0x89   : > { %v428_v44 = vrot.slane %v427_v41, 4 }
  0x8a   : > { %v273_v43 = vsel %vm272_vm0, %v271_v40, %v270_v38  ;;  %v277_v49 = vmul.f32 %v271_v40, %v229_v42 }
  0x8b   : > { %v276_v46 = vmul.f32 %v273_v43, %v228_v39  ;;  %v242_v47 = vpop.permute.xlu0 %241  ;;  %v430_v54 = vsel %vm429_vm2, %v428_v44, %v427_v41  ;;  %v434_v4 = vmul.f32 %v428_v44, %v413_v0 }
  0x8c   : > { %v243_v48 = vrot.slane %v242_v47, 4  ;;  %v522_v52 = vpop.permute.xlu1 %521  ;;  %v433_v58 = vmul.f32 %v430_v54, %v228_v39  ;;  %v285_v59 = vpack.c.bf16 %v277_v49, %v277_v49 }
  0x8d   : > { %v283_v50 = vpack.c.bf16 %v276_v46, %v276_v46  ;;  %v281_v51 = vcombine.high %v276_v46, %v276_v46  ;;  %v523_v57 = vrot.slane %v522_v52, 4  ;;  %v442_v16 = vpack.c.bf16 %v434_v4, %v434_v4  ;;  %v867_v46 = vld [vmem:[#allocation2 + $0xc] sm:$0xf] }
  0x8e   : > { %v245_v53 = vsel %vm244_vm1, %v243_v48, %v242_v47  ;;  %v249_v62 = vmul.f32 %v243_v48, %v229_v42  ;;  %v438_v2 = vcombine.high %v433_v58, %v433_v58  ;;  %v440_v10 = vpack.c.bf16 %v433_v58, %v433_v58 }
  0x8f   : > { %v248_v55 = vmul.f32 %v245_v53, %v228_v39  ;;  %289 = vrot.lane.b32.xlu0 %v283_v50, %s1335_s23  ;;  %v284_v56 = vpack.c.bf16 %v281_v51, %v281_v51  ;;  %v525_v1 = vsel %vm524_vm3, %v523_v57, %v522_v52  ;;  %v691_v3 = vpop.permute.xlu0 %690  ;;  %v529_v19 = vmul.f32 %v523_v57, %v508_v14  ;;  %v962_v53 = vld [vmem:[#allocation2 + $0xc] sm:$0xf] }
  0x90   : > { %v528_v7 = vmul.f32 %v525_v1, %v228_v39  ;;  %v256_v9 = vpack.c.bf16 %v249_v62, %v249_v62  ;;  %v786_v11 = vpop.permute.xlu1 %785  ;;  %v692_v12 = vrot.slane %v691_v3, 4  ;;  %v441_v13 = vpack.c.bf16 %v438_v2, %v438_v2  ;;  %v1276_v2 = vld [vmem:[%s1716_s1 + $0x4] ss:$8 sm:$0x3] }
  0x91   : > { %291 = vrot.lane.b32.xlu1 %v284_v56, %s1335_s23  ;;  %v254_v60 = vpack.c.bf16 %v248_v55, %v248_v55  ;;  %v252_v61 = vcombine.high %v248_v55, %v248_v55  ;;  %v787_v15 = vrot.slane %v786_v11, 4  ;;  %v537_v29 = vpack.c.bf16 %v529_v19, %v529_v19 }
  0x92   : > { %v533_v17 = vcombine.high %v528_v7, %v528_v7  ;;  %v694_v18 = vsel %vm547_vm4, %v692_v12, %v691_v3  ;;  %v535_v20 = vpack.c.bf16 %v528_v7, %v528_v7  ;;  %v698_v30 = vmul.f32 %v692_v12, %v677_v25  ;;  %v1263_v7 = vld [vmem:[%s1718_s3 + $0x4] sm:$0xf] }
  0x93   : > { %293 = vrot.lane.b32.xlu0 %v285_v59, %s1335_s23  ;;  %v255_v63 = vpack.c.bf16 %v252_v61, %v252_v61  ;;  %v881_v21 = vpop.permute.xlu0 %880  ;;  %v789_v22 = vsel %vm452_vm5, %v787_v15, %v786_v11  ;;  %v697_v23 = vmul.f32 %v694_v18, %v1425_v28  ;;  %v793_v40 = vmul.f32 %v787_v15, %v772_v36 }
  0x94   : > { %v536_v24 = vpack.c.bf16 %v533_v17, %v533_v17  ;;  %v882_v26 = vrot.slane %v881_v21, 4  ;;  %v792_v27 = vmul.f32 %v789_v22, %v1425_v28  ;;  %v976_v32 = vpop.permute.xlu1 %975  ;;  %v706_v39 = vpack.c.bf16 %v698_v30, %v698_v30 }
  0x95   : > { %353 = vrot.lane.b32.xlu1 %v254_v60, %s1336_s24  ;;  %v704_v31 = vpack.c.bf16 %v697_v23, %v697_v23  ;;  %v702_v35 = vcombine.high %v697_v23, %v697_v23  ;;  %v977_v37 = vrot.slane %v976_v32, 4  ;;  %v801_v48 = vpack.c.bf16 %v793_v40, %v793_v40  ;;  %v1056_v60 = vld [vmem:[%s1719_s4] sm:$0xff] }
  0x96   : > { %v884_v33 = vsel %vm295_vm6, %v882_v26, %v881_v21  ;;  %v799_v34 = vpack.c.bf16 %v792_v27, %v792_v27  ;;  %v797_v44 = vcombine.high %v792_v27, %v792_v27  ;;  %v888_v49 = vmul.f32 %v882_v26, %v867_v46  ;;  %v1277_v46 = vld [vmem:[%s1718_s3 + $0x10] sm:$0xf] }
  0x97   : > { %355 = vrot.lane.b32.xlu0 %v255_v63, %s1336_s24  ;;  %v887_v38 = vmul.f32 %v884_v33, %v1425_v28  ;;  %v705_v41 = vpack.c.bf16 %v702_v35, %v702_v35  ;;  %v979_v42 = vsel %vm359_vm7, %v977_v37, %v976_v32  ;;  %v983_v56 = vmul.f32 %v977_v37, %v962_v53  ;;  %v1273_v37 = vld [vmem:[%s1718_s3 + $0xc] sm:$0xf] }
  0x98   : > { %v982_v47 = vmul.f32 %v979_v42, %v1425_v28  ;;  %v800_v50 = vpack.c.bf16 %v797_v44, %v797_v44  ;;  %v896_v54 = vpack.c.bf16 %v888_v49, %v888_v49  ;;  %v613_v11 = vrot.slane %v1276_v2, %v1387_v6  ;;  %v250_v6 = vld [vmem:[%s1718_s3] sm:$0xf] }
  0x99   : > { %357 = vrot.lane.b32.xlu1 %v256_v9, %s1336_s24  ;;  %v894_v43 = vpack.c.bf16 %v887_v38, %v887_v38  ;;  %v892_v52 = vcombine.high %v887_v38, %v887_v38  ;;  %v991_v59 = vpack.c.bf16 %v983_v56, %v983_v56 }
  0x9a   : > { %v989_v51 = vpack.c.bf16 %v982_v47, %v982_v47  ;;  %v987_v55 = vcombine.high %v982_v47, %v982_v47 }
  0x9b   : > { %446 = vrot.lane.b32.xlu0 %v440_v10, %s1334_s22  ;;  %v895_v57 = vpack.c.bf16 %v892_v52, %v892_v52  ;;  %v609_v10 = vrot.slane %v1276_v2, %v1385_v5 }
  0x9c   : > { %v990_v58 = vpack.c.bf16 %v987_v55, %v987_v55 }
  0x9d   : > { %448 = vrot.lane.b32.xlu1 %v441_v13, %s1334_s22  ;;  %v614_v17 = vcombine.low %v609_v10, %v613_v11 }
  0x9f   : > { %450 = vrot.lane.b32.xlu0 %v442_v16, %s1334_s22 }
  0xa1   : > { %541 = vrot.lane.b32.xlu1 %v535_v20, %s1333_s21  ;;  %v616_v20 = vmul.f32 %v614_v17, %v1425_v28  ;;  %v1269_v28 = vld [vmem:[%s1718_s3 + $0x8] sm:$0xf] }
  0xa3   : > { %543 = vrot.lane.b32.xlu0 %v536_v24, %s1333_s21  ;;  %v620_v25 = vcombine.high %v616_v20, %v616_v20  ;;  %v622_v35 = vpack.c.bf16 %v616_v20, %v616_v20 }
  0xa5   : > { %545 = vrot.lane.b32.xlu1 %v537_v29, %s1333_s21  ;;  %v623_v32 = vpack.c.bf16 %v620_v25, %v620_v25 }
  0xa7   : > { %710 = vrot.lane.b32.xlu0 %v704_v31, %s1332_s20 }
  0xa9   : > { %805 = vrot.lane.b32.xlu1 %v799_v34, %s1330_s12 }
  0xab   : > { %714 = vrot.lane.b32.xlu0 %v706_v39, %s1332_s20  ;;  %v628_v39 = vsel %vm302_vm8, %v622_v35, 0 }
  0xad   : > { %712 = vrot.lane.b32.xlu1 %v705_v41, %s1332_s20 }
  0xaf   : > { %900 = vrot.lane.b32.xlu0 %v894_v43, %s1329_s8 }
  0xb1   : > { %809 = vrot.lane.b32.xlu1 %v801_v48, %s1330_s12 }
  0xb3   : > { %807 = vrot.lane.b32.xlu0 %v800_v50, %s1330_s12 }
  0xb5   : > { %995 = vrot.lane.b32.xlu1 %v989_v51, %s1331_s17 }
  0xb7   : > { %904 = vrot.lane.b32.xlu0 %v896_v54, %s1329_s8  ;;  %v1289_v54 = vld [vmem:[%s1718_s3 + $0x1c] sm:$0xf] }
  0xb9   : > { %902 = vrot.lane.b32.xlu1 %v895_v57, %s1329_s8 }
  0xbb   : > { %997 = vrot.lane.b32.xlu0 %v990_v58, %s1331_s17  ;;  %v1281_v58 = vld [vmem:[%s1718_s3 + $0x14] sm:$0xf] }
  0xbd   : > { %999 = vrot.lane.b32.xlu1 %v991_v59, %s1331_s17 }
  0xbf   : > { %1059 = vperm.xlu0 %1319, %v1056_v60  }
 0x101   : > { %v290_v61 = vpop.permute.xlu0 %289 }
 0x103   : > { %v292_v62 = vpop.permute.xlu1 %291 }
 0x104   : > { %v296_v63 = vsel %vm295_vm6, %v290_v61, %v292_v62 }
 0x105   : > { %v294_v0 = vpop.permute.xlu0 %293  ;;  %v304_v4 = vsel %vm302_vm8, %v296_v63, 0 }
 0x106   : > { %v297_v1 = vsel %vm295_vm6, %v292_v62, %v294_v0  ;;  %v1285_v62 = vld [vmem:[%s1718_s3 + $0x18] sm:$0xf]  ;;  %v1293_v0 = vld [vmem:[%s1718_s3 + $0x20] sm:$0xf] }
 0x107   : > { %1264 = vmatprep.subr.msk.bf16.mxu0 %vm302_vm8, %v297_v1  ;;  %v354_v3 = vpop.permute.xlu1 %353 }
 0x108   : > { %324 = vmatpush1.bf16.msra.mxu0 %v304_v4 }
 0x109   : > { %v356_v9 = vpop.permute.xlu0 %355 }
 0x10a   : > { %v360_v12 = vsel %vm359_vm7, %v354_v3, %v356_v9 }
 0x10b   : > { %1265 = vmatmul.mubr.msk.bf16.vlgmr.msra.gmra.mxu0 %vm298_vm9, %v1263_v7  ;;  %v358_v13 = vpop.permute.xlu1 %357  ;;  %v366_v15 = vsel %vm302_vm8, %v360_v12, 0 }
 0x10c   : > { %v361_v14 = vsel %vm359_vm7, %v356_v9, %v358_v13  ;;  %403 = vmatprep.mubr.bf16.mxu0 %v1337_v45 }
 0x10d   : > { %1266 = vmatprep.subr.msk.bf16.mxu0 %vm302_vm8, %v361_v14  ;;  %v447_v16 = vpop.permute.xlu0 %446 }
 0x10e   : > { %386 = vmatpush1.bf16.msra.mxu0 %v366_v15 }
 0x10f   : > { %v449_v18 = vpop.permute.xlu1 %448 }
 0x110   : > { %v453_v5 = vsel %vm452_vm5, %v447_v16, %v449_v18 }
 0x111   : > { %v451_v19 = vpop.permute.xlu0 %450  ;;  %v459_v22 = vsel %vm302_vm8, %v453_v5, 0 }
 0x112   : > { %v454_v21 = vsel %vm452_vm5, %v449_v18, %v451_v19 }
 0x113   : > { %v542_v23 = vpop.permute.xlu1 %541  ;;  %1267 = vmatmul.mubr.msk.bf16.vlgmr.msra.gmra.mxu0 %vm298_vm9, %v250_v6  ;;  %1270 = vmatprep.subr.msk.bf16.mxu0 %vm302_vm8, %v454_v21 }
 0x114   : > { %479 = vmatpush1.bf16.msra.mxu0 %v459_v22  ;;  %496 = vmatprep.mubr.bf16.mxu0 %v1337_v45 }
 0x115   : > { %v544_v24 = vpop.permute.xlu0 %543 }
 0x116   : > { %v548_v26 = vsel %vm547_vm4, %v542_v23, %v544_v24 }
 0x117   : > { %v546_v27 = vpop.permute.xlu1 %545  ;;  %v554_v30 = vsel %vm302_vm8, %v548_v26, 0 }
 0x118   : > { %v549_v29 = vsel %vm547_vm4, %v544_v24, %v546_v27 }
 0x119   : > { %1274 = vmatprep.subr.msk.bf16.mxu0 %vm302_vm8, %v549_v29  ;;  %v711_v31 = vpop.permute.xlu0 %710 }
 0x11b   : > { %1271 = vmatmul.mubr.msk.bf16.vlgmr.msra.gmra.mxu0 %vm298_vm9, %v1269_v28  ;;  %v806_v33 = vpop.permute.xlu1 %805 }
 0x11c   : > { %574 = vmatpush1.bf16.msra.mxu0 %v554_v30  ;;  %591 = vmatprep.mubr.bf16.mxu0 %v1337_v45 }
 0x11d   : > { %v715_v34 = vpop.permute.xlu0 %714  ;;  %1278 = vmatprep.subr.msk.bf16.mxu0 %vm302_vm8, %v623_v32 }
 0x11f   : > { %v713_v36 = vpop.permute.xlu1 %712 }
 0x120   : > { %v718_v40 = vsel %vm524_vm3, %v713_v36, %v715_v34  ;;  %v717_v43 = vsel %vm524_vm3, %v711_v31, %v713_v36 }
 0x121   : > { %v901_v38 = vpop.permute.xlu0 %900  ;;  %v723_v47 = vsel %vm302_vm8, %v717_v43, 0 }
 0x123   : > { %1275 = vmatmul.mubr.msk.bf16.vlgmr.msra.gmra.mxu0 %vm298_vm9, %v1273_v37  ;;  %v810_v41 = vpop.permute.xlu1 %809 }
 0x124   : > { %648 = vmatpush1.bf16.msra.mxu0 %v628_v39  ;;  %665 = vmatprep.mubr.bf16.mxu0 %v1337_v45 }
 0x125   : > { %v808_v42 = vpop.permute.xlu0 %807  ;;  %1282 = vmatprep.subr.msk.bf16.mxu0 %vm302_vm8, %v718_v40 }
 0x126   : > { %v813_v50 = vsel %vm429_vm2, %v808_v42, %v810_v41  ;;  %v812_v57 = vsel %vm429_vm2, %v806_v33, %v808_v42 }
 0x127   : > { %v996_v44 = vpop.permute.xlu1 %995  ;;  %v818_v60 = vsel %vm302_vm8, %v812_v57, 0 }
 0x129   : > { %v905_v48 = vpop.permute.xlu0 %904 }
 0x12b   : > { %1279 = vmatmul.mubr.msk.bf16.vlgmr.msra.gmra.mxu0 %vm298_vm9, %v1277_v46  ;;  %v903_v49 = vpop.permute.xlu1 %902 }
 0x12c   : > { %743 = vmatpush1.bf16.msra.mxu0 %v723_v47  ;;  %v908_v51 = vsel %vm272_vm0, %v903_v49, %v905_v48  ;;  %v907_v52 = vsel %vm272_vm0, %v901_v38, %v903_v49  ;;  %760 = vmatprep.mubr.bf16.mxu0 %v1337_v45 }
 0x12d   : > { %1286 = vmatprep.subr.msk.bf16.mxu0 %vm302_vm8, %v813_v50  ;;  %1290 = vmatprep.subr.msk.bf16.mxu1 %vm302_vm8, %v908_v51  ;;  %v913_v53 = vsel %vm302_vm8, %v907_v52, 0  ;;  %v998_v55 = vpop.permute.xlu0 %997  ;;  %v1107_v51 = vld [vmem:[%s1717_s2 + $0x78] sm:$0xff]  ;;  %v1106_v52 = vld [vmem:[%s1717_s2 + $0x70] sm:$0xff] }
 0x12e   : > { %933 = vmatpush1.bf16.msra.mxu1 %v913_v53  ;;  %v1002_v61 = vsel %vm244_vm1, %v996_v44, %v998_v55 }
 0x12f   : > { %v1000_v56 = vpop.permute.xlu1 %999  ;;  %1129 = vmatprep.subr.mxu1 %v1328_v8  ;;  %v1008_v63 = vsel %vm302_vm8, %v1002_v61, 0 }
 0x130   : > { %v1003_v59 = vsel %vm244_vm1, %v998_v55, %v1000_v56  ;;  %v1105_v56 = vld [vmem:[%s1717_s2 + $0x68] sm:$0xff] }
 0x131   : > { %1291 = vmatmul.mubr.msk.bf16.vlgmr.msra.gmra.mxu1 %vm298_vm9, %v1289_v54 }
 0x132   : > { %1130 = vmatpush1.msra.mxu1 %v1107_v51 }
 0x133   : > { %1283 = vmatmul.mubr.msk.bf16.vlgmr.msra.gmra.mxu0 %vm298_vm9, %v1281_v58  ;;  %1131 = vmatprep.subr.mxu1 %v1328_v8 }
 0x134   : > { %838 = vmatpush1.bf16.msra.mxu0 %v818_v60  ;;  %855 = vmatprep.mubr.bf16.mxu0 %v1337_v45  ;;  %v1104_v60 = vld [vmem:[%s1717_s2 + $0x60] sm:$0xff] }
 0x135   : > { %1294 = vmatprep.subr.msk.bf16.mxu0 %vm302_vm8, %v1003_v59  ;;  %1132 = vmatpush1.msra.mxu1 %v1106_v52 }
 0x136   : > { %1133 = vmatprep.subr.mxu1 %v1328_v8 }
 0x137   : > { %1134 = vmatpush1.msra.mxu1 %v1105_v56 }
 0x138   : > { %1135 = vmatprep.subr.mxu1 %v1328_v8 }
 0x139   : > { %1136 = vmatpush1.msra.mxu1 %v1104_v60 }
 0x13a   : > { %v1060_v48 = vpop.permute.xlu0 %1059  ;;  %1137 = vmatprep.subr.mxu1 %v1328_v8 }
 0x13b   : > { %1287 = vmatmul.mubr.msk.bf16.vlgmr.msra.gmra.mxu0 %vm298_vm9, %v1285_v62  ;;  %v1103_v62 = vld [vmem:[%s1717_s2 + $0x58] sm:$0xff] }
 0x13c   : > { %1028 = vmatpush1.bf16.msra.mxu0 %v1008_v63  ;;  %1045 = vmatprep.mubr.bf16.mxu0 %v1337_v45 }
 0x13d   : > { %1138 = vmatpush1.msra.mxu1 %v1103_v62 }
 0x13e   : > { %1139 = vmatprep.subr.mxu1 %v1328_v8 }
 0x143   : > { %1295 = vmatmul.mubr.msk.bf16.vlgmr.msra.gmra.mxu0 %vm298_vm9, %v1293_v0  ;;  %v1102_v0 = vld [vmem:[%s1717_s2 + $0x50] sm:$0xff] }
 0x144   : > { %1140 = vmatpush1.msra.mxu1 %v1102_v0 }
 0x145   : > { %1141 = vmatprep.subr.mxu1 %v1328_v8 }
 0x1cb   : > { %v343_v1 = vpop.f32.mrf.mxu0 }
 0x1cd   : > { %v345_v2 = vpop.f32.mrf.mxu0 }
 0x1cf   : > { %v347_v3 = vpop.f32.mrf.mxu0 }
 0x1d0   : > { %v1099_v3 = vld [vmem:[%s1717_s2 + $0x38] sm:$0xff] }
 0x1d1   : > { %v348_v4 = vpop.f32.mrf.mxu0 }
 0x1d2   : > { %v1098_v4 = vld [vmem:[%s1717_s2 + $0x30] sm:$0xff] }
 0x1d3   : > { %v405_v7 = vpop.f32.mrf.mxu0 }
 0x1d4   : > { %v406_v24 = vadd.f32 %v405_v7, %v343_v1  ;;  %v1101_v1 = vld [vmem:[%s1717_s2 + $0x48] sm:$0xff] }
 0x1d5   : > { %v407_v9 = vpop.f32.mrf.mxu0  ;;  %1142 = vmatpush1.msra.mxu1 %v1101_v1  ;;  %v1097_v7 = vld [vmem:[%s1717_s2 + $0x28] sm:$0xff] }
 0x1d6   : > { %v408_v27 = vadd.f32 %v407_v9, %v345_v2  ;;  %v1100_v2 = vld [vmem:[%s1717_s2 + $0x40] sm:$0xff]  ;;  %1143 = vmatprep.subr.mxu1 %v1328_v8 }
 0x1d7   : > { %v409_v10 = vpop.f32.mrf.mxu0  ;;  %1144 = vmatpush1.msra.mxu1 %v1100_v2  ;;  %v1096_v9 = vld [vmem:[%s1717_s2 + $0x20] sm:$0xff] }
 0x1d8   : > { %1145 = vmatprep.subr.mxu1 %v1328_v8  ;;  %v1095_v10 = vld [vmem:[%s1717_s2 + $0x18] sm:$0xff] }
 0x1d9   : > { %v410_v11 = vpop.f32.mrf.mxu0  ;;  %1146 = vmatpush1.msra.mxu1 %v1099_v3 }
 0x1da   : > { %1147 = vmatprep.subr.mxu1 %v1328_v8  ;;  %v1094_v11 = vld [vmem:[%s1717_s2 + $0x10] sm:$0xff] }
 0x1db   : > { %v498_v12 = vpop.f32.mrf.mxu0  ;;  %1148 = vmatpush1.msra.mxu1 %v1098_v4 }
 0x1dc   : > { %v505_v29 = vadd.f32 %v498_v12, %v406_v24  ;;  %1149 = vmatprep.subr.mxu1 %v1328_v8  ;;  %v1093_v12 = vld [vmem:[%s1717_s2 + $0x8] sm:$0xff]  ;;  %v1108_v24 = vld [vmem:[%s1717_s2 + $0x80] sm:$0xff] }
 0x1dd   : > { %v500_v13 = vpop.f32.mrf.mxu0  ;;  %1150 = vmatpush1.msra.mxu1 %v1097_v7 }
 0x1de   : > { %v506_v31 = vadd.f32 %v500_v13, %v408_v27  ;;  %1151 = vmatprep.subr.mxu1 %v1328_v8  ;;  %v1092_v13 = vld [vmem:[%s1717_s2] sm:$0xff] }
 0x1df   : > { %v502_v14 = vpop.f32.mrf.mxu0  ;;  %1152 = vmatpush1.msra.mxu1 %v1096_v9 }
 0x1e0   : > { %1153 = vmatprep.subr.mxu1 %v1328_v8  ;;  %v1121_v14 = vld [vmem:[%s1717_s2 + $0xe8] sm:$0x7f] }
 0x1e1   : > { %v503_v15 = vpop.f32.mrf.mxu0  ;;  %1154 = vmatpush1.msra.mxu1 %v1095_v10 }
 0x1e2   : > { %1155 = vmatprep.subr.mxu1 %v1328_v8  ;;  %v1120_v15 = vld [vmem:[%s1717_s2 + $0xe0] sm:$0xff] }
 0x1e3   : > { %v593_v16 = vpop.f32.mrf.mxu0  ;;  %1156 = vmatpush1.msra.mxu1 %v1094_v11 }
 0x1e4   : > { %v600_v32 = vadd.f32 %v593_v16, %v505_v29  ;;  %1157 = vmatprep.subr.mxu1 %v1328_v8  ;;  %v1119_v16 = vld [vmem:[%s1717_s2 + $0xd8] sm:$0xff] }
 0x1e5   : > { %v595_v45 = vpop.f32.mrf.mxu0  ;;  %1158 = vmatpush1.msra.mxu1 %v1093_v12 }
 0x1e6   : > { %v601_v34 = vadd.f32 %v595_v45, %v506_v31  ;;  %1159 = vmatprep.subr.mxu1 %v1328_v8  ;;  %v1118_v45 = vld [vmem:[%s1717_s2 + $0xd0] sm:$0xff] }
 0x1e7   : > { %v597_v17 = vpop.f32.mrf.mxu0  ;;  %1160 = vmatpush1.msra.mxu1 %v1092_v13 }
 0x1e8   : > { %1165 = vmatprep.subr.mxu1 %v1328_v8  ;;  %v1117_v17 = vld [vmem:[%s1717_s2 + $0xc8] sm:$0xff] }
 0x1e9   : > { %v598_v18 = vpop.f32.mrf.mxu0  ;;  %1296 = vmatpush2.msk.msra.mxu1 %vm1125_vm10, %v1121_v14 }
 0x1ea   : > { %1167 = vmatprep.subr.mxu1 %v1328_v8  ;;  %v1116_v18 = vld [vmem:[%s1717_s2 + $0xc0] sm:$0xff] }
 0x1eb   : > { %v667_v5 = vpop.f32.mrf.mxu0  ;;  %1168 = vmatpush2.msra.mxu1 %v1120_v15 }
 0x1ec   : > { %v674_v35 = vadd.f32 %v667_v5, %v600_v32  ;;  %1169 = vmatprep.subr.mxu1 %v1328_v8  ;;  %v1115_v5 = vld [vmem:[%s1717_s2 + $0xb8] sm:$0xff] }
 0x1ed   : > { %v669_v6 = vpop.f32.mrf.mxu0  ;;  %1170 = vmatpush2.msra.mxu1 %v1119_v16 }
 0x1ee   : > { %v675_v37 = vadd.f32 %v669_v6, %v601_v34  ;;  %1171 = vmatprep.subr.mxu1 %v1328_v8  ;;  %v1114_v6 = vld [vmem:[%s1717_s2 + $0xb0] sm:$0xff] }
 0x1ef   : > { %v671_v19 = vpop.f32.mrf.mxu0  ;;  %1172 = vmatpush2.msra.mxu1 %v1118_v45 }
 0x1f0   : > { %1173 = vmatprep.subr.mxu1 %v1328_v8  ;;  %v1113_v19 = vld [vmem:[%s1717_s2 + $0xa8] sm:$0xff] }
 0x1f1   : > { %v672_v20 = vpop.f32.mrf.mxu0  ;;  %v952_v21 = vpop.f32.mrf.mxu1  ;;  %1174 = vmatpush2.msra.mxu1 %v1117_v17 }
 0x1f2   : > { %1175 = vmatprep.subr.mxu1 %v1328_v8  ;;  %v1112_v20 = vld [vmem:[%s1717_s2 + $0xa0] sm:$0xff] }
 0x1f3   : > { %v762_v22 = vpop.f32.mrf.mxu0  ;;  %v954_v23 = vpop.f32.mrf.mxu1  ;;  %1176 = vmatpush2.msra.mxu1 %v1116_v18 }
 0x1f4   : > { %v769_v38 = vadd.f32 %v762_v22, %v674_v35  ;;  %1177 = vmatprep.subr.mxu1 %v1328_v8  ;;  %v1110_v22 = vld [vmem:[%s1717_s2 + $0x90] sm:$0xff] }
 0x1f5   : > { %v764_v25 = vpop.f32.mrf.mxu0  ;;  %v956_v26 = vpop.f32.mrf.mxu1  ;;  %1178 = vmatpush2.msra.mxu1 %v1115_v5 }
 0x1f6   : > { %v770_v40 = vadd.f32 %v764_v25, %v675_v37  ;;  %1179 = vmatprep.subr.mxu1 %v1328_v8 }
 0x1f7   : > { %v766_v28 = vpop.f32.mrf.mxu0  ;;  %v957_v30 = vpop.f32.mrf.mxu1  ;;  %1180 = vmatpush2.msra.mxu1 %v1114_v6 }
 0x1f8   : > { %1181 = vmatprep.subr.mxu1 %v1328_v8 }
 0x1f9   : > { %v767_v33 = vpop.f32.mrf.mxu0  ;;  %1182 = vmatpush2.msra.mxu1 %v1113_v19 }
 0x1fa   : > { %1183 = vmatprep.subr.mxu1 %v1328_v8 }
 0x1fb   : > { %v857_v36 = vpop.f32.mrf.mxu0  ;;  %1184 = vmatpush2.msra.mxu1 %v1112_v20 }
 0x1fc   : > { %v864_v41 = vadd.f32 %v857_v36, %v769_v38  ;;  %1185 = vmatprep.subr.mxu1 %v1328_v8 }
 0x1fd   : > { %v859_v39 = vpop.f32.mrf.mxu0 }
 0x1fe   : > { %v865_v43 = vadd.f32 %v859_v39, %v770_v40  ;;  %v959_v46 = vadd.f32 %v952_v21, %v864_v41  ;;  %v1111_v21 = vld [vmem:[%s1717_s2 + $0x98] sm:$0xff] }
 0x1ff   : > { %v861_v42 = vpop.f32.mrf.mxu0  ;;  %1186 = vmatpush2.msra.mxu1 %v1111_v21 }
 0x200   : > { %v960_v49 = vadd.f32 %v954_v23, %v865_v43  ;;  %1187 = vmatprep.subr.mxu1 %v1328_v8  ;;  %v1109_v23 = vld [vmem:[%s1717_s2 + $0x88] sm:$0xff] }
 0x201   : > { %v862_v44 = vpop.f32.mrf.mxu0  ;;  %1188 = vmatpush2.msra.mxu1 %v1110_v22 }
 0x202   : > { %1189 = vmatprep.subr.mxu1 %v1328_v8 }
 0x203   : > { %v1047_v47 = vpop.f32.mrf.mxu0  ;;  %1190 = vmatpush2.msra.mxu1 %v1109_v23 }
 0x204   : > { %v1054_v50 = vadd.f32 %v1047_v47, %v959_v46  ;;  %1191 = vmatprep.subr.mxu1 %v1328_v8 }
 0x205   : > { %v1049_v53 = vpop.f32.mrf.mxu0  ;;  %1192 = vmatpush2.msra.mxu1 %v1108_v24 }
 0x206   : > { %v1055_v54 = vadd.f32 %v1049_v53, %v960_v49  ;;  %v1573_v55 = vadd.f32 %v1060_v48, %v1054_v50 }
 0x207   : > { %v1051_v57 = vpop.f32.mrf.mxu0 }
 0x208   : > { %v1579_v58 = vadd.f32 %v1060_v48, %v1055_v54  ;;  %v1064_v59 = vmax.f32 %v1573_v55, 0.0 }
 0x209   : > { %v1052_v61 = vpop.f32.mrf.mxu0 }
 0x20a   : > { %1072 = vrot.lane.b32.xlu1 %v1064_v59, %s1332_s20  ;;  %v1065_v63 = vmax.f32 %v1579_v58, 0.0 }
 0x20e   : > { %1074 = vrot.lane.b32.xlu1 %v1065_v63, %s1332_s20 }
 0x27c   : > { %v1073_v25 = vpop.permute.xlu1 %1072 }
 0x280   : > { %v1075_v26 = vpop.permute.xlu1 %1074 }
 0x281   : > { %v1076_v27 = vsel %vm524_vm3, %v1073_v25, %v1075_v26  ;;  %v1080_v29 = vmax.f32 %v1065_v63, %v1075_v26 }
 0x282   : > { %v1079_v28 = vmax.f32 %v1064_v59, %v1076_v27 }
 0x283   : > { %1085 = vrot.lane.b32.xlu1 %v1080_v29, %s1329_s8 }
 0x284   : > { %1083 = vrot.lane.b32.xlu0 %v1079_v28, %s1329_s8 }
 0x2f5   : > { %v1086_v30 = vpop.permute.xlu1 %1085 }
 0x2f6   : > { %v1091_v31 = vmax.f32 %v1080_v29, %v1086_v30  ;;  %v1084_v32 = vpop.permute.xlu0 %1083 }
 0x2f7   : > { %v1087_v8 = vsel %vm272_vm0, %v1084_v32, %v1086_v30 }
 0x2f8   : > { %v1090_v33 = vmax.f32 %v1079_v28, %v1087_v8  ;;  %1297 = vmatprep.mubr.msk.f32.mxu1 %vm244_vm1, %v1091_v31 }
 0x2fa   : > { %1194 = vmatmul.mubr.f32.vlgmr.msra.gmra.mxu1 %v1090_v33 }
 0x3ba   : > { %v1195_v34 = vpop.f32.mrf.mxu1 }
 0x3bb   : > { %1200 = vst.msk [vmem:[%s222_s26] sm:$0xff] %vm1199_vm11, %v1195_v34 }
 0x3bc   : > { %v1197_v35 = vpop.f32.mrf.mxu1 }
 0x3bd PF: > { %s15_s18 = sadd.s32 1, %s1326_s18  }
 0x3be   : > { %p12_p4 = scmp.ge.s32.totalorder %s15_s18, 4  }
 0x3c0   :  { %14 = sbr.rel (!%p12_p4) target bundleno = 1 (0x1), region = 86 }

// kernel: unet_forward.8
= control target key start
LH: loop header
LB: loop body
LE: loop exit
PB: predicated region body
PF: predicated region fallthrough
CT: control target
= control target key end

     0   :  { %s1766_s24 = smov 0   ;;  %s1962_s0 = inlined_call_operand.vmem [shape: f32[2,16,16], index: 0, kind: input, shape index: {}]   ;;  %s1963_s1 = inlined_call_operand.vmem [shape: f32[9,16], index: 1, kind: input, shape index: {}]   ;;  %s1964_s2 = inlined_call_operand.vmem [shape: f32[11,4], index: 2, kind: input, shape index: {}]   ;;  %s1965_s3 = inlined_call_operand.vmem [shape: bf16[9,32,16], index: 3, kind: input, shape index: {}]   ;;  %s1966_s4 = inlined_call_operand.vmem [shape: f32[32,1], index: 4, kind: input, shape index: {}]   ;;  %s1967_s5 = inlined_call_operand.vmem [shape: bf16[32,32], index: 5, kind: input, shape index: {}]   ;;  %s1968_s6 = inlined_call_operand.vmem [shape: f32[32,1], index: 6, kind: input, shape index: {}]   ;;  %s1969_s7 = inlined_call_operand.vmem [shape: f32[2,32,4], index: 7, kind: output, shape index: {}]  }
   0x1 LB: > { %s1460_s25 = sadd.s32 4294967295, %s1714_s24   ;;  %p1464_p0 = scmp.ge.s32.totalorder %s1714_s24, 1  ;;  %s1714_s24 = sphi %s1766_s24, %s17_s24  }
   0x2   : > { %p237_p1 = scmp.lt.s32.totalorder %s1714_s24, 3 }
   0x4   : > { %p238_p2 = pnand %p1464_p0, %p237_p1 }
   0x5   : > { %s1716_s28 = smov (!%p238_p2), 124   ;;  %s1717_s10 = smov (!%p238_p2), 125  }
   0x6   : > { %241 = sbr.rel (%p238_p2) target bundleno = 1141 (0x475), region = 48  ;;  %p269_p3 = scmp.lt.s32.totalorder (!%p238_p2), %s1460_s25, 1 }
   0x7   : > { %s1718_s15 = smov (!%p238_p2), 123   ;;  %s1720_s18 = smov (!%p238_p2), 127  }
   0x8   : > { %s1721_s22 = smov (!%p238_p2), 1   ;;  %s1722_s8 = smov (!%p238_p2), 3  }
   0x9   : > { %s1723_s9 = smov (!%p238_p2), 4   ;;  %s1724_s11 = smov (!%p238_p2), 5  }
   0xb   : > { %v1470_v0 = vld [vmem:[%s1963_s1 + $0x1] ss:$0 sm:$0xff]  ;;  %v1483_v1 = vld [vmem:[%s1963_s1 + $0x2] ss:$0 sm:$0xff]  ;;  %v1469_v2 = vld [vmem:[%s1963_s1] ss:$0 sm:$0xff] }
   0xc   : > { %320 = vrot.lane.b32.xlu0 %v1470_v0, %s1716_s28  ;;  %488 = vrot.lane.b32.xlu1 %v1483_v1, %s1717_s10  ;;  %v1492_v3 = vld [vmem:[%s1963_s1 + $0x3] ss:$0 sm:$0xff]  ;;  %v1510_v4 = vld [vmem:[%s1963_s1 + $0x5] ss:$0 sm:$0xff]  ;;  %vm282_vm0 = vcmask 130048   ;;  %v1719_v6 = vmov 0.0  }
   0xd   : > { %v1519_v5 = vld [vmem:[%s1963_s1 + $0x6] ss:$0 sm:$0xff]  ;;  %281 = vst [vmem:[#allocation2 + $0x8] sm:$0xff] %v1719_v6  ;;  %285 = vst [vmem:[#allocation2 + $0x20] sm:$0xff] %v1719_v6  ;;  %s1971_s25 = smov (!%p269_p3, %s1460_s25), 1  ;;  %v1688_v11 = vld [vmem:[%s1965_s3 + $0x10] sm:$0xff]  }
   0xe   : > { %v1528_v7 = vld [vmem:[%s1963_s1 + $0x7] ss:$0 sm:$0xff]  ;;  %s1557_s21 = sshll.u32 %s1971_s25, 4  ;;  %v1537_v8 = vld [vmem:[%s1963_s1 + $0x8] ss:$0 sm:$0xff]  ;;  %1598 = vmatprep.mubr.msk.bf16.mxu0 %vm282_vm0, %v1688_v11  ;;  %v1725_v61 = vmov 0  }
   0xf   : > { %s273_s30 = scalar_lea.vmem %s1962_s0, %s1557_s21  ;;  %v1690_v14 = vld [vmem:[%s1965_s3] sm:$0xff]   ;;  %v1121_v59 = vld [vmem:[%s1966_s4 + $0x8] sm:$0xff]  ;;  %1687 = vset.pattern.permute.xlu1 %v1725_v61  ;;  %1686 = vset.pattern.permute.xlu0 %v1725_v61  ;;  %v1122_v62 = vld [vmem:[%s1966_s4 + $0x10] sm:$0xff]  ;;  %vm350_vm1 = vcmask 31744   ;;  %vm424_vm2 = vcmask 39936   ;;  %vm518_vm3 = vcmask 23552  }
  0x10   : > { %301 = vrot.lane.b32.xlu0 %v1469_v2, %s1718_s15  ;;  %586 = vrot.lane.b32.xlu1 %v1492_v3, %s1720_s18  ;;  %v287_v9 = vld [vmem:[%s273_s30] sm:$0xff]  ;;  %v288_v10 = vld [vmem:[%s273_s30 + $0x8] sm:$0xff]  ;;  %vm616_vm4 = vcmask 7168   ;;  %vm1215_vm5 = vcmask 1042432   ;;  %vm1202_vm6 = vcmask 89088   ;;  %vm1344_vm7 = vcmask 261120  }
  0x11   : > { %289 = vst.msk [vmem:[#allocation2 + $0x8] sm:$0xff] %vm282_vm0, %v287_v9  ;;  %290 = vst.msk [vmem:[#allocation2 + $0x20] sm:$0xff] %vm282_vm0, %v288_v10  ;;  %1604 = vmatprep.mubr.msk.bf16.mxu1 %vm282_vm0, %v1690_v14  ;;  %v1501_v26 = vld [vmem:[%s1963_s1 + $0x4] ss:$0 sm:$0xff]  ;;  %v1123_v63 = vld [vmem:[%s1966_s4 + $0x18] sm:$0xff]  ;;  %s1558_s16 = sshll.u32 %s1971_s25, 5 }
  0x12   : > { %v1120_v60 = vld [vmem:[%s1966_s4] sm:$0xff]  ;;  %v1689_v3 = vld [vmem:[%s1965_s3 + $0x18] sm:$0xff]   ;;  %v1694_v9 = vld [vmem:[%s1965_s3 + $0x30] sm:$0xff]   ;;  %s278_s20 = scalar_lea.vmem %s1969_s7, %s1558_s16 }
  0x14   : > { %766 = vrot.lane.b32.xlu0 %v1510_v4, %s1721_s22  ;;  %856 = vrot.lane.b32.xlu1 %v1519_v5, %s1722_s8  ;;  %v1692_v4 = vld [vmem:[%s1965_s3 + $0x20] sm:$0xff]  }
  0x18   : > { %946 = vrot.lane.b32.xlu0 %v1528_v7, %s1723_s9  ;;  %1036 = vrot.lane.b32.xlu1 %v1537_v8, %s1724_s11  ;;  %v292_v12 = vld [vmem:[#allocation2 + $0x8] sm:$0xff]  ;;  %v294_v13 = vld [vmem:[#allocation2 + $0x20] sm:$0xff] }
  0x19   : > { %v683_v31 = vmul.f32 %v1501_v26, %v292_v12  ;;  %v684_v34 = vmul.f32 %v1501_v26, %v294_v13  ;;  %v1691_v8 = vld [vmem:[%s1965_s3 + $0x8] sm:$0xff]   ;;  %v1699_v26 = vld [vmem:[%s1965_s3 + $0x58] sm:$0xff]  }
  0x1b   : > { %v1826_v42 = vpack.c.bf16 %v684_v34, %v683_v31  ;;  %v1705_v31 = vld [vmem:[%s1965_s3 + $0x88] sm:$0xff]  }
  0x7e   : > { %v321_v15 = vpop.permute.xlu0 %320  ;;  %v489_v19 = vpop.permute.xlu1 %488 }
  0x7f   : > { %v323_v16 = vmul.f32 0.0, %v321_v15  ;;  %v324_v17 = vmul.f32 %v321_v15, %v292_v12  ;;  %v326_v18 = vmul.f32 %v321_v15, %v294_v13  ;;  %v491_v23 = vmul.f32 0.0, %v489_v19 }
  0x80   : > { %v492_v24 = vmul.f32 %v489_v19, %v292_v12  ;;  %v494_v25 = vmul.f32 %v489_v19, %v294_v13  ;;  %v1698_v19 = vld [vmem:[%s1965_s3 + $0x50] sm:$0xff]  }
  0x81   : > { %v332_v20 = vpack.c.bf16 %v323_v16, %v323_v16  ;;  %v333_v21 = vpack.c.bf16 %v326_v18, %v324_v17  ;;  %v500_v36 = vpack.c.bf16 %v491_v23, %v491_v23  ;;  %v1696_v16 = vld [vmem:[%s1965_s3 + $0x40] sm:$0xff]   ;;  %v1695_v18 = vld [vmem:[%s1965_s3 + $0x38] sm:$0xff]  }
  0x82   : > { %v302_v22 = vpop.permute.xlu0 %301  ;;  %v587_v30 = vpop.permute.xlu1 %586  ;;  %v501_v37 = vpack.c.bf16 %v494_v25, %v492_v24  ;;  %v1700_v23 = vld [vmem:[%s1965_s3 + $0x60] sm:$0xff]  }
  0x83   : > { %v304_v27 = vmul.f32 0.0, %v302_v22  ;;  %v305_v28 = vmul.f32 %v302_v22, %v292_v12  ;;  %v307_v29 = vmul.f32 %v302_v22, %v294_v13  ;;  %346 = vrot.lane.b32.xlu0 %v332_v20, %s1723_s9  ;;  %348 = vrot.lane.b32.xlu1 %v333_v21, %s1723_s9  ;;  %v589_v35 = vmul.f32 0.0, %v587_v30  ;;  %v1697_v22 = vld [vmem:[%s1965_s3 + $0x48] sm:$0xff]  }
  0x84   : > { %v590_v38 = vmul.f32 %v587_v30, %v292_v12  ;;  %v592_v39 = vmul.f32 %v587_v30, %v294_v13  ;;  %v1703_v30 = vld [vmem:[%s1965_s3 + $0x78] sm:$0xff]  }
  0x85   : > { %v312_v32 = vpack.c.bf16 %v304_v27, %v304_v27  ;;  %v313_v33 = vpack.c.bf16 %v307_v29, %v305_v28  ;;  %v598_v47 = vpack.c.bf16 %v589_v35, %v589_v35  ;;  %v1702_v27 = vld [vmem:[%s1965_s3 + $0x70] sm:$0xff]   ;;  %v1701_v28 = vld [vmem:[%s1965_s3 + $0x68] sm:$0xff]   ;;  %v1704_v29 = vld [vmem:[%s1965_s3 + $0x80] sm:$0xff]  }
  0x86   : > { %v767_v40 = vpop.permute.xlu0 %766  ;;  %v857_v41 = vpop.permute.xlu1 %856  ;;  %v599_v48 = vpack.c.bf16 %v592_v39, %v590_v38 }
  0x87   : > { %420 = vrot.lane.b32.xlu0 %v312_v32, %s1724_s11  ;;  %422 = vrot.lane.b32.xlu1 %v313_v33, %s1724_s11  ;;  %v769_v43 = vmul.f32 %v767_v40, %v292_v12  ;;  %v770_v44 = vmul.f32 %v767_v40, %v294_v13  ;;  %v859_v45 = vmul.f32 %v857_v41, %v292_v12 }
  0x88   : > { %v860_v46 = vmul.f32 %v857_v41, %v294_v13 }
  0x89   : > { %v776_v51 = vpack.c.bf16 %v770_v44, %v769_v43 }
  0x8a   : > { %v947_v49 = vpop.permute.xlu0 %946  ;;  %v1037_v50 = vpop.permute.xlu1 %1036  ;;  %v866_v52 = vpack.c.bf16 %v860_v46, %v859_v45 }
  0x8b   : > { %514 = vrot.lane.b32.xlu0 %v500_v36, %s1722_s8  ;;  %516 = vrot.lane.b32.xlu1 %v501_v37, %s1722_s8  ;;  %v949_v53 = vmul.f32 %v947_v49, %v292_v12  ;;  %v950_v54 = vmul.f32 %v947_v49, %v294_v13  ;;  %v1039_v55 = vmul.f32 %v1037_v50, %v292_v12 }
  0x8c   : > { %v1040_v56 = vmul.f32 %v1037_v50, %v294_v13  ;;  %v1693_v13 = vld [vmem:[%s1965_s3 + $0x28] sm:$0xff]  }
  0x8d   : > { %v956_v57 = vpack.c.bf16 %v950_v54, %v949_v53 }
  0x8e   : > { %v1046_v58 = vpack.c.bf16 %v1040_v56, %v1039_v55 }
  0x8f   : > { %612 = vrot.lane.b32.xlu0 %v598_v47, %s1721_s22  ;;  %614 = vrot.lane.b32.xlu1 %v599_v48, %s1721_s22 }
  0x93   : > { %788 = vrot.lane.b32.xlu0 %v776_v51, %s1720_s18  ;;  %878 = vrot.lane.b32.xlu1 %v866_v52, %s1717_s10 }
  0x97   : > { %968 = vrot.lane.b32.xlu0 %v956_v57, %s1716_s28  ;;  %1058 = vrot.lane.b32.xlu1 %v1046_v58, %s1718_s15 }
  0x9b   : > { %1131 = vperm.xlu1 %1687, %v1121_v59   ;;  %1126 = vperm.xlu0 %1686, %v1120_v60  }
  0x9f   : > { %1136 = vperm.xlu1 %1687, %v1122_v62   ;;  %1141 = vperm.xlu0 %1686, %v1123_v63  }
  0xf5   : > { %v347_v0 = vpop.permute.xlu0 %346  ;;  %v349_v1 = vpop.permute.xlu1 %348 }
  0xf6   : > { %v351_v2 = vsel %vm350_vm1, %v347_v0, %v349_v1 }
  0xf7   : > { %1596 = vmatprep.subr.bf16.mxu0 %v351_v2 }
  0xf8   : > { %1597 = vmatpush3.bf16.msra.mxu0 %v351_v2 }
  0xf9   : > { %v421_v5 = vpop.permute.xlu0 %420  ;;  %v423_v6 = vpop.permute.xlu1 %422 }
  0xfa   : > { %v425_v7 = vsel %vm424_vm2, %v421_v5, %v423_v6 }
  0xfb   : > { %1599 = vmatmul.mubr.msk.bf16.vlgmr.msra.gmra.mxu0 %vm282_vm0, %v1689_v3  ;;  %1602 = vmatprep.subr.bf16.mxu1 %v425_v7 }
  0xfc   : > { %1603 = vmatpush3.bf16.msra.mxu1 %v425_v7  ;;  %1610 = vmatprep.mubr.msk.bf16.mxu0 %vm282_vm0, %v1692_v4 }
  0xfd   : > { %v515_v10 = vpop.permute.xlu0 %514  ;;  %v517_v11 = vpop.permute.xlu1 %516 }
  0xfe   : > { %v519_v12 = vsel %vm518_vm3, %v515_v10, %v517_v11 }
  0xff   : > { %1605 = vmatmul.mubr.msk.bf16.vlgmr.msra.gmra.mxu1 %vm282_vm0, %v1691_v8  ;;  %1608 = vmatprep.subr.bf16.mxu0 %v519_v12 }
 0x100   : > { %1609 = vmatpush3.bf16.msra.mxu0 %v519_v12  ;;  %1616 = vmatprep.mubr.msk.bf16.mxu1 %vm282_vm0, %v1694_v9 }
 0x101   : > { %v613_v14 = vpop.permute.xlu0 %612  ;;  %v615_v15 = vpop.permute.xlu1 %614  ;;  %1620 = vmatprep.subr.bf16.mxu0 %v1826_v42 }
 0x102   : > { %v617_v17 = vsel %vm616_vm4, %v613_v14, %v615_v15 }
 0x103   : > { %1611 = vmatmul.mubr.msk.bf16.vlgmr.msra.gmra.mxu0 %vm282_vm0, %v1693_v13  ;;  %1614 = vmatprep.subr.bf16.mxu1 %v617_v17 }
 0x104   : > { %1615 = vmatpush3.bf16.msra.mxu1 %v617_v17  ;;  %1621 = vmatpush3.bf16.msra.mxu0 %v1826_v42 }
 0x105   : > { %v789_v20 = vpop.permute.xlu0 %788  ;;  %1622 = vmatprep.mubr.msk.bf16.mxu0 %vm282_vm0, %v1696_v16  ;;  %v879_v21 = vpop.permute.xlu1 %878 }
 0x106   : > { %1626 = vmatprep.subr.bf16.mxu1 %v789_v20  ;;  %1632 = vmatprep.subr.bf16.mxu0 %v879_v21 }
 0x107   : > { %1617 = vmatmul.mubr.msk.bf16.vlgmr.msra.gmra.mxu1 %vm282_vm0, %v1695_v18 }
 0x108   : > { %1627 = vmatpush3.bf16.msra.mxu1 %v789_v20  ;;  %1628 = vmatprep.mubr.msk.bf16.mxu1 %vm282_vm0, %v1698_v19 }
 0x109   : > { %v969_v24 = vpop.permute.xlu0 %968  ;;  %v1059_v25 = vpop.permute.xlu1 %1058 }
 0x10a   : > { %1638 = vmatprep.subr.bf16.mxu1 %v969_v24 }
 0x10b   : > { %1623 = vmatmul.mubr.msk.bf16.vlgmr.msra.gmra.mxu0 %vm282_vm0, %v1697_v22 }
 0x10c   : > { %1633 = vmatpush3.bf16.msra.mxu0 %v879_v21  ;;  %1634 = vmatprep.mubr.msk.bf16.mxu0 %vm282_vm0, %v1700_v23 }
 0x10d   : > { %1644 = vmatprep.subr.bf16.mxu0 %v1059_v25 }
 0x10f   : > { %1629 = vmatmul.mubr.msk.bf16.vlgmr.msra.gmra.mxu1 %vm282_vm0, %v1699_v26 }
 0x110   : > { %1639 = vmatpush3.bf16.msra.mxu1 %v969_v24  ;;  %1640 = vmatprep.mubr.msk.bf16.mxu1 %vm282_vm0, %v1702_v27 }
 0x113   : > { %1635 = vmatmul.mubr.msk.bf16.vlgmr.msra.gmra.mxu0 %vm282_vm0, %v1701_v28 }
 0x114   : > { %1645 = vmatpush3.bf16.msra.mxu0 %v1059_v25  ;;  %1646 = vmatprep.mubr.msk.bf16.mxu0 %vm282_vm0, %v1704_v29 }
 0x116   : > { %v1132_v2 = vpop.permute.xlu1 %1131  ;;  %v1127_v15 = vpop.permute.xlu0 %1126 }
 0x117   : > { %1641 = vmatmul.mubr.msk.bf16.vlgmr.msra.gmra.mxu1 %vm282_vm0, %v1703_v30 }
 0x11a   : > { %v1137_v22 = vpop.permute.xlu1 %1136 }
 0x11b   : > { %1647 = vmatmul.mubr.msk.bf16.vlgmr.msra.gmra.mxu0 %vm282_vm0, %v1705_v31 }
 0x1bb   : > { %v1600_v32 = vpop.f32.mrf.mxu0 }
 0x1bd   : > { %v393_v33 = vpop.f32.mrf.mxu0 }
 0x1bf   : > { %v1601_v34 = vpop.f32.mrf.mxu0  ;;  %v1606_v35 = vpop.f32.mrf.mxu1 }
 0x1c0   : > { %v476_v50 = vadd.f32 %v1606_v35, %v1600_v32 }
 0x1c1   : > { %v396_v36 = vpop.f32.mrf.mxu0  ;;  %v467_v37 = vpop.f32.mrf.mxu1 }
 0x1c2   : > { %v468_v53 = vadd.f32 %v467_v37, %v393_v33 }
 0x1c3   : > { %v1607_v38 = vpop.f32.mrf.mxu1  ;;  %v1612_v39 = vpop.f32.mrf.mxu0 }
 0x1c4   : > { %v578_v54 = vadd.f32 %v1612_v39, %v476_v50  ;;  %v479_v57 = vadd.f32 %v1607_v38, %v1601_v34 }
 0x1c5   : > { %v470_v40 = vpop.f32.mrf.mxu1  ;;  %v561_v41 = vpop.f32.mrf.mxu0 }
 0x1c6   : > { %v576_v58 = vadd.f32 %v561_v41, %v468_v53  ;;  %v471_v62 = vadd.f32 %v470_v40, %v396_v36  ;;  %v1142_v36 = vpop.permute.xlu0 %1141  ;;  %v1200_v53 = vld [vmem:[%s1964_s2] sm:$0xff] }
 0x1c7   : > { %v1613_v42 = vpop.f32.mrf.mxu0  ;;  %v1618_v43 = vpop.f32.mrf.mxu1 }
 0x1c8   : > { %v676_v59 = vadd.f32 %v1618_v43, %v578_v54  ;;  %v579_v63 = vadd.f32 %v1613_v42, %v479_v57 }
 0x1c9   : > { %v564_v44 = vpop.f32.mrf.mxu0  ;;  %v659_v45 = vpop.f32.mrf.mxu1 }
 0x1ca   : > { %v674_v0 = vadd.f32 %v659_v45, %v576_v58  ;;  %v577_v5 = vadd.f32 %v564_v44, %v471_v62 }
 0x1cb   : > { %v1619_v46 = vpop.f32.mrf.mxu1  ;;  %v1624_v47 = vpop.f32.mrf.mxu0 }
 0x1cc   : > { %v758_v1 = vadd.f32 %v1624_v47, %v676_v59  ;;  %v677_v6 = vadd.f32 %v1619_v46, %v579_v63  ;;  %v1311_v63 = vld [vmem:[%s1968_s6 + $0x8] sm:$0xff] }
 0x1cd   : > { %v662_v48 = vpop.f32.mrf.mxu1  ;;  %v741_v49 = vpop.f32.mrf.mxu0 }
 0x1ce   : > { %v756_v7 = vadd.f32 %v741_v49, %v674_v0  ;;  %v675_v11 = vadd.f32 %v662_v48, %v577_v5  ;;  %v1312_v0 = vld [vmem:[%s1968_s6 + $0x10] sm:$0xff] }
 0x1cf   : > { %v1625_v51 = vpop.f32.mrf.mxu0  ;;  %v1630_v52 = vpop.f32.mrf.mxu1 }
 0x1d0   : > { %v848_v8 = vadd.f32 %v1630_v52, %v758_v1  ;;  %v759_v12 = vadd.f32 %v1625_v51, %v677_v6  ;;  %v1201_v52 = vld [vmem:[%s1964_s2 + $0x8] sm:$0x7]  ;;  %v1313_v1 = vld [vmem:[%s1968_s6 + $0x18] sm:$0xff] }
 0x1d1   : > { %v744_v55 = vpop.f32.mrf.mxu0  ;;  %v831_v56 = vpop.f32.mrf.mxu1  ;;  %1650 = vmatprep.subr.msk.mxu1 %vm1215_vm5, %v1201_v52 }
 0x1d2   : > { %v846_v13 = vadd.f32 %v831_v56, %v756_v7  ;;  %v757_v18 = vadd.f32 %v744_v55, %v675_v11  ;;  %1651 = vmatpush3.msk.msra.mxu1 %vm1215_vm5, %v1201_v52 }
 0x1d3   : > { %v1631_v60 = vpop.f32.mrf.mxu1  ;;  %v1636_v61 = vpop.f32.mrf.mxu0  ;;  %1652 = vmatprep.subr.mxu1 %v1200_v53 }
 0x1d4   : > { %v938_v14 = vadd.f32 %v1636_v61, %v848_v8  ;;  %v849_v19 = vadd.f32 %v1631_v60, %v759_v12  ;;  %1653 = vmatpush3.msra.mxu1 %v1200_v53  ;;  %v1310_v61 = vld [vmem:[%s1968_s6] sm:$0xff] }
 0x1d5   : > { %v834_v3 = vpop.f32.mrf.mxu1  ;;  %v921_v4 = vpop.f32.mrf.mxu0 }
 0x1d6   : > { %v936_v20 = vadd.f32 %v921_v4, %v846_v13  ;;  %v847_v25 = vadd.f32 %v834_v3, %v757_v18 }
 0x1d7   : > { %v1637_v9 = vpop.f32.mrf.mxu0  ;;  %v1642_v10 = vpop.f32.mrf.mxu1 }
 0x1d8   : > { %v1028_v21 = vadd.f32 %v1642_v10, %v938_v14  ;;  %v939_v26 = vadd.f32 %v1637_v9, %v849_v19  ;;  %v1706_v10 = vld [vmem:[%s1967_s5] sm:$0xff]  }
 0x1d9   : > { %v924_v16 = vpop.f32.mrf.mxu0  ;;  %v1011_v17 = vpop.f32.mrf.mxu1  ;;  %1664 = vmatprep.mubr.msk.bf16.mxu0 %vm1344_vm7, %v1706_v10 }
 0x1da   : > { %v1026_v27 = vadd.f32 %v1011_v17, %v936_v20  ;;  %v937_v31 = vadd.f32 %v924_v16, %v847_v25  ;;  %v1707_v17 = vld [vmem:[%s1967_s5 + $0x8] sm:$0xff]  }
 0x1db   : > { %v1643_v23 = vpop.f32.mrf.mxu1  ;;  %v1648_v24 = vpop.f32.mrf.mxu0 }
 0x1dc   : > { %v1118_v28 = vadd.f32 %v1648_v24, %v1028_v21  ;;  %v1029_v32 = vadd.f32 %v1643_v23, %v939_v26 }
 0x1dd   : > { %v1014_v29 = vpop.f32.mrf.mxu1  ;;  %v1101_v30 = vpop.f32.mrf.mxu0 }
 0x1de   : > { %v1116_v33 = vadd.f32 %v1101_v30, %v1026_v27  ;;  %v1146_v34 = vadd.f32 %v1137_v22, %v1118_v28  ;;  %v1027_v37 = vadd.f32 %v1014_v29, %v937_v31 }
 0x1df   : > { %v1649_v35 = vpop.f32.mrf.mxu0 }
 0x1e0   : > { %v1144_v38 = vadd.f32 %v1127_v15, %v1116_v33  ;;  %v1150_v39 = vmax.f32 %v1146_v34, 0.0  ;;  %v1119_v40 = vadd.f32 %v1649_v35, %v1029_v32 }
 0x1e1   : > { %v1104_v41 = vpop.f32.mrf.mxu0 }
 0x1e2   : > { %v1148_v42 = vmax.f32 %v1144_v38, 0.0  ;;  %1154 = vst.msk [vmem:[#allocation3 + $0x10] sm:$0xff] %vm282_vm0, %v1150_v39  ;;  %v1147_v43 = vadd.f32 %v1142_v36, %v1119_v40  ;;  %v1117_v44 = vadd.f32 %v1104_v41, %v1027_v37 }
 0x1e4   : > { %1152 = vst.msk [vmem:[#allocation3] sm:$0xff] %vm282_vm0, %v1148_v42  ;;  %v1151_v45 = vmax.f32 %v1147_v43, 0.0  ;;  %v1145_v46 = vadd.f32 %v1132_v2, %v1117_v44 }
 0x1e6   : > { %1155 = vst.msk [vmem:[#allocation3 + $0x18] sm:$0xff] %vm282_vm0, %v1151_v45  ;;  %v1149_v47 = vmax.f32 %v1145_v46, 0.0 }
 0x1e8   : > { %1153 = vst.msk [vmem:[#allocation3 + $0x8] sm:$0xff] %vm282_vm0, %v1149_v47 }
 0x1e9   : > { %v1158_v50 = vld [vmem:[#allocation3 + $0x10] sm:$0xff] }
 0x1eb   : > { %v1156_v48 = vld [vmem:[#allocation3] sm:$0xff] }
 0x1ec   : > { %1164 = vrot.lane.b32.xlu1 %v1156_v48, %s1720_s18 }
 0x1ed   : > { %v1159_v51 = vld [vmem:[#allocation3 + $0x18] sm:$0xff] }
 0x1ef   : > { %v1157_v49 = vld [vmem:[#allocation3 + $0x8] sm:$0xff] }
 0x1f0   : > { %1166 = vrot.lane.b32.xlu0 %v1157_v49, %s1720_s18  ;;  %1168 = vrot.lane.b32.xlu1 %v1158_v50, %s1720_s18 }
 0x1f4   : > { %1170 = vrot.lane.b32.xlu0 %v1159_v51, %s1720_s18 }
 0x25e   : > { %v1165_v54 = vpop.permute.xlu1 %1164 }
 0x25f   : > { %v1176_v55 = vmax.f32 %v1156_v48, %v1165_v54 }
 0x261   : > { %1184 = vrot.lane.b32.xlu1 %v1176_v55, %s1716_s28 }
 0x262   : > { %v1167_v56 = vpop.permute.xlu0 %1166  ;;  %v1169_v57 = vpop.permute.xlu1 %1168 }
 0x263   : > { %v1177_v58 = vmax.f32 %v1157_v49, %v1167_v56  ;;  %v1178_v59 = vmax.f32 %v1158_v50, %v1169_v57 }
 0x265   : > { %1186 = vrot.lane.b32.xlu0 %v1177_v58, %s1716_s28  ;;  %1188 = vrot.lane.b32.xlu1 %v1178_v59, %s1716_s28 }
 0x266   : > { %v1171_v60 = vpop.permute.xlu0 %1170 }
 0x267   : > { %v1179_v62 = vmax.f32 %v1159_v51, %v1171_v60 }
 0x269   : > { %1190 = vrot.lane.b32.xlu0 %v1179_v62, %s1716_s28  ;;  %1316 = vperm.xlu1 %1687, %v1310_v61  }
 0x26d   : > { %1321 = vperm.xlu0 %1686, %v1311_v63   ;;  %1326 = vperm.xlu1 %1687, %v1312_v0  }
 0x271   : > { %1331 = vperm.xlu0 %1686, %v1313_v1  }
 0x2d3   : > { %v1185_v2 = vpop.permute.xlu1 %1184 }
 0x2d4   : > { %v1196_v3 = vmax.f32 %v1176_v55, %v1185_v2 }
 0x2d6   : > { %1654 = vmatprep.mubr.msk.f32.mxu1 %vm1202_vm6, %v1196_v3 }
 0x2d7   : > { %v1187_v4 = vpop.permute.xlu0 %1186  ;;  %v1189_v5 = vpop.permute.xlu1 %1188 }
 0x2d8   : > { %v1197_v6 = vmax.f32 %v1177_v58, %v1187_v4  ;;  %v1198_v7 = vmax.f32 %v1178_v59, %v1189_v5 }
 0x2da   : > { %1655 = vmatmul.mubr.msk.f32.vlgmr.msra.gmra.mxu1 %vm1202_vm6, %v1197_v6 }
 0x2db   : > { %v1191_v8 = vpop.permute.xlu0 %1190  ;;  %1657 = vmatprep.mubr.msk.f32.mxu1 %vm1202_vm6, %v1198_v7 }
 0x2dc   : > { %v1199_v9 = vmax.f32 %v1179_v62, %v1191_v8 }
 0x2de   : > { %1658 = vmatmul.mubr.msk.f32.gmra.mxu1 %vm1202_vm6, %v1199_v9 }
 0x2e4   : > { %v1317_v18 = vpop.permute.xlu1 %1316 }
 0x2e8   : > { %v1322_v19 = vpop.permute.xlu0 %1321  ;;  %v1327_v20 = vpop.permute.xlu1 %1326 }
 0x2ec   : > { %v1332_v25 = vpop.permute.xlu0 %1331 }
 0x39a   : > { %v1656_v11 = vpop.f32.mrf.mxu1 }
 0x39c   : > { %v1285_v12 = vpop.f32.mrf.mxu1 }
 0x39d   : > { %v1308_v16 = vpack.c.bf16 %v1656_v11, %v1285_v12 }
 0x39e   : > { %v1659_v13 = vpop.f32.mrf.mxu1 }
 0x3a0   : > { %v1295_v14 = vpop.f32.mrf.mxu1 }
 0x3a1   : > { %v1309_v15 = vpack.c.bf16 %v1659_v13, %v1295_v14 }
 0x3a3   : > { %1660 = vmatprep.subr.bf16.mxu0 %v1309_v15 }
 0x3a4   : > { %1661 = vmatpush3.bf16.msra.mxu0 %v1309_v15 }
 0x3a5   : > { %1662 = vmatprep.subr.bf16.mxu0 %v1308_v16 }
 0x3a8   : > { %1663 = vmatpush3.bf16.msra.mxu0 %v1308_v16 }
 0x3ab   : > { %1665 = vmatmul.mubr.msk.bf16.vlgmr.msra.gmra.mxu0 %vm1344_vm7, %v1707_v17 }
 0x46b   : > { %v1666_v21 = vpop.f32.mrf.mxu0 }
 0x46c   : > { %v1394_v22 = vadd.f32 %v1666_v21, %v1327_v20 }
 0x46d   : > { %v1385_v23 = vpop.f32.mrf.mxu0 }
 0x46e   : > { %1403 = vst.msk [vmem:[%s278_s20 + $0x10] sm:$0xff] %vm350_vm1, %v1394_v22  ;;  %v1386_v24 = vadd.f32 %v1385_v23, %v1317_v18 }
 0x46f   : > { %v1667_v26 = vpop.f32.mrf.mxu0 }
 0x470   : > { %1401 = vst.msk [vmem:[%s278_s20] sm:$0xff] %vm350_vm1, %v1386_v24  ;;  %v1397_v27 = vadd.f32 %v1667_v26, %v1332_v25 }
 0x471   : > { %v1388_v28 = vpop.f32.mrf.mxu0 }
 0x472   : > { %1404 = vst.msk [vmem:[%s278_s20 + $0x18] sm:$0xff] %vm350_vm1, %v1397_v27  ;;  %v1389_v29 = vadd.f32 %v1388_v28, %v1322_v19 }
 0x474   : > { %1402 = vst.msk [vmem:[%s278_s20 + $0x8] sm:$0xff] %vm350_vm1, %v1389_v29 }
 0x475 PF: > { %s17_s24 = sadd.s32 1, %s1714_s24  }
 0x476   : > { %p14_p4 = scmp.ge.s32.totalorder %s17_s24, 4  }
 0x478   :  { %16 = sbr.rel (!%p14_p4) target bundleno = 1 (0x1), region = 86 }

// kernel: unet_forward.9
= control target key start
LH: loop header
LB: loop body
LE: loop exit
PB: predicated region body
PF: predicated region fallthrough
CT: control target
= control target key end

     0   :  { %s3449_s30 = smov 0   ;;  %s4152_s0 = inlined_call_operand.vmem [shape: f32[2,32,4], index: 0, kind: input, shape index: {}]   ;;  %s4153_s1 = inlined_call_operand.vmem [shape: f32[2,16,16], index: 1, kind: input, shape index: {}]   ;;  %s4154_s2 = inlined_call_operand.vmem [shape: f32[4,16], index: 2, kind: input, shape index: {}]   ;;  %s4155_s3 = inlined_call_operand.vmem [shape: f32[9,16], index: 3, kind: input, shape index: {}]   ;;  %s4156_s4 = inlined_call_operand.vmem [shape: bf16[9,32,32], index: 4, kind: input, shape index: {}]   ;;  %s4157_s5 = inlined_call_operand.vmem [shape: f32[32,1], index: 5, kind: input, shape index: {}]   ;;  %s4158_s6 = inlined_call_operand.vmem [shape: bf16[9,16,32], index: 6, kind: input, shape index: {}]   ;;  %s4159_s7 = inlined_call_operand.vmem [shape: bf16[9,16,16], index: 7, kind: input, shape index: {}]   ;;  %s4160_s8 = inlined_call_operand.vmem [shape: f32[16,1], index: 8, kind: input, shape index: {}]   ;;  %s4161_s9 = inlined_call_operand.vmem [shape: f32[2,16,16], index: 9, kind: output, shape index: {}]  }
   0x1 LB: > { %s2854_s10 = sadd.s32 4294967295, %s3386_s30   ;;  %p2858_p0 = scmp.ge.s32.totalorder %s3386_s30, 1  ;;  %s3386_s30 = sphi %s3449_s30, %s19_s30  }
   0x2   : > { %p297_p1 = scmp.lt.s32.totalorder %s3386_s30, 3 }
   0x4   : > { %p298_p2 = pnand %p2858_p0, %p297_p1 }
   0x5   : > { %p3460_p3 = scmp.lt.s32.totalorder (!%p298_p2), %s2854_s10, 1  ;;  %s3389_s16 = smov (!%p298_p2), 124  }
   0x6   : > { %301 = sbr.rel (%p298_p2) target bundleno = 1013 (0x3f5), region = 56  ;;  %s3390_s23 = smov (!%p298_p2), 125  }
   0x7   : > { %s3391_s15 = smov (!%p298_p2), 123   ;;  %s3392_s19 = smov (!%p298_p2), 127  }
   0x8   : > { %s3393_s24 = smov (!%p298_p2), 1   ;;  %s3394_s27 = smov (!%p298_p2), 3  }
   0x9   : > { %s3396_s29 = smov (!%p298_p2), 5  }
   0xb   : > { %v358_v0 = vld [vmem:[%s4154_s2] sm:$0xf]  ;;  %vm372_vm0 = vcmask 1043456   ;;  %vm463_vm1 = vcmask 130048   ;;  %v3388_v1 = vmov 0.0   ;;  %s4164_s10 = smov (!%p3460_p3, %s2854_s10), 1 }
   0xc   : > { %3115 = vmatprep.subr.msk.mxu0 %vm372_vm0, %v358_v0  ;;  %1448 = vst [vmem:[#allocation4 + $0x8] sm:$0xff] %v3388_v1  ;;  %1451 = vst [vmem:[#allocation4 + $0x20] sm:$0xff] %v3388_v1  ;;  %v3479_v2 = vld [vmem:[%s4155_s3 + $0x1] ss:$0 sm:$0xff]  ;;  %v3491_v3 = vld [vmem:[%s4155_s3 + $0x2] ss:$0 sm:$0xff] }
   0xd   : > { %461 = vst [vmem:[#allocation2] sm:$0xff] %v3388_v1  ;;  %462 = vst [vmem:[#allocation2 + $0x8] sm:$0xff] %v3388_v1  ;;  %3116 = vmatpush3.msk.msra.mxu0 %vm372_vm0, %v358_v0  ;;  %517 = vrot.lane.b32.xlu0 %v3479_v2, %s3389_s16  ;;  %v3496_v4 = vld [vmem:[%s4155_s3] ss:$0 sm:$0xff]  ;;  %s3026_s21 = sshll.u32 %s4164_s10, 5  ;;  %s3027_s22 = sshll.u32 %s4164_s10, 4 }
   0xe   : > { %466 = vst [vmem:[#allocation2 + $0x20] sm:$0xff] %v3388_v1  ;;  %469 = vst [vmem:[#allocation2 + $0x38] sm:$0xff] %v3388_v1  ;;  %vm359_vm2 = vcmask 31744   ;;  %708 = vrot.lane.b32.xlu1 %v3491_v3, %s3390_s23  ;;  %v3505_v5 = vld [vmem:[%s4155_s3 + $0x3] ss:$0 sm:$0xff]  ;;  %s342_s28 = scalar_lea.vmem %s4152_s0, %s3026_s21  ;;  %s347_s12 = scalar_lea.vmem %s4153_s1, %s3027_s22  ;;  %v3342_v49 = vld [vmem:[%s4156_s4 + $0x10] sm:$0xff]  }
   0xf   : > { %472 = vst [vmem:[#allocation2 + $0x50] sm:$0xff] %v3388_v1  ;;  %1432 = vst [vmem:[#allocation3 + $0x8] sm:$0xff] %v3388_v1  ;;  %v3518_v6 = vld [vmem:[%s4155_s3 + $0x5] ss:$0 sm:$0xff]  ;;  %v1454_v9 = vld [vmem:[%s347_s12 + $0x8] sm:$0xff]  ;;  %vm564_vm3 = vcmask 261120  }
  0x10   : > { %1435 = vst [vmem:[#allocation3 + $0x20] sm:$0xff] %v3388_v1  ;;  %1438 = vst [vmem:[#allocation3 + $0x38] sm:$0xff] %v3388_v1  ;;  %v354_v7 = vld [vmem:[%s342_s28] sm:$0xff]  ;;  %v355_v10 = vld [vmem:[%s342_s28 + $0x8] sm:$0xff]  ;;  %3127 = vmatprep.mubr.msk.bf16.mxu1 %vm564_vm3, %v3342_v49  ;;  %vm642_vm4 = vcmask 39936   ;;  %vm750_vm5 = vcmask 23552  }
  0x11   : > { %1441 = vst [vmem:[#allocation3 + $0x50] sm:$0xff] %v3388_v1  ;;  %v1453_v8 = vld [vmem:[%s347_s12] sm:$0xff]  ;;  %492 = vrot.lane.b32.xlu0 %v3496_v4, %s3391_s15  ;;  %3117 = vmatprep.mubr.msk.f32.mxu0 %vm359_vm2, %v354_v7  ;;  %1456 = vst.msk [vmem:[#allocation4 + $0x20] sm:$0xff] %vm463_vm1, %v1454_v9  ;;  %v356_v11 = vld [vmem:[%s342_s28 + $0x10] sm:$0xff]  ;;  %vm862_vm6 = vcmask 7168   ;;  %vm3398_vm7 = vmmov 0  }
  0x12   : > { %1455 = vst.msk [vmem:[#allocation4 + $0x8] sm:$0xff] %vm463_vm1, %v1453_v8  ;;  %v357_v12 = vld [vmem:[%s342_s28 + $0x18] sm:$0xff]  ;;  %v3528_v13 = vld [vmem:[%s4155_s3 + $0x6] ss:$0 sm:$0xff]  ;;  %3118 = vmatmul.mubr.msk.f32.vlgmr.msra.gmra.mxu0 %vm359_vm2, %v355_v10  ;;  %820 = vrot.lane.b32.xlu1 %v3505_v5, %s3392_s19  ;;  %v3537_v14 = vld [vmem:[%s4155_s3 + $0x7] ss:$0 sm:$0xff] }
  0x13   : > { %3120 = vmatprep.mubr.msk.f32.mxu0 %vm359_vm2, %v356_v11  ;;  %v3544_v15 = vld [vmem:[%s4155_s3 + $0x8] ss:$0 sm:$0xff]  ;;  %s3395_s28 = smov 4   ;;  %v3596_v51 = vld [vmem:[%s4155_s3 + $0x4] ss:$0 sm:$0xff] }
  0x14   : > { %v3344_v60 = vld [vmem:[%s4156_s4] sm:$0xff]  }
  0x15   : > { %1017 = vrot.lane.b32.xlu0 %v3518_v6, %s3393_s24 }
  0x16   : > { %3121 = vmatmul.mubr.msk.f32.gmra.mxu0 %vm359_vm2, %v357_v12  ;;  %1114 = vrot.lane.b32.xlu1 %v3528_v13, %s3394_s27 }
  0x17   : > { %3135 = vmatprep.mubr.msk.bf16.mxu0 %vm564_vm3, %v3344_v60 }
  0x19   : > { %1211 = vrot.lane.b32.xlu0 %v3537_v14, %s3395_s28 }
  0x1a   : > { %1308 = vrot.lane.b32.xlu1 %v3544_v15, %s3396_s29 }
  0x7f   : > { %v518_v16 = vpop.permute.xlu0 %517 }
  0x80   : > { %v524_v17 = vmul.f32 0.0, %v518_v16  ;;  %v3554_v21 = vpop.permute.xlu1 %708 }
  0x81   : > { %v715_v23 = vmul.f32 0.0, %v3554_v21 }
  0x82   : > { %v535_v18 = vpack.c.bf16 %v524_v17, %v524_v17 }
  0x83   : > { %v493_v19 = vpop.permute.xlu0 %492  ;;  %v726_v24 = vpack.c.bf16 %v715_v23, %v715_v23 }
  0x84   : > { %555 = vrot.lane.b32.xlu0 %v535_v18, %s3395_s28  ;;  %v499_v20 = vmul.f32 0.0, %v493_v19  ;;  %v3560_v25 = vpop.permute.xlu1 %820 }
  0x85   : > { %v827_v26 = vmul.f32 0.0, %v3560_v25 }
  0x86   : > { %v509_v22 = vpack.c.bf16 %v499_v20, %v499_v20 }
  0x87   : > { %v838_v27 = vpack.c.bf16 %v827_v26, %v827_v26  ;;  %v1018_v34 = vpop.permute.xlu0 %1017 }
  0x88   : > { %551 = vrot.lane.b32.xlu0 %v535_v18, %s3395_s28 }
  0x8b   : > { %v1212_v50 = vpop.permute.xlu0 %1211 }
  0x8c   : > { %638 = vrot.lane.b32.xlu0 %v509_v22, %s3396_s29 }
  0x90   : > { %746 = vrot.lane.b32.xlu0 %v726_v24, %s3394_s27 }
  0x94   : > { %634 = vrot.lane.b32.xlu0 %v509_v22, %s3396_s29 }
  0x98   : > { %742 = vrot.lane.b32.xlu0 %v726_v24, %s3394_s27 }
  0x9c   : > { %858 = vrot.lane.b32.xlu0 %v838_v27, %s3393_s24 }
  0xa0   : > { %854 = vrot.lane.b32.xlu0 %v838_v27, %s3393_s24 }
  0xd2   : > { %v3119_v28 = vpop.f32.mrf.mxu0 }
  0xd3   : > { %475 = vst.msk [vmem:[#allocation2 + $0x20] sm:$0xff] %vm463_vm1, %v3119_v28 }
  0xd4   : > { %v442_v29 = vpop.f32.mrf.mxu0 }
  0xd5   : > { %474 = vst.msk [vmem:[#allocation2 + $0x8] sm:$0xff] %vm463_vm1, %v442_v29  ;;  %v1115_v29 = vpop.permute.xlu1 %1114 }
  0xd6   : > { %v3122_v30 = vpop.f32.mrf.mxu0 }
  0xd7   : > { %477 = vst.msk [vmem:[#allocation2 + $0x50] sm:$0xff] %vm463_vm1, %v3122_v30 }
  0xd8   : > { %v452_v31 = vpop.f32.mrf.mxu0 }
  0xd9   : > { %476 = vst.msk [vmem:[#allocation2 + $0x38] sm:$0xff] %vm463_vm1, %v452_v31 }
  0xda   : > { %v3571_v32 = vld [vmem:[#allocation2 + $0x20] sm:$0xff] }
  0xdb   : > { %v523_v37 = vmul.f32 %v518_v16, %v3571_v32  ;;  %v498_v44 = vmul.f32 %v493_v19, %v3571_v32  ;;  %v1021_v46 = vmul.f32 %v1018_v34, %v3571_v32  ;;  %v932_v63 = vmul.f32 %v3596_v51, %v3571_v32 }
  0xdc   : > { %v3573_v33 = vld [vmem:[#allocation2 + $0x8] sm:$0xff]  ;;  %v714_v20 = vmul.f32 %v3554_v21, %v3571_v32  ;;  %v826_v28 = vmul.f32 %v3560_v25, %v3571_v32 }
  0xdd   : > { %v521_v36 = vmul.f32 %v518_v16, %v3573_v33  ;;  %v496_v41 = vmul.f32 %v493_v19, %v3573_v33  ;;  %v1020_v43 = vmul.f32 %v1018_v34, %v3573_v33  ;;  %v931_v62 = vmul.f32 %v3596_v51, %v3573_v33 }
  0xde   : > { %v3575_v35 = vld [vmem:[#allocation2 + $0x50] sm:$0xff]  ;;  %v1214_v8 = vmul.f32 %v1212_v50, %v3573_v33  ;;  %v824_v27 = vmul.f32 %v3560_v25, %v3573_v33 }
  0xdf   : > { %v1023_v38 = vmul.f32 %v1018_v34, %v3575_v35  ;;  %v534_v40 = vpack.c.bf16 %v523_v37, %v521_v36  ;;  %v508_v47 = vpack.c.bf16 %v498_v44, %v496_v41  ;;  %v1217_v52 = vmul.f32 %v1212_v50, %v3575_v35 }
  0xe0   : > { %v3580_v39 = vld [vmem:[#allocation2 + $0x38] sm:$0xff]  ;;  %v1029_v53 = vpack.c.bf16 %v1021_v46, %v1020_v43  ;;  %v527_v54 = vmul.f32 %v518_v16, %v3575_v35  ;;  %v502_v55 = vmul.f32 %v493_v19, %v3575_v35  ;;  %v934_v61 = vmul.f32 %v3596_v51, %v3575_v35 }
  0xe1   : > { %v1022_v42 = vmul.f32 %v1018_v34, %v3580_v39  ;;  %553 = vrot.lane.b32.xlu1 %v534_v40, %s3395_s28  ;;  %v525_v48 = vmul.f32 %v518_v16, %v3580_v39  ;;  %v1216_v56 = vmul.f32 %v1212_v50, %v3580_v39  ;;  %v500_v57 = vmul.f32 %v493_v19, %v3580_v39 }
  0xe2   : > { %v933_v58 = vmul.f32 %v3596_v51, %v3580_v39  ;;  %v3621_v7 = vpack.c.bf16 %v932_v63, %v931_v62  ;;  %v716_v11 = vmul.f32 %v3554_v21, %v3580_v39  ;;  %v718_v12 = vmul.f32 %v3554_v21, %v3575_v35 }
  0xe3   : > { %v1030_v45 = vpack.c.bf16 %v1023_v38, %v1022_v42  ;;  %v536_v59 = vpack.c.bf16 %v527_v54, %v525_v48  ;;  %v1224_v9 = vpack.c.bf16 %v1217_v52, %v1216_v56  ;;  %v510_v10 = vpack.c.bf16 %v502_v55, %v500_v57  ;;  %v1309_v38 = vpop.permute.xlu1 %1308  ;;  %v1401_v42 = vld [vmem:[%s4157_s5 + $0x10] sm:$0xff]  ;;  %v3343_v54 = vld [vmem:[%s4156_s4 + $0x18] sm:$0xff]   ;;  %v3346_v57 = vld [vmem:[%s4156_s4 + $0x20] sm:$0xff]  }
  0xe4   : > { %v3619_v0 = vpack.c.bf16 %v934_v61, %v933_v58  ;;  %v1215_v16 = vmul.f32 %v1212_v50, %v3571_v32  ;;  %v727_v18 = vpack.c.bf16 %v718_v12, %v716_v11  ;;  %v712_v19 = vmul.f32 %v3554_v21, %v3573_v33  ;;  %v3348_v61 = vld [vmem:[%s4156_s4 + $0x30] sm:$0xff]  }
  0xe5   : > { %1045 = vrot.lane.b32.xlu0 %v1030_v45, %s3392_s19  ;;  %636 = vrot.lane.b32.xlu1 %v508_v47, %s3396_s29  ;;  %v828_v23 = vmul.f32 %v3560_v25, %v3580_v39  ;;  %v830_v24 = vmul.f32 %v3560_v25, %v3575_v35  ;;  %v837_v21 = vpack.c.bf16 %v826_v28, %v824_v27  ;;  %v3397_v43 = vmov 0   ;;  %v1402_v47 = vld [vmem:[%s4157_s5 + $0x18] sm:$0xff]  ;;  %v3355_v27 = vld [vmem:[%s4156_s4 + $0x68] sm:$0xff]  }
  0xe6   : > { %v1223_v17 = vpack.c.bf16 %v1215_v16, %v1214_v8  ;;  %v725_v22 = vpack.c.bf16 %v714_v20, %v712_v19  ;;  %v1119_v30 = vmul.f32 %v1115_v29, %v3580_v39  ;;  %v1120_v31 = vmul.f32 %v1115_v29, %v3575_v35  ;;  %3341 = vset.pattern.permute.xlu1 %v3397_v43  ;;  %v3347_v8 = vld [vmem:[%s4156_s4 + $0x28] sm:$0xff]  }
  0xe7   : > { %v839_v26 = vpack.c.bf16 %v830_v24, %v828_v23  ;;  %v1117_v34 = vmul.f32 %v1115_v29, %v3573_v33  ;;  %v1118_v37 = vmul.f32 %v1115_v29, %v3571_v32  ;;  %v1313_v40 = vmul.f32 %v1309_v38, %v3580_v39  ;;  %3340 = vset.pattern.permute.xlu0 %v3397_v43  ;;  %v1400_v39 = vld [vmem:[%s4157_s5 + $0x8] sm:$0xff]  ;;  %v3353_v23 = vld [vmem:[%s4156_s4 + $0x60] sm:$0xff]   ;;  %v3356_v29 = vld [vmem:[%s4156_s4 + $0x70] sm:$0xff]  }
  0xe8   : > { %v1127_v36 = vpack.c.bf16 %v1120_v31, %v1119_v30  ;;  %v1314_v25 = vmul.f32 %v1309_v38, %v3575_v35  ;;  %v1311_v44 = vmul.f32 %v1309_v38, %v3573_v33  ;;  %v1312_v35 = vmul.f32 %v1309_v38, %v3571_v32  ;;  %v1399_v33 = vld [vmem:[%s4157_s5] sm:$0xff]  ;;  %v3351_v19 = vld [vmem:[%s4156_s4 + $0x48] sm:$0xff]  }
  0xe9   : > { %1043 = vrot.lane.b32.xlu0 %v1029_v53, %s3392_s19  ;;  %557 = vrot.lane.b32.xlu1 %v536_v59, %s3395_s28  ;;  %v1126_v41 = vpack.c.bf16 %v1118_v37, %v1117_v34  ;;  %v3345_v59 = vld [vmem:[%s4156_s4 + $0x8] sm:$0xff]   ;;  %v3358_v34 = vld [vmem:[%s4156_s4 + $0x78] sm:$0xff]  }
  0xea   : > { %v1321_v45 = vpack.c.bf16 %v1314_v25, %v1313_v40  ;;  %v1320_v46 = vpack.c.bf16 %v1312_v35, %v1311_v44 }
  0xed   : > { %1239 = vrot.lane.b32.xlu0 %v1224_v9, %s3389_s16  ;;  %640 = vrot.lane.b32.xlu1 %v510_v10, %s3396_s29  ;;  %v3349_v10 = vld [vmem:[%s4156_s4 + $0x40] sm:$0xff]  }
  0xf1   : > { %1237 = vrot.lane.b32.xlu0 %v1223_v17, %s3389_s16  ;;  %748 = vrot.lane.b32.xlu1 %v727_v18, %s3394_s27  ;;  %v3350_v18 = vld [vmem:[%s4156_s4 + $0x38] sm:$0xff]  }
  0xf5   : > { %744 = vrot.lane.b32.xlu1 %v725_v22, %s3394_s27  ;;  %1415 = vperm.xlu0 %3340, %v1401_v42   ;;  %v3352_v22 = vld [vmem:[%s4156_s4 + $0x50] sm:$0xff]  }
  0xf9   : > { %860 = vrot.lane.b32.xlu1 %v839_v26, %s3393_s24  ;;  %1410 = vperm.xlu0 %3340, %v1400_v39   ;;  %v3354_v26 = vld [vmem:[%s4156_s4 + $0x58] sm:$0xff]  }
  0xfd   : > { %856 = vrot.lane.b32.xlu1 %v837_v21, %s3393_s24  ;;  %1471 = vrot.lane.b32.xlu0 %v3496_v4, %s3391_s15  ;;  %v556_v4 = vpop.permute.xlu0 %555  ;;  %v3357_v21 = vld [vmem:[%s4156_s4 + $0x80] sm:$0xff]  }
 0x101   : > { %1142 = vrot.lane.b32.xlu1 %v1127_v36, %s3390_s23  ;;  %1739 = vrot.lane.b32.xlu0 %v3505_v5, %s3392_s19  ;;  %v552_v5 = vpop.permute.xlu0 %551  ;;  %v3359_v36 = vld [vmem:[%s4156_s4 + $0x88] sm:$0xff]  }
 0x105   : > { %1140 = vrot.lane.b32.xlu1 %v1126_v41, %s3390_s23  ;;  %1972 = vrot.lane.b32.xlu0 %v3528_v13, %s3394_s27  ;;  %v639_v32 = vpop.permute.xlu0 %638 }
 0x109   : > { %1336 = vrot.lane.b32.xlu1 %v1321_v45, %s3391_s15  ;;  %2126 = vrot.lane.b32.xlu0 %v3544_v15, %s3396_s29  ;;  %v747_v48 = vpop.permute.xlu0 %746 }
 0x10d   : > { %1334 = vrot.lane.b32.xlu1 %v1320_v46, %s3391_s15  ;;  %v635_v49 = vpop.permute.xlu0 %634 }
 0x111   : > { %1420 = vperm.xlu1 %3341, %v1402_v47  }
 0x115   : > { %1405 = vperm.xlu1 %3341, %v1399_v33  }
 0x119   : > { %1494 = vrot.lane.b32.xlu1 %v3479_v2, %s3389_s16  ;;  %v743_v2 = vpop.permute.xlu0 %742 }
 0x11d   : > { %1648 = vrot.lane.b32.xlu1 %v3491_v3, %s3390_s23  ;;  %v859_v53 = vpop.permute.xlu0 %858 }
 0x121   : > { %1895 = vrot.lane.b32.xlu1 %v3518_v6, %s3393_s24  ;;  %v855_v60 = vpop.permute.xlu0 %854 }
 0x125   : > { %2049 = vrot.lane.b32.xlu1 %v3537_v14, %s3395_s28 }
 0x153   : > { %v554_v13 = vpop.permute.xlu1 %553 }
 0x154   : > { %v560_v3 = vsel %vm359_vm2, %v552_v5, %v554_v13 }
 0x157   : > { %v637_v50 = vpop.permute.xlu1 %636  ;;  %v1046_v11 = vpop.permute.xlu0 %1045 }
 0x158   : > { %v643_v55 = vsel %vm642_vm4, %v635_v49, %v637_v50 }
 0x15b   : > { %v558_v52 = vpop.permute.xlu1 %557  ;;  %v1044_v20 = vpop.permute.xlu0 %1043 }
 0x15c   : > { %v561_v15 = vsel %vm359_vm2, %v556_v4, %v558_v52 }
 0x15d   : > { %3123 = vmatprep.subr.bf16.mxu1 %v561_v15 }
 0x15e   : > { %3124 = vmatpush3.bf16.msra.mxu1 %v561_v15 }
 0x15f   : > { %3125 = vmatprep.subr.bf16.mxu1 %v560_v3  ;;  %v641_v6 = vpop.permute.xlu1 %640 }
 0x160   : > { %v644_v14 = vsel %vm642_vm4, %v639_v32, %v641_v6 }
 0x161   : > { %3131 = vmatprep.subr.bf16.mxu0 %v644_v14 }
 0x162   : > { %3126 = vmatpush3.bf16.msra.mxu1 %v560_v3  ;;  %3132 = vmatpush3.bf16.msra.mxu0 %v644_v14 }
 0x163   : > { %3133 = vmatprep.subr.bf16.mxu0 %v643_v55  ;;  %v749_v56 = vpop.permute.xlu1 %748 }
 0x164   : > { %v752_v58 = vsel %vm750_vm5, %v747_v48, %v749_v56 }
 0x165   : > { %3128 = vmatmul.mubr.msk.bf16.vlgmr.msra.gmra.mxu1 %vm564_vm3, %v3343_v54  ;;  %3139 = vmatprep.subr.bf16.mxu1 %v752_v58 }
 0x166   : > { %3134 = vmatpush3.bf16.msra.mxu0 %v643_v55  ;;  %3140 = vmatpush3.bf16.msra.mxu1 %v752_v58 }
 0x167   : > { %v745_v62 = vpop.permute.xlu1 %744  ;;  %3143 = vmatprep.mubr.msk.bf16.mxu1 %vm564_vm3, %v3346_v57 }
 0x168   : > { %v751_v63 = vsel %vm750_vm5, %v743_v2, %v745_v62 }
 0x169   : > { %3136 = vmatmul.mubr.msk.bf16.vlgmr.msra.gmra.mxu0 %vm564_vm3, %v3345_v59  ;;  %3141 = vmatprep.subr.bf16.mxu1 %v751_v63 }
 0x16a   : > { %3142 = vmatpush3.bf16.msra.mxu1 %v751_v63  ;;  %3151 = vmatprep.mubr.msk.bf16.mxu0 %vm564_vm3, %v3348_v61 }
 0x16b   : > { %3155 = vmatprep.subr.bf16.mxu1 %v3619_v0  ;;  %v861_v9 = vpop.permute.xlu1 %860 }
 0x16c   : > { %v864_v12 = vsel %vm862_vm6, %v859_v53, %v861_v9 }
 0x16d   : > { %3144 = vmatmul.mubr.msk.bf16.vlgmr.msra.gmra.mxu1 %vm564_vm3, %v3347_v8  ;;  %3147 = vmatprep.subr.bf16.mxu0 %v864_v12 }
 0x16e   : > { %3148 = vmatpush3.bf16.msra.mxu0 %v864_v12  ;;  %3156 = vmatpush3.bf16.msra.mxu1 %v3619_v0 }
 0x16f   : > { %3157 = vmatprep.subr.bf16.mxu1 %v3621_v7  ;;  %v857_v16 = vpop.permute.xlu1 %856  ;;  %3159 = vmatprep.mubr.msk.bf16.mxu1 %vm564_vm3, %v3349_v10 }
 0x170   : > { %v863_v17 = vsel %vm862_vm6, %v855_v60, %v857_v16 }
 0x171   : > { %3149 = vmatprep.subr.bf16.mxu0 %v863_v17 }
 0x172   : > { %3150 = vmatpush3.bf16.msra.mxu0 %v863_v17  ;;  %3158 = vmatpush3.bf16.msra.mxu1 %v3621_v7  ;;  %v1240_v7 = vpop.permute.xlu0 %1239 }
 0x173   : > { %3163 = vmatprep.subr.bf16.mxu0 %v1046_v11  ;;  %v1143_v0 = vpop.permute.xlu1 %1142 }
 0x174   : > { %3171 = vmatprep.subr.bf16.mxu1 %v1143_v0 }
 0x175   : > { %3152 = vmatmul.mubr.msk.bf16.vlgmr.msra.gmra.mxu0 %vm564_vm3, %v3350_v18  ;;  %3160 = vmatmul.mubr.msk.bf16.vlgmr.msra.gmra.mxu1 %vm564_vm3, %v3351_v19 }
 0x176   : > { %3164 = vmatpush3.bf16.msra.mxu0 %v1046_v11  ;;  %3172 = vmatpush3.bf16.msra.mxu1 %v1143_v0  ;;  %v1238_v30 = vpop.permute.xlu0 %1237 }
 0x177   : > { %3165 = vmatprep.subr.bf16.mxu0 %v1044_v20  ;;  %v1141_v24 = vpop.permute.xlu1 %1140  ;;  %3167 = vmatprep.mubr.msk.bf16.mxu0 %vm564_vm3, %v3352_v22 }
 0x178   : > { %3173 = vmatprep.subr.bf16.mxu1 %v1141_v24  ;;  %3175 = vmatprep.mubr.msk.bf16.mxu1 %vm564_vm3, %v3353_v23 }
 0x17a   : > { %3166 = vmatpush3.bf16.msra.mxu0 %v1044_v20  ;;  %3174 = vmatpush3.bf16.msra.mxu1 %v1141_v24  ;;  %v3768_v38 = vpop.permute.xlu0 %1415 }
 0x17b   : > { %3179 = vmatprep.subr.bf16.mxu0 %v1240_v7  ;;  %v1337_v28 = vpop.permute.xlu1 %1336 }
 0x17c   : > { %3187 = vmatprep.subr.bf16.mxu1 %v1337_v28 }
 0x17d   : > { %3168 = vmatmul.mubr.msk.bf16.vlgmr.msra.gmra.mxu0 %vm564_vm3, %v3354_v26  ;;  %3176 = vmatmul.mubr.msk.bf16.vlgmr.msra.gmra.mxu1 %vm564_vm3, %v3355_v27 }
 0x17e   : > { %3180 = vmatpush3.bf16.msra.mxu0 %v1240_v7  ;;  %3188 = vmatpush3.bf16.msra.mxu1 %v1337_v28  ;;  %v3772_v25 = vpop.permute.xlu0 %1410 }
 0x17f   : > { %3181 = vmatprep.subr.bf16.mxu0 %v1238_v30  ;;  %v1335_v31 = vpop.permute.xlu1 %1334  ;;  %3183 = vmatprep.mubr.msk.bf16.mxu0 %vm564_vm3, %v3356_v29 }
 0x180   : > { %3189 = vmatprep.subr.bf16.mxu1 %v1335_v31  ;;  %3191 = vmatprep.mubr.msk.bf16.mxu1 %vm564_vm3, %v3357_v21 }
 0x182   : > { %3182 = vmatpush3.bf16.msra.mxu0 %v1238_v30  ;;  %3190 = vmatpush3.bf16.msra.mxu1 %v1335_v31  ;;  %v3777_v43 = vpop.permute.xlu0 %1471 }
 0x183   : > { %3195 = vmatprep.subr.bf16.mxu0 %v3388_v1  ;;  %3203 = vmatprep.subr.bf16.mxu1 %v3388_v1  ;;  %v1478_v1 = vmul.f32 0.0, %v3777_v43 }
 0x185   : > { %3184 = vmatmul.mubr.msk.bf16.vlgmr.msra.gmra.mxu0 %vm564_vm3, %v3358_v34  ;;  %3192 = vmatmul.mubr.msk.bf16.vlgmr.msra.gmra.mxu1 %vm564_vm3, %v3359_v36  ;;  %v1486_v45 = vpack.c.bf16 %v1478_v1, %v1478_v1 }
 0x186   : > { %v3786_v35 = vpop.permute.xlu0 %1739 }
 0x187   : > { %v1746_v47 = vmul.f32 0.0, %v3786_v35 }
 0x189   : > { %v1755_v4 = vpack.c.bf16 %v1746_v47, %v1746_v47 }
 0x18c   : > { %v3766_v37 = vpop.permute.xlu1 %1420 }
 0x190   : > { %v3770_v40 = vpop.permute.xlu1 %1405 }
 0x194   : > { %v3774_v41 = vpop.permute.xlu1 %1494 }
 0x195   : > { %v1501_v42 = vmul.f32 0.0, %v3774_v41 }
 0x197   : > { %v1510_v44 = vpack.c.bf16 %v1501_v42, %v1501_v42 }
 0x198   : > { %v3784_v39 = vpop.permute.xlu1 %1648 }
 0x199   : > { %1525 = vrot.lane.b32.xlu1 %v1510_v44, %s3395_s28  ;;  %v1655_v46 = vmul.f32 0.0, %v3784_v39 }
 0x19b   : > { %v1664_v33 = vpack.c.bf16 %v1655_v46, %v1655_v46 }
 0x19d   : > { %1590 = vrot.lane.b32.xlu1 %v1486_v45, %s3396_s29 }
 0x1a1   : > { %1521 = vrot.lane.b32.xlu1 %v1510_v44, %s3395_s28 }
 0x1a5   : > { %1586 = vrot.lane.b32.xlu1 %v1486_v45, %s3396_s29 }
 0x1a9   : > { %1679 = vrot.lane.b32.xlu1 %v1664_v33, %s3394_s27 }
 0x1ad   : > { %1770 = vrot.lane.b32.xlu1 %v1755_v4, %s3393_s24 }
 0x1b1   : > { %1675 = vrot.lane.b32.xlu1 %v1664_v33, %s3394_s27 }
 0x1b5   : > { %1766 = vrot.lane.b32.xlu1 %v1755_v4, %s3393_s24 }
 0x225   : > { %v3129_v5 = vpop.f32.mrf.mxu1 }
 0x227   : > { %v605_v32 = vpop.f32.mrf.mxu1 }
 0x229   : > { %v3130_v48 = vpop.f32.mrf.mxu1  ;;  %v3137_v13 = vpop.f32.mrf.mxu0 }
 0x22a   : > { %v696_v55 = vadd.f32 %v3137_v13, %v3129_v5 }
 0x22b   : > { %v608_v49 = vpop.f32.mrf.mxu1  ;;  %v687_v50 = vpop.f32.mrf.mxu0 }
 0x22c   : > { %v688_v58 = vadd.f32 %v687_v50, %v605_v32 }
 0x22d   : > { %v3145_v2 = vpop.f32.mrf.mxu1  ;;  %v3138_v52 = vpop.f32.mrf.mxu0 }
 0x22e   : > { %v812_v59 = vadd.f32 %v3145_v2, %v696_v55  ;;  %v699_v62 = vadd.f32 %v3138_v52, %v3130_v48 }
 0x22f   : > { %v795_v15 = vpop.f32.mrf.mxu1  ;;  %v690_v6 = vpop.f32.mrf.mxu0 }
 0x230   : > { %v810_v63 = vadd.f32 %v795_v15, %v688_v58  ;;  %v691_v11 = vadd.f32 %v690_v6, %v608_v49 }
 0x231   : > { %v3146_v3 = vpop.f32.mrf.mxu1 }
 0x232   : > { %v813_v12 = vadd.f32 %v3146_v3, %v699_v62 }
 0x233   : > { %v798_v53 = vpop.f32.mrf.mxu1 }
 0x234   : > { %v811_v19 = vadd.f32 %v798_v53, %v691_v11 }
 0x235   : > { %v3153_v14 = vpop.f32.mrf.mxu0  ;;  %v3161_v54 = vpop.f32.mrf.mxu1 }
 0x236   : > { %v924_v8 = vadd.f32 %v3153_v14, %v812_v59 }
 0x237   : > { %v907_v56 = vpop.f32.mrf.mxu0  ;;  %v992_v57 = vpop.f32.mrf.mxu1 }
 0x238   : > { %v922_v16 = vadd.f32 %v907_v56, %v810_v63  ;;  %v1009_v20 = vadd.f32 %v3161_v54, %v924_v8 }
 0x239   : > { %v3154_v60 = vpop.f32.mrf.mxu0  ;;  %v3162_v61 = vpop.f32.mrf.mxu1 }
 0x23a   : > { %v925_v0 = vadd.f32 %v3154_v60, %v813_v12  ;;  %v1007_v24 = vadd.f32 %v992_v57, %v922_v16 }
 0x23b   : > { %v910_v9 = vpop.f32.mrf.mxu0  ;;  %v995_v10 = vpop.f32.mrf.mxu1 }
 0x23c   : > { %v923_v7 = vadd.f32 %v910_v9, %v811_v19  ;;  %v1010_v29 = vadd.f32 %v3162_v61, %v925_v0  ;;  %v3804_v61 = vpop.permute.xlu1 %1895  ;;  %v3816_v9 = vpop.permute.xlu0 %1972 }
 0x23d   : > { %v3169_v17 = vpop.f32.mrf.mxu0  ;;  %v3177_v18 = vpop.f32.mrf.mxu1 }
 0x23e   : > { %v1106_v26 = vadd.f32 %v3169_v17, %v1009_v20  ;;  %v1008_v34 = vadd.f32 %v995_v10, %v923_v7 }
 0x23f   : > { %v1089_v22 = vpop.f32.mrf.mxu0  ;;  %v1186_v23 = vpop.f32.mrf.mxu1 }
 0x240   : > { %v1104_v21 = vadd.f32 %v1089_v22, %v1007_v24  ;;  %v1203_v36 = vadd.f32 %v3177_v18, %v1106_v26 }
 0x241   : > { %v3170_v27 = vpop.f32.mrf.mxu0  ;;  %v3178_v28 = vpop.f32.mrf.mxu1 }
 0x242   : > { %v1107_v42 = vadd.f32 %v3170_v27, %v1010_v29  ;;  %v1201_v45 = vadd.f32 %v1186_v23, %v1104_v21  ;;  %v3850_v29 = vpop.permute.xlu0 %2126 }
 0x243   : > { %v1092_v30 = vpop.f32.mrf.mxu0  ;;  %v1189_v31 = vpop.f32.mrf.mxu1 }
 0x244   : > { %v1105_v46 = vadd.f32 %v1092_v30, %v1008_v34  ;;  %v1204_v5 = vadd.f32 %v3178_v28, %v1107_v42  ;;  %v3854_v30 = vld [vmem:[#allocation2] sm:$0xff] }
 0x245   : > { %v3185_v44 = vpop.f32.mrf.mxu0  ;;  %v3193_v1 = vpop.f32.mrf.mxu1  ;;  %3199 = vmatprep.mubr.msk.bf16.mxu0 %vm3398_vm7, %v3854_v30  ;;  %3207 = vmatprep.mubr.msk.bf16.mxu1 %vm3398_vm7, %v3854_v30 }
 0x246   : > { %v1300_v47 = vadd.f32 %v3185_v44, %v1203_v36  ;;  %v1202_v50 = vadd.f32 %v1189_v31, %v1105_v46 }
 0x247   : > { %v1283_v33 = vpop.f32.mrf.mxu0  ;;  %v1380_v4 = vpop.f32.mrf.mxu1 }
 0x248   : > { %v1397_v32 = vadd.f32 %v3193_v1, %v1300_v47  ;;  %v1298_v48 = vadd.f32 %v1283_v33, %v1201_v45 }
 0x249   : > { %v3186_v13 = vpop.f32.mrf.mxu0  ;;  %v3194_v49 = vpop.f32.mrf.mxu1 }
 0x24a   : > { %v1425_v2 = vadd.f32 %v3768_v38, %v1397_v32  ;;  %v1395_v52 = vadd.f32 %v1380_v4, %v1298_v48  ;;  %v1301_v15 = vadd.f32 %v3186_v13, %v1204_v5  ;;  %v2209_v5 = vmul.f32 %v3854_v30, %v3774_v41 }
 0x24b   : > { %v1286_v3 = vpop.f32.mrf.mxu0  ;;  %v1383_v55 = vpop.f32.mrf.mxu1 }
 0x24c   : > { %v1429_v6 = vmax.f32 %v1425_v2, 0.0  ;;  %v1423_v53 = vadd.f32 %v3770_v40, %v1395_v52  ;;  %v1398_v14 = vadd.f32 %v3194_v49, %v1301_v15  ;;  %v1299_v54 = vadd.f32 %v1286_v3, %v1202_v50 }
 0x24d   : > { %v2216_v13 = vpack.c.bf16 %v2209_v5, %v2209_v5  ;;  %v2201_v50 = vmul.f32 %v3854_v30, %v3777_v43 }
 0x24e   : > { %1445 = vst.msk [vmem:[#allocation3 + $0x38] sm:$0xff] %vm463_vm1, %v1429_v6  ;;  %v1427_v56 = vmax.f32 %v1423_v53, 0.0  ;;  %v1426_v57 = vadd.f32 %v3766_v37, %v1398_v14  ;;  %v1396_v58 = vadd.f32 %v1383_v55, %v1299_v54  ;;  %v2332_v6 = vmul.f32 %v3854_v30, %v3784_v39 }
 0x24f   : > { %v2207_v15 = vpack.c.bf16 %v2201_v50, %v2201_v50 }
 0x250   : > { %1443 = vst.msk [vmem:[#allocation3 + $0x8] sm:$0xff] %vm463_vm1, %v1427_v56  ;;  %v1430_v59 = vmax.f32 %v1426_v57, 0.0  ;;  %v1424_v38 = vadd.f32 %v3772_v25, %v1396_v58  ;;  %v2339_v54 = vpack.c.bf16 %v2332_v6, %v2332_v6  ;;  %v2400_v56 = vmul.f32 %v3854_v30, %v3786_v35  ;;  %v3908_v57 = vld [vmem:[#allocation4 + $0x8] sm:$0xff]  ;;  %v3910_v58 = vld [vmem:[#allocation4 + $0x20] sm:$0xff] }
 0x251   : > { %v2586_v5 = vmul.f32 %v3908_v57, %v3816_v9 }
 0x252   : > { %1446 = vst.msk [vmem:[#allocation3 + $0x50] sm:$0xff] %vm463_vm1, %v1430_v59  ;;  %v1428_v60 = vmax.f32 %v1424_v38, 0.0  ;;  %v2525_v59 = vmul.f32 %v3908_v57, %v3804_v61  ;;  %v2526_v38 = vmul.f32 %v3910_v58, %v3804_v61 }
 0x254   : > { %1444 = vst.msk [vmem:[#allocation3 + $0x20] sm:$0xff] %vm463_vm1, %v1428_v60 }
 0x255   : > { %v3802_v40 = vld [vmem:[#allocation3 + $0x38] sm:$0xff] }
 0x256   : > { %v1502_v37 = vmul.f32 %v3774_v41, %v3802_v40  ;;  %v1900_v25 = vmul.f32 %v3804_v61, %v3802_v40  ;;  %v1479_v18 = vmul.f32 %v3777_v43, %v3802_v40  ;;  %v1977_v19 = vmul.f32 %v3816_v9, %v3802_v40 }
 0x257   : > { %v3830_v20 = vld [vmem:[#allocation3 + $0x8] sm:$0xff]  ;;  %v1656_v7 = vmul.f32 %v3784_v39, %v3802_v40  ;;  %v3844_v27 = vmul.f32 %v3596_v51, %v3802_v40  ;;  %v1747_v46 = vmul.f32 %v3786_v35, %v3802_v40 }
 0x258   : > { %v1975_v26 = vmul.f32 %v3816_v9, %v3830_v20  ;;  %v3862_v31 = vmul.f32 %v3596_v51, %v3830_v20  ;;  %v1498_v32 = vmul.f32 %v3774_v41, %v3830_v20  ;;  %v1475_v2 = vmul.f32 %v3777_v43, %v3830_v20 }
 0x259   : > { %v3806_v62 = vld [vmem:[#allocation3 + $0x50] sm:$0xff]  ;;  %v1652_v53 = vmul.f32 %v3784_v39, %v3830_v20  ;;  %v1743_v60 = vmul.f32 %v3786_v35, %v3830_v20 }
 0x25a   : > { %v1504_v63 = vmul.f32 %v3774_v41, %v3806_v62  ;;  %v1901_v8 = vmul.f32 %v3804_v61, %v3806_v62  ;;  %v1481_v12 = vmul.f32 %v3777_v43, %v3806_v62  ;;  %v1978_v16 = vmul.f32 %v3816_v9, %v3806_v62 }
 0x25b   : > { %v3822_v17 = vld [vmem:[#allocation3 + $0x20] sm:$0xff]  ;;  %v1658_v23 = vmul.f32 %v3784_v39, %v3806_v62  ;;  %v3848_v28 = vmul.f32 %v3596_v51, %v3806_v62  ;;  %v1749_v21 = vmul.f32 %v3786_v35, %v3806_v62  ;;  %v2132_v44 = vmul.f32 %v3850_v29, %v3806_v62 }
 0x25c   : > { %v1511_v10 = vpack.c.bf16 %v1504_v63, %v1502_v37  ;;  %v1906_v11 = vpack.c.bf16 %v1901_v8, %v1900_v25  ;;  %v1487_v0 = vpack.c.bf16 %v1481_v12, %v1479_v18  ;;  %v1983_v22 = vpack.c.bf16 %v1978_v16, %v1977_v19  ;;  %v2050_v8 = vpop.permute.xlu1 %2049 }
 0x25d   : > { %v1976_v24 = vmul.f32 %v3816_v9, %v3822_v17  ;;  %v3866_v34 = vmul.f32 %v3596_v51, %v3822_v17  ;;  %v1665_v36 = vpack.c.bf16 %v1658_v23, %v1656_v7  ;;  %v1837_v1 = vpack.c.bf16 %v3848_v28, %v3844_v27 }
 0x25e   : > { %1527 = vrot.lane.b32.xlu0 %v1511_v10, %s3395_s28  ;;  %1916 = vrot.lane.b32.xlu1 %v1906_v11, %s3392_s19  ;;  %v2131_v51 = vmul.f32 %v3850_v29, %v3802_v40  ;;  %v1756_v47 = vpack.c.bf16 %v1749_v21, %v1747_v46  ;;  %v1500_v4 = vmul.f32 %v3774_v41, %v3822_v17 }
 0x25f   : > { %v1982_v42 = vpack.c.bf16 %v1976_v24, %v1975_v26  ;;  %v1836_v45 = vpack.c.bf16 %v3866_v34, %v3862_v31  ;;  %v1477_v49 = vmul.f32 %v3777_v43, %v3822_v17  ;;  %v1654_v3 = vmul.f32 %v3784_v39, %v3822_v17  ;;  %v3366_v34 = vld [vmem:[%s4158_s6 + $0x30] sm:$0xff]  }
 0x260   : > { %v2137_v33 = vpack.c.bf16 %v2132_v44, %v2131_v51  ;;  %v1509_v48 = vpack.c.bf16 %v1500_v4, %v1498_v32  ;;  %v1745_v55 = vmul.f32 %v3786_v35, %v3822_v17  ;;  %v2407_v63 = vpack.c.bf16 %v2400_v56, %v2400_v56 }
 0x261   : > { %v1485_v52 = vpack.c.bf16 %v1477_v49, %v1475_v2  ;;  %v1663_v14 = vpack.c.bf16 %v1654_v3, %v1652_v53  ;;  %v1899_v25 = vmul.f32 %v3804_v61, %v3822_v17  ;;  %v2530_v10 = vpack.c.bf16 %v2526_v38, %v2525_v59  ;;  %v2772_v49 = vld [vmem:[%s4160_s8 + $0x8] sm:$0xff] }
 0x262   : > { %1592 = vrot.lane.b32.xlu0 %v1487_v0, %s3396_s29  ;;  %1993 = vrot.lane.b32.xlu1 %v1983_v22, %s3390_s23  ;;  %v1754_v37 = vpack.c.bf16 %v1745_v55, %v1743_v60  ;;  %v1898_v11 = vmul.f32 %v3804_v61, %v3830_v20  ;;  %v2647_v12 = vmul.f32 %v3908_v57, %v2050_v8 }
 0x263   : > { %v2648_v16 = vmul.f32 %v3910_v58, %v2050_v8  ;;  %v2055_v19 = vmul.f32 %v2050_v8, %v3806_v62  ;;  %v2054_v0 = vmul.f32 %v2050_v8, %v3802_v40  ;;  %v2053_v24 = vmul.f32 %v2050_v8, %v3822_v17  ;;  %v2771_v62 = vld [vmem:[%s4160_s8] sm:$0xff] }
 0x264   : > { %v1905_v18 = vpack.c.bf16 %v1899_v25, %v1898_v11  ;;  %v2052_v61 = vmul.f32 %v2050_v8, %v3830_v20  ;;  %v2130_v26 = vmul.f32 %v3850_v29, %v3822_v17  ;;  %v2129_v40 = vmul.f32 %v3850_v29, %v3830_v20  ;;  %v3361_v11 = vld [vmem:[%s4158_s6] sm:$0xff]  }
 0x265   : > { %v2652_v22 = vpack.c.bf16 %v2648_v16, %v2647_v12  ;;  %v2060_v23 = vpack.c.bf16 %v2055_v19, %v2054_v0  ;;  %v2202_v46 = vmul.f32 %v3908_v57, %v3777_v43  ;;  %v2204_v17 = vmul.f32 %v3910_v58, %v3777_v43  ;;  %v3362_v0 = vld [vmem:[%s4158_s6 + $0x10] sm:$0xff]  }
 0x266   : > { %1681 = vrot.lane.b32.xlu0 %v1665_v36, %s3394_s27  ;;  %1991 = vrot.lane.b32.xlu1 %v1982_v42, %s3390_s23  ;;  %v2059_v7 = vpack.c.bf16 %v2053_v24, %v2052_v61  ;;  %v2136_v21 = vpack.c.bf16 %v2130_v26, %v2129_v40  ;;  %v2210_v36 = vmul.f32 %v3908_v57, %v3774_v41  ;;  %v3363_v24 = vld [vmem:[%s4158_s6 + $0x18] sm:$0xff]  }
 0x267   : > { %v2212_v42 = vmul.f32 %v3910_v58, %v3774_v41  ;;  %v2208_v51 = vpack.c.bf16 %v2204_v17, %v2202_v46  ;;  %v2333_v20 = vmul.f32 %v3908_v57, %v3784_v39  ;;  %v2403_v4 = vmul.f32 %v3910_v58, %v3786_v35  ;;  %v3367_v40 = vld [vmem:[%s4158_s6 + $0x38] sm:$0xff]  }
 0x268   : > { %v2587_v32 = vmul.f32 %v3910_v58, %v3816_v9  ;;  %v1526_v9 = vpop.permute.xlu1 %1525 }
 0x269   : > { %v2217_v44 = vpack.c.bf16 %v2212_v42, %v2210_v36 }
 0x26a   : > { %1772 = vrot.lane.b32.xlu0 %v1756_v47, %s3393_s24  ;;  %2147 = vrot.lane.b32.xlu1 %v2137_v33, %s3391_s15  ;;  %v2335_v47 = vmul.f32 %v3910_v58, %v3784_v39  ;;  %v2401_v33 = vmul.f32 %v3908_v57, %v3786_v35  ;;  %v2591_v39 = vpack.c.bf16 %v2587_v32, %v2586_v5 }
 0x26c   : > { %v2340_v41 = vpack.c.bf16 %v2335_v47, %v2333_v20  ;;  %v2408_v43 = vpack.c.bf16 %v2403_v4, %v2401_v33  ;;  %v1591_v50 = vpop.permute.xlu1 %1590  ;;  %v3370_v33 = vld [vmem:[%s4159_s7] sm:$0xff]  }
 0x26d   : > { %v3379_v4 = vld [vmem:[%s4155_s3 + $0x4] ss:$0 sm:$0xff] }
 0x26e   : > { %1523 = vrot.lane.b32.xlu0 %v1509_v48, %s3395_s28  ;;  %2225 = vrot.lane.b32.xlu1 %v2216_v13, %s3395_s28  ;;  %v2708_v48 = vmul.f32 %v3908_v57, %v3850_v29  ;;  %v2709_v13 = vmul.f32 %v3910_v58, %v3850_v29  ;;  %v2469_v5 = vmul.f32 %v3379_v4, %v3910_v58 }
 0x270   : > { %v2713_v35 = vpack.c.bf16 %v2709_v13, %v2708_v48  ;;  %v1522_v2 = vpop.permute.xlu1 %1521  ;;  %v3371_v13 = vld [vmem:[%s4159_s7 + $0x10] sm:$0xff]  }
 0x272   : > { %1588 = vrot.lane.b32.xlu0 %v1485_v52, %s3396_s29  ;;  %2282 = vrot.lane.b32.xlu1 %v2207_v15, %s3396_s29 }
 0x274   : > { %v1587_v52 = vpop.permute.xlu1 %1586 }
 0x276   : > { %1677 = vrot.lane.b32.xlu0 %v1663_v14, %s3394_s27  ;;  %2348 = vrot.lane.b32.xlu1 %v2339_v54, %s3394_s27 }
 0x278   : > { %v1680_v15 = vpop.permute.xlu1 %1679 }
 0x27a   : > { %1768 = vrot.lane.b32.xlu0 %v1754_v37, %s3393_s24  ;;  %2416 = vrot.lane.b32.xlu1 %v2407_v63, %s3393_s24  ;;  %v3360_v37 = vld [vmem:[%s4158_s6 + $0x8] sm:$0xff]  }
 0x27c   : > { %v1771_v3 = vpop.permute.xlu1 %1770 }
 0x27e   : > { %1914 = vrot.lane.b32.xlu0 %v1905_v18, %s3392_s19  ;;  %2537 = vrot.lane.b32.xlu1 %v2530_v10, %s3392_s19 }
 0x280   : > { %v1676_v54 = vpop.permute.xlu1 %1675 }
 0x282   : > { %2070 = vrot.lane.b32.xlu0 %v2060_v23, %s3389_s16  ;;  %2659 = vrot.lane.b32.xlu1 %v2652_v22, %s3389_s16 }
 0x284   : > { %v1767_v56 = vpop.permute.xlu1 %1766 }
 0x286   : > { %2068 = vrot.lane.b32.xlu0 %v2059_v7, %s3389_s16  ;;  %2775 = vperm.xlu1 %3341, %v2771_v62   ;;  %v3364_v7 = vld [vmem:[%s4158_s6 + $0x20] sm:$0xff]  }
 0x28a   : > { %2145 = vrot.lane.b32.xlu0 %v2136_v21, %s3391_s15 }
 0x28e   : > { %2227 = vrot.lane.b32.xlu0 %v2217_v44, %s3395_s28  ;;  %v3368_v44 = vld [vmem:[%s4158_s6 + $0x40] sm:$0xff]   ;;  %s352_s28 = scalar_lea.vmem %s4161_s9, %s3027_s22 }
 0x292   : > { %2284 = vrot.lane.b32.xlu0 %v2208_v51, %s3396_s29  ;;  %v3369_v51 = vld [vmem:[%s4159_s7 + $0x8] sm:$0xff]  }
 0x296   : > { %2350 = vrot.lane.b32.xlu0 %v2340_v41, %s3394_s27 }
 0x29a   : > { %2418 = vrot.lane.b32.xlu0 %v2408_v43, %s3393_s24  ;;  %v2468_v43 = vmul.f32 %v3379_v4, %v3908_v57  ;;  %v3372_v57 = vld [vmem:[%s4159_s7 + $0x18] sm:$0xff]  }
 0x29e   : > { %2598 = vrot.lane.b32.xlu0 %v2591_v39, %s3390_s23 }
 0x2a2   : > { %2720 = vrot.lane.b32.xlu0 %v2713_v35, %s3391_s15  ;;  %v2473_v35 = vpack.c.bf16 %v2469_v5, %v2468_v43 }
 0x2a6   : > { %2780 = vperm.xlu0 %3340, %v2772_v49   ;;  %v3373_v49 = vld [vmem:[%s4159_s7 + $0x20] sm:$0xff]  }
 0x2d0   : > { %v1528_v6 = vpop.permute.xlu0 %1527  ;;  %v1917_v63 = vpop.permute.xlu1 %1916 }
 0x2d1   : > { %v1530_v53 = vsel %vm359_vm2, %v1526_v9, %v1528_v6  ;;  %v3377_v6 = vld [vmem:[%s4159_s7 + $0x40] sm:$0xff]  }
 0x2d2   : > { %3196 = vmatpush3.bf16.msra.mxu0 %v1530_v53 }
 0x2d3   : > { %3197 = vmatprep.subr.bf16.mxu0 %v3854_v30 }
 0x2d4   : > { %v1593_v29 = vpop.permute.xlu0 %1592  ;;  %v1994_v12 = vpop.permute.xlu1 %1993 }
 0x2d5   : > { %v1595_v14 = vsel %vm642_vm4, %v1591_v50, %v1593_v29  ;;  %v3374_v50 = vld [vmem:[%s4159_s7 + $0x28] sm:$0xff]  }
 0x2d6   : > { %3204 = vmatpush3.bf16.msra.mxu1 %v1595_v14 }
 0x2d7   : > { %3205 = vmatprep.subr.bf16.mxu1 %v3854_v30 }
 0x2d8   : > { %v1682_v55 = vpop.permute.xlu0 %1681  ;;  %v1992_v61 = vpop.permute.xlu1 %1991 }
 0x2d9   : > { %v1684_v8 = vsel %vm750_vm5, %v1680_v15, %v1682_v55 }
 0x2dc   : > { %v1773_v59 = vpop.permute.xlu0 %1772  ;;  %v2148_v27 = vpop.permute.xlu1 %2147 }
 0x2dd   : > { %v1775_v18 = vsel %vm862_vm6, %v1771_v3, %v1773_v59  ;;  %v3376_v3 = vld [vmem:[%s4159_s7 + $0x38] sm:$0xff]  }
 0x2e0   : > { %v1524_v38 = vpop.permute.xlu0 %1523 }
 0x2e1   : > { %v1529_v60 = vsel %vm359_vm2, %v1522_v2, %v1524_v38 }
 0x2e2   : > { %3198 = vmatpush3.bf16.msra.mxu0 %v1529_v60 }
 0x2e3   : > { %3211 = vmatprep.subr.bf16.mxu0 %v3854_v30 }
 0x2e4   : > { %v1589_v25 = vpop.permute.xlu0 %1588 }
 0x2e5   : > { %v1594_v10 = vsel %vm642_vm4, %v1587_v52, %v1589_v25  ;;  %3200 = vmatmul.mubr.msk.bf16.vlgmr.msra.gmra.mxu0 %vm564_vm3, %v3360_v37  ;;  %v3375_v52 = vld [vmem:[%s4159_s7 + $0x30] sm:$0xff]  }
 0x2e6   : > { %3206 = vmatpush3.bf16.msra.mxu1 %v1594_v10  ;;  %3212 = vmatpush3.bf16.msra.mxu0 %v1684_v8 }
 0x2e7   : > { %3213 = vmatprep.subr.bf16.mxu0 %v3854_v30  ;;  %3219 = vmatprep.subr.bf16.mxu1 %v3854_v30 }
 0x2e8   : > { %v1678_v16 = vpop.permute.xlu0 %1677  ;;  %3215 = vmatprep.mubr.msk.bf16.mxu0 %vm3398_vm7, %v3854_v30 }
 0x2e9   : > { %v1683_v19 = vsel %vm750_vm5, %v1676_v54, %v1678_v16  ;;  %3208 = vmatmul.mubr.msk.bf16.vlgmr.msra.gmra.mxu1 %vm564_vm3, %v3361_v11 }
 0x2ea   : > { %3214 = vmatpush3.bf16.msra.mxu0 %v1683_v19  ;;  %3220 = vmatpush3.bf16.msra.mxu1 %v1775_v18 }
 0x2eb   : > { %3221 = vmatprep.subr.bf16.mxu1 %v3854_v30  ;;  %3227 = vmatprep.subr.bf16.mxu0 %v3854_v30 }
 0x2ec   : > { %v1769_v22 = vpop.permute.xlu0 %1768  ;;  %3223 = vmatprep.mubr.msk.bf16.mxu1 %vm3398_vm7, %v3854_v30 }
 0x2ed   : > { %v1774_v23 = vsel %vm862_vm6, %v1767_v56, %v1769_v22  ;;  %3216 = vmatmul.mubr.msk.bf16.vlgmr.msra.gmra.mxu0 %vm564_vm3, %v3362_v0 }
 0x2ee   : > { %3222 = vmatpush3.bf16.msra.mxu1 %v1774_v23  ;;  %3228 = vmatpush3.bf16.msra.mxu0 %v1837_v1  ;;  %v3365_v1 = vld [vmem:[%s4158_s6 + $0x28] sm:$0xff]  }
 0x2ef   : > { %3229 = vmatprep.subr.bf16.mxu0 %v3854_v30  ;;  %3235 = vmatprep.subr.bf16.mxu1 %v3854_v30 }
 0x2f0   : > { %v1915_v62 = vpop.permute.xlu0 %1914  ;;  %3231 = vmatprep.mubr.msk.bf16.mxu0 %vm3398_vm7, %v3854_v30 }
 0x2f1   : > { %3224 = vmatmul.mubr.msk.bf16.vlgmr.msra.gmra.mxu1 %vm564_vm3, %v3363_v24 }
 0x2f2   : > { %3230 = vmatpush3.bf16.msra.mxu0 %v1836_v45  ;;  %3236 = vmatpush3.bf16.msra.mxu1 %v1917_v63  ;;  %v2226_v45 = vpop.permute.xlu1 %2225 }
 0x2f3   : > { %3237 = vmatprep.subr.bf16.mxu1 %v3854_v30  ;;  %3243 = vmatprep.subr.bf16.mxu0 %v3854_v30 }
 0x2f4   : > { %v2071_v28 = vpop.permute.xlu0 %2070  ;;  %3239 = vmatprep.mubr.msk.bf16.mxu1 %vm3398_vm7, %v3854_v30 }
 0x2f5   : > { %3232 = vmatmul.mubr.msk.bf16.vlgmr.msra.gmra.mxu0 %vm564_vm3, %v3364_v7 }
 0x2f6   : > { %3238 = vmatpush3.bf16.msra.mxu1 %v1915_v62  ;;  %3244 = vmatpush3.bf16.msra.mxu0 %v1994_v12  ;;  %v2283_v21 = vpop.permute.xlu1 %2282 }
 0x2f7   : > { %3245 = vmatprep.subr.bf16.mxu0 %v3854_v30  ;;  %3251 = vmatprep.subr.bf16.mxu1 %v3854_v30 }
 0x2f8   : > { %v2069_v31 = vpop.permute.xlu0 %2068  ;;  %3247 = vmatprep.mubr.msk.bf16.mxu0 %vm3398_vm7, %v3854_v30 }
 0x2f9   : > { %3240 = vmatmul.mubr.msk.bf16.vlgmr.msra.gmra.mxu1 %vm564_vm3, %v3365_v1 }
 0x2fa   : > { %3246 = vmatpush3.bf16.msra.mxu0 %v1992_v61  ;;  %3252 = vmatpush3.bf16.msra.mxu1 %v2071_v28  ;;  %v2349_v20 = vpop.permute.xlu1 %2348 }
 0x2fb   : > { %3253 = vmatprep.subr.bf16.mxu1 %v3854_v30  ;;  %3259 = vmatprep.subr.bf16.mxu0 %v3854_v30 }
 0x2fc   : > { %v2146_v26 = vpop.permute.xlu0 %2145  ;;  %3255 = vmatprep.mubr.msk.bf16.mxu1 %vm3398_vm7, %v3854_v30 }
 0x2fd   : > { %3248 = vmatmul.mubr.msk.bf16.vlgmr.msra.gmra.mxu0 %vm564_vm3, %v3366_v34 }
 0x2fe   : > { %3254 = vmatpush3.bf16.msra.mxu1 %v2069_v31  ;;  %3260 = vmatpush3.bf16.msra.mxu0 %v2148_v27  ;;  %v2417_v32 = vpop.permute.xlu1 %2416 }
 0x2ff   : > { %3261 = vmatprep.subr.bf16.mxu0 %v3854_v30  ;;  %3267 = vmatprep.subr.bf16.mxu1 %v3854_v30 }
 0x300   : > { %v2228_v36 = vpop.permute.xlu0 %2227  ;;  %3263 = vmatprep.mubr.msk.bf16.mxu0 %vm3398_vm7, %v3854_v30 }
 0x301   : > { %v2229_v42 = vsel %vm359_vm2, %v2226_v45, %v2228_v36  ;;  %3256 = vmatmul.mubr.msk.bf16.vlgmr.msra.gmra.mxu1 %vm564_vm3, %v3367_v40 }
 0x302   : > { %3262 = vmatpush3.bf16.msra.mxu0 %v2146_v26  ;;  %3268 = vmatpush3.bf16.msra.mxu1 %v2229_v42  ;;  %v2538_v58 = vpop.permute.xlu1 %2537 }
 0x303   : > { %3273 = vmatprep.subr.bf16.mxu0 %v3854_v30  ;;  %3269 = vmatprep.mubr.msk.bf16.mxu1 %vm3398_vm7, %v3854_v30 }
 0x304   : > { %v2285_v46 = vpop.permute.xlu0 %2284  ;;  %3279 = vmatprep.subr.bf16.mxu1 %v3854_v30 }
 0x305   : > { %v2286_v17 = vsel %vm642_vm4, %v2283_v21, %v2285_v46  ;;  %3264 = vmatmul.mubr.msk.bf16.vlgmr.msra.gmra.mxu0 %vm564_vm3, %v3368_v44 }
 0x306   : > { %3274 = vmatpush3.bf16.msra.mxu0 %v2286_v17  ;;  %3275 = vmatprep.mubr.msk.bf16.mxu0 %vm3398_vm7, %v3854_v30  ;;  %v2660_v2 = vpop.permute.xlu1 %2659 }
 0x307   : > { %3285 = vmatprep.subr.bf16.mxu0 %v3854_v30 }
 0x308   : > { %v2351_v47 = vpop.permute.xlu0 %2350 }
 0x309   : > { %v2352_v41 = vsel %vm750_vm5, %v2349_v20, %v2351_v47  ;;  %3270 = vmatmul.mubr.msk.bf16.vlgmr.msra.gmra.mxu1 %vm463_vm1, %v3369_v51 }
 0x30a   : > { %3280 = vmatpush3.bf16.msra.mxu1 %v2352_v41  ;;  %3281 = vmatprep.mubr.msk.bf16.mxu1 %vm3398_vm7, %v3854_v30 }
 0x30b   : > { %3291 = vmatprep.subr.bf16.mxu1 %v3854_v30 }
 0x30c   : > { %v2419_v39 = vpop.permute.xlu0 %2418 }
 0x30d   : > { %v2420_v48 = vsel %vm862_vm6, %v2417_v32, %v2419_v39  ;;  %3276 = vmatmul.mubr.msk.bf16.vlgmr.msra.gmra.mxu0 %vm463_vm1, %v3370_v33 }
 0x30e   : > { %3286 = vmatpush3.bf16.msra.mxu0 %v2420_v48  ;;  %3287 = vmatprep.mubr.msk.bf16.mxu0 %vm3398_vm7, %v3854_v30 }
 0x30f   : > { %3297 = vmatprep.subr.bf16.mxu0 %v3854_v30 }
 0x310   : > { %v2599_v9 = vpop.permute.xlu0 %2598 }
 0x311   : > { %3282 = vmatmul.mubr.msk.bf16.vlgmr.msra.gmra.mxu1 %vm463_vm1, %v3371_v13 }
 0x312   : > { %3292 = vmatpush3.bf16.msra.mxu1 %v2473_v35  ;;  %3293 = vmatprep.mubr.msk.bf16.mxu1 %vm3398_vm7, %v3854_v30 }
 0x313   : > { %3303 = vmatprep.subr.bf16.mxu1 %v3854_v30 }
 0x314   : > { %v2721_v15 = vpop.permute.xlu0 %2720 }
 0x315   : > { %3288 = vmatmul.mubr.msk.bf16.vlgmr.msra.gmra.mxu0 %vm463_vm1, %v3372_v57 }
 0x316   : > { %3298 = vmatpush3.bf16.msra.mxu0 %v2538_v58  ;;  %3299 = vmatprep.mubr.msk.bf16.mxu0 %vm3398_vm7, %v3854_v30 }
 0x317   : > { %3309 = vmatprep.subr.bf16.mxu0 %v3854_v30 }
 0x319   : > { %3294 = vmatmul.mubr.msk.bf16.vlgmr.msra.gmra.mxu1 %vm463_vm1, %v3373_v49 }
 0x31a   : > { %3304 = vmatpush3.bf16.msra.mxu1 %v2599_v9  ;;  %3305 = vmatprep.mubr.msk.bf16.mxu1 %vm3398_vm7, %v3854_v30 }
 0x31b   : > { %3315 = vmatprep.subr.bf16.mxu1 %v3854_v30 }
 0x31d   : > { %3300 = vmatmul.mubr.msk.bf16.vlgmr.msra.gmra.mxu0 %vm463_vm1, %v3374_v50 }
 0x31e   : > { %3310 = vmatpush3.bf16.msra.mxu0 %v2660_v2  ;;  %3311 = vmatprep.mubr.msk.bf16.mxu0 %vm3398_vm7, %v3854_v30 }
 0x321   : > { %3306 = vmatmul.mubr.msk.bf16.vlgmr.msra.gmra.mxu1 %vm463_vm1, %v3375_v52 }
 0x322   : > { %3316 = vmatpush3.bf16.msra.mxu1 %v2721_v15  ;;  %3317 = vmatprep.mubr.msk.bf16.mxu1 %vm3398_vm7, %v3854_v30 }
 0x325   : > { %3312 = vmatmul.mubr.msk.bf16.vlgmr.msra.gmra.mxu0 %vm463_vm1, %v3376_v3 }
 0x329   : > { %3318 = vmatmul.mubr.msk.bf16.vlgmr.msra.gmra.mxu1 %vm463_vm1, %v3377_v6 }
 0x3a5   : > { %v1570_v53 = vpop.f32.mrf.mxu0 }
 0x3a7   : > { %v3201_v29 = vpop.f32.mrf.mxu0 }
 0x3a9   : > { %v1573_v14 = vpop.f32.mrf.mxu0  ;;  %v1635_v54 = vpop.f32.mrf.mxu1 }
 0x3aa   : > { %v1636_v57 = vadd.f32 %v1635_v54, %v1570_v53 }
 0x3ab   : > { %v3202_v55 = vpop.f32.mrf.mxu0  ;;  %v3209_v56 = vpop.f32.mrf.mxu1 }
 0x3ad   : > { %v1638_v59 = vpop.f32.mrf.mxu1  ;;  %v1724_v38 = vpop.f32.mrf.mxu0 }
 0x3ae   : > { %v1731_v50 = vadd.f32 %v1724_v38, %v1636_v57  ;;  %v1639_v3 = vadd.f32 %v1638_v59, %v1573_v14 }
 0x3af   : > { %v3210_v60 = vpop.f32.mrf.mxu1  ;;  %v3217_v37 = vpop.f32.mrf.mxu0 }
 0x3b1   : > { %v1727_v63 = vpop.f32.mrf.mxu0  ;;  %v1815_v30 = vpop.f32.mrf.mxu1 }
 0x3b2   : > { %v1822_v6 = vadd.f32 %v1815_v30, %v1731_v50  ;;  %v1732_v37 = vadd.f32 %v1727_v63, %v1639_v3 }
 0x3b3   : > { %v3218_v25 = vpop.f32.mrf.mxu0  ;;  %v3225_v8 = vpop.f32.mrf.mxu1 }
 0x3b5   : > { %v1818_v10 = vpop.f32.mrf.mxu1  ;;  %v1880_v11 = vpop.f32.mrf.mxu0 }
 0x3b6   : > { %v1887_v25 = vadd.f32 %v1880_v11, %v1822_v6  ;;  %v1823_v53 = vadd.f32 %v1818_v10, %v1732_v37 }
 0x3b7   : > { %v3226_v12 = vpop.f32.mrf.mxu1  ;;  %v3233_v16 = vpop.f32.mrf.mxu0 }
 0x3b9   : > { %v1883_v18 = vpop.f32.mrf.mxu0  ;;  %v1957_v19 = vpop.f32.mrf.mxu1 }
 0x3ba   : > { %v1964_v54 = vadd.f32 %v1957_v19, %v1887_v25 }
 0x3bb   : > { %v3234_v0 = vpop.f32.mrf.mxu0  ;;  %v3241_v22 = vpop.f32.mrf.mxu1 }
 0x3bd   : > { %v4130_v23 = vpop.f32.mrf.mxu1  ;;  %v2034_v24 = vpop.f32.mrf.mxu0 }
 0x3bf   : > { %v3242_v61 = vpop.f32.mrf.mxu1  ;;  %v3249_v62 = vpop.f32.mrf.mxu0 }
 0x3c1   : > { %v4132_v7 = vpop.f32.mrf.mxu0  ;;  %v2111_v27 = vpop.f32.mrf.mxu1 }
 0x3c3   : > { %v3250_v28 = vpop.f32.mrf.mxu0  ;;  %v3257_v1 = vpop.f32.mrf.mxu1 }
 0x3c4   : > { %v1888_v28 = vadd.f32 %v1883_v18, %v1823_v53  ;;  %v2041_v1 = vadd.f32 %v2034_v24, %v1964_v54 }
 0x3c5   : > { %v4134_v31 = vpop.f32.mrf.mxu1  ;;  %v2188_v34 = vpop.f32.mrf.mxu0 }
 0x3c6   : > { %v1965_v63 = vadd.f32 %v4130_v23, %v1888_v28  ;;  %v2118_v11 = vadd.f32 %v2111_v27, %v2041_v1  ;;  %v2776_v23 = vpop.permute.xlu1 %2775 }
 0x3c7   : > { %v3258_v45 = vpop.f32.mrf.mxu1  ;;  %v3265_v26 = vpop.f32.mrf.mxu0 }
 0x3c8   : > { %v2042_v10 = vadd.f32 %v4132_v7, %v1965_v63  ;;  %v2195_v19 = vadd.f32 %v2188_v34, %v2118_v11 }
 0x3c9   : > { %v4136_v40 = vpop.f32.mrf.mxu0  ;;  %v2268_v21 = vpop.f32.mrf.mxu1 }
 0x3ca   : > { %v2119_v24 = vadd.f32 %v4134_v31, %v2042_v10 }
 0x3cb   : > { %v3266_v36 = vpop.f32.mrf.mxu0  ;;  %v3271_v42 = vpop.f32.mrf.mxu1 }
 0x3cd   : > { %v2271_v44 = vpop.f32.mrf.mxu1  ;;  %v2325_v46 = vpop.f32.mrf.mxu0 }
 0x3ce   : > { %v2326_v58 = vadd.f32 %v2325_v46, %v2268_v21 }
 0x3cf   : > { %v3272_v17 = vpop.f32.mrf.mxu1  ;;  %v3277_v51 = vpop.f32.mrf.mxu0 }
 0x3d1   : > { %v2328_v20 = vpop.f32.mrf.mxu0  ;;  %v2391_v47 = vpop.f32.mrf.mxu1 }
 0x3d2   : > { %v2398_v2 = vadd.f32 %v2391_v47, %v2326_v58  ;;  %v2329_v29 = vadd.f32 %v2328_v20, %v2271_v44  ;;  %v2196_v47 = vadd.f32 %v4136_v40, %v2119_v24 }
 0x3d3   : > { %v3278_v41 = vpop.f32.mrf.mxu0  ;;  %v3283_v33 = vpop.f32.mrf.mxu1 }
 0x3d5   : > { %v2394_v4 = vpop.f32.mrf.mxu1  ;;  %v2459_v43 = vpop.f32.mrf.mxu0 }
 0x3d6   : > { %v2466_v55 = vadd.f32 %v2459_v43, %v2398_v2  ;;  %v2399_v8 = vadd.f32 %v2394_v4, %v2329_v29  ;;  %v2781_v4 = vpop.permute.xlu0 %2780 }
 0x3d7   : > { %v3284_v5 = vpop.f32.mrf.mxu1  ;;  %v3289_v32 = vpop.f32.mrf.mxu0 }
 0x3d9   : > { %v2462_v39 = vpop.f32.mrf.mxu0  ;;  %v2516_v48 = vpop.f32.mrf.mxu1 }
 0x3da   : > { %v2523_v12 = vadd.f32 %v2516_v48, %v2466_v55  ;;  %v2467_v22 = vadd.f32 %v2462_v39, %v2399_v8 }
 0x3db   : > { %v3290_v13 = vpop.f32.mrf.mxu0  ;;  %v3295_v35 = vpop.f32.mrf.mxu1 }
 0x3dd   : > { %v2519_v49 = vpop.f32.mrf.mxu1  ;;  %v2577_v9 = vpop.f32.mrf.mxu0 }
 0x3de   : > { %v2584_v61 = vadd.f32 %v2577_v9, %v2523_v12  ;;  %v2524_v14 = vadd.f32 %v2519_v49, %v2467_v22 }
 0x3df   : > { %v3296_v52 = vpop.f32.mrf.mxu1  ;;  %v3301_v15 = vpop.f32.mrf.mxu0 }
 0x3e1   : > { %v2580_v56 = vpop.f32.mrf.mxu0  ;;  %v2638_v60 = vpop.f32.mrf.mxu1 }
 0x3e2   : > { %v2645_v59 = vadd.f32 %v2638_v60, %v2584_v61  ;;  %v2585_v26 = vadd.f32 %v2580_v56, %v2524_v14 }
 0x3e3   : > { %v3302_v16 = vpop.f32.mrf.mxu0  ;;  %v3307_v0 = vpop.f32.mrf.mxu1 }
 0x3e5   : > { %v2641_v38 = vpop.f32.mrf.mxu1  ;;  %v2699_v62 = vpop.f32.mrf.mxu0 }
 0x3e6   : > { %v2706_v21 = vadd.f32 %v2699_v62, %v2645_v59  ;;  %v2646_v44 = vadd.f32 %v2641_v38, %v2585_v26 }
 0x3e7   : > { %v3308_v30 = vpop.f32.mrf.mxu1  ;;  %v3313_v45 = vpop.f32.mrf.mxu0 }
 0x3e9   : > { %v2702_v36 = vpop.f32.mrf.mxu0  ;;  %v2760_v42 = vpop.f32.mrf.mxu1 }
 0x3ea   : > { %v2767_v46 = vadd.f32 %v2760_v42, %v2706_v21  ;;  %v2707_v51 = vadd.f32 %v2702_v36, %v2646_v44 }
 0x3eb   : > { %v3314_v17 = vpop.f32.mrf.mxu0  ;;  %v3319_v18 = vpop.f32.mrf.mxu1 }
 0x3ec   : > { %v2769_v20 = vadd.f32 %v2767_v46, %v2195_v19 }
 0x3ed   : > { %v2763_v27 = vpop.f32.mrf.mxu1 }
 0x3ee   : > { %v2783_v41 = vadd.f32 %v2776_v23, %v2769_v20  ;;  %v2768_v7 = vadd.f32 %v2763_v27, %v2707_v51 }
 0x3ef   : > { %v3320_v34 = vpop.f32.mrf.mxu1 }
 0x3f0   : > { %2785 = vst.msk [vmem:[%s352_s28] sm:$0xff] %vm463_vm1, %v2783_v41  ;;  %v2770_v33 = vadd.f32 %v2768_v7, %v2196_v47 }
 0x3f2   : > { %v2784_v43 = vadd.f32 %v2781_v4, %v2770_v33 }
 0x3f4   : > { %2786 = vst.msk [vmem:[%s352_s28 + $0x8] sm:$0xff] %vm463_vm1, %v2784_v43 }
 0x3f5 PF: > { %s19_s30 = sadd.s32 1, %s3386_s30  }
 0x3f6   : > { %p16_p4 = scmp.ge.s32.totalorder %s19_s30, 4  }
 0x3f8   :  { %18 = sbr.rel (!%p16_p4) target bundleno = 1 (0x1), region = 113 }

// kernel: unet_forward.10
= control target key start
LH: loop header
LB: loop body
LE: loop exit
PB: predicated region body
PF: predicated region fallthrough
CT: control target
= control target key end

     0   :  { %s2713_s30 = smov 0   ;;  %s3172_s0 = inlined_call_operand.vmem [shape: f32[2,16,16], index: 0, kind: input, shape index: {}]   ;;  %s3173_s1 = inlined_call_operand.vmem [shape: f32[2,8,64], index: 1, kind: input, shape index: {}]   ;;  %s3174_s2 = inlined_call_operand.vmem [shape: f32[16,64], index: 2, kind: input, shape index: {}]   ;;  %s3175_s3 = inlined_call_operand.vmem [shape: f32[9,64], index: 3, kind: input, shape index: {}]   ;;  %s3176_s4 = inlined_call_operand.vmem [shape: bf16[9,16,16], index: 4, kind: input, shape index: {}]   ;;  %s3177_s5 = inlined_call_operand.vmem [shape: f32[16,1], index: 5, kind: input, shape index: {}]   ;;  %s3178_s6 = inlined_call_operand.vmem [shape: bf16[9,8,16], index: 6, kind: input, shape index: {}]   ;;  %s3179_s7 = inlined_call_operand.vmem [shape: bf16[9,8,8], index: 7, kind: input, shape index: {}]   ;;  %s3180_s8 = inlined_call_operand.vmem [shape: f32[8,1], index: 8, kind: input, shape index: {}]   ;;  %s3181_s9 = inlined_call_operand.vmem [shape: f32[2,8,64], index: 9, kind: output, shape index: {}]  }
   0x1 LB: > { %s2287_s10 = sadd.s32 4294967295, %s2650_s30   ;;  %p2291_p0 = scmp.ge.s32.totalorder %s2650_s30, 1  ;;  %s2650_s30 = sphi %s2713_s30, %s19_s30  }
   0x2   : > { %p296_p1 = scmp.lt.s32.totalorder %s2650_s30, 3 }
   0x4   : > { %p297_p2 = pnand %p2291_p0, %p296_p1 }
   0x5   : > { %p335_p3 = scmp.lt.s32.totalorder (!%p297_p2), %s2287_s10, 1  ;;  %s2653_s19 = smov (!%p297_p2), 120  }
   0x6   : > { %300 = sbr.rel (%p297_p2) target bundleno = 977 (0x3d1), region = 56  ;;  %s2654_s20 = smov (!%p297_p2), 121  }
   0x7   : > { %s2655_s16 = smov (!%p297_p2), 119   ;;  %s2656_s21 = smov (!%p297_p2), 127  }
   0x8   : > { %s2657_s25 = smov (!%p297_p2), 1   ;;  %s2658_s28 = smov (!%p297_p2), 7  }
   0x9   : > { %s2660_s11 = smov (!%p297_p2), 9  }
   0xb   : > { %v352_v0 = vld [vmem:[%s3174_s2 + $0x8] sm:$0xff]  ;;  %v351_v1 = vld [vmem:[%s3174_s2] sm:$0xff]  ;;  %vm437_vm0 = vcmask 523264   ;;  %v2652_v2 = vmov 0.0   ;;  %s3183_s10 = smov (!%p335_p3, %s2287_s10), 1  ;;  %vm353_vm1 = vcmask 130048  }
   0xc   : > { %2445 = vmatprep.subr.mxu0 %v352_v0  ;;  %1122 = vst [vmem:[#allocation4 + $0x8] sm:$0xff] %v2652_v2  ;;  %436 = vst [vmem:[#allocation2 + $0x8] sm:$0xff] %v2652_v2  ;;  %v2735_v3 = vld [vmem:[%s3175_s3 + $0x1] ss:$0 sm:$0xff]  ;;  %v2740_v4 = vld [vmem:[%s3175_s3 + $0x2] ss:$0 sm:$0xff]  ;;  %2452 = vmatprep.subr.bf16.mxu1 %v2652_v2 }
   0xd   : > { %440 = vst [vmem:[#allocation2 + $0x20] sm:$0xff] %v2652_v2  ;;  %1114 = vst [vmem:[#allocation3 + $0x8] sm:$0xff] %v2652_v2  ;;  %2446 = vmatpush3.msra.mxu0 %v352_v0  ;;  %471 = vrot.lane.b32.xlu0 %v2735_v3, %s2653_s19  ;;  %v2752_v5 = vld [vmem:[%s3175_s3] ss:$0 sm:$0xff]  ;;  %s2386_s23 = sshll.u32 %s3183_s10, 4  ;;  %s2294_s24 = sshll.u32 %s3183_s10, 3 }
   0xe   : > { %1117 = vst [vmem:[#allocation3 + $0x20] sm:$0xff] %v2652_v2  ;;  %2447 = vmatprep.subr.mxu0 %v351_v1  ;;  %605 = vrot.lane.b32.xlu1 %v2740_v4, %s2654_s20  ;;  %v2759_v6 = vld [vmem:[%s3175_s3 + $0x3] ss:$0 sm:$0xff]  ;;  %s339_s29 = scalar_lea.vmem %s3172_s0, %s2386_s23  ;;  %s343_s13 = scalar_lea.vmem %s3173_s1, %s2294_s24  ;;  %v2772_v7 = vld [vmem:[%s3175_s3 + $0x5] ss:$0 sm:$0xff]  ;;  %vm2661_vm2 = vmmov 0  }
   0xf   : > { %2448 = vmatpush3.msra.mxu0 %v351_v1  ;;  %v349_v8 = vld [vmem:[%s339_s29] sm:$0xff]  ;;  %v350_v9 = vld [vmem:[%s339_s29 + $0x8] sm:$0xff]  ;;  %s2659_s29 = smov 8   ;;  %2454 = vmatprep.mubr.msk.bf16.mxu1 %vm2661_vm2, %v2652_v2  ;;  %v2662_v0 = vmov 0   ;;  %vm494_vm3 = vcmask 64512   ;;  %vm552_vm4 = vcmask 72704  }
  0x10   : > { %2458 = vmatprep.subr.bf16.mxu0 %v2652_v2  ;;  %v1124_v10 = vld [vmem:[%s343_s13] sm:$0xff]  ;;  %2449 = vmatprep.mubr.msk.f32.mxu0 %vm353_vm1, %v349_v8  ;;  %v2797_v13 = vld [vmem:[%s3175_s3 + $0x8] ss:$0 sm:$0xff]  ;;  %vm628_vm5 = vcmask 56320   ;;  %vm706_vm6 = vcmask 7168   ;;  %vm1729_vm7 = vcmask 1043456  }
  0x11   : > { %454 = vrot.lane.b32.xlu0 %v2752_v5, %s2655_s16  ;;  %v2780_v11 = vld [vmem:[%s3175_s3 + $0x6] ss:$0 sm:$0xff]  ;;  %1125 = vst.msk [vmem:[#allocation4 + $0x8] sm:$0xff] %vm437_vm0, %v1124_v10  ;;  %2450 = vmatmul.mubr.msk.f32.vlgmr.msra.gmra.mxu0 %vm353_vm1, %v350_v9  ;;  %v2790_v12 = vld [vmem:[%s3175_s3 + $0x7] ss:$0 sm:$0xff]  ;;  %v1098_v63 = vld [vmem:[%s3177_s5 + $0x8] sm:$0xff] }
  0x12   : > { %683 = vrot.lane.b32.xlu1 %v2759_v6, %s2656_s21  ;;  %2460 = vmatprep.mubr.msk.bf16.mxu0 %vm2661_vm2, %v2652_v2  ;;  %v2818_v36 = vld [vmem:[%s3175_s3 + $0x4] ss:$0 sm:$0xff] }
  0x13   : > { %v1097_v62 = vld [vmem:[%s3177_s5] sm:$0xff]  ;;  %2634 = vset.pattern.permute.xlu1 %v2662_v0  ;;  %2633 = vset.pattern.permute.xlu0 %v2662_v0 }
  0x14   : > { %v2636_v10 = vld [vmem:[%s3176_s4] sm:$0xff]  }
  0x15   : > { %823 = vrot.lane.b32.xlu0 %v2772_v7, %s2657_s25 }
  0x16   : > { %893 = vrot.lane.b32.xlu1 %v2780_v11, %s2658_s28 }
  0x19   : > { %963 = vrot.lane.b32.xlu0 %v2790_v12, %s2659_s29 }
  0x1a   : > { %1033 = vrot.lane.b32.xlu1 %v2797_v13, %s2660_s11 }
  0x7f   : > { %v472_v14 = vpop.permute.xlu0 %471 }
  0x80   : > { %v474_v15 = vmul.f32 0.0, %v472_v14  ;;  %v606_v16 = vpop.permute.xlu1 %605 }
  0x81   : > { %v608_v19 = vmul.f32 0.0, %v606_v16 }
  0x82   : > { %v481_v17 = vpack.c.bf16 %v474_v15, %v474_v15 }
  0x83   : > { %v455_v18 = vpop.permute.xlu0 %454  ;;  %v615_v24 = vpack.c.bf16 %v608_v19, %v608_v19  ;;  %v2639_v19 = vld [vmem:[%s3176_s4 + $0x20] sm:$0xff]  }
  0x84   : > { %v457_v20 = vmul.f32 0.0, %v455_v18  ;;  %490 = vrot.lane.b32.xlu0 %v481_v17, %s2659_s29  ;;  %v684_v22 = vpop.permute.xlu1 %683  ;;  %v2638_v17 = vld [vmem:[%s3176_s4 + $0x18] sm:$0xff]  }
  0x85   : > { %v686_v23 = vmul.f32 0.0, %v684_v22 }
  0x86   : > { %v463_v21 = vpack.c.bf16 %v457_v20, %v457_v20 }
  0x87   : > { %v693_v25 = vpack.c.bf16 %v686_v23, %v686_v23  ;;  %v824_v28 = vpop.permute.xlu0 %823  ;;  %v2641_v23 = vld [vmem:[%s3176_s4 + $0x30] sm:$0xff]  }
  0x88   : > { %548 = vrot.lane.b32.xlu0 %v463_v21, %s2660_s11  ;;  %v894_v52 = vpop.permute.xlu1 %893  ;;  %v2640_v21 = vld [vmem:[%s3176_s4 + $0x28] sm:$0xff]  }
  0x8b   : > { %v964_v33 = vpop.permute.xlu0 %963 }
  0x8c   : > { %624 = vrot.lane.b32.xlu0 %v615_v24, %s2658_s28  ;;  %v1034_v57 = vpop.permute.xlu1 %1033 }
  0x90   : > { %702 = vrot.lane.b32.xlu0 %v693_v25, %s2657_s25  ;;  %v2642_v25 = vld [vmem:[%s3176_s4 + $0x38] sm:$0xff]  }
  0xd1   : > { %v2451_v26 = vpop.f32.mrf.mxu0 }
  0xd2   : > { %443 = vst.msk [vmem:[#allocation2 + $0x20] sm:$0xff] %vm437_vm0, %v2451_v26  ;;  %v2643_v26 = vld [vmem:[%s3176_s4 + $0x40] sm:$0xff]  }
  0xd3   : > { %v426_v27 = vpop.f32.mrf.mxu0 }
  0xd4   : > { %442 = vst.msk [vmem:[#allocation2 + $0x8] sm:$0xff] %vm437_vm0, %v426_v27 }
  0xd9   : > { %v447_v29 = vld [vmem:[#allocation2 + $0x20] sm:$0xff] }
  0xda   : > { %v827_v32 = vmul.f32 %v824_v28, %v447_v29  ;;  %v477_v35 = vmul.f32 %v472_v14, %v447_v29  ;;  %v967_v41 = vmul.f32 %v964_v33, %v447_v29  ;;  %v2825_v43 = vmul.f32 %v2818_v36, %v447_v29 }
  0xdb   : > { %v445_v30 = vld [vmem:[#allocation2 + $0x8] sm:$0xff]  ;;  %v460_v44 = vmul.f32 %v455_v18, %v447_v29  ;;  %v611_v49 = vmul.f32 %v606_v16, %v447_v29  ;;  %v689_v53 = vmul.f32 %v684_v22, %v447_v29  ;;  %v897_v56 = vmul.f32 %v894_v52, %v447_v29 }
  0xdc   : > { %v826_v31 = vmul.f32 %v824_v28, %v445_v30  ;;  %v475_v34 = vmul.f32 %v472_v14, %v445_v30  ;;  %v966_v38 = vmul.f32 %v964_v33, %v445_v30  ;;  %v458_v40 = vmul.f32 %v455_v18, %v445_v30 }
  0xdd   : > { %v2822_v42 = vmul.f32 %v2818_v36, %v445_v30  ;;  %v609_v48 = vmul.f32 %v606_v16, %v445_v30  ;;  %v687_v51 = vmul.f32 %v684_v22, %v445_v30  ;;  %v896_v54 = vmul.f32 %v894_v52, %v445_v30 }
  0xde   : > { %v831_v37 = vpack.c.bf16 %v827_v32, %v826_v31  ;;  %v482_v39 = vpack.c.bf16 %v477_v35, %v475_v34  ;;  %v971_v45 = vpack.c.bf16 %v967_v41, %v966_v38  ;;  %v464_v47 = vpack.c.bf16 %v460_v44, %v458_v40 }
  0xdf   : > { %v765_v46 = vpack.c.bf16 %v2825_v43, %v2822_v42  ;;  %v616_v50 = vpack.c.bf16 %v611_v49, %v609_v48  ;;  %v694_v55 = vpack.c.bf16 %v689_v53, %v687_v51  ;;  %v901_v58 = vpack.c.bf16 %v897_v56, %v896_v54 }
  0xe0   : > { %838 = vrot.lane.b32.xlu0 %v831_v37, %s2656_s21  ;;  %492 = vrot.lane.b32.xlu1 %v482_v39, %s2659_s29  ;;  %v1036_v59 = vmul.f32 %v1034_v57, %v445_v30  ;;  %v1037_v60 = vmul.f32 %v1034_v57, %v447_v29 }
  0xe2   : > { %v1041_v61 = vpack.c.bf16 %v1037_v60, %v1036_v59 }
  0xe4   : > { %978 = vrot.lane.b32.xlu0 %v971_v45, %s2653_s19  ;;  %550 = vrot.lane.b32.xlu1 %v464_v47, %s2660_s11 }
  0xe8   : > { %626 = vrot.lane.b32.xlu1 %v616_v50, %s2658_s28  ;;  %1101 = vperm.xlu0 %2633, %v1097_v62  }
  0xec   : > { %704 = vrot.lane.b32.xlu1 %v694_v55, %s2657_s25  ;;  %1136 = vrot.lane.b32.xlu0 %v2752_v5, %s2655_s16 }
  0xf0   : > { %908 = vrot.lane.b32.xlu1 %v901_v58, %s2654_s20  ;;  %1340 = vrot.lane.b32.xlu0 %v2759_v6, %s2656_s21 }
  0xf4   : > { %1048 = vrot.lane.b32.xlu1 %v1041_v61, %s2655_s16  ;;  %1525 = vrot.lane.b32.xlu0 %v2780_v11, %s2658_s28 }
  0xf6   : > { %v491_v1 = vpop.permute.xlu0 %490 }
  0xf8   : > { %1106 = vperm.xlu1 %2634, %v1098_v63   ;;  %1649 = vrot.lane.b32.xlu0 %v2797_v13, %s2660_s11  ;;  %v2637_v13 = vld [vmem:[%s3176_s4 + $0x10] sm:$0xff]  }
  0xfc   : > { %1152 = vrot.lane.b32.xlu1 %v2735_v3, %s2653_s19  ;;  %v549_v3 = vpop.permute.xlu0 %548 }
 0x100   : > { %1271 = vrot.lane.b32.xlu1 %v2740_v4, %s2654_s20  ;;  %v2635_v4 = vld [vmem:[%s3176_s4 + $0x8] sm:$0xff]   ;;  %v625_v8 = vpop.permute.xlu0 %624 }
 0x104   : > { %1463 = vrot.lane.b32.xlu1 %v2772_v7, %s2657_s25  ;;  %v703_v14 = vpop.permute.xlu0 %702 }
 0x108   : > { %1587 = vrot.lane.b32.xlu1 %v2790_v12, %s2659_s29 }
 0x152   : > { %v493_v5 = vpop.permute.xlu1 %492  ;;  %v839_v18 = vpop.permute.xlu0 %838 }
 0x153   : > { %v495_v6 = vsel %vm494_vm3, %v491_v1, %v493_v5 }
 0x154   : > { %2453 = vmatpush3.bf16.msra.mxu1 %v495_v6 }
 0x155   : > { %2464 = vmatprep.subr.bf16.mxu1 %v2652_v2 }
 0x156   : > { %v551_v7 = vpop.permute.xlu1 %550  ;;  %v979_v22 = vpop.permute.xlu0 %978 }
 0x157   : > { %v553_v9 = vsel %vm552_vm4, %v549_v3, %v551_v7  ;;  %2455 = vmatmul.mubr.msk.bf16.vlgmr.msra.gmra.mxu1 %vm353_vm1, %v2635_v4 }
 0x158   : > { %2459 = vmatpush3.bf16.msra.mxu0 %v553_v9  ;;  %2466 = vmatprep.mubr.msk.bf16.mxu1 %vm2661_vm2, %v2652_v2 }
 0x159   : > { %2470 = vmatprep.subr.bf16.mxu0 %v2652_v2 }
 0x15a   : > { %v627_v11 = vpop.permute.xlu1 %626 }
 0x15b   : > { %v629_v12 = vsel %vm628_vm5, %v625_v8, %v627_v11  ;;  %2461 = vmatmul.mubr.msk.bf16.vlgmr.msra.gmra.mxu0 %vm353_vm1, %v2636_v10 }
 0x15c   : > { %2465 = vmatpush3.bf16.msra.mxu1 %v629_v12  ;;  %2472 = vmatprep.mubr.msk.bf16.mxu0 %vm2661_vm2, %v2652_v2 }
 0x15d   : > { %2476 = vmatprep.subr.bf16.mxu1 %v2652_v2 }
 0x15e   : > { %v705_v15 = vpop.permute.xlu1 %704 }
 0x15f   : > { %v707_v16 = vsel %vm706_vm6, %v703_v14, %v705_v15  ;;  %2467 = vmatmul.mubr.msk.bf16.vlgmr.msra.gmra.mxu1 %vm353_vm1, %v2637_v13 }
 0x160   : > { %2471 = vmatpush3.bf16.msra.mxu0 %v707_v16  ;;  %2477 = vmatpush3.bf16.msra.mxu1 %v765_v46 }
 0x161   : > { %2482 = vmatprep.subr.bf16.mxu0 %v2652_v2  ;;  %2478 = vmatprep.mubr.msk.bf16.mxu1 %vm2661_vm2, %v2652_v2 }
 0x162   : > { %2488 = vmatprep.subr.bf16.mxu1 %v2652_v2  ;;  %v909_v20 = vpop.permute.xlu1 %908 }
 0x163   : > { %2473 = vmatmul.mubr.msk.bf16.vlgmr.msra.gmra.mxu0 %vm353_vm1, %v2638_v17  ;;  %v2930_v28 = vpop.permute.xlu0 %1101 }
 0x164   : > { %2483 = vmatpush3.bf16.msra.mxu0 %v839_v18  ;;  %2484 = vmatprep.mubr.msk.bf16.mxu0 %vm2661_vm2, %v2652_v2 }
 0x165   : > { %2494 = vmatprep.subr.bf16.mxu0 %v2652_v2 }
 0x166   : > { %v1049_v24 = vpop.permute.xlu1 %1048 }
 0x167   : > { %2479 = vmatmul.mubr.msk.bf16.vlgmr.msra.gmra.mxu1 %vm353_vm1, %v2639_v19  ;;  %v2937_v32 = vpop.permute.xlu0 %1136 }
 0x168   : > { %2489 = vmatpush3.bf16.msra.mxu1 %v909_v20  ;;  %2490 = vmatprep.mubr.msk.bf16.mxu1 %vm2661_vm2, %v2652_v2  ;;  %v1139_v33 = vmul.f32 0.0, %v2937_v32 }
 0x169   : > { %2500 = vmatprep.subr.bf16.mxu1 %v2652_v2 }
 0x16a   : > { %v2942_v34 = vpack.c.bf16 %v1139_v33, %v1139_v33 }
 0x16b   : > { %2485 = vmatmul.mubr.msk.bf16.vlgmr.msra.gmra.mxu0 %vm353_vm1, %v2640_v21  ;;  %v2949_v38 = vpop.permute.xlu0 %1340 }
 0x16c   : > { %2495 = vmatpush3.bf16.msra.mxu0 %v979_v22  ;;  %2496 = vmatprep.mubr.msk.bf16.mxu0 %vm2661_vm2, %v2652_v2  ;;  %v1343_v40 = vmul.f32 0.0, %v2949_v38 }
 0x16d   : > { %2506 = vmatprep.subr.bf16.mxu0 %v2652_v2 }
 0x16e   : > { %v2956_v41 = vpack.c.bf16 %v1343_v40, %v1343_v40 }
 0x16f   : > { %2491 = vmatmul.mubr.msk.bf16.vlgmr.msra.gmra.mxu1 %vm353_vm1, %v2641_v23 }
 0x170   : > { %2501 = vmatpush3.bf16.msra.mxu1 %v1049_v24  ;;  %2502 = vmatprep.mubr.msk.bf16.mxu1 %vm2661_vm2, %v2652_v2 }
 0x171   : > { %2512 = vmatprep.subr.bf16.mxu1 %v2652_v2 }
 0x173   : > { %2497 = vmatmul.mubr.msk.bf16.vlgmr.msra.gmra.mxu0 %vm353_vm1, %v2642_v25  ;;  %v2928_v27 = vpop.permute.xlu1 %1106 }
 0x174   : > { %2508 = vmatprep.mubr.msk.bf16.mxu0 %vm2661_vm2, %v2652_v2 }
 0x177   : > { %2503 = vmatmul.mubr.msk.bf16.vlgmr.msra.gmra.mxu1 %vm353_vm1, %v2643_v26  ;;  %v2932_v29 = vpop.permute.xlu1 %1152 }
 0x178   : > { %2514 = vmatprep.mubr.msk.bf16.mxu1 %vm2661_vm2, %v2652_v2  ;;  %v1155_v30 = vmul.f32 0.0, %v2932_v29 }
 0x17a   : > { %v2935_v31 = vpack.c.bf16 %v1155_v30, %v1155_v30 }
 0x17b   : > { %v2944_v35 = vpop.permute.xlu1 %1271 }
 0x17c   : > { %1165 = vrot.lane.b32.xlu1 %v2935_v31, %s2659_s29  ;;  %v1274_v37 = vmul.f32 0.0, %v2944_v35 }
 0x17e   : > { %v2951_v39 = vpack.c.bf16 %v1274_v37, %v1274_v37 }
 0x180   : > { %1216 = vrot.lane.b32.xlu1 %v2942_v34, %s2660_s11 }
 0x184   : > { %1284 = vrot.lane.b32.xlu1 %v2951_v39, %s2658_s28 }
 0x188   : > { %1353 = vrot.lane.b32.xlu1 %v2956_v41, %s2657_s25 }
 0x217   : > { %v534_v42 = vpop.f32.mrf.mxu1 }
 0x219   : > { %v2456_v43 = vpop.f32.mrf.mxu1 }
 0x21b   : > { %v537_v44 = vpop.f32.mrf.mxu1  ;;  %v592_v45 = vpop.f32.mrf.mxu0 }
 0x21c   : > { %v593_v60 = vadd.f32 %v592_v45, %v534_v42 }
 0x21d   : > { %v2457_v46 = vpop.f32.mrf.mxu1  ;;  %v2462_v47 = vpop.f32.mrf.mxu0 }
 0x21e   : > { %v1464_v46 = vpop.permute.xlu1 %1463 }
 0x21f   : > { %v595_v48 = vpop.f32.mrf.mxu0  ;;  %v668_v49 = vpop.f32.mrf.mxu1 }
 0x220   : > { %v675_v63 = vadd.f32 %v668_v49, %v593_v60  ;;  %v596_v3 = vadd.f32 %v595_v48, %v537_v44 }
 0x221   : > { %v2463_v50 = vpop.f32.mrf.mxu0  ;;  %v2468_v51 = vpop.f32.mrf.mxu1 }
 0x222   : > { %v1588_v51 = vpop.permute.xlu1 %1587 }
 0x223   : > { %v671_v52 = vpop.f32.mrf.mxu1  ;;  %v746_v53 = vpop.f32.mrf.mxu0 }
 0x224   : > { %v753_v5 = vadd.f32 %v746_v53, %v675_v63  ;;  %v676_v7 = vadd.f32 %v671_v52, %v596_v3 }
 0x225   : > { %v2469_v54 = vpop.f32.mrf.mxu1  ;;  %v2474_v55 = vpop.f32.mrf.mxu0 }
 0x227   : > { %v749_v56 = vpop.f32.mrf.mxu0  ;;  %v808_v57 = vpop.f32.mrf.mxu1 }
 0x228   : > { %v815_v8 = vadd.f32 %v808_v57, %v753_v5  ;;  %v754_v11 = vadd.f32 %v749_v56, %v676_v7 }
 0x229   : > { %v2475_v58 = vpop.f32.mrf.mxu0  ;;  %v2480_v59 = vpop.f32.mrf.mxu1 }
 0x22b   : > { %v811_v61 = vpop.f32.mrf.mxu1  ;;  %v878_v62 = vpop.f32.mrf.mxu0 }
 0x22c   : > { %v885_v12 = vadd.f32 %v878_v62, %v815_v8  ;;  %v816_v15 = vadd.f32 %v811_v61, %v754_v11  ;;  %v2987_v8 = vld [vmem:[#allocation4 + $0x8] sm:$0xff] }
 0x22d   : > { %v2481_v0 = vpop.f32.mrf.mxu1  ;;  %v2486_v1 = vpop.f32.mrf.mxu0  ;;  %v1713_v11 = vmul.f32 %v2987_v8, %v2932_v29 }
 0x22f   : > { %v881_v6 = vpop.f32.mrf.mxu0  ;;  %v948_v4 = vpop.f32.mrf.mxu1 }
 0x230   : > { %v955_v16 = vadd.f32 %v948_v4, %v885_v12  ;;  %v886_v19 = vadd.f32 %v881_v6, %v816_v15  ;;  %v1526_v6 = vpop.permute.xlu0 %1525  ;;  %v2105_v15 = vmul.f32 %v2987_v8, %v1588_v51 }
 0x231   : > { %v2487_v9 = vpop.f32.mrf.mxu0  ;;  %v2492_v10 = vpop.f32.mrf.mxu1 }
 0x233   : > { %v951_v13 = vpop.f32.mrf.mxu1  ;;  %v1018_v14 = vpop.f32.mrf.mxu0 }
 0x234   : > { %v1025_v20 = vadd.f32 %v1018_v14, %v955_v16  ;;  %v956_v23 = vadd.f32 %v951_v13, %v886_v19  ;;  %v1650_v12 = vpop.permute.xlu0 %1649  ;;  %v1717_v14 = vpack.c.bf16 %v1713_v11, %v1713_v11  ;;  %v1827_v19 = vmul.f32 %v2987_v8, %v2944_v35 }
 0x235   : > { %v2493_v17 = vpop.f32.mrf.mxu1  ;;  %v2498_v18 = vpop.f32.mrf.mxu0 }
 0x236   : > { %v2108_v17 = vpack.c.bf16 %v2105_v15, %v2105_v15 }
 0x237   : > { %v1021_v21 = vpop.f32.mrf.mxu0  ;;  %v1088_v22 = vpop.f32.mrf.mxu1 }
 0x238   : > { %v1095_v24 = vadd.f32 %v1088_v22, %v1025_v20  ;;  %v1026_v30 = vadd.f32 %v1021_v21, %v956_v23  ;;  %v1831_v20 = vpack.c.bf16 %v1827_v19, %v1827_v19  ;;  %v2051_v21 = vmul.f32 %v2987_v8, %v1526_v6  ;;  %v2376_v19 = vld [vmem:[%s3179_s7 + $0x14] sm:$0xf] }
 0x239   : > { %v2499_v25 = vpop.f32.mrf.mxu0  ;;  %v2504_v26 = vpop.f32.mrf.mxu1 }
 0x23a   : > { %v1109_v33 = vadd.f32 %v2930_v28, %v1095_v24  ;;  %v2054_v23 = vpack.c.bf16 %v2051_v21, %v2051_v21  ;;  %v1166_v25 = vpop.permute.xlu1 %1165 }
 0x23b   : > { %v1091_v37 = vpop.f32.mrf.mxu1 }
 0x23c   : > { %v1111_v40 = vmax.f32 %v1109_v33, 0.0  ;;  %v1096_v42 = vadd.f32 %v1091_v37, %v1026_v30  ;;  %v2343_v37 = vld [vmem:[%s3178_s6 + $0x4] sm:$0xf] }
 0x23d   : > { %v2505_v43 = vpop.f32.mrf.mxu1 }
 0x23e   : > { %1119 = vst.msk [vmem:[#allocation3 + $0x8] sm:$0xff] %vm437_vm0, %v1111_v40  ;;  %v1110_v44 = vadd.f32 %v2928_v27, %v1096_v42  ;;  %v1217_v26 = vpop.permute.xlu1 %1216 }
 0x240   : > { %v1112_v45 = vmax.f32 %v1110_v44, 0.0  ;;  %v1143_v44 = vld [vmem:[%s3178_s6] sm:$0xf] }
 0x242   : > { %1120 = vst.msk [vmem:[#allocation3 + $0x20] sm:$0xff] %vm437_vm0, %v1112_v45  ;;  %v1285_v30 = vpop.permute.xlu1 %1284 }
 0x245   : > { %v1127_v47 = vld [vmem:[#allocation3 + $0x8] sm:$0xff] }
 0x246   : > { %v1466_v49 = vmul.f32 %v1464_v46, %v1127_v47  ;;  %v1156_v52 = vmul.f32 %v2932_v29, %v1127_v47  ;;  %v1590_v57 = vmul.f32 %v1588_v51, %v1127_v47  ;;  %v2969_v27 = vmul.f32 %v2818_v36, %v1127_v47  ;;  %v1354_v42 = vpop.permute.xlu1 %1353 }
 0x247   : > { %v1140_v59 = vmul.f32 %v2937_v32, %v1127_v47  ;;  %v1275_v0 = vmul.f32 %v2944_v35, %v1127_v47  ;;  %v1344_v5 = vmul.f32 %v2949_v38, %v1127_v47  ;;  %v1528_v9 = vmul.f32 %v1526_v6, %v1127_v47 }
 0x249   : > { %v1129_v48 = vld [vmem:[#allocation3 + $0x20] sm:$0xff] }
 0x24a   : > { %v1467_v50 = vmul.f32 %v1464_v46, %v1129_v48  ;;  %v1158_v28 = vmul.f32 %v2932_v29, %v1129_v48  ;;  %v1591_v53 = vmul.f32 %v1588_v51, %v1129_v48  ;;  %v1142_v56 = vmul.f32 %v2937_v32, %v1129_v48  ;;  %v2350_v51 = vld [vmem:[%s3178_s6 + $0xc] sm:$0xf] }
 0x24b   : > { %v2972_v58 = vmul.f32 %v2818_v36, %v1129_v48  ;;  %v1277_v63 = vmul.f32 %v2944_v35, %v1129_v48  ;;  %v1346_v3 = vmul.f32 %v2949_v38, %v1129_v48  ;;  %v1529_v4 = vmul.f32 %v1526_v6, %v1129_v48 }
 0x24c   : > { %v1470_v54 = vpack.c.bf16 %v1467_v50, %v1466_v49  ;;  %v1162_v55 = vpack.c.bf16 %v1158_v28, %v1156_v52  ;;  %v1594_v60 = vpack.c.bf16 %v1591_v53, %v1590_v57  ;;  %v1145_v62 = vpack.c.bf16 %v1142_v56, %v1140_v59  ;;  %v2353_v53 = vld [vmem:[%s3178_s6 + $0x10] sm:$0xf] }
 0x24d   : > { %v1412_v61 = vpack.c.bf16 %v2972_v58, %v2969_v27  ;;  %v1281_v1 = vpack.c.bf16 %v1277_v63, %v1275_v0  ;;  %v1350_v7 = vpack.c.bf16 %v1346_v3, %v1344_v5  ;;  %v1532_v10 = vpack.c.bf16 %v1529_v4, %v1528_v9  ;;  %v2359_v27 = vld [vmem:[%s3178_s6 + $0x18] sm:$0xf]  ;;  %v2367_v4 = vld [vmem:[%s3179_s7 + $0x4] sm:$0xf] }
 0x24e   : > { %1472 = vrot.lane.b32.xlu1 %v1470_v54, %s2656_s21  ;;  %1167 = vrot.lane.b32.xlu0 %v1162_v55, %s2659_s29  ;;  %v1653_v13 = vmul.f32 %v1650_v12, %v1129_v48  ;;  %v2159_v35 = vmul.f32 %v2987_v8, %v1650_v12  ;;  %v2356_v55 = vld [vmem:[%s3178_s6 + $0x14] sm:$0xf]  ;;  %v1946_v9 = vmul.f32 %v2818_v36, %v2987_v8 }
 0x250   : > { %v2162_v24 = vpack.c.bf16 %v2159_v35, %v2159_v35  ;;  %v2382_v35 = vld [vmem:[%s3179_s7 + $0x20] sm:$0xf] }
 0x252   : > { %1596 = vrot.lane.b32.xlu1 %v1594_v60, %s2653_s19  ;;  %1218 = vrot.lane.b32.xlu0 %v1145_v62, %s2660_s11 }
 0x256   : > { %1720 = vrot.lane.b32.xlu1 %v2935_v31, %s2659_s29  ;;  %1286 = vrot.lane.b32.xlu0 %v1281_v1, %s2658_s28  ;;  %v1997_v31 = vmul.f32 %v2987_v8, %v1464_v46  ;;  %v2365_v1 = vld [vmem:[%s3178_s6 + $0x20] sm:$0xf] }
 0x258   : > { %v2000_v16 = vpack.c.bf16 %v1997_v31, %v1997_v31 }
 0x25a   : > { %1775 = vrot.lane.b32.xlu1 %v2942_v34, %s2660_s11  ;;  %1355 = vrot.lane.b32.xlu0 %v1350_v7, %s2657_s25  ;;  %v1652_v34 = vmul.f32 %v1650_v12, %v1127_v47  ;;  %v2347_v47 = vld [vmem:[%s3178_s6 + $0x8] sm:$0xf]  ;;  %v1709_v12 = vld [vmem:[%s3179_s7] sm:$0xf] }
 0x25c   : > { %v1656_v29 = vpack.c.bf16 %v1653_v13, %v1652_v34  ;;  %v1949_v13 = vpack.c.bf16 %v1946_v9, %v1946_v9  ;;  %v2372_v34 = vld [vmem:[%s3179_s7 + $0xc] sm:$0xf] }
 0x25e   : > { %1834 = vrot.lane.b32.xlu1 %v2951_v39, %s2658_s28  ;;  %1534 = vrot.lane.b32.xlu0 %v1532_v10, %s2654_s20  ;;  %v1708_v39 = vmul.f32 %v2987_v8, %v2937_v32  ;;  %v1887_v32 = vmul.f32 %v2987_v8, %v2949_v38  ;;  %v2370_v8 = vld [vmem:[%s3179_s7 + $0x8] sm:$0xf] }
 0x260   : > { %v1711_v18 = vpack.c.bf16 %v1708_v39, %v1708_v39  ;;  %v1891_v22 = vpack.c.bf16 %v1887_v32, %v1887_v32  ;;  %v2374_v39 = vld [vmem:[%s3179_s7 + $0x10] sm:$0xf]  ;;  %v2378_v32 = vld [vmem:[%s3179_s7 + $0x18] sm:$0xf] }
 0x262   : > { %1894 = vrot.lane.b32.xlu1 %v2956_v41, %s2657_s25  ;;  %1722 = vrot.lane.b32.xlu0 %v1717_v14, %s2659_s29  ;;  %v2214_v41 = vld [vmem:[%s3180_s8] sm:$0xff]  ;;  %v1954_v14 = vsel %vm1729_vm7, %v1949_v13, 0 }
 0x266   : > { %2002 = vrot.lane.b32.xlu1 %v2000_v16, %s2656_s21  ;;  %1658 = vrot.lane.b32.xlu0 %v1656_v29, %s2655_s16 }
 0x26a   : > { %2110 = vrot.lane.b32.xlu1 %v2108_v17, %s2653_s19  ;;  %1777 = vrot.lane.b32.xlu0 %v1711_v18, %s2660_s11 }
 0x26e   : > { %2217 = vperm.xlu1 %2634, %v2214_v41   ;;  %1836 = vrot.lane.b32.xlu0 %v1831_v20, %s2658_s28 }
 0x272   : > { %1896 = vrot.lane.b32.xlu0 %v1891_v22, %s2657_s25  ;;  %v2380_v22 = vld [vmem:[%s3179_s7 + $0x1c] sm:$0xf] }
 0x276   : > { %2056 = vrot.lane.b32.xlu0 %v2054_v23, %s2654_s20  ;;  %s347_s20 = scalar_lea.vmem %s3181_s9, %s2294_s24 }
 0x27a   : > { %2164 = vrot.lane.b32.xlu0 %v2162_v24, %s2655_s16 }
 0x2c0   : > { %v1168_v38 = vpop.permute.xlu0 %1167  ;;  %v1473_v48 = vpop.permute.xlu1 %1472 }
 0x2c1   : > { %v1169_v33 = vsel %vm494_vm3, %v1166_v25, %v1168_v38 }
 0x2c2   : > { %2507 = vmatpush3.bf16.msra.mxu0 %v1169_v33 }
 0x2c3   : > { %2518 = vmatprep.subr.bf16.mxu0 %v2652_v2 }
 0x2c4   : > { %v1219_v40 = vpop.permute.xlu0 %1218  ;;  %v1597_v28 = vpop.permute.xlu1 %1596 }
 0x2c5   : > { %v1220_v43 = vsel %vm552_vm4, %v1217_v26, %v1219_v40  ;;  %2509 = vmatmul.mubr.msk.bf16.vlgmr.msra.gmra.mxu0 %vm353_vm1, %v2343_v37 }
 0x2c6   : > { %2513 = vmatpush3.bf16.msra.mxu1 %v1220_v43  ;;  %2520 = vmatprep.mubr.msk.bf16.mxu0 %vm2661_vm2, %v2652_v2 }
 0x2c7   : > { %2524 = vmatprep.subr.bf16.mxu1 %v2652_v2 }
 0x2c8   : > { %v1287_v45 = vpop.permute.xlu0 %1286  ;;  %v1721_v56 = vpop.permute.xlu1 %1720 }
 0x2c9   : > { %v1288_v46 = vsel %vm628_vm5, %v1285_v30, %v1287_v45  ;;  %2515 = vmatmul.mubr.msk.bf16.vlgmr.msra.gmra.mxu1 %vm353_vm1, %v1143_v44 }
 0x2ca   : > { %2519 = vmatpush3.bf16.msra.mxu0 %v1288_v46  ;;  %2526 = vmatprep.mubr.msk.bf16.mxu1 %vm2661_vm2, %v2652_v2 }
 0x2cb   : > { %2530 = vmatprep.subr.bf16.mxu0 %v2652_v2 }
 0x2cc   : > { %v1356_v49 = vpop.permute.xlu0 %1355  ;;  %v1776_v59 = vpop.permute.xlu1 %1775 }
 0x2cd   : > { %v1357_v50 = vsel %vm706_vm6, %v1354_v42, %v1356_v49  ;;  %2521 = vmatmul.mubr.msk.bf16.vlgmr.msra.gmra.mxu0 %vm353_vm1, %v2347_v47 }
 0x2ce   : > { %2525 = vmatpush3.bf16.msra.mxu1 %v1357_v50  ;;  %2531 = vmatpush3.bf16.msra.mxu0 %v1412_v61  ;;  %v2362_v61 = vld [vmem:[%s3178_s6 + $0x1c] sm:$0xf] }
 0x2cf   : > { %2536 = vmatprep.subr.bf16.mxu1 %v2652_v2  ;;  %2532 = vmatprep.mubr.msk.bf16.mxu0 %vm2661_vm2, %v2652_v2 }
 0x2d0   : > { %v1535_v52 = vpop.permute.xlu0 %1534  ;;  %2542 = vmatprep.subr.bf16.mxu0 %v2652_v2  ;;  %v1835_v3 = vpop.permute.xlu1 %1834 }
 0x2d1   : > { %2527 = vmatmul.mubr.msk.bf16.vlgmr.msra.gmra.mxu1 %vm353_vm1, %v2350_v51 }
 0x2d2   : > { %2537 = vmatpush3.bf16.msra.mxu1 %v1473_v48  ;;  %2538 = vmatprep.mubr.msk.bf16.mxu1 %vm2661_vm2, %v2652_v2 }
 0x2d3   : > { %2548 = vmatprep.subr.bf16.mxu1 %v2652_v2 }
 0x2d4   : > { %v1723_v54 = vpop.permute.xlu0 %1722  ;;  %v1895_v10 = vpop.permute.xlu1 %1894 }
 0x2d5   : > { %2533 = vmatmul.mubr.msk.bf16.vlgmr.msra.gmra.mxu0 %vm353_vm1, %v2353_v53  ;;  %v1724_v60 = vsel %vm494_vm3, %v1721_v56, %v1723_v54 }
 0x2d6   : > { %2543 = vmatpush3.bf16.msra.mxu0 %v1535_v52  ;;  %2544 = vmatprep.mubr.msk.bf16.mxu0 %vm2661_vm2, %v2652_v2  ;;  %v1731_v62 = vsel %vm1729_vm7, %v1724_v60, 0 }
 0x2d7   : > { %2554 = vmatprep.subr.bf16.mxu0 %v2652_v2 }
 0x2d8   : > { %v1659_v57 = vpop.permute.xlu0 %1658  ;;  %v2003_v15 = vpop.permute.xlu1 %2002 }
 0x2d9   : > { %2539 = vmatmul.mubr.msk.bf16.vlgmr.msra.gmra.mxu1 %vm353_vm1, %v2356_v55  ;;  %v2008_v16 = vsel %vm1729_vm7, %v2003_v15, 0 }
 0x2da   : > { %2549 = vmatpush3.bf16.msra.mxu1 %v1597_v28  ;;  %2550 = vmatprep.mubr.msk.bf16.mxu1 %vm2661_vm2, %v2652_v2 }
 0x2db   : > { %2560 = vmatprep.subr.bf16.mxu1 %v2652_v2 }
 0x2dc   : > { %v1778_v58 = vpop.permute.xlu0 %1777  ;;  %v2111_v18 = vpop.permute.xlu1 %2110 }
 0x2dd   : > { %2545 = vmatmul.mubr.msk.bf16.vlgmr.msra.gmra.mxu0 %vm353_vm1, %v2359_v27  ;;  %v1779_v0 = vsel %vm552_vm4, %v1776_v59, %v1778_v58  ;;  %v2116_v41 = vsel %vm1729_vm7, %v2111_v18, 0 }
 0x2de   : > { %2555 = vmatpush3.bf16.msra.mxu0 %v1659_v57  ;;  %2556 = vmatprep.mubr.msk.bf16.mxu0 %vm2661_vm2, %v2652_v2  ;;  %v1784_v5 = vsel %vm1729_vm7, %v1779_v0, 0 }
 0x2df   : > { %2566 = vmatprep.subr.bf16.mxu0 %v2652_v2 }
 0x2e0   : > { %v1837_v63 = vpop.permute.xlu0 %1836 }
 0x2e1   : > { %2551 = vmatmul.mubr.msk.bf16.vlgmr.msra.gmra.mxu1 %vm353_vm1, %v2362_v61  ;;  %v1838_v6 = vsel %vm628_vm5, %v1835_v3, %v1837_v63 }
 0x2e2   : > { %2561 = vmatpush3.bf16.msra.mxu1 %v1731_v62  ;;  %2562 = vmatprep.mubr.msk.bf16.mxu1 %vm2661_vm2, %v2652_v2  ;;  %v1843_v11 = vsel %vm1729_vm7, %v1838_v6, 0 }
 0x2e3   : > { %2572 = vmatprep.subr.bf16.mxu1 %v2652_v2 }
 0x2e4   : > { %v1897_v7 = vpop.permute.xlu0 %1896 }
 0x2e5   : > { %2557 = vmatmul.mubr.msk.bf16.vlgmr.msra.gmra.mxu0 %vm353_vm1, %v2365_v1  ;;  %v1898_v31 = vsel %vm706_vm6, %v1895_v10, %v1897_v7 }
 0x2e6   : > { %2567 = vmatpush3.bf16.msra.mxu0 %v1784_v5  ;;  %2568 = vmatprep.mubr.msk.bf16.mxu0 %vm2661_vm2, %v2652_v2  ;;  %v1903_v36 = vsel %vm1729_vm7, %v1898_v31, 0 }
 0x2e7   : > { %2578 = vmatprep.subr.bf16.mxu0 %v2652_v2 }
 0x2e8   : > { %v2057_v29 = vpop.permute.xlu0 %2056 }
 0x2e9   : > { %2563 = vmatmul.mubr.msk.bf16.vlgmr.msra.gmra.mxu1 %vm494_vm3, %v2367_v4  ;;  %v2062_v17 = vsel %vm1729_vm7, %v2057_v29, 0 }
 0x2ea   : > { %2573 = vmatpush3.bf16.msra.mxu1 %v1843_v11  ;;  %2574 = vmatprep.mubr.msk.bf16.mxu1 %vm2661_vm2, %v2652_v2 }
 0x2eb   : > { %2584 = vmatprep.subr.bf16.mxu1 %v2652_v2 }
 0x2ec   : > { %v2165_v20 = vpop.permute.xlu0 %2164 }
 0x2ed   : > { %2569 = vmatmul.mubr.msk.bf16.vlgmr.msra.gmra.mxu0 %vm494_vm3, %v1709_v12  ;;  %v2170_v21 = vsel %vm1729_vm7, %v2165_v20, 0 }
 0x2ee   : > { %2579 = vmatpush3.bf16.msra.mxu0 %v1903_v36  ;;  %2580 = vmatprep.mubr.msk.bf16.mxu0 %vm2661_vm2, %v2652_v2 }
 0x2ef   : > { %2590 = vmatprep.subr.bf16.mxu0 %v2652_v2 }
 0x2f1   : > { %2575 = vmatmul.mubr.msk.bf16.vlgmr.msra.gmra.mxu1 %vm494_vm3, %v2370_v8 }
 0x2f2   : > { %2585 = vmatpush3.bf16.msra.mxu1 %v1954_v14  ;;  %2586 = vmatprep.mubr.msk.bf16.mxu1 %vm2661_vm2, %v2652_v2 }
 0x2f3   : > { %2596 = vmatprep.subr.bf16.mxu1 %v2652_v2 }
 0x2f5   : > { %2581 = vmatmul.mubr.msk.bf16.vlgmr.msra.gmra.mxu0 %vm494_vm3, %v2372_v34 }
 0x2f6   : > { %2591 = vmatpush3.bf16.msra.mxu0 %v2008_v16  ;;  %2592 = vmatprep.mubr.msk.bf16.mxu0 %vm2661_vm2, %v2652_v2 }
 0x2f7   : > { %2602 = vmatprep.subr.bf16.mxu0 %v2652_v2 }
 0x2f9   : > { %2587 = vmatmul.mubr.msk.bf16.vlgmr.msra.gmra.mxu1 %vm494_vm3, %v2374_v39 }
 0x2fa   : > { %2597 = vmatpush3.bf16.msra.mxu1 %v2062_v17  ;;  %2598 = vmatprep.mubr.msk.bf16.mxu1 %vm2661_vm2, %v2652_v2 }
 0x2fb   : > { %2608 = vmatprep.subr.bf16.mxu1 %v2652_v2 }
 0x2fd   : > { %2593 = vmatmul.mubr.msk.bf16.vlgmr.msra.gmra.mxu0 %vm494_vm3, %v2376_v19 }
 0x2fe   : > { %2603 = vmatpush3.bf16.msra.mxu0 %v2116_v41  ;;  %2604 = vmatprep.mubr.msk.bf16.mxu0 %vm2661_vm2, %v2652_v2 }
 0x301   : > { %2599 = vmatmul.mubr.msk.bf16.vlgmr.msra.gmra.mxu1 %vm494_vm3, %v2378_v32 }
 0x302   : > { %2609 = vmatpush3.bf16.msra.mxu1 %v2170_v21  ;;  %2610 = vmatprep.mubr.msk.bf16.mxu1 %vm2661_vm2, %v2652_v2 }
 0x305   : > { %2605 = vmatmul.mubr.msk.bf16.vlgmr.msra.gmra.mxu0 %vm494_vm3, %v2380_v22 }
 0x309   : > { %2611 = vmatmul.mubr.msk.bf16.vlgmr.msra.gmra.mxu1 %vm494_vm3, %v2382_v35 }
 0x385   : > { %v1208_v23 = vpop.f32.mrf.mxu0 }
 0x387   : > { %v2510_v24 = vpop.f32.mrf.mxu0 }
 0x389   : > { %v1211_v25 = vpop.f32.mrf.mxu0  ;;  %v1259_v26 = vpop.f32.mrf.mxu1 }
 0x38a   : > { %v1260_v39 = vadd.f32 %v1259_v26, %v1208_v23 }
 0x38b   : > { %v2511_v30 = vpop.f32.mrf.mxu0  ;;  %v2516_v38 = vpop.f32.mrf.mxu1 }
 0x38d   : > { %v1262_v33 = vpop.f32.mrf.mxu1  ;;  %v1327_v37 = vpop.f32.mrf.mxu0 }
 0x38e   : > { %v1333_v41 = vadd.f32 %v1327_v37, %v1260_v39 }
 0x38f   : > { %v2517_v40 = vpop.f32.mrf.mxu1  ;;  %v2522_v42 = vpop.f32.mrf.mxu0 }
 0x391   : > { %v1330_v43 = vpop.f32.mrf.mxu0  ;;  %v1396_v2 = vpop.f32.mrf.mxu1 }
 0x392   : > { %v1402_v22 = vadd.f32 %v1396_v2, %v1333_v41 }
 0x393   : > { %v2523_v44 = vpop.f32.mrf.mxu0  ;;  %v2528_v45 = vpop.f32.mrf.mxu1 }
 0x395   : > { %v1399_v46 = vpop.f32.mrf.mxu1  ;;  %v1450_v47 = vpop.f32.mrf.mxu0 }
 0x396   : > { %v1456_v30 = vadd.f32 %v1450_v47, %v1402_v22 }
 0x397   : > { %v2529_v48 = vpop.f32.mrf.mxu1  ;;  %v2534_v49 = vpop.f32.mrf.mxu0 }
 0x399   : > { %v1453_v50 = vpop.f32.mrf.mxu0  ;;  %v1512_v51 = vpop.f32.mrf.mxu1 }
 0x39a   : > { %v1518_v42 = vadd.f32 %v1512_v51, %v1456_v30  ;;  %v2218_v51 = vpop.permute.xlu1 %2217 }
 0x39b   : > { %v2535_v52 = vpop.f32.mrf.mxu0  ;;  %v2540_v28 = vpop.f32.mrf.mxu1 }
 0x39d   : > { %v1515_v53 = vpop.f32.mrf.mxu1  ;;  %v1574_v54 = vpop.f32.mrf.mxu0 }
 0x39e   : > { %v1580_v26 = vadd.f32 %v1574_v54, %v1518_v42 }
 0x39f   : > { %v2541_v55 = vpop.f32.mrf.mxu1  ;;  %v2546_v56 = vpop.f32.mrf.mxu0 }
 0x3a1   : > { %v1577_v57 = vpop.f32.mrf.mxu0  ;;  %v1636_v27 = vpop.f32.mrf.mxu1 }
 0x3a2   : > { %v1642_v48 = vadd.f32 %v1636_v27, %v1580_v26 }
 0x3a3   : > { %v2547_v58 = vpop.f32.mrf.mxu0  ;;  %v2552_v59 = vpop.f32.mrf.mxu1 }
 0x3a5   : > { %v1639_v60 = vpop.f32.mrf.mxu1  ;;  %v1698_v61 = vpop.f32.mrf.mxu0 }
 0x3a6   : > { %v1704_v52 = vadd.f32 %v1698_v61, %v1642_v48 }
 0x3a7   : > { %v2553_v62 = vpop.f32.mrf.mxu1  ;;  %v2558_v63 = vpop.f32.mrf.mxu0 }
 0x3a9   : > { %v1701_v0 = vpop.f32.mrf.mxu0  ;;  %v1767_v1 = vpop.f32.mrf.mxu1 }
 0x3ab   : > { %v2559_v3 = vpop.f32.mrf.mxu0  ;;  %v2564_v5 = vpop.f32.mrf.mxu1 }
 0x3ad   : > { %v1770_v6 = vpop.f32.mrf.mxu1  ;;  %v1820_v4 = vpop.f32.mrf.mxu0 }
 0x3ae   : > { %v1821_v17 = vadd.f32 %v1820_v4, %v1767_v1 }
 0x3af   : > { %v2565_v7 = vpop.f32.mrf.mxu1  ;;  %v2570_v9 = vpop.f32.mrf.mxu0 }
 0x3b1   : > { %v1823_v10 = vpop.f32.mrf.mxu0  ;;  %v1879_v11 = vpop.f32.mrf.mxu1 }
 0x3b2   : > { %v1885_v20 = vadd.f32 %v1879_v11, %v1821_v17 }
 0x3b3   : > { %v2571_v31 = vpop.f32.mrf.mxu0  ;;  %v2576_v12 = vpop.f32.mrf.mxu1 }
 0x3b5   : > { %v1882_v13 = vpop.f32.mrf.mxu1  ;;  %v1939_v36 = vpop.f32.mrf.mxu0 }
 0x3b6   : > { %v1945_v35 = vadd.f32 %v1939_v36, %v1885_v20 }
 0x3b7   : > { %v2577_v8 = vpop.f32.mrf.mxu1  ;;  %v2582_v14 = vpop.f32.mrf.mxu0 }
 0x3b9   : > { %v1942_v15 = vpop.f32.mrf.mxu0  ;;  %v1990_v34 = vpop.f32.mrf.mxu1 }
 0x3ba   : > { %v1996_v38 = vadd.f32 %v1990_v34, %v1945_v35 }
 0x3bb   : > { %v2583_v16 = vpop.f32.mrf.mxu0  ;;  %v2588_v29 = vpop.f32.mrf.mxu1 }
 0x3bd   : > { %v1993_v18 = vpop.f32.mrf.mxu1  ;;  %v2044_v19 = vpop.f32.mrf.mxu0 }
 0x3be   : > { %v2050_v43 = vadd.f32 %v2044_v19, %v1996_v38 }
 0x3bf   : > { %v2589_v32 = vpop.f32.mrf.mxu1  ;;  %v2594_v21 = vpop.f32.mrf.mxu0 }
 0x3c1   : > { %v2047_v24 = vpop.f32.mrf.mxu0  ;;  %v2098_v25 = vpop.f32.mrf.mxu1 }
 0x3c2   : > { %v2104_v45 = vadd.f32 %v2098_v25, %v2050_v43 }
 0x3c3   : > { %v2595_v33 = vpop.f32.mrf.mxu0  ;;  %v2600_v40 = vpop.f32.mrf.mxu1 }
 0x3c5   : > { %v2101_v44 = vpop.f32.mrf.mxu1  ;;  %v2152_v23 = vpop.f32.mrf.mxu0 }
 0x3c6   : > { %v2158_v49 = vadd.f32 %v2152_v23, %v2104_v45 }
 0x3c7   : > { %v2601_v46 = vpop.f32.mrf.mxu1  ;;  %v2606_v37 = vpop.f32.mrf.mxu0 }
 0x3c9   : > { %v2206_v50 = vpop.f32.mrf.mxu1  ;;  %v2155_v2 = vpop.f32.mrf.mxu0 }
 0x3ca   : > { %v2212_v28 = vadd.f32 %v2206_v50, %v2158_v49 }
 0x3cb   : > { %v2612_v53 = vpop.f32.mrf.mxu1  ;;  %v2607_v47 = vpop.f32.mrf.mxu0 }
 0x3cc   : > { %v2213_v55 = vadd.f32 %v2212_v28, %v1704_v52 }
 0x3cd   : > { %v2209_v56 = vpop.f32.mrf.mxu1 }
 0x3ce   : > { %v2220_v54 = vadd.f32 %v2218_v51, %v2213_v55 }
 0x3cf   : > { %v2613_v57 = vpop.f32.mrf.mxu1 }
 0x3d0   : > { %2221 = vst.msk [vmem:[%s347_s20] sm:$0xff] %vm437_vm0, %v2220_v54 }
 0x3d1 PF: > { %s19_s30 = sadd.s32 1, %s2650_s30  }
 0x3d2   : > { %p16_p4 = scmp.ge.s32.totalorder %s19_s30, 4  }
 0x3d4   :  { %18 = sbr.rel (!%p16_p4) target bundleno = 1 (0x1), region = 113 }

// kernel: unet_forward.11
= control target key start
LH: loop header
LB: loop body
LE: loop exit
PB: predicated region body
PF: predicated region fallthrough
CT: control target
= control target key end

     0   :  { %s3202_s19 = smov 0   ;;  %s3913_s0 = inlined_call_operand.vmem [shape: f32[2,8,64], index: 0, kind: input, shape index: {}]   ;;  %s3914_s1 = inlined_call_operand.vmem [shape: f32[2,4,256], index: 1, kind: input, shape index: {}]   ;;  %s3915_s2 = inlined_call_operand.vmem [shape: f32[64,256], index: 2, kind: input, shape index: {}]   ;;  %s3916_s3 = inlined_call_operand.vmem [shape: f32[9,256], index: 3, kind: input, shape index: {}]   ;;  %s3917_s4 = inlined_call_operand.vmem [shape: bf16[9,8,8], index: 4, kind: input, shape index: {}]   ;;  %s3918_s5 = inlined_call_operand.vmem [shape: f32[8,1], index: 5, kind: input, shape index: {}]   ;;  %s3919_s6 = inlined_call_operand.vmem [shape: bf16[9,4,8], index: 6, kind: input, shape index: {}]   ;;  %s3920_s7 = inlined_call_operand.vmem [shape: bf16[9,4,4], index: 7, kind: input, shape index: {}]   ;;  %s3921_s8 = inlined_call_operand.vmem [shape: f32[4,1], index: 8, kind: input, shape index: {}]   ;;  %s3922_s9 = inlined_call_operand.vmem [shape: bf16[1,4], index: 9, kind: input, shape index: {}]   ;;  %s3923_s10 = inlined_call_operand.<no memory space> [shape: f32[1,1], index: 10, kind: input, shape index: {}]   ;;  %s3924_s11 = inlined_call_operand.vmem [shape: f32[2,1,256], index: 11, kind: output, shape index: {}]  }
   0x1   :  { %v16_v0 = vstv %s3923_s10 }
   0x2   :  { %17 = vst [vmem:[#allocation5] sm:$0x1] %v16_v0 }
   0x3 LB: > { %s2990_s20 = sadd.s32 4294967295, %s3126_s19   ;;  %p2994_p0 = scmp.ge.s32.totalorder %s3126_s19, 1  ;;  %s3126_s19 = sphi %s3202_s19, %s23_s19  }
   0x4   : > { %p348_p1 = scmp.lt.s32.totalorder %s3126_s19, 3 }
   0x6   : > { %p349_p2 = pnand %p2994_p0, %p348_p1 }
   0x7   : > { %p391_p3 = scmp.lt.s32.totalorder (!%p349_p2), %s2990_s20, 1  ;;  %s3129_s13 = smov (!%p349_p2), 112  }
   0x8   : > { %352 = sbr.rel (%p349_p2) target bundleno = 1201 (0x4b1), region = 64  ;;  %s3130_s17 = smov (!%p349_p2), 111  }
   0x9   : > { %s3131_s16 = smov (!%p349_p2), 113   ;;  %s3133_s24 = smov (!%p349_p2), 1  }
   0xa   : > { %s3135_s30 = smov (!%p349_p2), 16   ;;  %s3136_s12 = smov (!%p349_p2), 17  }
   0xd   : > { %v421_v1 = vld [vmem:[%s3915_s2 + $0x78] sm:$0xff]  ;;  %v420_v2 = vld [vmem:[%s3915_s2 + $0x70] sm:$0xff]  ;;  %v419_v3 = vld [vmem:[%s3915_s2 + $0x68] sm:$0xff]  ;;  %v508_v4 = vlaneseq  ;;  %v3128_v6 = vmov 0.0   ;;  %s3926_s20 = smov (!%p391_p3, %s2990_s20), 1  ;;  %vm422_vm0 = vcmask 523264  }
   0xe   : > { %442 = vmatprep.subr.mxu0 %v421_v1  ;;  %v418_v5 = vld [vmem:[%s3915_s2 + $0x60] sm:$0xff]  ;;  %490 = vmatprep.mubr.f32.mxu0 %v3128_v6  ;;  %1328 = vst [vmem:[#allocation4] sm:$0xff] %v3128_v6  ;;  %1329 = vst [vmem:[#allocation4 + $0x8] sm:$0xff] %v3128_v6  ;;  %v417_v7 = vld [vmem:[%s3915_s2 + $0x58] sm:$0xff]  ;;  %s2995_s15 = sshll.u32 %s3926_s20, 3  ;;  %vm547_vm1 = vcmask 916480  }
   0xf   : > { %443 = vmatpush1.msra.mxu0 %v420_v2  ;;  %v3228_v8 = vshrl.u32 %v508_v4, 7  ;;  %v416_v9 = vld [vmem:[%s3915_s2 + $0x50] sm:$0xff]  ;;  %v415_v10 = vld [vmem:[%s3915_s2 + $0x48] sm:$0xff]  ;;  %v414_v12 = vld [vmem:[%s3915_s2 + $0x40] sm:$0xff]  ;;  %s399_s22 = scalar_lea.vmem %s3914_s1, %s2995_s15  ;;  %s394_s27 = scalar_lea.vmem %s3913_s0, %s2995_s15  ;;  %vm520_vm2 = vcmask 908288   ;;  %vm701_vm3 = vcmask 924672  }
  0x10   : > { %444 = vmatprep.subr.mxu0 %v419_v3  ;;  %v3000_v14 = vld [vmem:[%s3916_s3 + $0x1] ss:$8 sm:$0x3]  ;;  %v413_v15 = vld [vmem:[%s3915_s2 + $0x38] sm:$0xff]  ;;  %v412_v19 = vld [vmem:[%s3915_s2 + $0x30] sm:$0xff]  ;;  %vm793_vm4 = vcmask 1039360  }
  0x11   : > { %445 = vmatpush1.msra.mxu0 %v418_v5  ;;  %v3238_v11 = vsub.s32 0, %v3228_v8  ;;  %v3249_v13 = vsub.s32 1, %v3228_v8  ;;  %v1330_v16 = vld [vmem:[%s399_s22] sm:$0xff]  ;;  %v411_v21 = vld [vmem:[%s3915_s2 + $0x28] sm:$0xff]  ;;  %v409_v26 = vld [vmem:[%s3915_s2 + $0x18] sm:$0xff]  ;;  %s3132_s22 = smov 127  }
  0x12   : > { %446 = vmatprep.subr.mxu0 %v417_v7  ;;  %v506_v18 = vld [vmem:[%s3916_s3] ss:$8 sm:$0x3]  ;;  %1331 = vst [vmem:[#allocation4 + $0x4] sm:$0xff] %v1330_v16  ;;  %v408_v27 = vld [vmem:[%s3915_s2 + $0x10] sm:$0xff]  ;;  %vm815_vm5 = vcmask 7168  }
  0x13   : > { %447 = vmatpush1.msra.mxu0 %v416_v9  ;;  %v538_v17 = vrot.slane %v3000_v14, %v3238_v11  ;;  %v511_v20 = vrot.slane %v506_v18, %v3238_v11  ;;  %v542_v22 = vrot.slane %v3000_v14, %v3249_v13  ;;  %v410_v23 = vld [vmem:[%s3915_s2 + $0x20] sm:$0xff]  ;;  %v515_v24 = vrot.slane %v506_v18, %v3249_v13  ;;  %v407_v28 = vld [vmem:[%s3915_s2 + $0x8] sm:$0xff]  ;;  %v3030_v45 = vld [vmem:[%s3916_s3 + $0x10] ss:$8 sm:$0x3] }
  0x14   : > { %448 = vmatprep.subr.mxu0 %v415_v10  ;;  %v3006_v25 = vld [vmem:[%s3916_s3 + $0x2] ss:$8 sm:$0x3]  ;;  %v3010_v32 = vld [vmem:[%s3916_s3 + $0x3] ss:$8 sm:$0x3]  ;;  %v1226_v46 = vrot.slane %v3030_v45, %v3238_v11  ;;  %v1230_v47 = vrot.slane %v3030_v45, %v3249_v13 }
  0x15   : > { %449 = vmatpush1.msra.mxu0 %v414_v12  ;;  %543 = vrot.lane.b32.xlu0 %v538_v17, %s3129_s13  ;;  %v692_v29 = vrot.slane %v3006_v25, %v3238_v11  ;;  %v406_v30 = vld [vmem:[%s3915_s2] sm:$0xff]  ;;  %v696_v31 = vrot.slane %v3006_v25, %v3249_v13  ;;  %v784_v34 = vrot.slane %v3010_v32, %v3238_v11  ;;  %v3137_v9 = vmov 0  }
  0x16   : > { %450 = vmatprep.subr.mxu0 %v413_v15  ;;  %516 = vrot.lane.b32.xlu1 %v511_v20, %s3130_s17  ;;  %v405_v33 = vld [vmem:[%s394_s27] sm:$0xff]  ;;  %v788_v35 = vrot.slane %v3010_v32, %v3249_v13  ;;  %s3134_s27 = smov 15   ;;  %vm723_vm6 = vcmask 121856   ;;  %vm569_vm7 = vcmask 130048   ;;  %vm633_vm8 = vcmask 138240  }
  0x17   : > { %451 = vmatpush1.msra.mxu0 %v412_v19  ;;  %v3018_v36 = vld [vmem:[%s3916_s3 + $0x5] ss:$8 sm:$0x3]  ;;  %v3022_v39 = vld [vmem:[%s3916_s3 + $0x6] ss:$8 sm:$0x3]  ;;  %615 = vmatprep.mubr.bf16.mxu1 %v3137_v9 }
  0x18   : > { %452 = vmatprep.subr.mxu0 %v411_v21  ;;  %v950_v37 = vrot.slane %v3018_v36, %v3238_v11  ;;  %v954_v38 = vrot.slane %v3018_v36, %v3249_v13  ;;  %v1042_v40 = vrot.slane %v3022_v39, %v3238_v11  ;;  %v1046_v41 = vrot.slane %v3022_v39, %v3249_v13  ;;  %v3026_v42 = vld [vmem:[%s3916_s3 + $0x7] ss:$8 sm:$0x3] }
  0x19   : > { %453 = vmatpush1.msra.mxu0 %v410_v23  ;;  %545 = vrot.lane.b32.xlu0 %v542_v22, %s3129_s13  ;;  %v1134_v43 = vrot.slane %v3026_v42, %v3238_v11  ;;  %v1138_v44 = vrot.slane %v3026_v42, %v3249_v13  ;;  %vm576_vm9 = vcmask 1043456   ;;  %vm572_vm10 = vcmask 64512  }
  0x1a   : > { %454 = vmatprep.subr.mxu0 %v409_v26  ;;  %518 = vrot.lane.b32.xlu1 %v515_v24, %s3130_s17  ;;  %vm2165_vm11 = vcmask 1041408   ;;  %vm2161_vm12 = vcmask 31744   ;;  %vm2922_vm13 = vcmp.lt.s32.totalorder %v508_v4, 256 }
  0x1b   : > { %455 = vmatpush1.msra.mxu0 %v408_v27  ;;  %3118 = vset.pattern.permute.xlu0 %v3137_v9 }
  0x1c   : > { %456 = vmatprep.subr.mxu0 %v407_v28  ;;  %3119 = vset.pattern.permute.xlu1 %v3137_v9 }
  0x1d   : > { %457 = vmatpush1.msra.mxu0 %v406_v30  ;;  %697 = vrot.lane.b32.xlu0 %v692_v29, %s3131_s16 }
  0x1e   : > { %2999 = vmatmul.mubr.msk.f32.vlgmr.msra.gmra.mxu0 %vm422_vm0, %v405_v33  ;;  %699 = vrot.lane.b32.xlu1 %v696_v31, %s3131_s16 }
  0x1f   : > { %767 = vmatprep.mubr.bf16.mxu0 %v3137_v9 }
  0x21   : > { %789 = vrot.lane.b32.xlu0 %v784_v34, %s3132_s22 }
  0x22   : > { %791 = vrot.lane.b32.xlu1 %v788_v35, %s3132_s22 }
  0x25   : > { %955 = vrot.lane.b32.xlu0 %v950_v37, %s3133_s24 }
  0x26   : > { %957 = vrot.lane.b32.xlu1 %v954_v38, %s3133_s24 }
  0x29   : > { %1047 = vrot.lane.b32.xlu0 %v1042_v40, %s3134_s27 }
  0x2a   : > { %1049 = vrot.lane.b32.xlu1 %v1046_v41, %s3134_s27 }
  0x2d   : > { %1139 = vrot.lane.b32.xlu0 %v1134_v43, %s3135_s30 }
  0x2e   : > { %1141 = vrot.lane.b32.xlu1 %v1138_v44, %s3135_s30 }
  0x31   : > { %1231 = vrot.lane.b32.xlu0 %v1226_v46, %s3136_s12 }
  0x32   : > { %1233 = vrot.lane.b32.xlu1 %v1230_v47, %s3136_s12 }
  0x87   : > { %v544_v48 = vpop.permute.xlu0 %543 }
  0x88   : > { %v552_v49 = vmul.f32 0.0, %v544_v48  ;;  %v517_v50 = vpop.permute.xlu1 %516 }
  0x89   : > { %v525_v51 = vmul.f32 0.0, %v517_v50 }
  0x8a   : > { %v557_v52 = vpack.c.bf16 %v552_v49, %v552_v49 }
  0x8b   : > { %v529_v53 = vpack.c.bf16 %v525_v51, %v525_v51  ;;  %v546_v54 = vpop.permute.xlu0 %545 }
  0x8c   : > { %563 = vrot.lane.b32.xlu0 %v557_v52, %s3135_s30  ;;  %v519_v55 = vpop.permute.xlu1 %518  ;;  %v548_v58 = vsel %vm547_vm1, %v544_v48, %v546_v54 }
  0x8d   : > { %627 = vrot.lane.b32.xlu1 %v529_v53, %s3136_s12  ;;  %v521_v59 = vsel %vm520_vm2, %v517_v50, %v519_v55 }
  0x8f   : > { %v698_v56 = vpop.permute.xlu0 %697 }
  0x90   : > { %v700_v57 = vpop.permute.xlu1 %699  ;;  %v706_v10 = vmul.f32 0.0, %v698_v56 }
  0x91   : > { %v702_v60 = vsel %vm701_vm3, %v698_v56, %v700_v57 }
  0x92   : > { %v711_v19 = vpack.c.bf16 %v706_v10, %v706_v10  ;;  %v3040_v10 = vld [vmem:[%s3916_s3 + $0x2] ss:$8 sm:$0x3] }
  0x93   : > { %v790_v0 = vpop.permute.xlu0 %789 }
  0x94   : > { %v798_v7 = vmul.f32 0.0, %v790_v0  ;;  %v792_v12 = vpop.permute.xlu1 %791 }
  0x95   : > { %v794_v16 = vsel %vm793_vm4, %v790_v0, %v792_v12 }
  0x96   : > { %v803_v18 = vpack.c.bf16 %v798_v7, %v798_v7 }
  0x97   : > { %v956_v17 = vpop.permute.xlu0 %955 }
  0x98   : > { %v958_v22 = vpop.permute.xlu1 %957 }
  0x99   : > { %v966_v35 = vmul.f32 0.0, %v958_v22  ;;  %v960_v38 = vsel %vm815_vm5, %v956_v17, %v958_v22 }
  0x9b   : > { %v1048_v23 = vpop.permute.xlu0 %1047  ;;  %v971_v41 = vpack.c.bf16 %v966_v35, %v966_v35 }
  0x9c   : > { %v1050_v32 = vpop.permute.xlu1 %1049 }
  0x9d   : > { %v1058_v33 = vmul.f32 0.0, %v1050_v32  ;;  %v1052_v44 = vsel %vm723_vm6, %v1048_v23, %v1050_v32 }
  0x9f   : > { %v1140_v34 = vpop.permute.xlu0 %1139  ;;  %v1063_v39 = vpack.c.bf16 %v1058_v33, %v1058_v33 }
  0xa0   : > { %v1142_v40 = vpop.permute.xlu1 %1141 }
  0xa1   : > { %v1144_v50 = vsel %vm569_vm7, %v1140_v34, %v1142_v40  ;;  %v1150_v51 = vmul.f32 0.0, %v1142_v40 }
  0xa3   : > { %v1232_v45 = vpop.permute.xlu0 %1231 }
  0xa4   : > { %v1234_v52 = vpop.permute.xlu1 %1233 }
  0xa5   : > { %v1236_v56 = vsel %vm633_vm8, %v1232_v45, %v1234_v52 }
  0xde   : > { %v3341_v61 = vpop.f32.mrf.mxu0 }
  0xdf   : > { %v553_v62 = vmul.f32 %v548_v58, %v3341_v61  ;;  %v526_v63 = vmul.f32 %v521_v59, %v3341_v61  ;;  %v707_v5 = vmul.f32 %v702_v60, %v3341_v61  ;;  %v799_v20 = vmul.f32 %v794_v16, %v3341_v61 }
  0xe0   : > { %v3345_v1 = vpop.f32.mrf.mxu0  ;;  %v1056_v27 = vmul.f32 %v1048_v23, %v3341_v61  ;;  %v964_v30 = vmul.f32 %v956_v17, %v3341_v61  ;;  %v1148_v42 = vmul.f32 %v1140_v34, %v3341_v61  ;;  %v1240_v49 = vmul.f32 %v1232_v45, %v3341_v61 }
  0xe1   : > { %v558_v2 = vpack.c.bf16 %v553_v62, %v553_v62  ;;  %v530_v3 = vpack.c.bf16 %v526_v63, %v526_v63  ;;  %v554_v6 = vmul.f32 %v546_v54, %v3345_v1  ;;  %v712_v14 = vpack.c.bf16 %v707_v5, %v707_v5  ;;  %v3034_v63 = vld [vmem:[%s3916_s3 + $0x1] ss:$8 sm:$0x3]  ;;  %v1335_v5 = vld [vmem:[%s3916_s3] ss:$8 sm:$0x3] }
  0xe2   : > { %v527_v21 = vmul.f32 %v519_v55, %v3345_v1  ;;  %v804_v24 = vpack.c.bf16 %v799_v20, %v799_v20  ;;  %v708_v26 = vmul.f32 %v700_v57, %v3345_v1  ;;  %v1061_v29 = vpack.c.bf16 %v1056_v27, %v1056_v27 }
  0xe3   : > { %565 = vrot.lane.b32.xlu1 %v558_v2, %s3135_s30  ;;  %629 = vrot.lane.b32.xlu0 %v530_v3, %s3136_s12  ;;  %v559_v15 = vpack.c.bf16 %v554_v6, %v554_v6  ;;  %v800_v31 = vmul.f32 %v792_v12, %v3345_v1  ;;  %v969_v36 = vpack.c.bf16 %v964_v30, %v964_v30  ;;  %v1242_v57 = vmul.f32 0.0, %v1234_v52  ;;  %v1312_v3 = vld [vmem:[%s3918_s5] sm:$0xff] }
  0xe4   : > { %v531_v25 = vpack.c.bf16 %v527_v21, %v527_v21  ;;  %v713_v28 = vpack.c.bf16 %v708_v26, %v708_v26  ;;  %v965_v43 = vmul.f32 %v960_v38, %v3345_v1  ;;  %v1153_v46 = vpack.c.bf16 %v1148_v42, %v1148_v42  ;;  %v3056_v21 = vld [vmem:[%s3916_s3 + $0x6] ss:$8 sm:$0x3] }
  0xe5   : > { %v805_v37 = vpack.c.bf16 %v800_v31, %v800_v31  ;;  %v1057_v48 = vmul.f32 %v1052_v44, %v3345_v1  ;;  %v1245_v54 = vpack.c.bf16 %v1240_v49, %v1240_v49  ;;  %v1149_v55 = vmul.f32 %v1144_v50, %v3345_v1  ;;  %v3014_v49 = vld [vmem:[%s3916_s3 + $0x4] ss:$8 sm:$0x3] }
  0xe6   : > { %v970_v47 = vpack.c.bf16 %v965_v43, %v965_v43  ;;  %v1155_v58 = vpack.c.bf16 %v1150_v51, %v1150_v51  ;;  %v1241_v60 = vmul.f32 %v1236_v56, %v3345_v1  ;;  %v1247_v62 = vpack.c.bf16 %v1242_v57, %v1242_v57 }
  0xe7   : > { %719 = vrot.lane.b32.xlu1 %v712_v14, %s3134_s27  ;;  %567 = vrot.lane.b32.xlu0 %v559_v15, %s3135_s30  ;;  %v1062_v53 = vpack.c.bf16 %v1057_v48, %v1057_v48  ;;  %v1154_v59 = vpack.c.bf16 %v1149_v55, %v1149_v55  ;;  %v1365_v2 = vrot.slane %v3034_v63, %v3238_v11  ;;  %v3044_v15 = vld [vmem:[%s3916_s3 + $0x3] ss:$8 sm:$0x3]  ;;  %v3001_v48 = vld [vmem:[%s3917_s4 + $0x4] sm:$0xf] }
  0xe8   : > { %v1246_v0 = vpack.c.bf16 %v1241_v60, %v1241_v60  ;;  %v1369_v6 = vrot.slane %v3034_v63, %v3249_v13  ;;  %v1340_v7 = vrot.slane %v1335_v5, %v3238_v11  ;;  %v1344_v12 = vrot.slane %v1335_v5, %v3249_v13  ;;  %v528_v63 = vld [vmem:[%s3917_s4] sm:$0xf] }
  0xe9   : > { %v1513_v14 = vrot.slane %v3040_v10, %v3238_v11  ;;  %v1517_v16 = vrot.slane %v3040_v10, %v3249_v13  ;;  %v1602_v17 = vrot.slane %v3044_v15, %v3238_v11  ;;  %v1853_v23 = vrot.slane %v3056_v21, %v3238_v11 }
  0xea   : > { %v2117_v32 = vcombine.low %v1340_v7, %v1344_v12  ;;  %v880_v52 = vrot.slane %v3014_v49, %v3249_v13 }
  0xeb   : > { %809 = vrot.lane.b32.xlu1 %v803_v18, %s3133_s24  ;;  %717 = vrot.lane.b32.xlu0 %v711_v19, %s3134_s27  ;;  %v3052_v18 = vld [vmem:[%s3916_s3 + $0x5] ss:$8 sm:$0x3]  ;;  %v1606_v19 = vrot.slane %v3044_v15, %v3249_v13  ;;  %v2276_v33 = vcombine.low %v1513_v14, %v1517_v16 }
  0xec   : > { %v1764_v20 = vrot.slane %v3052_v18, %v3238_v11  ;;  %v1768_v22 = vrot.slane %v3052_v18, %v3249_v13 }
  0xed   : > { %v2358_v34 = vcombine.low %v1602_v17, %v1606_v19 }
  0xee   : > { %v2503_v35 = vcombine.low %v1764_v20, %v1768_v22 }
  0xef   : > { %811 = vrot.lane.b32.xlu0 %v804_v24, %s3133_s24  ;;  %631 = vrot.lane.b32.xlu1 %v531_v25, %s3136_s12  ;;  %v3060_v24 = vld [vmem:[%s3916_s3 + $0x7] ss:$8 sm:$0x3]  ;;  %v1857_v25 = vrot.slane %v3056_v21, %v3249_v13 }
  0xf0   : > { %v1942_v26 = vrot.slane %v3060_v24, %v3238_v11  ;;  %v1946_v27 = vrot.slane %v3060_v24, %v3249_v13 }
  0xf3   : > { %721 = vrot.lane.b32.xlu0 %v713_v28, %s3134_s27  ;;  %1067 = vrot.lane.b32.xlu1 %v1061_v29, %s3131_s16  ;;  %v2133_v28 = vcombine.low %v1365_v2, %v1369_v6  ;;  %v3064_v29 = vld [vmem:[%s3916_s3 + $0x10] ss:$8 sm:$0x3] }
  0xf4   : > { %v2031_v30 = vrot.slane %v3064_v29, %v3238_v11  ;;  %v2035_v31 = vrot.slane %v3064_v29, %v3249_v13 }
  0xf6   : > { %v2749_v38 = vcombine.low %v2031_v30, %v2035_v31 }
  0xf7   : > { %975 = vrot.lane.b32.xlu0 %v969_v36, %s3132_s22  ;;  %813 = vrot.lane.b32.xlu1 %v805_v37, %s3133_s24  ;;  %v2585_v36 = vcombine.low %v1853_v23, %v1857_v25  ;;  %v2667_v37 = vcombine.low %v1942_v26, %v1946_v27 }
  0xfb   : > { %979 = vrot.lane.b32.xlu0 %v971_v41, %s3132_s22  ;;  %1071 = vrot.lane.b32.xlu1 %v1063_v39, %s3131_s16 }
  0xfe   : > { %v564_v39 = vpop.permute.xlu0 %563 }
  0xff   : > { %1159 = vrot.lane.b32.xlu0 %v1153_v46, %s3129_s13  ;;  %977 = vrot.lane.b32.xlu1 %v970_v47, %s3132_s22  ;;  %v628_v40 = vpop.permute.xlu1 %627 }
 0x103   : > { %1069 = vrot.lane.b32.xlu0 %v1062_v53, %s3131_s16  ;;  %1251 = vrot.lane.b32.xlu1 %v1245_v54, %s3130_s17  ;;  %v876_v53 = vrot.slane %v3014_v49, %v3238_v11 }
 0x105   : > { %v883_v60 = vmul.f32 %v876_v53, %v3341_v61 }
 0x107   : > { %1163 = vrot.lane.b32.xlu0 %v1155_v58, %s3129_s13  ;;  %1161 = vrot.lane.b32.xlu1 %v1154_v59, %s3129_s13  ;;  %v884_v59 = vmul.f32 %v880_v52, %v3345_v1 }
 0x109   : > { %v888_v1 = vpack.c.bf16 %v884_v59, %v884_v59 }
 0x10b   : > { %1253 = vrot.lane.b32.xlu0 %v1246_v0, %s3130_s17  ;;  %1255 = vrot.lane.b32.xlu1 %v1247_v62, %s3130_s17 }
 0x10f   : > { %1315 = vperm.xlu0 %3118, %v1312_v3   ;;  %1370 = vrot.lane.b32.xlu1 %v1365_v2, %s3129_s13 }
 0x113   : > { %1372 = vrot.lane.b32.xlu1 %v1369_v6, %s3129_s13  ;;  %1345 = vrot.lane.b32.xlu0 %v1340_v7, %s3130_s17  ;;  %v887_v6 = vpack.c.bf16 %v883_v60, %v883_v60  ;;  %v3007_v7 = vld [vmem:[%s3917_s4 + $0x8] sm:$0xf] }
 0x117   : > { %1347 = vrot.lane.b32.xlu1 %v1344_v12, %s3130_s17  ;;  %1518 = vrot.lane.b32.xlu0 %v1513_v14, %s3131_s16 }
 0x11b   : > { %1520 = vrot.lane.b32.xlu1 %v1517_v16, %s3131_s16  ;;  %1607 = vrot.lane.b32.xlu0 %v1602_v17, %s3132_s22  ;;  %v893_v16 = vsel %vm576_vm9, %v887_v6, 0  ;;  %v3011_v17 = vld [vmem:[%s3917_s4 + $0xc] sm:$0xf] }
 0x11f   : > { %1609 = vrot.lane.b32.xlu1 %v1606_v19, %s3132_s22  ;;  %1769 = vrot.lane.b32.xlu0 %v1764_v20, %s3133_s24  ;;  %v3015_v20 = vld [vmem:[%s3917_s4 + $0x10] sm:$0xf] }
 0x123   : > { %1771 = vrot.lane.b32.xlu1 %v1768_v22, %s3133_s24  ;;  %1858 = vrot.lane.b32.xlu0 %v1853_v23, %s3134_s27 }
 0x127   : > { %1860 = vrot.lane.b32.xlu1 %v1857_v25, %s3134_s27  ;;  %1947 = vrot.lane.b32.xlu0 %v1942_v26, %s3135_s30  ;;  %v3019_v26 = vld [vmem:[%s3917_s4 + $0x14] sm:$0xf] }
 0x12b   : > { %1949 = vrot.lane.b32.xlu1 %v1946_v27, %s3135_s30  ;;  %2134 = vrot.lane.b32.xlu0 %v2133_v28, %s3129_s13 }
 0x12f   : > { %2036 = vrot.lane.b32.xlu1 %v2031_v30, %s3136_s12  ;;  %2038 = vrot.lane.b32.xlu0 %v2035_v31, %s3136_s12 }
 0x133   : > { %2118 = vrot.lane.b32.xlu1 %v2117_v32, %s3130_s17  ;;  %2277 = vrot.lane.b32.xlu0 %v2276_v33, %s3131_s16  ;;  %v3023_v32 = vld [vmem:[%s3917_s4 + $0x18] sm:$0xf] }
 0x137   : > { %2359 = vrot.lane.b32.xlu1 %v2358_v34, %s3132_s22  ;;  %2504 = vrot.lane.b32.xlu0 %v2503_v35, %s3133_s24 }
 0x13b   : > { %2586 = vrot.lane.b32.xlu1 %v2585_v36, %s3134_s27  ;;  %2668 = vrot.lane.b32.xlu0 %v2667_v37, %s3135_s30 }
 0x13f   : > { %2750 = vrot.lane.b32.xlu1 %v2749_v38, %s3136_s12  ;;  %v3027_v38 = vld [vmem:[%s3917_s4 + $0x1c] sm:$0xf] }
 0x155   : > { %v566_v41 = vpop.permute.xlu1 %565  ;;  %v630_v42 = vpop.permute.xlu0 %629 }
 0x156   : > { %v570_v43 = vsel %vm569_vm7, %v564_v39, %v566_v41  ;;  %v634_v54 = vsel %vm633_vm8, %v628_v40, %v630_v42 }
 0x157   : > { %v578_v47 = vsel %vm576_vm9, %v570_v43, 0  ;;  %v640_v58 = vsel %vm576_vm9, %v634_v54, 0 }
 0x159   : > { %v720_v44 = vpop.permute.xlu1 %719  ;;  %v568_v45 = vpop.permute.xlu0 %567 }
 0x15a   : > { %v571_v46 = vsel %vm569_vm7, %v566_v41, %v568_v45 }
 0x15b   : > { %3002 = vmatprep.subr.msk.bf16.mxu1 %vm576_vm9, %v571_v46 }
 0x15c   : > { %598 = vmatpush1.bf16.msra.mxu1 %v578_v47 }
 0x15d   : > { %v810_v50 = vpop.permute.xlu1 %809  ;;  %v718_v51 = vpop.permute.xlu0 %717 }
 0x15e   : > { %v724_v62 = vsel %vm723_vm6, %v718_v51, %v720_v44 }
 0x15f   : > { %3003 = vmatmul.mubr.msk.bf16.vlgmr.msra.gmra.mxu1 %vm572_vm10, %v3001_v48  ;;  %v730_v5 = vsel %vm576_vm9, %v724_v62, 0 }
 0x160   : > { %677 = vmatprep.mubr.bf16.mxu1 %v3137_v9 }
 0x161   : > { %v812_v55 = vpop.permute.xlu0 %811  ;;  %v632_v56 = vpop.permute.xlu1 %631 }
 0x162   : > { %v635_v57 = vsel %vm633_vm8, %v630_v42, %v632_v56  ;;  %v816_v61 = vsel %vm815_vm5, %v810_v50, %v812_v55 }
 0x163   : > { %3004 = vmatprep.subr.msk.bf16.mxu1 %vm576_vm9, %v635_v57  ;;  %v822_v15 = vsel %vm576_vm9, %v816_v61, 0 }
 0x164   : > { %660 = vmatpush1.bf16.msra.mxu1 %v640_v58 }
 0x165   : > { %v722_v0 = vpop.permute.xlu0 %721  ;;  %v1068_v2 = vpop.permute.xlu1 %1067 }
 0x166   : > { %v725_v3 = vsel %vm723_vm6, %v720_v44, %v722_v0  ;;  %v3031_v44 = vld [vmem:[%s3917_s4 + $0x20] sm:$0xf] }
 0x167   : > { %3005 = vmatmul.mubr.msk.bf16.vlgmr.msra.gmra.mxu1 %vm572_vm10, %v528_v63  ;;  %3008 = vmatprep.subr.msk.bf16.mxu0 %vm576_vm9, %v725_v3 }
 0x168   : > { %750 = vmatpush1.bf16.msra.mxu0 %v730_v5  ;;  %859 = vmatprep.mubr.bf16.mxu1 %v3137_v9 }
 0x169   : > { %3016 = vmatprep.subr.msk.bf16.mxu0 %vm576_vm9, %v888_v1  ;;  %v976_v10 = vpop.permute.xlu0 %975  ;;  %v814_v12 = vpop.permute.xlu1 %813 }
 0x16a   : > { %v817_v14 = vsel %vm815_vm5, %v812_v55, %v814_v12 }
 0x16b   : > { %3009 = vmatmul.mubr.msk.bf16.vlgmr.msra.gmra.mxu0 %vm572_vm10, %v3007_v7  ;;  %3012 = vmatprep.subr.msk.bf16.mxu1 %vm576_vm9, %v817_v14 }
 0x16c   : > { %842 = vmatpush1.bf16.msra.mxu1 %v822_v15  ;;  %913 = vmatpush1.bf16.msra.mxu0 %v893_v16 }
 0x16d   : > { %v980_v18 = vpop.permute.xlu0 %979  ;;  %v1072_v19 = vpop.permute.xlu1 %1071  ;;  %930 = vmatprep.mubr.bf16.mxu0 %v3137_v9 }
 0x16f   : > { %3013 = vmatmul.mubr.msk.bf16.vlgmr.msra.gmra.mxu1 %vm572_vm10, %v3011_v17 }
 0x170   : > { %1025 = vmatprep.mubr.bf16.mxu1 %v3137_v9 }
 0x171   : > { %v1160_v21 = vpop.permute.xlu0 %1159  ;;  %v978_v22 = vpop.permute.xlu1 %977 }
 0x172   : > { %v982_v23 = vsel %vm793_vm4, %v976_v10, %v978_v22  ;;  %v983_v24 = vsel %vm793_vm4, %v978_v22, %v980_v18 }
 0x173   : > { %v988_v25 = vsel %vm576_vm9, %v982_v23, 0  ;;  %3017 = vmatmul.mubr.msk.bf16.vlgmr.msra.gmra.mxu0 %vm572_vm10, %v3015_v20  ;;  %3020 = vmatprep.subr.msk.bf16.mxu1 %vm576_vm9, %v983_v24 }
 0x174   : > { %1008 = vmatpush1.bf16.msra.mxu1 %v988_v25  ;;  %1117 = vmatprep.mubr.bf16.mxu0 %v3137_v9 }
 0x175   : > { %v1070_v27 = vpop.permute.xlu0 %1069  ;;  %v1252_v28 = vpop.permute.xlu1 %1251 }
 0x176   : > { %v1074_v29 = vsel %vm701_vm3, %v1068_v2, %v1070_v27  ;;  %v1075_v30 = vsel %vm701_vm3, %v1070_v27, %v1072_v19 }
 0x177   : > { %v1080_v31 = vsel %vm576_vm9, %v1074_v29, 0  ;;  %3021 = vmatmul.mubr.msk.bf16.vlgmr.msra.gmra.mxu1 %vm572_vm10, %v3019_v26  ;;  %3024 = vmatprep.subr.msk.bf16.mxu0 %vm576_vm9, %v1075_v30 }
 0x178   : > { %1100 = vmatpush1.bf16.msra.mxu0 %v1080_v31  ;;  %1209 = vmatprep.mubr.bf16.mxu1 %v3137_v9 }
 0x179   : > { %v1164_v33 = vpop.permute.xlu0 %1163  ;;  %v1162_v34 = vpop.permute.xlu1 %1161 }
 0x17a   : > { %v1166_v35 = vsel %vm547_vm1, %v1160_v21, %v1162_v34  ;;  %v1167_v36 = vsel %vm547_vm1, %v1162_v34, %v1164_v33 }
 0x17b   : > { %v1172_v37 = vsel %vm576_vm9, %v1166_v35, 0  ;;  %3025 = vmatmul.mubr.msk.bf16.vlgmr.msra.gmra.mxu0 %vm572_vm10, %v3023_v32  ;;  %3028 = vmatprep.subr.msk.bf16.mxu1 %vm576_vm9, %v1167_v36 }
 0x17c   : > { %1192 = vmatpush1.bf16.msra.mxu1 %v1172_v37  ;;  %1301 = vmatprep.mubr.bf16.mxu0 %v3137_v9 }
 0x17d   : > { %v1254_v39 = vpop.permute.xlu0 %1253  ;;  %v1256_v40 = vpop.permute.xlu1 %1255 }
 0x17e   : > { %v1258_v41 = vsel %vm520_vm2, %v1252_v28, %v1254_v39  ;;  %v1259_v42 = vsel %vm520_vm2, %v1254_v39, %v1256_v40 }
 0x17f   : > { %v1264_v43 = vsel %vm576_vm9, %v1258_v41, 0  ;;  %3029 = vmatmul.mubr.msk.bf16.vlgmr.msra.gmra.mxu1 %vm572_vm10, %v3027_v38  ;;  %3032 = vmatprep.subr.msk.bf16.mxu0 %vm576_vm9, %v1259_v42 }
 0x180   : > { %1284 = vmatpush1.bf16.msra.mxu0 %v1264_v43  ;;  %1438 = vmatprep.mubr.bf16.mxu1 %v3137_v9 }
 0x181   : > { %v3545_v45 = vpop.permute.xlu1 %1370 }
 0x182   : > { %v1378_v47 = vmul.f32 0.0, %v3545_v45 }
 0x183   : > { %3033 = vmatmul.mubr.msk.bf16.vlgmr.msra.gmra.mxu0 %vm572_vm10, %v3031_v44 }
 0x184   : > { %1499 = vmatprep.mubr.bf16.mxu0 %v3137_v9  ;;  %v1383_v48 = vpack.c.bf16 %v1378_v47, %v1378_v47 }
 0x185   : > { %v3550_v49 = vpop.permute.xlu1 %1372 }
 0x186   : > { %1389 = vrot.lane.b32.xlu0 %v1383_v48, %s3135_s30 }
 0x189   : > { %v3556_v53 = vpop.permute.xlu1 %1347 }
 0x18a   : > { %v3547_v46 = vpop.permute.xlu0 %1315 }
 0x18d   : > { %v3562_v57 = vpop.permute.xlu1 %1520 }
 0x18e   : > { %v3552_v50 = vpop.permute.xlu0 %1345 }
 0x18f   : > { %v1353_v51 = vmul.f32 0.0, %v3552_v50 }
 0x191   : > { %v1357_v52 = vpack.c.bf16 %v1353_v51, %v1353_v51  ;;  %v3568_v62 = vpop.permute.xlu1 %1609 }
 0x192   : > { %v3558_v54 = vpop.permute.xlu0 %1518 }
 0x193   : > { %v1526_v55 = vmul.f32 0.0, %v3558_v54  ;;  %1450 = vrot.lane.b32.xlu1 %v1357_v52, %s3136_s12 }
 0x195   : > { %v1531_v56 = vpack.c.bf16 %v1526_v55, %v1526_v55  ;;  %v3571_v63 = vpop.permute.xlu1 %1771 }
 0x196   : > { %v3564_v58 = vpop.permute.xlu0 %1607  ;;  %v1779_v0 = vmul.f32 0.0, %v3571_v63 }
 0x197   : > { %v1615_v59 = vmul.f32 0.0, %v3564_v58  ;;  %1537 = vrot.lane.b32.xlu0 %v1531_v56, %s3134_s27 }
 0x198   : > { %v1784_v2 = vpack.c.bf16 %v1779_v0, %v1779_v0 }
 0x199   : > { %v1620_v60 = vpack.c.bf16 %v1615_v59, %v1615_v59  ;;  %v3574_v3 = vpop.permute.xlu1 %1860 }
 0x19a   : > { %v1868_v5 = vmul.f32 0.0, %v3574_v3  ;;  %v3579_v56 = vpop.permute.xlu0 %1769 }
 0x19b   : > { %1626 = vrot.lane.b32.xlu1 %v1620_v60, %s3133_s24  ;;  %1792 = vrot.lane.b32.xlu0 %v1784_v2, %s3132_s22 }
 0x19c   : > { %v1873_v1 = vpack.c.bf16 %v1868_v5, %v1868_v5 }
 0x19f   : > { %1881 = vrot.lane.b32.xlu1 %v1873_v1, %s3131_s16 }
 0x21f   : > { %v617_v6 = vpop.f32.mrf.mxu1 }
 0x221   : > { %v619_v61 = vpop.f32.mrf.mxu1 }
 0x223   : > { %v621_v7 = vpop.f32.mrf.mxu1 }
 0x225   : > { %v622_v10 = vpop.f32.mrf.mxu1 }
 0x227   : > { %v679_v12 = vpop.f32.mrf.mxu1 }
 0x228   : > { %v680_v27 = vadd.f32 %v679_v12, %v617_v6  ;;  %v3582_v12 = vpop.permute.xlu0 %1858 }
 0x229   : > { %v681_v14 = vpop.f32.mrf.mxu1 }
 0x22a   : > { %v682_v33 = vadd.f32 %v681_v14, %v619_v61 }
 0x22b   : > { %v683_v15 = vpop.f32.mrf.mxu1  ;;  %v769_v16 = vpop.f32.mrf.mxu0 }
 0x22c   : > { %v776_v30 = vadd.f32 %v769_v16, %v680_v27  ;;  %v1374_v16 = vsel %vm547_vm1, %v3545_v45, %v3550_v49 }
 0x22d   : > { %v684_v17 = vpop.f32.mrf.mxu1  ;;  %v771_v18 = vpop.f32.mrf.mxu0 }
 0x22e   : > { %v777_v37 = vadd.f32 %v771_v18, %v682_v33  ;;  %v1349_v17 = vsel %vm520_vm2, %v3552_v50, %v3556_v53 }
 0x22f   : > { %v773_v19 = vpop.f32.mrf.mxu0  ;;  %v861_v20 = vpop.f32.mrf.mxu1 }
 0x230   : > { %v868_v34 = vadd.f32 %v861_v20, %v776_v30 }
 0x231   : > { %v774_v21 = vpop.f32.mrf.mxu0  ;;  %v863_v22 = vpop.f32.mrf.mxu1 }
 0x232   : > { %v869_v41 = vadd.f32 %v863_v22, %v777_v37  ;;  %v1611_v21 = vsel %vm793_vm4, %v3564_v58, %v3568_v62  ;;  %v1522_v22 = vsel %vm701_vm3, %v3558_v54, %v3562_v57  ;;  %v1950_v58 = vpop.permute.xlu1 %1949 }
 0x233   : > { %v865_v23 = vpop.f32.mrf.mxu1  ;;  %v932_v24 = vpop.f32.mrf.mxu0 }
 0x234   : > { %v939_v38 = vadd.f32 %v932_v24, %v868_v34 }
 0x235   : > { %v866_v25 = vpop.f32.mrf.mxu1  ;;  %v934_v26 = vpop.f32.mrf.mxu0 }
 0x236   : > { %v940_v47 = vadd.f32 %v934_v26, %v869_v41  ;;  %v3603_v26 = vpop.permute.xlu0 %1947 }
 0x237   : > { %v936_v28 = vpop.f32.mrf.mxu0  ;;  %v1027_v29 = vpop.f32.mrf.mxu1 }
 0x238   : > { %v1034_v42 = vadd.f32 %v1027_v29, %v939_v38 }
 0x239   : > { %v937_v31 = vpop.f32.mrf.mxu0  ;;  %v1029_v32 = vpop.f32.mrf.mxu1 }
 0x23a   : > { %v1035_v55 = vadd.f32 %v1029_v32, %v940_v47  ;;  %v2135_v30 = vpop.permute.xlu0 %2134 }
 0x23b   : > { %v1031_v35 = vpop.f32.mrf.mxu1  ;;  %v1119_v36 = vpop.f32.mrf.mxu0 }
 0x23c   : > { %v1126_v48 = vadd.f32 %v1119_v36, %v1034_v42  ;;  %v2037_v35 = vpop.permute.xlu1 %2036 }
 0x23d   : > { %v1032_v39 = vpop.f32.mrf.mxu1  ;;  %v1121_v40 = vpop.f32.mrf.mxu0 }
 0x23e   : > { %v1127_v2 = vadd.f32 %v1121_v40, %v1035_v55  ;;  %v2136_v40 = vrot.slane %v2135_v30, 4  ;;  %v2039_v41 = vpop.permute.xlu0 %2038 }
 0x23f   : > { %v1123_v43 = vpop.f32.mrf.mxu0  ;;  %v1211_v44 = vpop.f32.mrf.mxu1 }
 0x240   : > { %v1218_v59 = vadd.f32 %v1211_v44, %v1126_v48  ;;  %v3628_v44 = vld [vmem:[#allocation4] sm:$0xff]  ;;  %v2137_v47 = vsel %vm547_vm1, %v2136_v40, %v2135_v30 }
 0x241   : > { %v1124_v51 = vpop.f32.mrf.mxu0  ;;  %v1213_v52 = vpop.f32.mrf.mxu1  ;;  %v2140_v55 = vmul.f32 %v2137_v47, %v3628_v44 }
 0x242   : > { %v1219_v61 = vadd.f32 %v1213_v52, %v1127_v2  ;;  %v1957_v51 = vmul.f32 0.0, %v1950_v58 }
 0x243   : > { %v1215_v60 = vpop.f32.mrf.mxu1  ;;  %v1303_v0 = vpop.f32.mrf.mxu0 }
 0x244   : > { %v1310_v5 = vadd.f32 %v1303_v0, %v1218_v59  ;;  %v1962_v60 = vpack.c.bf16 %v1957_v51, %v1957_v51  ;;  %v2116_v0 = vld [vmem:[#allocation4 + $0x8] sm:$0xf] }
 0x245   : > { %v1216_v1 = vpop.f32.mrf.mxu1  ;;  %v1305_v6 = vpop.f32.mrf.mxu0 }
 0x246   : > { %v1318_v7 = vadd.f32 %v3547_v46, %v1310_v5  ;;  %v1311_v15 = vadd.f32 %v1305_v6, %v1219_v61  ;;  %v2145_v1 = vcombine.high %v2140_v55, %v2140_v55  ;;  %v1773_v6 = vsel %vm815_vm5, %v3579_v56, %v3571_v63 }
 0x247   : > { %v1307_v10 = vpop.f32.mrf.mxu0  ;;  %v2141_v61 = vmul.f32 %v2136_v40, %v2116_v0  ;;  %v2357_v40 = vld [vmem:[#allocation4 + $0x8] sm:$0xf] }
 0x248   : > { %v3584_v14 = vmax.f32 %v1318_v7, 0.0  ;;  %v1319_v23 = vadd.f32 %v3547_v46, %v1311_v15  ;;  %v2148_v10 = vpack.c.bf16 %v2145_v1, %v2145_v1 }
 0x249   : > { %v1308_v18 = vpop.f32.mrf.mxu0 }
 0x24a   : > { %v1354_v19 = vmul.f32 %v1349_v17, %v3584_v14  ;;  %v1379_v20 = vmul.f32 %v1374_v16, %v3584_v14  ;;  %v1616_v24 = vmul.f32 %v1611_v21, %v3584_v14  ;;  %v1527_v50 = vmul.f32 %v1522_v22, %v3584_v14  ;;  %v2278_v17 = vpop.permute.xlu0 %2277 }
 0x24b   : > { %v3607_v27 = vmax.f32 %v1319_v23, 0.0  ;;  %v1777_v54 = vmul.f32 %v3579_v56, %v3584_v14  ;;  %v1866_v29 = vmul.f32 %v3582_v12, %v3584_v14  ;;  %v1955_v37 = vmul.f32 %v3603_v26, %v3584_v14 }
 0x24c   : > { %v1358_v45 = vpack.c.bf16 %v1354_v19, %v1354_v19  ;;  %v1384_v25 = vpack.c.bf16 %v1379_v20, %v1379_v20  ;;  %v1621_v28 = vpack.c.bf16 %v1616_v24, %v1616_v24  ;;  %v1532_v46 = vpack.c.bf16 %v1527_v50, %v1527_v50 }
 0x24d   : > { %v1782_v31 = vpack.c.bf16 %v1777_v54, %v1777_v54  ;;  %v1380_v32 = vmul.f32 %v3550_v49, %v3607_v27  ;;  %v1871_v33 = vpack.c.bf16 %v1866_v29, %v1866_v29  ;;  %v1355_v34 = vmul.f32 %v3556_v53, %v3607_v27 }
 0x24e   : > { %1452 = vrot.lane.b32.xlu0 %v1358_v45, %s3136_s12  ;;  %1391 = vrot.lane.b32.xlu1 %v1384_v25, %s3135_s30  ;;  %v2044_v38 = vmul.f32 %v2037_v35, %v3584_v14  ;;  %v2046_v49 = vmul.f32 0.0, %v2039_v41  ;;  %v1960_v53 = vpack.c.bf16 %v1955_v37, %v1955_v37  ;;  %v1528_v42 = vmul.f32 %v3562_v57, %v3607_v27  ;;  %v2119_v57 = vpop.permute.xlu1 %2118  ;;  %v2505_v29 = vpop.permute.xlu0 %2504 }
 0x24f   : > { %v1385_v36 = vpack.c.bf16 %v1380_v32, %v1380_v32  ;;  %v1359_v39 = vpack.c.bf16 %v1355_v34, %v1355_v34  ;;  %v1617_v59 = vmul.f32 %v3568_v62, %v3607_v27  ;;  %v2120_v5 = vrot.slane %v2119_v57, 4 }
 0x250   : > { %v2049_v43 = vpack.c.bf16 %v2044_v38, %v2044_v38  ;;  %v2051_v48 = vpack.c.bf16 %v2046_v49, %v2046_v49  ;;  %v1533_v52 = vpack.c.bf16 %v1528_v42, %v1528_v42  ;;  %v2147_v62 = vpack.c.bf16 %v2140_v55, %v2140_v55 }
 0x251   : > { %v1622_v2 = vpack.c.bf16 %v1617_v59, %v1617_v59  ;;  %v2121_v7 = vsel %vm520_vm2, %v2120_v5, %v2119_v57  ;;  %v1778_v15 = vmul.f32 %v1773_v6, %v3607_v27  ;;  %v1862_v16 = vsel %vm723_vm6, %v3582_v12, %v3574_v3  ;;  %v2502_v57 = vld [vmem:[#allocation4 + $0xc] sm:$0xf] }
 0x252   : > { %1628 = vrot.lane.b32.xlu0 %v1621_v28, %s3133_s24  ;;  %1539 = vrot.lane.b32.xlu1 %v1532_v46, %s3134_s27  ;;  %v2124_v18 = vmul.f32 %v2121_v7, %v3628_v44  ;;  %v2149_v19 = vpack.c.bf16 %v2141_v61, %v2141_v61  ;;  %v1867_v63 = vmul.f32 %v1862_v16, %v3607_v27  ;;  %v2279_v21 = vrot.slane %v2278_v17, 4  ;;  %v2360_v25 = vpop.permute.xlu1 %2359 }
 0x253   : > { %v1783_v56 = vpack.c.bf16 %v1778_v15, %v1778_v15  ;;  %v1951_v20 = vsel %vm569_vm7, %v3603_v26, %v1950_v58  ;;  %v2040_v12 = vsel %vm633_vm8, %v2037_v35, %v2039_v41  ;;  %v2125_v28 = vmul.f32 %v2120_v5, %v2116_v0  ;;  %v3669_v41 = vld [vmem:[#allocation4 + $0x4] sm:$0xff] }
 0x254   : > { %v1872_v22 = vpack.c.bf16 %v1867_v63, %v1867_v63  ;;  %v2128_v23 = vcombine.high %v2124_v18, %v2124_v18  ;;  %v1956_v3 = vmul.f32 %v1951_v20, %v3607_v27  ;;  %v2130_v45 = vpack.c.bf16 %v2124_v18, %v2124_v18 }
 0x255   : > { %v2280_v24 = vsel %vm701_vm3, %v2279_v21, %v2278_v17  ;;  %v2045_v50 = vmul.f32 %v2040_v12, %v3607_v27  ;;  %v2361_v46 = vrot.slane %v2360_v25, 4  ;;  %v2506_v35 = vrot.slane %v2505_v29, 4 }
 0x256   : > { %1788 = vrot.lane.b32.xlu0 %v1782_v31, %s3132_s22  ;;  %1877 = vrot.lane.b32.xlu1 %v1871_v33, %s3131_s16  ;;  %v2131_v26 = vpack.c.bf16 %v2128_v23, %v2128_v23  ;;  %v1961_v58 = vpack.c.bf16 %v1956_v3, %v1956_v3  ;;  %v2283_v54 = vmul.f32 %v2280_v24, %v3628_v44  ;;  %v2275_v31 = vld [vmem:[#allocation4 + $0x8] sm:$0xf] }
 0x257   : > { %v2050_v30 = vpack.c.bf16 %v2045_v50, %v2045_v50  ;;  %v2362_v32 = vsel %vm793_vm4, %v2361_v46, %v2360_v25  ;;  %v2132_v33 = vpack.c.bf16 %v2125_v28, %v2125_v28  ;;  %v2507_v49 = vsel %vm815_vm5, %v2506_v35, %v2505_v29  ;;  %v2748_v25 = vld [vmem:[#allocation4 + $0xc] sm:$0xf]  ;;  %v2831_v29 = vld [vmem:[%s3921_s8] sm:$0xf] }
 0x258   : > { %v2288_v34 = vcombine.high %v2283_v54, %v2283_v54  ;;  %v2365_v37 = vmul.f32 %v2362_v32, %v3628_v44  ;;  %v2290_v38 = vpack.c.bf16 %v2283_v54, %v2283_v54  ;;  %v2366_v47 = vmul.f32 %v2361_v46, %v2357_v40  ;;  %v2669_v44 = vpop.permute.xlu0 %2668 }
 0x259   : > { %v2510_v51 = vmul.f32 %v2507_v49, %v3669_v41  ;;  %v2511_v5 = vmul.f32 %v2506_v35, %v2502_v57 }
 0x25a   : > { %1393 = vrot.lane.b32.xlu0 %v1385_v36, %s3135_s30  ;;  %1454 = vrot.lane.b32.xlu1 %v1359_v39, %s3136_s12  ;;  %v2284_v36 = vmul.f32 %v2279_v21, %v2275_v31  ;;  %v2291_v39 = vpack.c.bf16 %v2288_v34, %v2288_v34  ;;  %v2370_v42 = vcombine.high %v2365_v37, %v2365_v37  ;;  %v2666_v21 = vld [vmem:[#allocation4 + $0xc] sm:$0xf] }
 0x25b   : > { %v2374_v59 = vpack.c.bf16 %v2366_v47, %v2366_v47  ;;  %v2517_v1 = vpack.c.bf16 %v2510_v51, %v2510_v51  ;;  %v2519_v15 = vpack.c.bf16 %v2511_v5, %v2511_v5 }
 0x25c   : > { %v2373_v55 = vpack.c.bf16 %v2370_v42, %v2370_v42  ;;  %v1390_v31 = vpop.permute.xlu0 %1389  ;;  %v3048_v42 = vld [vmem:[%s3916_s3 + $0x4] ss:$8 sm:$0x3] }
 0x25e   : > { %1966 = vrot.lane.b32.xlu0 %v1960_v53, %s3129_s13  ;;  %2055 = vrot.lane.b32.xlu1 %v2049_v43, %s3130_s17  ;;  %v2587_v53 = vpop.permute.xlu1 %2586  ;;  %v2292_v43 = vpack.c.bf16 %v2284_v36, %v2284_v36 }
 0x262   : > { %1541 = vrot.lane.b32.xlu0 %v1533_v52, %s3134_s27  ;;  %2059 = vrot.lane.b32.xlu1 %v2051_v48, %s3130_s17  ;;  %v2372_v48 = vpack.c.bf16 %v2365_v37, %v2365_v37  ;;  %v2588_v52 = vrot.slane %v2587_v53, 4 }
 0x264   : > { %v2589_v0 = vsel %vm723_vm6, %v2588_v52, %v2587_v53 }
 0x265   : > { %v2592_v6 = vmul.f32 %v2589_v0, %v3669_v41 }
 0x266   : > { %1970 = vrot.lane.b32.xlu0 %v1962_v60, %s3129_s13  ;;  %1630 = vrot.lane.b32.xlu1 %v1622_v2, %s3133_s24  ;;  %v2515_v60 = vcombine.high %v2510_v51, %v2510_v51  ;;  %v2670_v2 = vrot.slane %v2669_v44, 4 }
 0x267   : > { %v2597_v16 = vcombine.high %v2592_v6, %v2592_v6  ;;  %v2599_v18 = vpack.c.bf16 %v2592_v6, %v2592_v6 }
 0x268   : > { %v2518_v61 = vpack.c.bf16 %v2515_v60, %v2515_v60  ;;  %v2671_v7 = vsel %vm569_vm7, %v2670_v2, %v2669_v44  ;;  %v2675_v3 = vmul.f32 %v2670_v2, %v2666_v21  ;;  %v3035_v60 = vld [vmem:[%s3919_s6 + $0x2] sm:$0x3]  ;;  %v1356_v2 = vld [vmem:[%s3919_s6] sm:$0x3]  ;;  %v3045_v21 = vld [vmem:[%s3919_s6 + $0x6] sm:$0x3] }
 0x26a   : > { %2153 = vrot.lane.b32.xlu0 %v2147_v62, %s3135_s30  ;;  %2155 = vrot.lane.b32.xlu1 %v2148_v10, %s3135_s30  ;;  %v2584_v62 = vld [vmem:[#allocation4 + $0xc] sm:$0xf]  ;;  %v2751_v10 = vpop.permute.xlu1 %2750  ;;  %v2683_v50 = vpack.c.bf16 %v2675_v3, %v2675_v3 }
 0x26b   : > { %v2593_v17 = vmul.f32 %v2588_v52, %v2584_v62  ;;  %v2752_v63 = vrot.slane %v2751_v10, 4 }
 0x26d   : > { %v2601_v20 = vpack.c.bf16 %v2593_v17, %v2593_v17  ;;  %v2753_v23 = vsel %vm633_vm8, %v2752_v63, %v2751_v10 }
 0x26e   : > { %2157 = vrot.lane.b32.xlu0 %v2149_v19, %s3135_s30  ;;  %1790 = vrot.lane.b32.xlu1 %v1783_v56, %s3132_s22  ;;  %v2674_v19 = vmul.f32 %v2671_v7, %v3669_v41  ;;  %v2600_v56 = vpack.c.bf16 %v2597_v16, %v2597_v16  ;;  %s2998_s30 = sshll.u32 %s3926_s20, 1 }
 0x26f   : > { %s403_s29 = scalar_lea.vmem %s3924_s11, %s2998_s30 }
 0x270   : > { %v2681_v12 = vpack.c.bf16 %v2674_v19, %v2674_v19 }
 0x272   : > { %1879 = vrot.lane.b32.xlu0 %v1872_v22, %s3131_s16  ;;  %2216 = vrot.lane.b32.xlu1 %v2130_v45, %s3136_s12  ;;  %v2679_v22 = vcombine.high %v2674_v19, %v2674_v19  ;;  %v2756_v45 = vmul.f32 %v2753_v23, %v3669_v41  ;;  %v3049_v23 = vld [vmem:[%s3919_s6 + $0x8] sm:$0x3] }
 0x274   : > { %v2682_v24 = vpack.c.bf16 %v2679_v22, %v2679_v22  ;;  %v2763_v28 = vpack.c.bf16 %v2756_v45, %v2756_v45 }
 0x276   : > { %2218 = vrot.lane.b32.xlu0 %v2131_v26, %s3136_s12  ;;  %1968 = vrot.lane.b32.xlu1 %v1961_v58, %s3129_s13  ;;  %v2761_v26 = vcombine.high %v2756_v45, %v2756_v45  ;;  %v2757_v58 = vmul.f32 %v2752_v63, %v2748_v25 }
 0x278   : > { %v2764_v54 = vpack.c.bf16 %v2761_v26, %v2761_v26  ;;  %v2765_v46 = vpack.c.bf16 %v2757_v58, %v2757_v58  ;;  %v3053_v26 = vld [vmem:[%s3919_s6 + $0xa] sm:$0x3] }
 0x27a   : > { %2057 = vrot.lane.b32.xlu0 %v2050_v30, %s3130_s17  ;;  %2220 = vrot.lane.b32.xlu1 %v2132_v33, %s3136_s12  ;;  %v1451_v30 = vpop.permute.xlu1 %1450  ;;  %v1538_v33 = vpop.permute.xlu0 %1537 }
 0x27e   : > { %2296 = vrot.lane.b32.xlu0 %v2290_v38, %s3134_s27  ;;  %2298 = vrot.lane.b32.xlu1 %v2291_v39, %s3134_s27  ;;  %v1627_v32 = vpop.permute.xlu1 %1626  ;;  %v3702_v35 = vpop.permute.xlu0 %1792 }
 0x282   : > { %2300 = vrot.lane.b32.xlu0 %v2292_v43, %s3134_s27  ;;  %2378 = vrot.lane.b32.xlu1 %v2372_v48, %s3133_s24  ;;  %v3700_v34 = vpop.permute.xlu1 %1881 }
 0x286   : > { %2380 = vrot.lane.b32.xlu0 %v2373_v55, %s3133_s24  ;;  %2382 = vrot.lane.b32.xlu1 %v2374_v59, %s3133_s24  ;;  %v3716_v55 = vrot.slane %v3048_v42, %v3249_v13  ;;  %v3719_v59 = vrot.slane %v3048_v42, %v3238_v11 }
 0x288   : > { %v1699_v5 = vmul.f32 %v3716_v55, %v3607_v27 }
 0x28a   : > { %2523 = vrot.lane.b32.xlu0 %v2517_v1, %s3132_s22  ;;  %2525 = vrot.lane.b32.xlu1 %v2518_v61, %s3132_s22  ;;  %v1698_v1 = vmul.f32 %v3719_v59, %v3584_v14  ;;  %v1703_v27 = vpack.c.bf16 %v1699_v5, %v1699_v5  ;;  %v3041_v14 = vld [vmem:[%s3919_s6 + $0x4] sm:$0x3] }
 0x28e   : > { %2527 = vrot.lane.b32.xlu0 %v2519_v15, %s3132_s22  ;;  %2605 = vrot.lane.b32.xlu1 %v2599_v18, %s3131_s16  ;;  %v1702_v15 = vpack.c.bf16 %v1698_v1, %v1698_v1 }
 0x290   : > { %v1708_v63 = vsel %vm576_vm9, %v1702_v15, 0 }
 0x292   : > { %2607 = vrot.lane.b32.xlu0 %v2600_v56, %s3131_s16  ;;  %2609 = vrot.lane.b32.xlu1 %v2601_v20, %s3131_s16 }
 0x296   : > { %2687 = vrot.lane.b32.xlu0 %v2681_v12, %s3129_s13  ;;  %2689 = vrot.lane.b32.xlu1 %v2682_v24, %s3129_s13 }
 0x29a   : > { %2691 = vrot.lane.b32.xlu0 %v2683_v50, %s3129_s13  ;;  %2769 = vrot.lane.b32.xlu1 %v2763_v28, %s3130_s17 }
 0x29e   : > { %2771 = vrot.lane.b32.xlu0 %v2764_v54, %s3130_s17  ;;  %2773 = vrot.lane.b32.xlu1 %v2765_v46, %s3130_s17 }
 0x2a2   : > { %2834 = vperm.xlu0 %3118, %v2831_v29   ;;  %v3057_v29 = vld [vmem:[%s3919_s6 + $0xc] sm:$0x3] }
 0x2c0   : > { %v1453_v36 = vpop.permute.xlu0 %1452  ;;  %v1392_v37 = vpop.permute.xlu1 %1391 }
 0x2c1   : > { %v1395_v53 = vsel %vm569_vm7, %v1390_v31, %v1392_v37  ;;  %v1456_v43 = vsel %vm633_vm8, %v1451_v30, %v1453_v36  ;;  %v2439_v31 = vcombine.low %v3719_v59, %v3716_v55 }
 0x2c2   : > { %v1401_v52 = vsel %vm576_vm9, %v1395_v53, 0  ;;  %v1462_v57 = vsel %vm576_vm9, %v1456_v43, 0 }
 0x2c3   : > { %v2441_v42 = vmul.f32 %v3669_v41, %v2439_v31 }
 0x2c4   : > { %v1629_v38 = vpop.permute.xlu0 %1628  ;;  %v1540_v39 = vpop.permute.xlu1 %1539 }
 0x2c5   : > { %v1543_v6 = vsel %vm723_vm6, %v1538_v33, %v1540_v39  ;;  %v1632_v16 = vsel %vm815_vm5, %v1627_v32, %v1629_v38  ;;  %v2445_v55 = vcombine.high %v2441_v42, %v2441_v42 }
 0x2c6   : > { %v1549_v10 = vsel %vm576_vm9, %v1543_v6, 0  ;;  %v1638_v56 = vsel %vm576_vm9, %v1632_v16, 0  ;;  %v2126_v6 = vld [vmem:[%s3920_s7] sm:$0x3]  ;;  %v3073_v16 = vld [vmem:[%s3920_s7 + $0x4] sm:$0x3] }
 0x2c7   : > { %v2448_v5 = vpack.c.bf16 %v2445_v55, %v2445_v55 }
 0x2c8   : > { %v1789_v40 = vpop.permute.xlu0 %1788  ;;  %v3704_v49 = vpop.permute.xlu1 %1877 }
 0x2cc   : > { %v1394_v47 = vpop.permute.xlu0 %1393  ;;  %v1455_v51 = vpop.permute.xlu1 %1454 }
 0x2cd   : > { %v1396_v48 = vsel %vm569_vm7, %v1392_v37, %v1394_v47  ;;  %v1457_v44 = vsel %vm633_vm8, %v1453_v36, %v1455_v51 }
 0x2ce   : > { %3036 = vmatprep.subr.msk.bf16.mxu1 %vm576_vm9, %v1396_v48  ;;  %3038 = vmatprep.subr.msk.bf16.mxu0 %vm576_vm9, %v1457_v44 }
 0x2cf   : > { %1421 = vmatpush1.bf16.msra.mxu1 %v1401_v52  ;;  %1482 = vmatpush1.bf16.msra.mxu0 %v1462_v57  ;;  %v3065_v52 = vld [vmem:[%s3919_s6 + $0x10] sm:$0x3] }
 0x2d0   : > { %v1967_v0 = vpop.permute.xlu0 %1966  ;;  %v3729_v13 = vpop.permute.xlu1 %2055 }
 0x2d2   : > { %3037 = vmatmul.mubr.msk.bf16.vlgmr.msra.gmra.mxu1 %vm572_vm10, %v3035_v60  ;;  %3039 = vmatmul.mubr.msk.bf16.vlgmr.msra.gmra.mxu0 %vm572_vm10, %v1356_v2 }
 0x2d3   : > { %1586 = vmatprep.mubr.bf16.mxu1 %v3137_v9  ;;  %1675 = vmatprep.mubr.bf16.mxu0 %v3137_v9 }
 0x2d4   : > { %v1542_v61 = vpop.permute.xlu0 %1541  ;;  %v2060_v7 = vpop.permute.xlu1 %2059 }
 0x2d5   : > { %v1544_v62 = vsel %vm723_vm6, %v1540_v39, %v1542_v61  ;;  %v3061_v39 = vld [vmem:[%s3919_s6 + $0xe] sm:$0x3] }
 0x2d6   : > { %3042 = vmatprep.subr.msk.bf16.mxu1 %vm576_vm9, %v1544_v62 }
 0x2d7   : > { %1569 = vmatpush1.bf16.msra.mxu1 %v1549_v10  ;;  %v2447_v10 = vpack.c.bf16 %v2441_v42, %v2441_v42 }
 0x2d8   : > { %v1971_v17 = vpop.permute.xlu0 %1970  ;;  %3050 = vmatprep.subr.msk.bf16.mxu1 %vm576_vm9, %v1703_v27  ;;  %v1631_v18 = vpop.permute.xlu1 %1630 }
 0x2d9   : > { %v1633_v19 = vsel %vm815_vm5, %v1629_v38, %v1631_v18  ;;  %v2453_v18 = vsel %vm2165_vm11, %v2447_v10, 0 }
 0x2da   : > { %3043 = vmatmul.mubr.msk.bf16.vlgmr.msra.gmra.mxu1 %vm572_vm10, %v3041_v14  ;;  %3046 = vmatprep.subr.msk.bf16.mxu0 %vm576_vm9, %v1633_v19 }
 0x2db   : > { %1728 = vmatpush1.bf16.msra.mxu1 %v1708_v63  ;;  %1658 = vmatpush1.bf16.msra.mxu0 %v1638_v56  ;;  %v3076_v63 = vld [vmem:[%s3920_s7 + $0x6] sm:$0x3] }
 0x2dc   : > { %v2154_v20 = vpop.permute.xlu0 %2153  ;;  %1745 = vmatprep.mubr.bf16.mxu1 %v3137_v9  ;;  %v2156_v22 = vpop.permute.xlu1 %2155 }
 0x2dd   : > { %v2159_v36 = vsel %vm569_vm7, %v2154_v20, %v2156_v22 }
 0x2de   : > { %3047 = vmatmul.mubr.msk.bf16.vlgmr.msra.gmra.mxu0 %vm572_vm10, %v3045_v21  ;;  %v2167_v47 = vsel %vm2165_vm11, %v2159_v36, 0 }
 0x2df   : > { %1837 = vmatprep.mubr.bf16.mxu0 %v3137_v9 }
 0x2e0   : > { %v2158_v3 = vpop.permute.xlu0 %2157  ;;  %v1791_v12 = vpop.permute.xlu1 %1790 }
 0x2e1   : > { %v1794_v45 = vsel %vm793_vm4, %v1789_v40, %v1791_v12  ;;  %v1795_v24 = vsel %vm793_vm4, %v1791_v12, %v3702_v35  ;;  %v2160_v37 = vsel %vm569_vm7, %v2156_v22, %v2158_v3  ;;  %v3079_v3 = vld [vmem:[%s3920_s7 + $0x8] sm:$0x3] }
 0x2e2   : > { %3051 = vmatmul.mubr.msk.bf16.vlgmr.msra.gmra.mxu1 %vm572_vm10, %v3049_v23  ;;  %v1800_v25 = vsel %vm576_vm9, %v1794_v45, 0  ;;  %3054 = vmatprep.subr.msk.bf16.mxu0 %vm576_vm9, %v1795_v24 }
 0x2e3   : > { %1926 = vmatprep.mubr.bf16.mxu1 %v3137_v9  ;;  %1820 = vmatpush1.bf16.msra.mxu0 %v1800_v25 }
 0x2e4   : > { %v1880_v50 = vpop.permute.xlu0 %1879  ;;  %v2217_v54 = vpop.permute.xlu1 %2216 }
 0x2e5   : > { %v1883_v58 = vsel %vm701_vm3, %v3704_v49, %v1880_v50  ;;  %v1884_v28 = vsel %vm701_vm3, %v1880_v50, %v3700_v34  ;;  %v3082_v50 = vld [vmem:[%s3920_s7 + $0xa] sm:$0x3] }
 0x2e6   : > { %v1889_v46 = vsel %vm576_vm9, %v1883_v58, 0  ;;  %3058 = vmatprep.subr.msk.bf16.mxu1 %vm576_vm9, %v1884_v28  ;;  %3055 = vmatmul.mubr.msk.bf16.vlgmr.msra.gmra.mxu0 %vm572_vm10, %v3053_v26 }
 0x2e7   : > { %1909 = vmatpush1.bf16.msra.mxu1 %v1889_v46  ;;  %2015 = vmatprep.mubr.bf16.mxu0 %v3137_v9  ;;  %v3085_v46 = vld [vmem:[%s3920_s7 + $0xc] sm:$0x3] }
 0x2e8   : > { %v2219_v30 = vpop.permute.xlu0 %2218  ;;  %v1969_v32 = vpop.permute.xlu1 %1968 }
 0x2e9   : > { %v1972_v33 = vsel %vm547_vm1, %v1967_v0, %v1969_v32  ;;  %v1973_v34 = vsel %vm547_vm1, %v1969_v32, %v1971_v17  ;;  %v2222_v48 = vsel %vm633_vm8, %v2217_v54, %v2219_v30  ;;  %v3068_v0 = vld [vmem:[%s3920_s7 + $0x2] sm:$0x3]  ;;  %v3088_v32 = vld [vmem:[%s3920_s7 + $0xe] sm:$0x3] }
 0x2ea   : > { %3059 = vmatmul.mubr.msk.bf16.vlgmr.msra.gmra.mxu1 %vm572_vm10, %v3057_v29  ;;  %v1978_v35 = vsel %vm576_vm9, %v1972_v33, 0  ;;  %3062 = vmatprep.subr.msk.bf16.mxu0 %vm576_vm9, %v1973_v34  ;;  %v2228_v59 = vsel %vm2165_vm11, %v2222_v48, 0 }
 0x2eb   : > { %2104 = vmatprep.mubr.bf16.mxu1 %v3137_v9  ;;  %1998 = vmatpush1.bf16.msra.mxu0 %v1978_v35 }
 0x2ec   : > { %v2058_v38 = vpop.permute.xlu0 %2057  ;;  %3069 = vmatprep.subr.msk.bf16.mxu0 %vm2165_vm11, %v2160_v37  ;;  %v2221_v53 = vpop.permute.xlu1 %2220 }
 0x2ed   : > { %v2061_v40 = vsel %vm520_vm2, %v3729_v13, %v2058_v38  ;;  %v2062_v49 = vsel %vm520_vm2, %v2058_v38, %v2060_v7  ;;  %v2223_v51 = vsel %vm633_vm8, %v2219_v30, %v2221_v53  ;;  %v3091_v38 = vld [vmem:[%s3920_s7 + $0x10] sm:$0x3] }
 0x2ee   : > { %v2067_v43 = vsel %vm576_vm9, %v2061_v40, 0  ;;  %3066 = vmatprep.subr.msk.bf16.mxu1 %vm576_vm9, %v2062_v49  ;;  %3063 = vmatmul.mubr.msk.bf16.vlgmr.msra.gmra.mxu0 %vm572_vm10, %v3061_v39  ;;  %v2842_v39 = vld [vmem:[#allocation5] sm:$0x1] }
 0x2ef   : > { %2087 = vmatpush1.bf16.msra.mxu1 %v2067_v43  ;;  %2187 = vmatpush1.bf16.msra.mxu0 %v2167_v47 }
 0x2f0   : > { %v2297_v44 = vpop.permute.xlu0 %2296  ;;  %3071 = vmatprep.subr.msk.bf16.mxu1 %vm2165_vm11, %v2223_v51  ;;  %v2299_v41 = vpop.permute.xlu1 %2298  ;;  %2204 = vmatprep.mubr.bf16.mxu0 %v3137_v9 }
 0x2f1   : > { %v2302_v57 = vsel %vm723_vm6, %v2297_v44, %v2299_v41  ;;  %2845 = vperm.xlu1 %3119, %v2842_v39  }
 0x2f2   : > { %3067 = vmatmul.mubr.msk.bf16.vlgmr.msra.gmra.mxu1 %vm572_vm10, %v3065_v52  ;;  %v2308_v1 = vsel %vm2165_vm11, %v2302_v57, 0 }
 0x2f3   : > { %2248 = vmatpush1.bf16.msra.mxu1 %v2228_v59  ;;  %2265 = vmatprep.mubr.bf16.mxu1 %v3137_v9 }
 0x2f4   : > { %v2301_v60 = vpop.permute.xlu0 %2300  ;;  %v2379_v13 = vpop.permute.xlu1 %2378 }
 0x2f5   : > { %v2303_v2 = vsel %vm723_vm6, %v2299_v41, %v2301_v60 }
 0x2f6   : > { %3074 = vmatprep.subr.msk.bf16.mxu0 %vm2165_vm11, %v2303_v2  ;;  %3070 = vmatmul.mubr.msk.bf16.vlgmr.msra.gmra.mxu0 %vm2161_vm12, %v3068_v0 }
 0x2f7   : > { %2328 = vmatpush1.bf16.msra.mxu0 %v2308_v1  ;;  %2345 = vmatprep.mubr.bf16.mxu0 %v3137_v9 }
 0x2f8   : > { %v2381_v61 = vpop.permute.xlu0 %2380  ;;  %v2383_v7 = vpop.permute.xlu1 %2382  ;;  %3080 = vmatprep.subr.msk.bf16.mxu0 %vm2165_vm11, %v2448_v5 }
 0x2f9   : > { %v2384_v62 = vsel %vm815_vm5, %v2379_v13, %v2381_v61  ;;  %v2385_v15 = vsel %vm815_vm5, %v2381_v61, %v2383_v7 }
 0x2fa   : > { %v2390_v27 = vsel %vm2165_vm11, %v2384_v62, 0  ;;  %3072 = vmatmul.mubr.msk.bf16.vlgmr.msra.gmra.mxu1 %vm2161_vm12, %v2126_v6  ;;  %3077 = vmatprep.subr.msk.bf16.mxu1 %vm2165_vm11, %v2385_v15 }
 0x2fb   : > { %2427 = vmatprep.mubr.bf16.mxu1 %v3137_v9  ;;  %2410 = vmatpush1.bf16.msra.mxu1 %v2390_v27 }
 0x2fc   : > { %v2524_v14 = vpop.permute.xlu0 %2523  ;;  %v2526_v17 = vpop.permute.xlu1 %2525 }
 0x2fd   : > { %v2529_v19 = vsel %vm793_vm4, %v2524_v14, %v2526_v17 }
 0x2fe   : > { %3075 = vmatmul.mubr.msk.bf16.vlgmr.msra.gmra.mxu0 %vm2161_vm12, %v3073_v16  ;;  %v2535_v22 = vsel %vm2165_vm11, %v2529_v19, 0 }
 0x2ff   : > { %2473 = vmatpush1.bf16.msra.mxu0 %v2453_v18  ;;  %2490 = vmatprep.mubr.bf16.mxu0 %v3137_v9 }
 0x300   : > { %v2528_v56 = vpop.permute.xlu0 %2527  ;;  %v2606_v21 = vpop.permute.xlu1 %2605 }
 0x301   : > { %v2530_v20 = vsel %vm793_vm4, %v2526_v17, %v2528_v56 }
 0x302   : > { %3078 = vmatmul.mubr.msk.bf16.vlgmr.msra.gmra.mxu1 %vm2161_vm12, %v3076_v63  ;;  %3083 = vmatprep.subr.msk.bf16.mxu1 %vm2165_vm11, %v2530_v20 }
 0x303   : > { %2555 = vmatpush1.bf16.msra.mxu1 %v2535_v22  ;;  %2572 = vmatprep.mubr.bf16.mxu1 %v3137_v9 }
 0x304   : > { %v2608_v23 = vpop.permute.xlu0 %2607  ;;  %v2610_v45 = vpop.permute.xlu1 %2609 }
 0x305   : > { %v2611_v12 = vsel %vm701_vm3, %v2606_v21, %v2608_v23  ;;  %v2612_v25 = vsel %vm701_vm3, %v2608_v23, %v2610_v45 }
 0x306   : > { %v2617_v24 = vsel %vm2165_vm11, %v2611_v12, 0  ;;  %3081 = vmatmul.mubr.msk.bf16.vlgmr.msra.gmra.mxu0 %vm2161_vm12, %v3079_v3  ;;  %3086 = vmatprep.subr.msk.bf16.mxu0 %vm2165_vm11, %v2612_v25 }
 0x307   : > { %2637 = vmatpush1.bf16.msra.mxu0 %v2617_v24  ;;  %2654 = vmatprep.mubr.bf16.mxu0 %v3137_v9 }
 0x308   : > { %v2688_v26 = vpop.permute.xlu0 %2687  ;;  %v2690_v58 = vpop.permute.xlu1 %2689 }
 0x309   : > { %v2693_v28 = vsel %vm547_vm1, %v2688_v26, %v2690_v58 }
 0x30a   : > { %3084 = vmatmul.mubr.msk.bf16.vlgmr.msra.gmra.mxu1 %vm2161_vm12, %v3082_v50  ;;  %v2699_v31 = vsel %vm2165_vm11, %v2693_v28, 0 }
 0x30b   : > { %2736 = vmatprep.mubr.bf16.mxu1 %v3137_v9 }
 0x30c   : > { %v2692_v54 = vpop.permute.xlu0 %2691  ;;  %v2770_v30 = vpop.permute.xlu1 %2769 }
 0x30d   : > { %v2694_v29 = vsel %vm547_vm1, %v2690_v58, %v2692_v54 }
 0x30e   : > { %3089 = vmatprep.subr.msk.bf16.mxu1 %vm2165_vm11, %v2694_v29  ;;  %3087 = vmatmul.mubr.msk.bf16.vlgmr.msra.gmra.mxu0 %vm2161_vm12, %v3085_v46 }
 0x30f   : > { %2719 = vmatpush1.bf16.msra.mxu1 %v2699_v31  ;;  %2818 = vmatprep.mubr.bf16.mxu0 %v3137_v9 }
 0x310   : > { %v2772_v33 = vpop.permute.xlu0 %2771  ;;  %v2774_v35 = vpop.permute.xlu1 %2773 }
 0x311   : > { %v2775_v34 = vsel %vm520_vm2, %v2770_v30, %v2772_v33  ;;  %v2776_v37 = vsel %vm520_vm2, %v2772_v33, %v2774_v35 }
 0x312   : > { %v2781_v36 = vsel %vm2165_vm11, %v2775_v34, 0  ;;  %3090 = vmatmul.mubr.msk.bf16.vlgmr.msra.gmra.mxu1 %vm2161_vm12, %v3088_v32  ;;  %3092 = vmatprep.subr.msk.bf16.mxu0 %vm2165_vm11, %v2776_v37 }
 0x313   : > { %2893 = vmatprep.mubr.bf16.mxu1 %v3137_v9  ;;  %2801 = vmatpush1.bf16.msra.mxu0 %v2781_v36 }
 0x316   : > { %3093 = vmatmul.mubr.msk.bf16.vlgmr.msra.gmra.mxu0 %vm2161_vm12, %v3091_v38 }
 0x392   : > { %v1440_v40 = vpop.f32.mrf.mxu1  ;;  %v1501_v49 = vpop.f32.mrf.mxu0 }
 0x393   : > { %v1502_v33 = vadd.f32 %v1501_v49, %v1440_v40 }
 0x394   : > { %v1442_v53 = vpop.f32.mrf.mxu1  ;;  %v1503_v42 = vpop.f32.mrf.mxu0 }
 0x395   : > { %v1504_v37 = vadd.f32 %v1503_v42, %v1442_v53 }
 0x396   : > { %v1444_v43 = vpop.f32.mrf.mxu1  ;;  %v1505_v47 = vpop.f32.mrf.mxu0 }
 0x398   : > { %v1445_v48 = vpop.f32.mrf.mxu1  ;;  %v1506_v51 = vpop.f32.mrf.mxu0 }
 0x39a   : > { %v1588_v52 = vpop.f32.mrf.mxu1 }
 0x39b   : > { %v1595_v38 = vadd.f32 %v1588_v52, %v1502_v33  ;;  %v2846_v33 = vpop.permute.xlu1 %2845 }
 0x39c   : > { %v1590_v44 = vpop.f32.mrf.mxu1 }
 0x39d   : > { %v1596_v51 = vadd.f32 %v1590_v44, %v1504_v37 }
 0x39e   : > { %v1592_v9 = vpop.f32.mrf.mxu1  ;;  %v1677_v41 = vpop.f32.mrf.mxu0 }
 0x39f   : > { %v1684_v9 = vadd.f32 %v1677_v41, %v1595_v38 }
 0x3a0   : > { %v1593_v55 = vpop.f32.mrf.mxu1  ;;  %v1679_v59 = vpop.f32.mrf.mxu0 }
 0x3a2   : > { %v1747_v57 = vpop.f32.mrf.mxu1  ;;  %v1681_v60 = vpop.f32.mrf.mxu0 }
 0x3a4   : > { %v1749_v0 = vpop.f32.mrf.mxu1  ;;  %v1682_v2 = vpop.f32.mrf.mxu0 }
 0x3a6   : > { %v1751_v13 = vpop.f32.mrf.mxu1  ;;  %v1839_v5 = vpop.f32.mrf.mxu0 }
 0x3a8   : > { %v1752_v1 = vpop.f32.mrf.mxu1  ;;  %v1841_v6 = vpop.f32.mrf.mxu0 }
 0x3a9   : > { %v1685_v1 = vadd.f32 %v1679_v59, %v1596_v51 }
 0x3aa   : > { %v1928_v61 = vpop.f32.mrf.mxu1  ;;  %v1843_v62 = vpop.f32.mrf.mxu0 }
 0x3ab   : > { %v1754_v62 = vadd.f32 %v1747_v57, %v1684_v9 }
 0x3ac   : > { %v3885_v7 = vpop.f32.mrf.mxu1  ;;  %v1844_v10 = vpop.f32.mrf.mxu0 }
 0x3ae   : > { %v1932_v27 = vpop.f32.mrf.mxu1  ;;  %v2017_v15 = vpop.f32.mrf.mxu0 }
 0x3b0   : > { %v1933_v14 = vpop.f32.mrf.mxu1  ;;  %v3887_v16 = vpop.f32.mrf.mxu0 }
 0x3b1   : > { %v1755_v14 = vadd.f32 %v1749_v0, %v1685_v1 }
 0x3b2   : > { %v3889_v17 = vpop.f32.mrf.mxu1  ;;  %v2021_v18 = vpop.f32.mrf.mxu0 }
 0x3b3   : > { %v1846_v18 = vadd.f32 %v1839_v5, %v1754_v62 }
 0x3b4   : > { %v3891_v19 = vpop.f32.mrf.mxu1  ;;  %v2022_v63 = vpop.f32.mrf.mxu0 }
 0x3b6   : > { %v2110_v56 = vpop.f32.mrf.mxu1  ;;  %v2206_v20 = vpop.f32.mrf.mxu0 }
 0x3b7   : > { %v1847_v56 = vadd.f32 %v1841_v6, %v1755_v14 }
 0x3b8   : > { %v2111_v21 = vpop.f32.mrf.mxu1  ;;  %v2208_v22 = vpop.f32.mrf.mxu0 }
 0x3ba   : > { %v2267_v23 = vpop.f32.mrf.mxu1  ;;  %v2210_v3 = vpop.f32.mrf.mxu0 }
 0x3bb   : > { %v2268_v34 = vadd.f32 %v2267_v23, %v2206_v20  ;;  %v1935_v20 = vadd.f32 %v1928_v61, %v1846_v18  ;;  %v1936_v23 = vadd.f32 %v3885_v7, %v1847_v56 }
 0x3bc   : > { %v2269_v12 = vpop.f32.mrf.mxu1  ;;  %v2211_v45 = vpop.f32.mrf.mxu0 }
 0x3bd   : > { %v2270_v39 = vadd.f32 %v2269_v12, %v2208_v22  ;;  %v2024_v59 = vadd.f32 %v2017_v15, %v1935_v20  ;;  %v2025_v0 = vadd.f32 %v3887_v16, %v1936_v23 }
 0x3be   : > { %v2271_v24 = vpop.f32.mrf.mxu1  ;;  %v2347_v25 = vpop.f32.mrf.mxu0 }
 0x3bf   : > { %v2354_v43 = vadd.f32 %v2347_v25, %v2268_v34  ;;  %v2113_v5 = vadd.f32 %v3889_v17, %v2024_v59  ;;  %v2114_v61 = vadd.f32 %v3891_v19, %v2025_v0  ;;  %v2839_v17 = vld [vmem:[%s3922_s9] sm:$0x1]  ;;  %v3138_v19 = vmov 1966171168  }
 0x3c0   : > { %v2272_v50 = vpop.f32.mrf.mxu1  ;;  %v2349_v26 = vpop.f32.mrf.mxu0 }
 0x3c1   : > { %v2355_v55 = vadd.f32 %v2349_v26, %v2270_v39 }
 0x3c2   : > { %v2429_v58 = vpop.f32.mrf.mxu1  ;;  %v2351_v28 = vpop.f32.mrf.mxu0 }
 0x3c3   : > { %v2436_v60 = vadd.f32 %v2429_v58, %v2354_v43  ;;  %v2835_v28 = vpop.permute.xlu0 %2834 }
 0x3c4   : > { %v2431_v54 = vpop.f32.mrf.mxu1  ;;  %v2352_v46 = vpop.f32.mrf.mxu0 }
 0x3c5   : > { %v2437_v10 = vadd.f32 %v2431_v54, %v2355_v55 }
 0x3c6   : > { %v2433_v29 = vpop.f32.mrf.mxu1  ;;  %v2492_v30 = vpop.f32.mrf.mxu0 }
 0x3c7   : > { %v2499_v27 = vadd.f32 %v2492_v30, %v2436_v60 }
 0x3c8   : > { %v2434_v31 = vpop.f32.mrf.mxu1  ;;  %v2494_v32 = vpop.f32.mrf.mxu0 }
 0x3c9   : > { %v2500_v53 = vadd.f32 %v2494_v32, %v2437_v10  ;;  %v2906_v32 = vunpack.c.l.s4 %v3138_v19 }
 0x3ca   : > { %v2574_v35 = vpop.f32.mrf.mxu1  ;;  %v2496_v36 = vpop.f32.mrf.mxu0 }
 0x3cb   : > { %v2581_v42 = vadd.f32 %v2574_v35, %v2499_v27  ;;  %v2907_v34 = vunpack.c.0.s8 %v2906_v32  ;;  %v2851_v35 = vrot.slane %v2846_v33, %v3238_v11 }
 0x3cc   : > { %v2576_v47 = vpop.f32.mrf.mxu1  ;;  %v2497_v48 = vpop.f32.mrf.mxu0 }
 0x3cd   : > { %v2582_v44 = vadd.f32 %v2576_v47, %v2500_v53  ;;  %v2910_v38 = vsub.s32 %v2907_v34, %v3228_v8 }
 0x3ce   : > { %v2578_v2 = vpop.f32.mrf.mxu1  ;;  %v2656_v13 = vpop.f32.mrf.mxu0 }
 0x3cf   : > { %v2663_v41 = vadd.f32 %v2656_v13, %v2581_v42 }
 0x3d0   : > { %v2579_v40 = vpop.f32.mrf.mxu1  ;;  %v2658_v49 = vpop.f32.mrf.mxu0 }
 0x3d1   : > { %v2664_v57 = vadd.f32 %v2658_v49, %v2582_v44 }
 0x3d2   : > { %v2738_v52 = vpop.f32.mrf.mxu1  ;;  %v2660_v63 = vpop.f32.mrf.mxu0 }
 0x3d3   : > { %v2745_v3 = vadd.f32 %v2738_v52, %v2663_v41 }
 0x3d4   : > { %v2740_v21 = vpop.f32.mrf.mxu1  ;;  %v2661_v22 = vpop.f32.mrf.mxu0 }
 0x3d5   : > { %v2746_v24 = vadd.f32 %v2740_v21, %v2664_v57 }
 0x3d6   : > { %v2742_v12 = vpop.f32.mrf.mxu1  ;;  %v2820_v45 = vpop.f32.mrf.mxu0 }
 0x3d7   : > { %v2827_v25 = vadd.f32 %v2820_v45, %v2745_v3 }
 0x3d8   : > { %v2743_v50 = vpop.f32.mrf.mxu1  ;;  %v2822_v6 = vpop.f32.mrf.mxu0 }
 0x3d9   : > { %v2829_v26 = vadd.f32 %v2827_v25, %v2113_v5  ;;  %v2828_v58 = vadd.f32 %v2822_v6, %v2746_v24 }
 0x3da   : > { %v2824_v54 = vpop.f32.mrf.mxu0 }
 0x3db   : > { %v2837_v7 = vadd.f32 %v2835_v28, %v2829_v26  ;;  %v2830_v15 = vadd.f32 %v2828_v58, %v2114_v61 }
 0x3dc   : > { %v2825_v46 = vpop.f32.mrf.mxu0 }
 0x3dd   : > { %v2840_v29 = vpack.c.bf16 %v2837_v7, %v2837_v7  ;;  %v2838_v30 = vadd.f32 %v2835_v28, %v2830_v15 }
 0x3df   : > { %v2841_v31 = vpack.c.bf16 %v2838_v30, %v2838_v30  ;;  %v2856_v16 = vsel %vm2165_vm11, %v2840_v29, 0 }
 0x3e1   : > { %3094 = vmatprep.subr.msk.bf16.mxu1 %vm2165_vm11, %v2841_v31 }
 0x3e2   : > { %2876 = vmatpush1.bf16.msra.mxu1 %v2856_v16 }
 0x3e5   : > { %3095 = vmatmul.mubr.msk.bf16.vlgmr.msra.gmra.mxu1 %vm2161_vm12, %v2839_v17 }
 0x4a5   : > { %v2895_v36 = vpop.f32.mrf.mxu1 }
 0x4a6   : > { %v2896_v39 = vadd.f32 %v2895_v36, %v2851_v35 }
 0x4a7   : > { %v2897_v37 = vpop.f32.mrf.mxu1 }
 0x4a8   : > { %v2898_v43 = vadd.f32 %v2897_v37, %v2851_v35 }
 0x4a9   : > { %v2899_v47 = vpop.f32.mrf.mxu1 }
 0x4aa   : > { %v2904_v48 = vcombine.low %v2896_v39, %v2898_v43 }
 0x4ab   : > { %v2900_v51 = vpop.f32.mrf.mxu1 }
 0x4ac   : > { %v2911_v9 = vrot.slane %v2904_v48, %v2910_v38 }
 0x4ae   : > { %v2918_v55 = vrot.slane %v2911_v9, %v2910_v38 }
 0x4b0   : > { %2924 = vst.msk [vmem:[%s403_s29] sm:$0x3] %vm2922_vm13, %v2918_v55 }
 0x4b1 PF: > { %s23_s19 = sadd.s32 1, %s3126_s19  }
 0x4b2   : > { %p20_p4 = scmp.ge.s32.totalorder %s23_s19, 4  }
 0x4b4   :  { %22 = sbr.rel (!%p20_p4) target bundleno = 3 (0x3), region = 129 }

</bundles_post_ra>
